<compile_context>
chip_gen: v5e
topology: v5e:2x2
jax: 0.10.0
libtpu: 0.0.40
codegen_flags: <defaults>
</compile_context>

<pallas_src>
import functools

import jax
import jax.numpy as jnp
from jax import lax
from jax.experimental import pallas as pl
from jax.experimental.pallas import tpu as pltpu

# ---------------------------------------------------------------------------
# Small, structure-preserving configuration of the original module.
# Original: img_size=128, patch_size=16, in_chans=4, embed_dim=768, depth=4,
#           num_heads=4, mlp_ratio=4, num_frames=128, num_classes=128,
#           attention_type='divided_space_time', LayerNorm eps=1e-6.
# ---------------------------------------------------------------------------
IMG = 16
PATCH = 4
IN_CHANS = 4
NUM_FRAMES = 4
EMBED_DIM = 64
DEPTH = 4
NUM_HEADS = 4
MLP_RATIO = 4
NUM_CLASSES = 16
LN_EPS = 1e-6
HEAD_PAD = 128      # lane-dense padded output width for the head projection
NEG_INF = -1e9      # additive mask value


# ---------------------------------------------------------------------------
# In-kernel math helpers
# ---------------------------------------------------------------------------
def _erf_f32(x):
    # Abramowitz & Stegun 7.1.26 rational approximation (exact divide, ~1.5e-7
    # abs error) so nn.GELU's erf semantics are reproduced with Mosaic-safe ops.
    a1, a2, a3, a4, a5 = 0.254829592, -0.284496736, 1.421413741, -1.453152027, 1.061405429
    pcoef = 0.3275911
    sgn = jnp.where(x < 0.0, -1.0, 1.0)
    ax = jnp.abs(x)
    t = 1.0 / (1.0 + pcoef * ax)
    poly = ((((a5 * t + a4) * t + a3) * t + a2) * t + a1) * t
    return sgn * (1.0 - poly * jnp.exp(-ax * ax))


def _gelu_exact(x):
    return 0.5 * x * (1.0 + _erf_f32(x * 0.7071067811865476))


def _layernorm(x2d, g, b, eps):
    mu = jnp.mean(x2d, axis=-1, keepdims=True)
    xc = x2d - mu
    var = jnp.mean(xc * xc, axis=-1, keepdims=True)
    return xc * lax.rsqrt(var + eps) * g + b


def _dot_nt(a, b):
    # a (m, d) . b (n, d)^T -> (m, n), bf16 operands, f32 accumulate, no transpose op.
    return lax.dot_general(a.astype(jnp.bfloat16), b.astype(jnp.bfloat16),
                           (((1,), (1,)), ((), ())),
                           preferred_element_type=jnp.float32)


def _dotf(a, b):
    return jnp.dot(a.astype(jnp.bfloat16), b, preferred_element_type=jnp.float32)


# ---------------------------------------------------------------------------
# Fused whole-model kernel.  Grid = (B, DEPTH): axis 0 = batch (parallel,
# feeds both v7x TensorCores), axis 1 = layer (sequential, weights pipelined).
# Activation layout in the VMEM scratch: rows 0..NT-1 = patch tokens in
# (h w t) order, row NT = cls token, rows NT+1.. = zero padding.
# ---------------------------------------------------------------------------
def _fused_forward_kernel(
        # constants / per-batch inputs
        patches_ref,      # (1, NT, CPP) f32  flattened patches, (h w t) row order
        patch_w_ref,      # (CPP, D)     bf16
        embcls_ref,       # (ROWS_PAD, D) f32 rows<NT: conv_bias+pos+time; row NT: cls+pos[0]; rest 0
        t_mask_ref,       # (NT, NT) f32  additive mask: same spatial patch  (temporal attention)
        sp_mask_ref,      # (NT, NT) f32  additive mask: same frame          (spatial attn, patch queries)
        sc_mask_ref,      # (T,  NT) f32  additive mask: frame f vs patch    (spatial attn, cls queries)
        # per-layer stacked parameters (leading DEPTH axis selected by grid axis 1)
        t_ln_g_ref, t_ln_b_ref,           # (1, 1, D) f32
        t_wqkv_ref,                       # (1, 3, H, D, hd) bf16  (softmax scale folded into Q)
        t_bqkv_ref,                       # (1, 3, H, 1, hd) f32
        t_wo_ref,                         # (1, H, hd, D) bf16
        t_bo_ref,                         # (1, 1, D) f32
        t_fcw_ref,                        # (1, D, D) bf16
        t_fcb_ref,                        # (1, 1, D) f32
        s_ln_g_ref, s_ln_b_ref,
        s_wqkv_ref, s_bqkv_ref, s_wo_ref, s_bo_ref,
        ln2_g_ref, ln2_b_ref,
        fc1_w_ref,                        # (1, D, HID) bf16
        fc1_b_ref,                        # (1, 1, HID) f32
        fc2_w_ref,                        # (1, HID, D) bf16
        fc2_b_ref,                        # (1, 1, D) f32
        # head
        norm_g_ref, norm_b_ref,           # (1, D) f32
        head_w_ref,                       # (D, HEAD_PAD) bf16
        head_b_ref,                       # (1, HEAD_PAD) f32
        # output / scratch
        out_ref,                          # (1, NT, HEAD_PAD) f32
        act_ref,                          # (ROWS_PAD, D) f32 resident activation
        *, nt, t_frames, nheads, eps):

    layer = pl.program_id(1)

    # ---- layer 0: patch embedding + pos/time/cls embedding into the resident activation ----
    @pl.when(layer == 0)
    def _():
        tok = _dotf(patches_ref[0], patch_w_ref[...])          # (NT, D)
        emb = embcls_ref[...]
        act_ref[:nt, :] = tok + emb[:nt, :]
        act_ref[nt:, :] = emb[nt:, :]                          # cls row + zero padding rows

    x = act_ref[...]                                           # (ROWS_PAD, D)
    d = x.shape[-1]
    xt_in = x[:nt, :]                                          # (NT, D) patch tokens
    cls_in = x[nt:nt + 1, :]                                   # (1, D)  cls token

    # =============== temporal attention (block-diagonal mask: same spatial patch) ===============
    xn = _layernorm(xt_in, t_ln_g_ref[0], t_ln_b_ref[0], eps)
    xnb = xn.astype(jnp.bfloat16)
    tmask = t_mask_ref[...]
    attn_t = jnp.zeros((nt, d), jnp.float32)
    for h in range(nheads):
        q = _dotf(xnb, t_wqkv_ref[0, 0, h]) + t_bqkv_ref[0, 0, h]       # (NT, hd)
        k = _dotf(xnb, t_wqkv_ref[0, 1, h]) + t_bqkv_ref[0, 1, h]
        v = _dotf(xnb, t_wqkv_ref[0, 2, h]) + t_bqkv_ref[0, 2, h]
        s = _dot_nt(q, k) + tmask                                       # (NT, NT)
        s = s - jnp.max(s, axis=-1, keepdims=True)
        p = jnp.exp(s)
        # approx reciprocal: rows sum to 1 only to ~1e-3 (inference-grade).
        p = p * pl.reciprocal(jnp.sum(p, axis=-1, keepdims=True), approx=True)
        o = _dotf(p, v.astype(jnp.bfloat16))                            # (NT, hd)
        attn_t = attn_t + _dotf(o, t_wo_ref[0, h])                      # accumulate proj per head
    res_t = attn_t + t_bo_ref[0]
    res_t = _dotf(res_t, t_fcw_ref[0]) + t_fcb_ref[0]                   # temporal_fc
    xt = xt_in + res_t                                                  # (NT, D)

    # =============== spatial attention (same-frame mask; cls handled per frame then averaged) ===============
    zn_p = _layernorm(xt, s_ln_g_ref[0], s_ln_b_ref[0], eps)            # (NT, D)
    zn_c = _layernorm(cls_in, s_ln_g_ref[0], s_ln_b_ref[0], eps)        # (1, D)
    znb_p = zn_p.astype(jnp.bfloat16)
    znb_c = zn_c.astype(jnp.bfloat16)
    spmask = sp_mask_ref[...]
    scmask = sc_mask_ref[...]
    attn_sp = jnp.zeros((nt, d), jnp.float32)
    attn_sc = jnp.zeros((1, d), jnp.float32)
    for h in range(nheads):
        q_p = _dotf(znb_p, s_wqkv_ref[0, 0, h]) + s_bqkv_ref[0, 0, h]   # (NT, hd)
        k_p = _dotf(znb_p, s_wqkv_ref[0, 1, h]) + s_bqkv_ref[0, 1, h]
        v_p = _dotf(znb_p, s_wqkv_ref[0, 2, h]) + s_bqkv_ref[0, 2, h]
        q_c = _dotf(znb_c, s_wqkv_ref[0, 0, h]) + s_bqkv_ref[0, 0, h]   # (1, hd)
        k_c = _dotf(znb_c, s_wqkv_ref[0, 1, h]) + s_bqkv_ref[0, 1, h]
        v_c = _dotf(znb_c, s_wqkv_ref[0, 2, h]) + s_bqkv_ref[0, 2, h]
        hd = q_c.shape[-1]

        # -- patch-token queries: keys = {cls} U {patches in the same frame} --
        s_pp = _dot_nt(q_p, k_p) + spmask                               # (NT, NT)
        s_pc = jnp.sum(q_p * k_c, axis=-1, keepdims=True)               # (NT, 1)  score vs cls key
        m = jnp.maximum(jnp.max(s_pp, axis=-1, keepdims=True), s_pc)
        e_pp = jnp.exp(s_pp - m)
        e_pc = jnp.exp(s_pc - m)
        inv = pl.reciprocal(jnp.sum(e_pp, axis=-1, keepdims=True) + e_pc, approx=True)
        o_p = _dotf(e_pp * inv, v_p.astype(jnp.bfloat16)) + (e_pc * inv) * v_c   # (NT, hd)

        # -- cls queries: one softmax per frame, averaged over frames (proj commutes with the mean) --
        q_cf = jnp.broadcast_to(q_c, (t_frames, hd))
        s_cf = _dot_nt(q_cf, k_p) + scmask                              # (T, NT)
        s_cc = jnp.sum(q_c * k_c, axis=-1, keepdims=True)               # (1, 1)
        m_c = jnp.maximum(jnp.max(s_cf, axis=-1, keepdims=True), s_cc)
        e_cf = jnp.exp(s_cf - m_c)
        e_cc = jnp.exp(s_cc - m_c)
        inv_c = pl.reciprocal(jnp.sum(e_cf, axis=-1, keepdims=True) + e_cc, approx=True)
        o_cf = _dotf(e_cf * inv_c, v_p.astype(jnp.bfloat16)) + (e_cc * inv_c) * v_c  # (T, hd)
        o_c = jnp.mean(o_cf, axis=0, keepdims=True)                     # (1, hd)

        attn_sp = attn_sp + _dotf(o_p, s_wo_ref[0, h])
        attn_sc = attn_sc + _dotf(o_c, s_wo_ref[0, h])

    x_p = xt + attn_sp + s_bo_ref[0]                                    # (NT, D)
    x_c = cls_in + attn_sc + s_bo_ref[0]                                # (1, D)

    # =============== MLP (LN2 -> fc1 -> exact GELU -> fc2 -> +residual) ===============
    act_ref[:nt, :] = x_p
    act_ref[nt:nt + 1, :] = x_c
    xm = act_ref[...]                                                   # (ROWS_PAD, D); pad rows stay 0
    hn = _layernorm(xm, ln2_g_ref[0], ln2_b_ref[0], eps)
    hh = _dotf(hn, fc1_w_ref[0]) + fc1_b_ref[0]                         # (ROWS_PAD, HID)
    hh = _gelu_exact(hh)
    yy = _dotf(hh, fc2_w_ref[0]) + fc2_b_ref[0]
    xout = xm + yy
    act_ref[...] = xout

    # ---- last layer: final LayerNorm + lane-dense (128-wide padded) head projection ----
    @pl.when(layer == pl.num_programs(1) - 1)
    def _():
        xf = _layernorm(xout[:nt, :], norm_g_ref[...], norm_b_ref[...], eps)
        out_ref[0] = _dotf(xf, head_w_ref[...]) + head_b_ref[...]


# ---------------------------------------------------------------------------
# BlockSpec helpers (grid = (batch, layer))
# ---------------------------------------------------------------------------
def _const_spec(a):
    nd = a.ndim

    def im(b, l):
        return (0,) * nd
    return pl.BlockSpec(a.shape, im)


def _batch_spec(a):
    nd = a.ndim

    def im(b, l):
        return (b,) + (0,) * (nd - 1)
    return pl.BlockSpec((1,) + a.shape[1:], im)


def _layer_spec(a):
    nd = a.ndim

    def im(b, l):
        return (l,) + (0,) * (nd - 1)
    return pl.BlockSpec((1,) + a.shape[1:], im)


# ---------------------------------------------------------------------------
# Model forward (divided space-time attention; dropout / drop_path = identity
# in the deterministic eval forward)
# ---------------------------------------------------------------------------
def segmentformer_forward(x, params):
    B, C, T, H, W = x.shape
    Hp, Wp = H // PATCH, W // PATCH
    N = Hp * Wp
    NT = N * T
    D = EMBED_DIM
    HID = D * MLP_RATIO
    CPP = C * PATCH * PATCH
    ROWS_PAD = ((NT + 1 + 7) // 8) * 8
    nheads = NUM_HEADS
    hd = D // nheads

    # --- im2col: (B, C, T, H, W) -> (B, N*T, C*p*p), rows in (h w t) order ---
    xr = x.reshape(B, C, T, Hp, PATCH, Wp, PATCH)
    patches = jnp.transpose(xr, (0, 3, 5, 2, 1, 4, 6)).reshape(B, NT, CPP)

    # --- combined additive embedding rows: conv bias + pos + time (tokens), cls + pos[0] (row NT) ---
    pos = params["pos_embed"][0]                         # (N+1, D)
    tim = params["time_embed"][0]                        # (T, D)
    tok_emb = (pos[1:, None, :] + tim[None, :, :]).reshape(NT, D) + params["patch_b"]
    cls_row = params["cls_token"][0] + pos[0:1, :]
    embcls = jnp.concatenate(
        [tok_emb, cls_row, jnp.zeros((ROWS_PAD - NT - 1, D), jnp.float32)], axis=0)

    # --- static additive attention masks (0 = allowed, NEG_INF = masked) ---
    tok_idx = jnp.arange(NT)
    n_idx = tok_idx // T                                 # spatial patch index
    t_idx = tok_idx % T                                  # frame index
    t_mask = jnp.where(n_idx[:, None] == n_idx[None, :], 0.0, NEG_INF).astype(jnp.float32)
    sp_mask = jnp.where(t_idx[:, None] == t_idx[None, :], 0.0, NEG_INF).astype(jnp.float32)
    sc_mask = jnp.where(jnp.arange(T)[:, None] == t_idx[None, :], 0.0, NEG_INF).astype(jnp.float32)

    lp = params["layers"]
    operands = [
        (patches, _batch_spec),
        (params["patch_w"], _const_spec),
        (embcls, _const_spec),
        (t_mask, _const_spec),
        (sp_mask, _const_spec),
        (sc_mask, _const_spec),
        (lp["t_ln_g"], _layer_spec), (lp["t_ln_b"], _layer_spec),
        (lp["t_wqkv"], _layer_spec), (lp["t_bqkv"], _layer_spec),
        (lp["t_wo"], _layer_spec), (lp["t_bo"], _layer_spec),
        (lp["t_fcw"], _layer_spec), (lp["t_fcb"], _layer_spec),
        (lp["s_ln_g"], _layer_spec), (lp["s_ln_b"], _layer_spec),
        (lp["s_wqkv"], _layer_spec), (lp["s_bqkv"], _layer_spec),
        (lp["s_wo"], _layer_spec), (lp["s_bo"], _layer_spec),
        (lp["ln2_g"], _layer_spec), (lp["ln2_b"], _layer_spec),
        (lp["fc1_w"], _layer_spec), (lp["fc1_b"], _layer_spec),
        (lp["fc2_w"], _layer_spec), (lp["fc2_b"], _layer_spec),
        (params["norm_g"], _const_spec), (params["norm_b"], _const_spec),
        (params["head_w"], _const_spec), (params["head_b"], _const_spec),
    ]
    arrays = [a for a, _ in operands]
    in_specs = [mk(a) for a, mk in operands]

    # Advisory cost estimate so XLA can schedule around the custom call.
    attn_flops = (2 * NT * D * 3 * D * 2            # temporal + spatial qkv
                  + 2 * NT * NT * hd * nheads * 2 * 2   # scores + P@V, both attentions
                  + 2 * NT * D * D * 3)             # proj x2 + temporal_fc
    mlp_flops = 2 * ROWS_PAD * D * HID * 2
    cost = pl.CostEstimate(
        flops=int(B * DEPTH * (attn_flops + mlp_flops)),
        transcendentals=int(B * DEPTH * (2 * nheads * NT * NT + ROWS_PAD * HID)),
        bytes_accessed=int(sum(a.size * a.dtype.itemsize for a in arrays)
                           + B * NT * HEAD_PAD * 4))

    kernel = functools.partial(_fused_forward_kernel,
                               nt=NT, t_frames=T, nheads=nheads, eps=LN_EPS)
    logits = pl.pallas_call(
        kernel,
        out_shape=jax.ShapeDtypeStruct((B, NT, HEAD_PAD), jnp.float32),
        grid=(B, DEPTH),
        in_specs=in_specs,
        out_specs=pl.BlockSpec((1, NT, HEAD_PAD), lambda b, l: (b, 0, 0)),
        scratch_shapes=[pltpu.VMEM((ROWS_PAD, D), jnp.float32)],
        compiler_params=pltpu.CompilerParams(
            dimension_semantics=("parallel", "arbitrary")),
        cost_estimate=cost,
    )(*arrays)

    # TODO(synk): UNet3DDecoder source is not provided in brats/train.py; the head is implemented
    # as a per-token linear (1x1x1-conv-equivalent) projection of the patch tokens to num_classes.
    logits = logits[:, :, :NUM_CLASSES].reshape(B, Hp, Wp, T, NUM_CLASSES)
    return jnp.transpose(logits, (0, 4, 3, 1, 2))        # (B, num_classes, T, H/p, W/p)


# ---------------------------------------------------------------------------
# Deterministic parameter init (shapes from the module's __init__).
# Matmul weights stored in bf16 (f32 accumulate at every dot); LayerNorm
# params, biases and embeddings stay f32.  Per-layer params are stacked on a
# leading DEPTH axis; qkv / proj weights are stored per-head; the softmax
# scale (hd**-0.5) is folded into the Q weights.
# ---------------------------------------------------------------------------
def init_params(key):
    D, HID, H, HD = EMBED_DIM, EMBED_DIM * MLP_RATIO, NUM_HEADS, EMBED_DIM // NUM_HEADS
    N = (IMG // PATCH) ** 2
    CPP = IN_CHANS * PATCH * PATCH
    scale = HD ** -0.5
    keys = iter(jax.random.split(key, 256))

    def rnd(shape, dtype=jnp.bfloat16, s=0.02):
        return (s * jax.random.normal(next(keys), shape, dtype=jnp.float32)).astype(dtype)

    def zeros(shape):
        return jnp.zeros(shape, jnp.float32)

    def ones(shape):
        return jnp.ones(shape, jnp.float32)

    def attn_params():
        wq = rnd((H, D, HD), jnp.float32) * scale          # softmax scale folded into Q
        wk = rnd((H, D, HD), jnp.float32)
        wv = rnd((H, D, HD), jnp.float32)
        wqkv = jnp.stack([wq, wk, wv], axis=0).astype(jnp.bfloat16)   # (3, H, D, hd)
        bqkv = zeros((3, H, 1, HD))
        wo = rnd((H, HD, D))                                           # per-head proj slabs
        return wqkv, bqkv, wo

    def layer_params():
        t_wqkv, t_bqkv, t_wo = attn_params()
        s_wqkv, s_bqkv, s_wo = attn_params()
        return dict(
            t_ln_g=ones((1, D)), t_ln_b=zeros((1, D)),
            t_wqkv=t_wqkv, t_bqkv=t_bqkv, t_wo=t_wo, t_bo=zeros((1, D)),
            t_fcw=rnd((D, D)), t_fcb=zeros((1, D)),
            s_ln_g=ones((1, D)), s_ln_b=zeros((1, D)),
            s_wqkv=s_wqkv, s_bqkv=s_bqkv, s_wo=s_wo, s_bo=zeros((1, D)),
            ln2_g=ones((1, D)), ln2_b=zeros((1, D)),
            fc1_w=rnd((D, HID)), fc1_b=zeros((1, HID)),
            fc2_w=rnd((HID, D)), fc2_b=zeros((1, D)),
        )

    layers = [layer_params() for _ in range(DEPTH)]
    stacked = jax.tree_util.tree_map(lambda *xs: jnp.stack(xs, axis=0), *layers)

    head_w = jnp.pad(rnd((D, NUM_CLASSES), jnp.float32),
                     ((0, 0), (0, HEAD_PAD - NUM_CLASSES))).astype(jnp.bfloat16)

    return dict(
        patch_w=rnd((CPP, D)),                     # Conv2d(4, D, k=p, s=p) weight, flattened
        patch_b=zeros((1, D)),
        cls_token=rnd((1, 1, D), jnp.float32),
        pos_embed=rnd((1, N + 1, D), jnp.float32),
        time_embed=rnd((1, NUM_FRAMES, D), jnp.float32),
        norm_g=ones((1, D)), norm_b=zeros((1, D)),
        head_w=head_w, head_b=zeros((1, HEAD_PAD)),
        layers=stacked,
    )


# ---------------------------------------------------------------------------
if __name__ == "__main__":
    key = jax.random.PRNGKey(0)
    pkey, xkey = jax.random.split(key)
    params = init_params(pkey)
    x = jax.random.normal(xkey, (2, IN_CHANS, NUM_FRAMES, IMG, IMG), dtype=jnp.float32)

    fwd = jax.jit(segmentformer_forward)
    out = jax.block_until_ready(fwd(x, params))

    expected = (2, NUM_CLASSES, NUM_FRAMES, IMG // PATCH, IMG // PATCH)
    assert out.shape == expected, (out.shape, expected)
    assert bool(jnp.all(jnp.isfinite(out)))
    print("KERNEL_OK")
</pallas_src>

<mosaic_0001>
module attributes {stable_mosaic.version = 11 : i64} {
  func.func @_fused_forward_kernel(%arg0: i32, %arg1: i32, %arg2: memref<1x64x64xf32, #tpu.memory_space<vmem>>, %arg3: memref<64x64xbf16, #tpu.memory_space<vmem>>, %arg4: memref<72x64xf32, #tpu.memory_space<vmem>>, %arg5: memref<64x64xf32, #tpu.memory_space<vmem>>, %arg6: memref<64x64xf32, #tpu.memory_space<vmem>>, %arg7: memref<4x64xf32, #tpu.memory_space<vmem>>, %arg8: memref<1x1x64xf32, #tpu.memory_space<vmem>>, %arg9: memref<1x1x64xf32, #tpu.memory_space<vmem>>, %arg10: memref<1x3x4x64x16xbf16, #tpu.memory_space<vmem>>, %arg11: memref<1x3x4x1x16xf32, #tpu.memory_space<vmem>>, %arg12: memref<1x4x16x64xbf16, #tpu.memory_space<vmem>>, %arg13: memref<1x1x64xf32, #tpu.memory_space<vmem>>, %arg14: memref<1x64x64xbf16, #tpu.memory_space<vmem>>, %arg15: memref<1x1x64xf32, #tpu.memory_space<vmem>>, %arg16: memref<1x1x64xf32, #tpu.memory_space<vmem>>, %arg17: memref<1x1x64xf32, #tpu.memory_space<vmem>>, %arg18: memref<1x3x4x64x16xbf16, #tpu.memory_space<vmem>>, %arg19: memref<1x3x4x1x16xf32, #tpu.memory_space<vmem>>, %arg20: memref<1x4x16x64xbf16, #tpu.memory_space<vmem>>, %arg21: memref<1x1x64xf32, #tpu.memory_space<vmem>>, %arg22: memref<1x1x64xf32, #tpu.memory_space<vmem>>, %arg23: memref<1x1x64xf32, #tpu.memory_space<vmem>>, %arg24: memref<1x64x256xbf16, #tpu.memory_space<vmem>>, %arg25: memref<1x1x256xf32, #tpu.memory_space<vmem>>, %arg26: memref<1x256x64xbf16, #tpu.memory_space<vmem>>, %arg27: memref<1x1x64xf32, #tpu.memory_space<vmem>>, %arg28: memref<1x64xf32, #tpu.memory_space<vmem>>, %arg29: memref<1x64xf32, #tpu.memory_space<vmem>>, %arg30: memref<64x128xbf16, #tpu.memory_space<vmem>>, %arg31: memref<1x128xf32, #tpu.memory_space<vmem>>, %arg32: memref<1x64x128xf32, #tpu.memory_space<vmem>>, %arg33: memref<72x64xf32, #tpu.memory_space<vmem>>) attributes {dimension_semantics = [#tpu.dimension_semantics<parallel>, #tpu.dimension_semantics<arbitrary>], iteration_bounds = array<i64: 2, 4>, scalar_prefetch = 0 : i64, scratch_operands = 1 : i64, tpu.core_type = #tpu.core_type<tc>, window_params = [{transform_indices = @transform_0, window_bounds = array<i64: 1, 64, 64>}, {pipeline_mode = #tpu.pipeline_mode<synchronous>, transform_indices = @transform_1, window_bounds = array<i64: 64, 64>}, {pipeline_mode = #tpu.pipeline_mode<synchronous>, transform_indices = @transform_2, window_bounds = array<i64: 72, 64>}, {pipeline_mode = #tpu.pipeline_mode<synchronous>, transform_indices = @transform_3, window_bounds = array<i64: 64, 64>}, {pipeline_mode = #tpu.pipeline_mode<synchronous>, transform_indices = @transform_4, window_bounds = array<i64: 64, 64>}, {pipeline_mode = #tpu.pipeline_mode<synchronous>, transform_indices = @transform_5, window_bounds = array<i64: 4, 64>}, {transform_indices = @transform_6, window_bounds = array<i64: 1, 1, 64>}, {transform_indices = @transform_7, window_bounds = array<i64: 1, 1, 64>}, {transform_indices = @transform_8, window_bounds = array<i64: 1, 3, 4, 64, 16>}, {transform_indices = @transform_9, window_bounds = array<i64: 1, 3, 4, 1, 16>}, {transform_indices = @transform_10, window_bounds = array<i64: 1, 4, 16, 64>}, {transform_indices = @transform_11, window_bounds = array<i64: 1, 1, 64>}, {transform_indices = @transform_12, window_bounds = array<i64: 1, 64, 64>}, {transform_indices = @transform_13, window_bounds = array<i64: 1, 1, 64>}, {transform_indices = @transform_14, window_bounds = array<i64: 1, 1, 64>}, {transform_indices = @transform_15, window_bounds = array<i64: 1, 1, 64>}, {transform_indices = @transform_16, window_bounds = array<i64: 1, 3, 4, 64, 16>}, {transform_indices = @transform_17, window_bounds = array<i64: 1, 3, 4, 1, 16>}, {transform_indices = @transform_18, window_bounds = array<i64: 1, 4, 16, 64>}, {transform_indices = @transform_19, window_bounds = array<i64: 1, 1, 64>}, {transform_indices = @transform_20, window_bounds = array<i64: 1, 1, 64>}, {transform_indices = @transform_21, window_bounds = array<i64: 1, 1, 64>}, {transform_indices = @transform_22, window_bounds = array<i64: 1, 64, 256>}, {transform_indices = @transform_23, window_bounds = array<i64: 1, 1, 256>}, {transform_indices = @transform_24, window_bounds = array<i64: 1, 256, 64>}, {transform_indices = @transform_25, window_bounds = array<i64: 1, 1, 64>}, {pipeline_mode = #tpu.pipeline_mode<synchronous>, transform_indices = @transform_26, window_bounds = array<i64: 1, 64>}, {pipeline_mode = #tpu.pipeline_mode<synchronous>, transform_indices = @transform_27, window_bounds = array<i64: 1, 64>}, {pipeline_mode = #tpu.pipeline_mode<synchronous>, transform_indices = @transform_28, window_bounds = array<i64: 64, 128>}, {pipeline_mode = #tpu.pipeline_mode<synchronous>, transform_indices = @transform_29, window_bounds = array<i64: 1, 128>}, {transform_indices = @transform_30, window_bounds = array<i64: 1, 64, 128>}]} {
    %c0_i32 = arith.constant 0 : i32
    %0 = arith.cmpi eq, %arg1, %c0_i32 : i32
    %1 = arith.extui %0 : i1 to i32
    %c0_i32_0 = arith.constant 0 : i32
    %2 = arith.cmpi ne, %1, %c0_i32_0 : i32
    scf.if %2 {
      %c0_625 = arith.constant 0 : index
      %c0_626 = arith.constant 0 : index
      %c0_627 = arith.constant 0 : index
      %832 = vector.load %arg2[%c0_625, %c0_626, %c0_627] : memref<1x64x64xf32, #tpu.memory_space<vmem>>, vector<1x64x64xf32>
      %833 = vector.shape_cast %832 : vector<1x64x64xf32> to vector<64x64xf32>
      %c0_628 = arith.constant 0 : index
      %c0_629 = arith.constant 0 : index
      %834 = vector.load %arg3[%c0_628, %c0_629] : memref<64x64xbf16, #tpu.memory_space<vmem>>, vector<64x64xbf16>
      %835 = arith.truncf %833 : vector<64x64xf32> to vector<64x64xbf16>
      %cst_630 = arith.constant dense<0.000000e+00> : vector<64x64xf32>
      %836 = tpu.matmul %835, %834, %cst_630 {dimension_numbers = #tpu.dot_dimension_numbers<[1], [0], [0], [1], [0, 0, 1, 1], [], []>} : vector<64x64xbf16>, vector<64x64xbf16>, vector<64x64xf32> -> vector<64x64xf32>
      %c0_631 = arith.constant 0 : index
      %c0_632 = arith.constant 0 : index
      %837 = vector.load %arg4[%c0_631, %c0_632] : memref<72x64xf32, #tpu.memory_space<vmem>>, vector<72x64xf32>
      %838 = vector.extract_strided_slice %837 {offsets = [0, 0], sizes = [64, 64], strides = [1, 1]} : vector<72x64xf32> to vector<64x64xf32>
      %839 = arith.addf %836, %838 : vector<64x64xf32>
      %c0_633 = arith.constant 0 : index
      %c0_634 = arith.constant 0 : index
      %840 = vector.load %arg33[%c0_633, %c0_634] : memref<72x64xf32, #tpu.memory_space<vmem>>, vector<64x64xf32>
      tpu.vector_store %arg33[%c0_633, %c0_634], %839 {strides = array<i32>} : memref<72x64xf32, #tpu.memory_space<vmem>>, vector<64x64xf32>,
      %841 = vector.extract_strided_slice %837 {offsets = [64, 0], sizes = [8, 64], strides = [1, 1]} : vector<72x64xf32> to vector<8x64xf32>
      %c64_635 = arith.constant 64 : index
      %c0_636 = arith.constant 0 : index
      %842 = vector.load %arg33[%c64_635, %c0_636] : memref<72x64xf32, #tpu.memory_space<vmem>>, vector<8x64xf32>
      tpu.vector_store %arg33[%c64_635, %c0_636], %841 {strides = array<i32>} : memref<72x64xf32, #tpu.memory_space<vmem>>, vector<8x64xf32>,
    } else {
    }
    %c0 = arith.constant 0 : index
    %c0_1 = arith.constant 0 : index
    %3 = vector.load %arg33[%c0, %c0_1] : memref<72x64xf32, #tpu.memory_space<vmem>>, vector<72x64xf32>
    %4 = vector.extract_strided_slice %3 {offsets = [0, 0], sizes = [64, 64], strides = [1, 1]} : vector<72x64xf32> to vector<64x64xf32>
    %5 = vector.extract_strided_slice %3 {offsets = [64, 0], sizes = [1, 64], strides = [1, 1]} : vector<72x64xf32> to vector<1x64xf32>
    %c0_2 = arith.constant 0 : index
    %c0_3 = arith.constant 0 : index
    %c0_4 = arith.constant 0 : index
    %6 = vector.load %arg8[%c0_2, %c0_3, %c0_4] : memref<1x1x64xf32, #tpu.memory_space<vmem>>, vector<1x1x64xf32>
    %7 = vector.shape_cast %6 : vector<1x1x64xf32> to vector<1x64xf32>
    %c0_5 = arith.constant 0 : index
    %c0_6 = arith.constant 0 : index
    %c0_7 = arith.constant 0 : index
    %8 = vector.load %arg9[%c0_5, %c0_6, %c0_7] : memref<1x1x64xf32, #tpu.memory_space<vmem>>, vector<1x1x64xf32>
    %9 = vector.shape_cast %8 : vector<1x1x64xf32> to vector<1x64xf32>
    %cst = arith.constant dense<0.000000e+00> : vector<64xf32>
    %10 = vector.multi_reduction <add>, %4, %cst [1] : vector<64x64xf32> to vector<64xf32>
    %11 = vector.shape_cast %10 : vector<64xf32> to vector<64x1xf32>
    %cst_8 = arith.constant 6.400000e+01 : f32
    %12 = vector.broadcast %cst_8 : f32 to vector<64x1xf32>
    %13 = arith.divf %11, %12 : vector<64x1xf32>
    %14 = vector.broadcast %13 : vector<64x1xf32> to vector<64x64xf32>
    %15 = arith.subf %4, %14 : vector<64x64xf32>
    %16 = arith.mulf %15, %15 : vector<64x64xf32>
    %cst_9 = arith.constant dense<0.000000e+00> : vector<64xf32>
    %17 = vector.multi_reduction <add>, %16, %cst_9 [1] : vector<64x64xf32> to vector<64xf32>
    %18 = vector.shape_cast %17 : vector<64xf32> to vector<64x1xf32>
    %cst_10 = arith.constant 6.400000e+01 : f32
    %19 = vector.broadcast %cst_10 : f32 to vector<64x1xf32>
    %20 = arith.divf %18, %19 : vector<64x1xf32>
    %cst_11 = arith.constant 9.99999997E-7 : f32
    %21 = vector.broadcast %cst_11 : f32 to vector<64x1xf32>
    %22 = arith.addf %20, %21 : vector<64x1xf32>
    %23 = math.rsqrt %22 : vector<64x1xf32>
    %24 = vector.broadcast %23 : vector<64x1xf32> to vector<64x64xf32>
    %25 = arith.mulf %15, %24 : vector<64x64xf32>
    %26 = vector.broadcast %7 : vector<1x64xf32> to vector<64x64xf32>
    %27 = arith.mulf %25, %26 : vector<64x64xf32>
    %28 = vector.broadcast %9 : vector<1x64xf32> to vector<64x64xf32>
    %29 = arith.addf %27, %28 : vector<64x64xf32>
    %30 = arith.truncf %29 : vector<64x64xf32> to vector<64x64xbf16>
    %c0_12 = arith.constant 0 : index
    %c0_13 = arith.constant 0 : index
    %31 = vector.load %arg5[%c0_12, %c0_13] : memref<64x64xf32, #tpu.memory_space<vmem>>, vector<64x64xf32>
    %cst_14 = arith.constant 0.000000e+00 : f32
    %32 = vector.broadcast %cst_14 : f32 to vector<64x64xf32>
    %c0_15 = arith.constant 0 : index
    %c0_16 = arith.constant 0 : index
    %c0_17 = arith.constant 0 : index
    %c0_18 = arith.constant 0 : index
    %c0_19 = arith.constant 0 : index
    %33 = vector.load %arg10[%c0_15, %c0_16, %c0_17, %c0_18, %c0_19] : memref<1x3x4x64x16xbf16, #tpu.memory_space<vmem>>, vector<1x1x1x64x16xbf16>
    %34 = vector.shape_cast %33 : vector<1x1x1x64x16xbf16> to vector<64x16xbf16>
    %cst_20 = arith.constant dense<0.000000e+00> : vector<64x16xf32>
    %35 = tpu.matmul %30, %34, %cst_20 {dimension_numbers = #tpu.dot_dimension_numbers<[1], [0], [0], [1], [0, 0, 1, 1], [], []>} : vector<64x64xbf16>, vector<64x16xbf16>, vector<64x16xf32> -> vector<64x16xf32>
    %c0_21 = arith.constant 0 : index
    %c0_22 = arith.constant 0 : index
    %c0_23 = arith.constant 0 : index
    %c0_24 = arith.constant 0 : index
    %c0_25 = arith.constant 0 : index
    %36 = vector.load %arg11[%c0_21, %c0_22, %c0_23, %c0_24, %c0_25] : memref<1x3x4x1x16xf32, #tpu.memory_space<vmem>>, vector<1x1x1x1x16xf32>
    %37 = vector.shape_cast %36 : vector<1x1x1x1x16xf32> to vector<1x16xf32>
    %38 = vector.broadcast %37 : vector<1x16xf32> to vector<64x16xf32>
    %39 = arith.addf %35, %38 : vector<64x16xf32>
    %c0_26 = arith.constant 0 : index
    %c1 = arith.constant 1 : index
    %c0_27 = arith.constant 0 : index
    %c0_28 = arith.constant 0 : index
    %c0_29 = arith.constant 0 : index
    %40 = vector.load %arg10[%c0_26, %c1, %c0_27, %c0_28, %c0_29] : memref<1x3x4x64x16xbf16, #tpu.memory_space<vmem>>, vector<1x1x1x64x16xbf16>
    %41 = vector.shape_cast %40 : vector<1x1x1x64x16xbf16> to vector<64x16xbf16>
    %cst_30 = arith.constant dense<0.000000e+00> : vector<64x16xf32>
    %42 = tpu.matmul %30, %41, %cst_30 {dimension_numbers = #tpu.dot_dimension_numbers<[1], [0], [0], [1], [0, 0, 1, 1], [], []>} : vector<64x64xbf16>, vector<64x16xbf16>, vector<64x16xf32> -> vector<64x16xf32>
    %c0_31 = arith.constant 0 : index
    %c1_32 = arith.constant 1 : index
    %c0_33 = arith.constant 0 : index
    %c0_34 = arith.constant 0 : index
    %c0_35 = arith.constant 0 : index
    %43 = vector.load %arg11[%c0_31, %c1_32, %c0_33, %c0_34, %c0_35] : memref<1x3x4x1x16xf32, #tpu.memory_space<vmem>>, vector<1x1x1x1x16xf32>
    %44 = vector.shape_cast %43 : vector<1x1x1x1x16xf32> to vector<1x16xf32>
    %45 = vector.broadcast %44 : vector<1x16xf32> to vector<64x16xf32>
    %46 = arith.addf %42, %45 : vector<64x16xf32>
    %c0_36 = arith.constant 0 : index
    %c2 = arith.constant 2 : index
    %c0_37 = arith.constant 0 : index
    %c0_38 = arith.constant 0 : index
    %c0_39 = arith.constant 0 : index
    %47 = vector.load %arg10[%c0_36, %c2, %c0_37, %c0_38, %c0_39] : memref<1x3x4x64x16xbf16, #tpu.memory_space<vmem>>, vector<1x1x1x64x16xbf16>
    %48 = vector.shape_cast %47 : vector<1x1x1x64x16xbf16> to vector<64x16xbf16>
    %cst_40 = arith.constant dense<0.000000e+00> : vector<64x16xf32>
    %49 = tpu.matmul %30, %48, %cst_40 {dimension_numbers = #tpu.dot_dimension_numbers<[1], [0], [0], [1], [0, 0, 1, 1], [], []>} : vector<64x64xbf16>, vector<64x16xbf16>, vector<64x16xf32> -> vector<64x16xf32>
    %c0_41 = arith.constant 0 : index
    %c2_42 = arith.constant 2 : index
    %c0_43 = arith.constant 0 : index
    %c0_44 = arith.constant 0 : index
    %c0_45 = arith.constant 0 : index
    %50 = vector.load %arg11[%c0_41, %c2_42, %c0_43, %c0_44, %c0_45] : memref<1x3x4x1x16xf32, #tpu.memory_space<vmem>>, vector<1x1x1x1x16xf32>
    %51 = vector.shape_cast %50 : vector<1x1x1x1x16xf32> to vector<1x16xf32>
    %52 = vector.broadcast %51 : vector<1x16xf32> to vector<64x16xf32>
    %53 = arith.addf %49, %52 : vector<64x16xf32>
    %54 = arith.truncf %39 : vector<64x16xf32> to vector<64x16xbf16>
    %55 = arith.truncf %46 : vector<64x16xf32> to vector<64x16xbf16>
    %cst_46 = arith.constant dense<0.000000e+00> : vector<64x64xf32>
    %56 = tpu.matmul %54, %55, %cst_46 {dimension_numbers = #tpu.dot_dimension_numbers<[1], [1], [0], [0], [0, 0, 1, 0], [], []>} : vector<64x16xbf16>, vector<64x16xbf16>, vector<64x64xf32> -> vector<64x64xf32>
    %57 = arith.addf %56, %31 : vector<64x64xf32>
    %cst_47 = arith.constant dense<0xFF800000> : vector<64xf32>
    %58 = vector.multi_reduction <maximumf>, %57, %cst_47 [1] : vector<64x64xf32> to vector<64xf32>
    %59 = vector.shape_cast %58 : vector<64xf32> to vector<64x1xf32>
    %60 = vector.broadcast %59 : vector<64x1xf32> to vector<64x64xf32>
    %61 = arith.subf %57, %60 : vector<64x64xf32>
    %62 = math.exp %61 : vector<64x64xf32>
    %cst_48 = arith.constant dense<0.000000e+00> : vector<64xf32>
    %63 = vector.multi_reduction <add>, %62, %cst_48 [1] : vector<64x64xf32> to vector<64xf32>
    %64 = vector.shape_cast %63 : vector<64xf32> to vector<64x1xf32>
    %65 = tpu.reciprocal %64 {approx = true} : vector<64x1xf32> -> vector<64x1xf32>
    %66 = vector.broadcast %65 : vector<64x1xf32> to vector<64x64xf32>
    %67 = arith.mulf %62, %66 : vector<64x64xf32>
    %68 = arith.truncf %53 : vector<64x16xf32> to vector<64x16xbf16>
    %69 = arith.truncf %67 : vector<64x64xf32> to vector<64x64xbf16>
    %cst_49 = arith.constant dense<0.000000e+00> : vector<64x16xf32>
    %70 = tpu.matmul %69, %68, %cst_49 {dimension_numbers = #tpu.dot_dimension_numbers<[1], [0], [0], [1], [0, 0, 1, 1], [], []>} : vector<64x64xbf16>, vector<64x16xbf16>, vector<64x16xf32> -> vector<64x16xf32>
    %c0_50 = arith.constant 0 : index
    %c0_51 = arith.constant 0 : index
    %c0_52 = arith.constant 0 : index
    %c0_53 = arith.constant 0 : index
    %71 = vector.load %arg12[%c0_50, %c0_51, %c0_52, %c0_53] : memref<1x4x16x64xbf16, #tpu.memory_space<vmem>>, vector<1x1x16x64xbf16>
    %72 = vector.shape_cast %71 : vector<1x1x16x64xbf16> to vector<16x64xbf16>
    %73 = arith.truncf %70 : vector<64x16xf32> to vector<64x16xbf16>
    %cst_54 = arith.constant dense<0.000000e+00> : vector<64x64xf32>
    %74 = tpu.matmul %73, %72, %cst_54 {dimension_numbers = #tpu.dot_dimension_numbers<[1], [0], [0], [1], [0, 0, 1, 1], [], []>} : vector<64x16xbf16>, vector<16x64xbf16>, vector<64x64xf32> -> vector<64x64xf32>
    %75 = arith.addf %32, %74 : vector<64x64xf32>
    %c0_55 = arith.constant 0 : index
    %c0_56 = arith.constant 0 : index
    %c1_57 = arith.constant 1 : index
    %c0_58 = arith.constant 0 : index
    %c0_59 = arith.constant 0 : index
    %76 = vector.load %arg10[%c0_55, %c0_56, %c1_57, %c0_58, %c0_59] : memref<1x3x4x64x16xbf16, #tpu.memory_space<vmem>>, vector<1x1x1x64x16xbf16>
    %77 = vector.shape_cast %76 : vector<1x1x1x64x16xbf16> to vector<64x16xbf16>
    %cst_60 = arith.constant dense<0.000000e+00> : vector<64x16xf32>
    %78 = tpu.matmul %30, %77, %cst_60 {dimension_numbers = #tpu.dot_dimension_numbers<[1], [0], [0], [1], [0, 0, 1, 1], [], []>} : vector<64x64xbf16>, vector<64x16xbf16>, vector<64x16xf32> -> vector<64x16xf32>
    %c0_61 = arith.constant 0 : index
    %c0_62 = arith.constant 0 : index
    %c1_63 = arith.constant 1 : index
    %c0_64 = arith.constant 0 : index
    %c0_65 = arith.constant 0 : index
    %79 = vector.load %arg11[%c0_61, %c0_62, %c1_63, %c0_64, %c0_65] : memref<1x3x4x1x16xf32, #tpu.memory_space<vmem>>, vector<1x1x1x1x16xf32>
    %80 = vector.shape_cast %79 : vector<1x1x1x1x16xf32> to vector<1x16xf32>
    %81 = vector.broadcast %80 : vector<1x16xf32> to vector<64x16xf32>
    %82 = arith.addf %78, %81 : vector<64x16xf32>
    %c0_66 = arith.constant 0 : index
    %c1_67 = arith.constant 1 : index
    %c1_68 = arith.constant 1 : index
    %c0_69 = arith.constant 0 : index
    %c0_70 = arith.constant 0 : index
    %83 = vector.load %arg10[%c0_66, %c1_67, %c1_68, %c0_69, %c0_70] : memref<1x3x4x64x16xbf16, #tpu.memory_space<vmem>>, vector<1x1x1x64x16xbf16>
    %84 = vector.shape_cast %83 : vector<1x1x1x64x16xbf16> to vector<64x16xbf16>
    %cst_71 = arith.constant dense<0.000000e+00> : vector<64x16xf32>
    %85 = tpu.matmul %30, %84, %cst_71 {dimension_numbers = #tpu.dot_dimension_numbers<[1], [0], [0], [1], [0, 0, 1, 1], [], []>} : vector<64x64xbf16>, vector<64x16xbf16>, vector<64x16xf32> -> vector<64x16xf32>
    %c0_72 = arith.constant 0 : index
    %c1_73 = arith.constant 1 : index
    %c1_74 = arith.constant 1 : index
    %c0_75 = arith.constant 0 : index
    %c0_76 = arith.constant 0 : index
    %86 = vector.load %arg11[%c0_72, %c1_73, %c1_74, %c0_75, %c0_76] : memref<1x3x4x1x16xf32, #tpu.memory_space<vmem>>, vector<1x1x1x1x16xf32>
    %87 = vector.shape_cast %86 : vector<1x1x1x1x16xf32> to vector<1x16xf32>
    %88 = vector.broadcast %87 : vector<1x16xf32> to vector<64x16xf32>
    %89 = arith.addf %85, %88 : vector<64x16xf32>
    %c0_77 = arith.constant 0 : index
    %c2_78 = arith.constant 2 : index
    %c1_79 = arith.constant 1 : index
    %c0_80 = arith.constant 0 : index
    %c0_81 = arith.constant 0 : index
    %90 = vector.load %arg10[%c0_77, %c2_78, %c1_79, %c0_80, %c0_81] : memref<1x3x4x64x16xbf16, #tpu.memory_space<vmem>>, vector<1x1x1x64x16xbf16>
    %91 = vector.shape_cast %90 : vector<1x1x1x64x16xbf16> to vector<64x16xbf16>
    %cst_82 = arith.constant dense<0.000000e+00> : vector<64x16xf32>
    %92 = tpu.matmul %30, %91, %cst_82 {dimension_numbers = #tpu.dot_dimension_numbers<[1], [0], [0], [1], [0, 0, 1, 1], [], []>} : vector<64x64xbf16>, vector<64x16xbf16>, vector<64x16xf32> -> vector<64x16xf32>
    %c0_83 = arith.constant 0 : index
    %c2_84 = arith.constant 2 : index
    %c1_85 = arith.constant 1 : index
    %c0_86 = arith.constant 0 : index
    %c0_87 = arith.constant 0 : index
    %93 = vector.load %arg11[%c0_83, %c2_84, %c1_85, %c0_86, %c0_87] : memref<1x3x4x1x16xf32, #tpu.memory_space<vmem>>, vector<1x1x1x1x16xf32>
    %94 = vector.shape_cast %93 : vector<1x1x1x1x16xf32> to vector<1x16xf32>
    %95 = vector.broadcast %94 : vector<1x16xf32> to vector<64x16xf32>
    %96 = arith.addf %92, %95 : vector<64x16xf32>
    %97 = arith.truncf %82 : vector<64x16xf32> to vector<64x16xbf16>
    %98 = arith.truncf %89 : vector<64x16xf32> to vector<64x16xbf16>
    %cst_88 = arith.constant dense<0.000000e+00> : vector<64x64xf32>
    %99 = tpu.matmul %97, %98, %cst_88 {dimension_numbers = #tpu.dot_dimension_numbers<[1], [1], [0], [0], [0, 0, 1, 0], [], []>} : vector<64x16xbf16>, vector<64x16xbf16>, vector<64x64xf32> -> vector<64x64xf32>
    %100 = arith.addf %99, %31 : vector<64x64xf32>
    %cst_89 = arith.constant dense<0xFF800000> : vector<64xf32>
    %101 = vector.multi_reduction <maximumf>, %100, %cst_89 [1] : vector<64x64xf32> to vector<64xf32>
    %102 = vector.shape_cast %101 : vector<64xf32> to vector<64x1xf32>
    %103 = vector.broadcast %102 : vector<64x1xf32> to vector<64x64xf32>
    %104 = arith.subf %100, %103 : vector<64x64xf32>
    %105 = math.exp %104 : vector<64x64xf32>
    %cst_90 = arith.constant dense<0.000000e+00> : vector<64xf32>
    %106 = vector.multi_reduction <add>, %105, %cst_90 [1] : vector<64x64xf32> to vector<64xf32>
    %107 = vector.shape_cast %106 : vector<64xf32> to vector<64x1xf32>
    %108 = tpu.reciprocal %107 {approx = true} : vector<64x1xf32> -> vector<64x1xf32>
    %109 = vector.broadcast %108 : vector<64x1xf32> to vector<64x64xf32>
    %110 = arith.mulf %105, %109 : vector<64x64xf32>
    %111 = arith.truncf %96 : vector<64x16xf32> to vector<64x16xbf16>
    %112 = arith.truncf %110 : vector<64x64xf32> to vector<64x64xbf16>
    %cst_91 = arith.constant dense<0.000000e+00> : vector<64x16xf32>
    %113 = tpu.matmul %112, %111, %cst_91 {dimension_numbers = #tpu.dot_dimension_numbers<[1], [0], [0], [1], [0, 0, 1, 1], [], []>} : vector<64x64xbf16>, vector<64x16xbf16>, vector<64x16xf32> -> vector<64x16xf32>
    %c0_92 = arith.constant 0 : index
    %c1_93 = arith.constant 1 : index
    %c0_94 = arith.constant 0 : index
    %c0_95 = arith.constant 0 : index
    %114 = vector.load %arg12[%c0_92, %c1_93, %c0_94, %c0_95] : memref<1x4x16x64xbf16, #tpu.memory_space<vmem>>, vector<1x1x16x64xbf16>
    %115 = vector.shape_cast %114 : vector<1x1x16x64xbf16> to vector<16x64xbf16>
    %116 = arith.truncf %113 : vector<64x16xf32> to vector<64x16xbf16>
    %cst_96 = arith.constant dense<0.000000e+00> : vector<64x64xf32>
    %117 = tpu.matmul %116, %115, %cst_96 {dimension_numbers = #tpu.dot_dimension_numbers<[1], [0], [0], [1], [0, 0, 1, 1], [], []>} : vector<64x16xbf16>, vector<16x64xbf16>, vector<64x64xf32> -> vector<64x64xf32>
    %118 = arith.addf %75, %117 : vector<64x64xf32>
    %c0_97 = arith.constant 0 : index
    %c0_98 = arith.constant 0 : index
    %c2_99 = arith.constant 2 : index
    %c0_100 = arith.constant 0 : index
    %c0_101 = arith.constant 0 : index
    %119 = vector.load %arg10[%c0_97, %c0_98, %c2_99, %c0_100, %c0_101] : memref<1x3x4x64x16xbf16, #tpu.memory_space<vmem>>, vector<1x1x1x64x16xbf16>
    %120 = vector.shape_cast %119 : vector<1x1x1x64x16xbf16> to vector<64x16xbf16>
    %cst_102 = arith.constant dense<0.000000e+00> : vector<64x16xf32>
    %121 = tpu.matmul %30, %120, %cst_102 {dimension_numbers = #tpu.dot_dimension_numbers<[1], [0], [0], [1], [0, 0, 1, 1], [], []>} : vector<64x64xbf16>, vector<64x16xbf16>, vector<64x16xf32> -> vector<64x16xf32>
    %c0_103 = arith.constant 0 : index
    %c0_104 = arith.constant 0 : index
    %c2_105 = arith.constant 2 : index
    %c0_106 = arith.constant 0 : index
    %c0_107 = arith.constant 0 : index
    %122 = vector.load %arg11[%c0_103, %c0_104, %c2_105, %c0_106, %c0_107] : memref<1x3x4x1x16xf32, #tpu.memory_space<vmem>>, vector<1x1x1x1x16xf32>
    %123 = vector.shape_cast %122 : vector<1x1x1x1x16xf32> to vector<1x16xf32>
    %124 = vector.broadcast %123 : vector<1x16xf32> to vector<64x16xf32>
    %125 = arith.addf %121, %124 : vector<64x16xf32>
    %c0_108 = arith.constant 0 : index
    %c1_109 = arith.constant 1 : index
    %c2_110 = arith.constant 2 : index
    %c0_111 = arith.constant 0 : index
    %c0_112 = arith.constant 0 : index
    %126 = vector.load %arg10[%c0_108, %c1_109, %c2_110, %c0_111, %c0_112] : memref<1x3x4x64x16xbf16, #tpu.memory_space<vmem>>, vector<1x1x1x64x16xbf16>
    %127 = vector.shape_cast %126 : vector<1x1x1x64x16xbf16> to vector<64x16xbf16>
    %cst_113 = arith.constant dense<0.000000e+00> : vector<64x16xf32>
    %128 = tpu.matmul %30, %127, %cst_113 {dimension_numbers = #tpu.dot_dimension_numbers<[1], [0], [0], [1], [0, 0, 1, 1], [], []>} : vector<64x64xbf16>, vector<64x16xbf16>, vector<64x16xf32> -> vector<64x16xf32>
    %c0_114 = arith.constant 0 : index
    %c1_115 = arith.constant 1 : index
    %c2_116 = arith.constant 2 : index
    %c0_117 = arith.constant 0 : index
    %c0_118 = arith.constant 0 : index
    %129 = vector.load %arg11[%c0_114, %c1_115, %c2_116, %c0_117, %c0_118] : memref<1x3x4x1x16xf32, #tpu.memory_space<vmem>>, vector<1x1x1x1x16xf32>
    %130 = vector.shape_cast %129 : vector<1x1x1x1x16xf32> to vector<1x16xf32>
    %131 = vector.broadcast %130 : vector<1x16xf32> to vector<64x16xf32>
    %132 = arith.addf %128, %131 : vector<64x16xf32>
    %c0_119 = arith.constant 0 : index
    %c2_120 = arith.constant 2 : index
    %c2_121 = arith.constant 2 : index
    %c0_122 = arith.constant 0 : index
    %c0_123 = arith.constant 0 : index
    %133 = vector.load %arg10[%c0_119, %c2_120, %c2_121, %c0_122, %c0_123] : memref<1x3x4x64x16xbf16, #tpu.memory_space<vmem>>, vector<1x1x1x64x16xbf16>
    %134 = vector.shape_cast %133 : vector<1x1x1x64x16xbf16> to vector<64x16xbf16>
    %cst_124 = arith.constant dense<0.000000e+00> : vector<64x16xf32>
    %135 = tpu.matmul %30, %134, %cst_124 {dimension_numbers = #tpu.dot_dimension_numbers<[1], [0], [0], [1], [0, 0, 1, 1], [], []>} : vector<64x64xbf16>, vector<64x16xbf16>, vector<64x16xf32> -> vector<64x16xf32>
    %c0_125 = arith.constant 0 : index
    %c2_126 = arith.constant 2 : index
    %c2_127 = arith.constant 2 : index
    %c0_128 = arith.constant 0 : index
    %c0_129 = arith.constant 0 : index
    %136 = vector.load %arg11[%c0_125, %c2_126, %c2_127, %c0_128, %c0_129] : memref<1x3x4x1x16xf32, #tpu.memory_space<vmem>>, vector<1x1x1x1x16xf32>
    %137 = vector.shape_cast %136 : vector<1x1x1x1x16xf32> to vector<1x16xf32>
    %138 = vector.broadcast %137 : vector<1x16xf32> to vector<64x16xf32>
    %139 = arith.addf %135, %138 : vector<64x16xf32>
    %140 = arith.truncf %125 : vector<64x16xf32> to vector<64x16xbf16>
    %141 = arith.truncf %132 : vector<64x16xf32> to vector<64x16xbf16>
    %cst_130 = arith.constant dense<0.000000e+00> : vector<64x64xf32>
    %142 = tpu.matmul %140, %141, %cst_130 {dimension_numbers = #tpu.dot_dimension_numbers<[1], [1], [0], [0], [0, 0, 1, 0], [], []>} : vector<64x16xbf16>, vector<64x16xbf16>, vector<64x64xf32> -> vector<64x64xf32>
    %143 = arith.addf %142, %31 : vector<64x64xf32>
    %cst_131 = arith.constant dense<0xFF800000> : vector<64xf32>
    %144 = vector.multi_reduction <maximumf>, %143, %cst_131 [1] : vector<64x64xf32> to vector<64xf32>
    %145 = vector.shape_cast %144 : vector<64xf32> to vector<64x1xf32>
    %146 = vector.broadcast %145 : vector<64x1xf32> to vector<64x64xf32>
    %147 = arith.subf %143, %146 : vector<64x64xf32>
    %148 = math.exp %147 : vector<64x64xf32>
    %cst_132 = arith.constant dense<0.000000e+00> : vector<64xf32>
    %149 = vector.multi_reduction <add>, %148, %cst_132 [1] : vector<64x64xf32> to vector<64xf32>
    %150 = vector.shape_cast %149 : vector<64xf32> to vector<64x1xf32>
    %151 = tpu.reciprocal %150 {approx = true} : vector<64x1xf32> -> vector<64x1xf32>
    %152 = vector.broadcast %151 : vector<64x1xf32> to vector<64x64xf32>
    %153 = arith.mulf %148, %152 : vector<64x64xf32>
    %154 = arith.truncf %139 : vector<64x16xf32> to vector<64x16xbf16>
    %155 = arith.truncf %153 : vector<64x64xf32> to vector<64x64xbf16>
    %cst_133 = arith.constant dense<0.000000e+00> : vector<64x16xf32>
    %156 = tpu.matmul %155, %154, %cst_133 {dimension_numbers = #tpu.dot_dimension_numbers<[1], [0], [0], [1], [0, 0, 1, 1], [], []>} : vector<64x64xbf16>, vector<64x16xbf16>, vector<64x16xf32> -> vector<64x16xf32>
    %c0_134 = arith.constant 0 : index
    %c2_135 = arith.constant 2 : index
    %c0_136 = arith.constant 0 : index
    %c0_137 = arith.constant 0 : index
    %157 = vector.load %arg12[%c0_134, %c2_135, %c0_136, %c0_137] : memref<1x4x16x64xbf16, #tpu.memory_space<vmem>>, vector<1x1x16x64xbf16>
    %158 = vector.shape_cast %157 : vector<1x1x16x64xbf16> to vector<16x64xbf16>
    %159 = arith.truncf %156 : vector<64x16xf32> to vector<64x16xbf16>
    %cst_138 = arith.constant dense<0.000000e+00> : vector<64x64xf32>
    %160 = tpu.matmul %159, %158, %cst_138 {dimension_numbers = #tpu.dot_dimension_numbers<[1], [0], [0], [1], [0, 0, 1, 1], [], []>} : vector<64x16xbf16>, vector<16x64xbf16>, vector<64x64xf32> -> vector<64x64xf32>
    %161 = arith.addf %118, %160 : vector<64x64xf32>
    %c0_139 = arith.constant 0 : index
    %c0_140 = arith.constant 0 : index
    %c3 = arith.constant 3 : index
    %c0_141 = arith.constant 0 : index
    %c0_142 = arith.constant 0 : index
    %162 = vector.load %arg10[%c0_139, %c0_140, %c3, %c0_141, %c0_142] : memref<1x3x4x64x16xbf16, #tpu.memory_space<vmem>>, vector<1x1x1x64x16xbf16>
    %163 = vector.shape_cast %162 : vector<1x1x1x64x16xbf16> to vector<64x16xbf16>
    %cst_143 = arith.constant dense<0.000000e+00> : vector<64x16xf32>
    %164 = tpu.matmul %30, %163, %cst_143 {dimension_numbers = #tpu.dot_dimension_numbers<[1], [0], [0], [1], [0, 0, 1, 1], [], []>} : vector<64x64xbf16>, vector<64x16xbf16>, vector<64x16xf32> -> vector<64x16xf32>
    %c0_144 = arith.constant 0 : index
    %c0_145 = arith.constant 0 : index
    %c3_146 = arith.constant 3 : index
    %c0_147 = arith.constant 0 : index
    %c0_148 = arith.constant 0 : index
    %165 = vector.load %arg11[%c0_144, %c0_145, %c3_146, %c0_147, %c0_148] : memref<1x3x4x1x16xf32, #tpu.memory_space<vmem>>, vector<1x1x1x1x16xf32>
    %166 = vector.shape_cast %165 : vector<1x1x1x1x16xf32> to vector<1x16xf32>
    %167 = vector.broadcast %166 : vector<1x16xf32> to vector<64x16xf32>
    %168 = arith.addf %164, %167 : vector<64x16xf32>
    %c0_149 = arith.constant 0 : index
    %c1_150 = arith.constant 1 : index
    %c3_151 = arith.constant 3 : index
    %c0_152 = arith.constant 0 : index
    %c0_153 = arith.constant 0 : index
    %169 = vector.load %arg10[%c0_149, %c1_150, %c3_151, %c0_152, %c0_153] : memref<1x3x4x64x16xbf16, #tpu.memory_space<vmem>>, vector<1x1x1x64x16xbf16>
    %170 = vector.shape_cast %169 : vector<1x1x1x64x16xbf16> to vector<64x16xbf16>
    %cst_154 = arith.constant dense<0.000000e+00> : vector<64x16xf32>
    %171 = tpu.matmul %30, %170, %cst_154 {dimension_numbers = #tpu.dot_dimension_numbers<[1], [0], [0], [1], [0, 0, 1, 1], [], []>} : vector<64x64xbf16>, vector<64x16xbf16>, vector<64x16xf32> -> vector<64x16xf32>
    %c0_155 = arith.constant 0 : index
    %c1_156 = arith.constant 1 : index
    %c3_157 = arith.constant 3 : index
    %c0_158 = arith.constant 0 : index
    %c0_159 = arith.constant 0 : index
    %172 = vector.load %arg11[%c0_155, %c1_156, %c3_157, %c0_158, %c0_159] : memref<1x3x4x1x16xf32, #tpu.memory_space<vmem>>, vector<1x1x1x1x16xf32>
    %173 = vector.shape_cast %172 : vector<1x1x1x1x16xf32> to vector<1x16xf32>
    %174 = vector.broadcast %173 : vector<1x16xf32> to vector<64x16xf32>
    %175 = arith.addf %171, %174 : vector<64x16xf32>
    %c0_160 = arith.constant 0 : index
    %c2_161 = arith.constant 2 : index
    %c3_162 = arith.constant 3 : index
    %c0_163 = arith.constant 0 : index
    %c0_164 = arith.constant 0 : index
    %176 = vector.load %arg10[%c0_160, %c2_161, %c3_162, %c0_163, %c0_164] : memref<1x3x4x64x16xbf16, #tpu.memory_space<vmem>>, vector<1x1x1x64x16xbf16>
    %177 = vector.shape_cast %176 : vector<1x1x1x64x16xbf16> to vector<64x16xbf16>
    %cst_165 = arith.constant dense<0.000000e+00> : vector<64x16xf32>
    %178 = tpu.matmul %30, %177, %cst_165 {dimension_numbers = #tpu.dot_dimension_numbers<[1], [0], [0], [1], [0, 0, 1, 1], [], []>} : vector<64x64xbf16>, vector<64x16xbf16>, vector<64x16xf32> -> vector<64x16xf32>
    %c0_166 = arith.constant 0 : index
    %c2_167 = arith.constant 2 : index
    %c3_168 = arith.constant 3 : index
    %c0_169 = arith.constant 0 : index
    %c0_170 = arith.constant 0 : index
    %179 = vector.load %arg11[%c0_166, %c2_167, %c3_168, %c0_169, %c0_170] : memref<1x3x4x1x16xf32, #tpu.memory_space<vmem>>, vector<1x1x1x1x16xf32>
    %180 = vector.shape_cast %179 : vector<1x1x1x1x16xf32> to vector<1x16xf32>
    %181 = vector.broadcast %180 : vector<1x16xf32> to vector<64x16xf32>
    %182 = arith.addf %178, %181 : vector<64x16xf32>
    %183 = arith.truncf %168 : vector<64x16xf32> to vector<64x16xbf16>
    %184 = arith.truncf %175 : vector<64x16xf32> to vector<64x16xbf16>
    %cst_171 = arith.constant dense<0.000000e+00> : vector<64x64xf32>
    %185 = tpu.matmul %183, %184, %cst_171 {dimension_numbers = #tpu.dot_dimension_numbers<[1], [1], [0], [0], [0, 0, 1, 0], [], []>} : vector<64x16xbf16>, vector<64x16xbf16>, vector<64x64xf32> -> vector<64x64xf32>
    %186 = arith.addf %185, %31 : vector<64x64xf32>
    %cst_172 = arith.constant dense<0xFF800000> : vector<64xf32>
    %187 = vector.multi_reduction <maximumf>, %186, %cst_172 [1] : vector<64x64xf32> to vector<64xf32>
    %188 = vector.shape_cast %187 : vector<64xf32> to vector<64x1xf32>
    %189 = vector.broadcast %188 : vector<64x1xf32> to vector<64x64xf32>
    %190 = arith.subf %186, %189 : vector<64x64xf32>
    %191 = math.exp %190 : vector<64x64xf32>
    %cst_173 = arith.constant dense<0.000000e+00> : vector<64xf32>
    %192 = vector.multi_reduction <add>, %191, %cst_173 [1] : vector<64x64xf32> to vector<64xf32>
    %193 = vector.shape_cast %192 : vector<64xf32> to vector<64x1xf32>
    %194 = tpu.reciprocal %193 {approx = true} : vector<64x1xf32> -> vector<64x1xf32>
    %195 = vector.broadcast %194 : vector<64x1xf32> to vector<64x64xf32>
    %196 = arith.mulf %191, %195 : vector<64x64xf32>
    %197 = arith.truncf %182 : vector<64x16xf32> to vector<64x16xbf16>
    %198 = arith.truncf %196 : vector<64x64xf32> to vector<64x64xbf16>
    %cst_174 = arith.constant dense<0.000000e+00> : vector<64x16xf32>
    %199 = tpu.matmul %198, %197, %cst_174 {dimension_numbers = #tpu.dot_dimension_numbers<[1], [0], [0], [1], [0, 0, 1, 1], [], []>} : vector<64x64xbf16>, vector<64x16xbf16>, vector<64x16xf32> -> vector<64x16xf32>
    %c0_175 = arith.constant 0 : index
    %c3_176 = arith.constant 3 : index
    %c0_177 = arith.constant 0 : index
    %c0_178 = arith.constant 0 : index
    %200 = vector.load %arg12[%c0_175, %c3_176, %c0_177, %c0_178] : memref<1x4x16x64xbf16, #tpu.memory_space<vmem>>, vector<1x1x16x64xbf16>
    %201 = vector.shape_cast %200 : vector<1x1x16x64xbf16> to vector<16x64xbf16>
    %202 = arith.truncf %199 : vector<64x16xf32> to vector<64x16xbf16>
    %cst_179 = arith.constant dense<0.000000e+00> : vector<64x64xf32>
    %203 = tpu.matmul %202, %201, %cst_179 {dimension_numbers = #tpu.dot_dimension_numbers<[1], [0], [0], [1], [0, 0, 1, 1], [], []>} : vector<64x16xbf16>, vector<16x64xbf16>, vector<64x64xf32> -> vector<64x64xf32>
    %204 = arith.addf %161, %203 : vector<64x64xf32>
    %c0_180 = arith.constant 0 : index
    %c0_181 = arith.constant 0 : index
    %c0_182 = arith.constant 0 : index
    %205 = vector.load %arg13[%c0_180, %c0_181, %c0_182] : memref<1x1x64xf32, #tpu.memory_space<vmem>>, vector<1x1x64xf32>
    %206 = vector.shape_cast %205 : vector<1x1x64xf32> to vector<1x64xf32>
    %207 = vector.broadcast %206 : vector<1x64xf32> to vector<64x64xf32>
    %208 = arith.addf %204, %207 : vector<64x64xf32>
    %c0_183 = arith.constant 0 : index
    %c0_184 = arith.constant 0 : index
    %c0_185 = arith.constant 0 : index
    %209 = vector.load %arg14[%c0_183, %c0_184, %c0_185] : memref<1x64x64xbf16, #tpu.memory_space<vmem>>, vector<1x64x64xbf16>
    %210 = vector.shape_cast %209 : vector<1x64x64xbf16> to vector<64x64xbf16>
    %211 = arith.truncf %208 : vector<64x64xf32> to vector<64x64xbf16>
    %cst_186 = arith.constant dense<0.000000e+00> : vector<64x64xf32>
    %212 = tpu.matmul %211, %210, %cst_186 {dimension_numbers = #tpu.dot_dimension_numbers<[1], [0], [0], [1], [0, 0, 1, 1], [], []>} : vector<64x64xbf16>, vector<64x64xbf16>, vector<64x64xf32> -> vector<64x64xf32>
    %c0_187 = arith.constant 0 : index
    %c0_188 = arith.constant 0 : index
    %c0_189 = arith.constant 0 : index
    %213 = vector.load %arg15[%c0_187, %c0_188, %c0_189] : memref<1x1x64xf32, #tpu.memory_space<vmem>>, vector<1x1x64xf32>
    %214 = vector.shape_cast %213 : vector<1x1x64xf32> to vector<1x64xf32>
    %215 = vector.broadcast %214 : vector<1x64xf32> to vector<64x64xf32>
    %216 = arith.addf %212, %215 : vector<64x64xf32>
    %217 = arith.addf %4, %216 : vector<64x64xf32>
    %c0_190 = arith.constant 0 : index
    %c0_191 = arith.constant 0 : index
    %c0_192 = arith.constant 0 : index
    %218 = vector.load %arg16[%c0_190, %c0_191, %c0_192] : memref<1x1x64xf32, #tpu.memory_space<vmem>>, vector<1x1x64xf32>
    %219 = vector.shape_cast %218 : vector<1x1x64xf32> to vector<1x64xf32>
    %c0_193 = arith.constant 0 : index
    %c0_194 = arith.constant 0 : index
    %c0_195 = arith.constant 0 : index
    %220 = vector.load %arg17[%c0_193, %c0_194, %c0_195] : memref<1x1x64xf32, #tpu.memory_space<vmem>>, vector<1x1x64xf32>
    %221 = vector.shape_cast %220 : vector<1x1x64xf32> to vector<1x64xf32>
    %cst_196 = arith.constant dense<0.000000e+00> : vector<64xf32>
    %222 = vector.multi_reduction <add>, %217, %cst_196 [1] : vector<64x64xf32> to vector<64xf32>
    %223 = vector.shape_cast %222 : vector<64xf32> to vector<64x1xf32>
    %cst_197 = arith.constant 6.400000e+01 : f32
    %224 = vector.broadcast %cst_197 : f32 to vector<64x1xf32>
    %225 = arith.divf %223, %224 : vector<64x1xf32>
    %226 = vector.broadcast %225 : vector<64x1xf32> to vector<64x64xf32>
    %227 = arith.subf %217, %226 : vector<64x64xf32>
    %228 = arith.mulf %227, %227 : vector<64x64xf32>
    %cst_198 = arith.constant dense<0.000000e+00> : vector<64xf32>
    %229 = vector.multi_reduction <add>, %228, %cst_198 [1] : vector<64x64xf32> to vector<64xf32>
    %230 = vector.shape_cast %229 : vector<64xf32> to vector<64x1xf32>
    %cst_199 = arith.constant 6.400000e+01 : f32
    %231 = vector.broadcast %cst_199 : f32 to vector<64x1xf32>
    %232 = arith.divf %230, %231 : vector<64x1xf32>
    %cst_200 = arith.constant 9.99999997E-7 : f32
    %233 = vector.broadcast %cst_200 : f32 to vector<64x1xf32>
    %234 = arith.addf %232, %233 : vector<64x1xf32>
    %235 = math.rsqrt %234 : vector<64x1xf32>
    %236 = vector.broadcast %235 : vector<64x1xf32> to vector<64x64xf32>
    %237 = arith.mulf %227, %236 : vector<64x64xf32>
    %238 = vector.broadcast %219 : vector<1x64xf32> to vector<64x64xf32>
    %239 = arith.mulf %237, %238 : vector<64x64xf32>
    %240 = vector.broadcast %221 : vector<1x64xf32> to vector<64x64xf32>
    %241 = arith.addf %239, %240 : vector<64x64xf32>
    %c0_201 = arith.constant 0 : index
    %c0_202 = arith.constant 0 : index
    %c0_203 = arith.constant 0 : index
    %242 = vector.load %arg16[%c0_201, %c0_202, %c0_203] : memref<1x1x64xf32, #tpu.memory_space<vmem>>, vector<1x1x64xf32>
    %243 = vector.shape_cast %242 : vector<1x1x64xf32> to vector<1x64xf32>
    %c0_204 = arith.constant 0 : index
    %c0_205 = arith.constant 0 : index
    %c0_206 = arith.constant 0 : index
    %244 = vector.load %arg17[%c0_204, %c0_205, %c0_206] : memref<1x1x64xf32, #tpu.memory_space<vmem>>, vector<1x1x64xf32>
    %245 = vector.shape_cast %244 : vector<1x1x64xf32> to vector<1x64xf32>
    %cst_207 = arith.constant dense<0.000000e+00> : vector<1xf32>
    %246 = vector.multi_reduction <add>, %5, %cst_207 [1] : vector<1x64xf32> to vector<1xf32>
    %247 = vector.shape_cast %246 : vector<1xf32> to vector<1x1xf32>
    %cst_208 = arith.constant 6.400000e+01 : f32
    %248 = vector.broadcast %cst_208 : f32 to vector<1x1xf32>
    %249 = arith.divf %247, %248 : vector<1x1xf32>
    %250 = vector.broadcast %249 : vector<1x1xf32> to vector<1x64xf32>
    %251 = arith.subf %5, %250 : vector<1x64xf32>
    %252 = arith.mulf %251, %251 : vector<1x64xf32>
    %cst_209 = arith.constant dense<0.000000e+00> : vector<1xf32>
    %253 = vector.multi_reduction <add>, %252, %cst_209 [1] : vector<1x64xf32> to vector<1xf32>
    %254 = vector.shape_cast %253 : vector<1xf32> to vector<1x1xf32>
    %cst_210 = arith.constant 6.400000e+01 : f32
    %255 = vector.broadcast %cst_210 : f32 to vector<1x1xf32>
    %256 = arith.divf %254, %255 : vector<1x1xf32>
    %cst_211 = arith.constant 9.99999997E-7 : f32
    %257 = vector.broadcast %cst_211 : f32 to vector<1x1xf32>
    %258 = arith.addf %256, %257 : vector<1x1xf32>
    %259 = math.rsqrt %258 : vector<1x1xf32>
    %260 = vector.broadcast %259 : vector<1x1xf32> to vector<1x64xf32>
    %261 = arith.mulf %251, %260 : vector<1x64xf32>
    %262 = arith.mulf %261, %243 : vector<1x64xf32>
    %263 = arith.addf %262, %245 : vector<1x64xf32>
    %264 = arith.truncf %241 : vector<64x64xf32> to vector<64x64xbf16>
    %265 = arith.truncf %263 : vector<1x64xf32> to vector<1x64xbf16>
    %c0_212 = arith.constant 0 : index
    %c0_213 = arith.constant 0 : index
    %266 = vector.load %arg6[%c0_212, %c0_213] : memref<64x64xf32, #tpu.memory_space<vmem>>, vector<64x64xf32>
    %c0_214 = arith.constant 0 : index
    %c0_215 = arith.constant 0 : index
    %267 = vector.load %arg7[%c0_214, %c0_215] : memref<4x64xf32, #tpu.memory_space<vmem>>, vector<4x64xf32>
    %cst_216 = arith.constant 0.000000e+00 : f32
    %268 = vector.broadcast %cst_216 : f32 to vector<64x64xf32>
    %cst_217 = arith.constant 0.000000e+00 : f32
    %269 = vector.broadcast %cst_217 : f32 to vector<1x64xf32>
    %c0_218 = arith.constant 0 : index
    %c0_219 = arith.constant 0 : index
    %c0_220 = arith.constant 0 : index
    %c0_221 = arith.constant 0 : index
    %c0_222 = arith.constant 0 : index
    %270 = vector.load %arg18[%c0_218, %c0_219, %c0_220, %c0_221, %c0_222] : memref<1x3x4x64x16xbf16, #tpu.memory_space<vmem>>, vector<1x1x1x64x16xbf16>
    %271 = vector.shape_cast %270 : vector<1x1x1x64x16xbf16> to vector<64x16xbf16>
    %cst_223 = arith.constant dense<0.000000e+00> : vector<64x16xf32>
    %272 = tpu.matmul %264, %271, %cst_223 {dimension_numbers = #tpu.dot_dimension_numbers<[1], [0], [0], [1], [0, 0, 1, 1], [], []>} : vector<64x64xbf16>, vector<64x16xbf16>, vector<64x16xf32> -> vector<64x16xf32>
    %c0_224 = arith.constant 0 : index
    %c0_225 = arith.constant 0 : index
    %c0_226 = arith.constant 0 : index
    %c0_227 = arith.constant 0 : index
    %c0_228 = arith.constant 0 : index
    %273 = vector.load %arg19[%c0_224, %c0_225, %c0_226, %c0_227, %c0_228] : memref<1x3x4x1x16xf32, #tpu.memory_space<vmem>>, vector<1x1x1x1x16xf32>
    %274 = vector.shape_cast %273 : vector<1x1x1x1x16xf32> to vector<1x16xf32>
    %275 = vector.broadcast %274 : vector<1x16xf32> to vector<64x16xf32>
    %276 = arith.addf %272, %275 : vector<64x16xf32>
    %c0_229 = arith.constant 0 : index
    %c1_230 = arith.constant 1 : index
    %c0_231 = arith.constant 0 : index
    %c0_232 = arith.constant 0 : index
    %c0_233 = arith.constant 0 : index
    %277 = vector.load %arg18[%c0_229, %c1_230, %c0_231, %c0_232, %c0_233] : memref<1x3x4x64x16xbf16, #tpu.memory_space<vmem>>, vector<1x1x1x64x16xbf16>
    %278 = vector.shape_cast %277 : vector<1x1x1x64x16xbf16> to vector<64x16xbf16>
    %cst_234 = arith.constant dense<0.000000e+00> : vector<64x16xf32>
    %279 = tpu.matmul %264, %278, %cst_234 {dimension_numbers = #tpu.dot_dimension_numbers<[1], [0], [0], [1], [0, 0, 1, 1], [], []>} : vector<64x64xbf16>, vector<64x16xbf16>, vector<64x16xf32> -> vector<64x16xf32>
    %c0_235 = arith.constant 0 : index
    %c1_236 = arith.constant 1 : index
    %c0_237 = arith.constant 0 : index
    %c0_238 = arith.constant 0 : index
    %c0_239 = arith.constant 0 : index
    %280 = vector.load %arg19[%c0_235, %c1_236, %c0_237, %c0_238, %c0_239] : memref<1x3x4x1x16xf32, #tpu.memory_space<vmem>>, vector<1x1x1x1x16xf32>
    %281 = vector.shape_cast %280 : vector<1x1x1x1x16xf32> to vector<1x16xf32>
    %282 = vector.broadcast %281 : vector<1x16xf32> to vector<64x16xf32>
    %283 = arith.addf %279, %282 : vector<64x16xf32>
    %c0_240 = arith.constant 0 : index
    %c2_241 = arith.constant 2 : index
    %c0_242 = arith.constant 0 : index
    %c0_243 = arith.constant 0 : index
    %c0_244 = arith.constant 0 : index
    %284 = vector.load %arg18[%c0_240, %c2_241, %c0_242, %c0_243, %c0_244] : memref<1x3x4x64x16xbf16, #tpu.memory_space<vmem>>, vector<1x1x1x64x16xbf16>
    %285 = vector.shape_cast %284 : vector<1x1x1x64x16xbf16> to vector<64x16xbf16>
    %cst_245 = arith.constant dense<0.000000e+00> : vector<64x16xf32>
    %286 = tpu.matmul %264, %285, %cst_245 {dimension_numbers = #tpu.dot_dimension_numbers<[1], [0], [0], [1], [0, 0, 1, 1], [], []>} : vector<64x64xbf16>, vector<64x16xbf16>, vector<64x16xf32> -> vector<64x16xf32>
    %c0_246 = arith.constant 0 : index
    %c2_247 = arith.constant 2 : index
    %c0_248 = arith.constant 0 : index
    %c0_249 = arith.constant 0 : index
    %c0_250 = arith.constant 0 : index
    %287 = vector.load %arg19[%c0_246, %c2_247, %c0_248, %c0_249, %c0_250] : memref<1x3x4x1x16xf32, #tpu.memory_space<vmem>>, vector<1x1x1x1x16xf32>
    %288 = vector.shape_cast %287 : vector<1x1x1x1x16xf32> to vector<1x16xf32>
    %289 = vector.broadcast %288 : vector<1x16xf32> to vector<64x16xf32>
    %290 = arith.addf %286, %289 : vector<64x16xf32>
    %c0_251 = arith.constant 0 : index
    %c0_252 = arith.constant 0 : index
    %c0_253 = arith.constant 0 : index
    %c0_254 = arith.constant 0 : index
    %c0_255 = arith.constant 0 : index
    %291 = vector.load %arg18[%c0_251, %c0_252, %c0_253, %c0_254, %c0_255] : memref<1x3x4x64x16xbf16, #tpu.memory_space<vmem>>, vector<1x1x1x64x16xbf16>
    %292 = vector.shape_cast %291 : vector<1x1x1x64x16xbf16> to vector<64x16xbf16>
    %cst_256 = arith.constant dense<0.000000e+00> : vector<1x16xf32>
    %293 = tpu.matmul %265, %292, %cst_256 {dimension_numbers = #tpu.dot_dimension_numbers<[1], [0], [0], [1], [0, 0, 1, 1], [], []>} : vector<1x64xbf16>, vector<64x16xbf16>, vector<1x16xf32> -> vector<1x16xf32>
    %c0_257 = arith.constant 0 : index
    %c0_258 = arith.constant 0 : index
    %c0_259 = arith.constant 0 : index
    %c0_260 = arith.constant 0 : index
    %c0_261 = arith.constant 0 : index
    %294 = vector.load %arg19[%c0_257, %c0_258, %c0_259, %c0_260, %c0_261] : memref<1x3x4x1x16xf32, #tpu.memory_space<vmem>>, vector<1x1x1x1x16xf32>
    %295 = vector.shape_cast %294 : vector<1x1x1x1x16xf32> to vector<1x16xf32>
    %296 = arith.addf %293, %295 : vector<1x16xf32>
    %c0_262 = arith.constant 0 : index
    %c1_263 = arith.constant 1 : index
    %c0_264 = arith.constant 0 : index
    %c0_265 = arith.constant 0 : index
    %c0_266 = arith.constant 0 : index
    %297 = vector.load %arg18[%c0_262, %c1_263, %c0_264, %c0_265, %c0_266] : memref<1x3x4x64x16xbf16, #tpu.memory_space<vmem>>, vector<1x1x1x64x16xbf16>
    %298 = vector.shape_cast %297 : vector<1x1x1x64x16xbf16> to vector<64x16xbf16>
    %cst_267 = arith.constant dense<0.000000e+00> : vector<1x16xf32>
    %299 = tpu.matmul %265, %298, %cst_267 {dimension_numbers = #tpu.dot_dimension_numbers<[1], [0], [0], [1], [0, 0, 1, 1], [], []>} : vector<1x64xbf16>, vector<64x16xbf16>, vector<1x16xf32> -> vector<1x16xf32>
    %c0_268 = arith.constant 0 : index
    %c1_269 = arith.constant 1 : index
    %c0_270 = arith.constant 0 : index
    %c0_271 = arith.constant 0 : index
    %c0_272 = arith.constant 0 : index
    %300 = vector.load %arg19[%c0_268, %c1_269, %c0_270, %c0_271, %c0_272] : memref<1x3x4x1x16xf32, #tpu.memory_space<vmem>>, vector<1x1x1x1x16xf32>
    %301 = vector.shape_cast %300 : vector<1x1x1x1x16xf32> to vector<1x16xf32>
    %302 = arith.addf %299, %301 : vector<1x16xf32>
    %c0_273 = arith.constant 0 : index
    %c2_274 = arith.constant 2 : index
    %c0_275 = arith.constant 0 : index
    %c0_276 = arith.constant 0 : index
    %c0_277 = arith.constant 0 : index
    %303 = vector.load %arg18[%c0_273, %c2_274, %c0_275, %c0_276, %c0_277] : memref<1x3x4x64x16xbf16, #tpu.memory_space<vmem>>, vector<1x1x1x64x16xbf16>
    %304 = vector.shape_cast %303 : vector<1x1x1x64x16xbf16> to vector<64x16xbf16>
    %cst_278 = arith.constant dense<0.000000e+00> : vector<1x16xf32>
    %305 = tpu.matmul %265, %304, %cst_278 {dimension_numbers = #tpu.dot_dimension_numbers<[1], [0], [0], [1], [0, 0, 1, 1], [], []>} : vector<1x64xbf16>, vector<64x16xbf16>, vector<1x16xf32> -> vector<1x16xf32>
    %c0_279 = arith.constant 0 : index
    %c2_280 = arith.constant 2 : index
    %c0_281 = arith.constant 0 : index
    %c0_282 = arith.constant 0 : index
    %c0_283 = arith.constant 0 : index
    %306 = vector.load %arg19[%c0_279, %c2_280, %c0_281, %c0_282, %c0_283] : memref<1x3x4x1x16xf32, #tpu.memory_space<vmem>>, vector<1x1x1x1x16xf32>
    %307 = vector.shape_cast %306 : vector<1x1x1x1x16xf32> to vector<1x16xf32>
    %308 = arith.addf %305, %307 : vector<1x16xf32>
    %309 = arith.truncf %276 : vector<64x16xf32> to vector<64x16xbf16>
    %310 = arith.truncf %283 : vector<64x16xf32> to vector<64x16xbf16>
    %cst_284 = arith.constant dense<0.000000e+00> : vector<64x64xf32>
    %311 = tpu.matmul %309, %310, %cst_284 {dimension_numbers = #tpu.dot_dimension_numbers<[1], [1], [0], [0], [0, 0, 1, 0], [], []>} : vector<64x16xbf16>, vector<64x16xbf16>, vector<64x64xf32> -> vector<64x64xf32>
    %312 = arith.addf %311, %266 : vector<64x64xf32>
    %313 = vector.broadcast %302 : vector<1x16xf32> to vector<64x16xf32>
    %314 = arith.mulf %276, %313 : vector<64x16xf32>
    %cst_285 = arith.constant dense<0.000000e+00> : vector<64xf32>
    %315 = vector.multi_reduction <add>, %314, %cst_285 [1] : vector<64x16xf32> to vector<64xf32>
    %316 = vector.shape_cast %315 : vector<64xf32> to vector<64x1xf32>
    %cst_286 = arith.constant dense<0xFF800000> : vector<64xf32>
    %317 = vector.multi_reduction <maximumf>, %312, %cst_286 [1] : vector<64x64xf32> to vector<64xf32>
    %318 = vector.shape_cast %317 : vector<64xf32> to vector<64x1xf32>
    %319 = arith.maximumf %318, %316 : vector<64x1xf32>
    %320 = vector.broadcast %319 : vector<64x1xf32> to vector<64x64xf32>
    %321 = arith.subf %312, %320 : vector<64x64xf32>
    %322 = math.exp %321 : vector<64x64xf32>
    %323 = arith.subf %316, %319 : vector<64x1xf32>
    %324 = math.exp %323 : vector<64x1xf32>
    %cst_287 = arith.constant dense<0.000000e+00> : vector<64xf32>
    %325 = vector.multi_reduction <add>, %322, %cst_287 [1] : vector<64x64xf32> to vector<64xf32>
    %326 = vector.shape_cast %325 : vector<64xf32> to vector<64x1xf32>
    %327 = arith.addf %326, %324 : vector<64x1xf32>
    %328 = tpu.reciprocal %327 {approx = true} : vector<64x1xf32> -> vector<64x1xf32>
    %329 = vector.broadcast %328 : vector<64x1xf32> to vector<64x64xf32>
    %330 = arith.mulf %322, %329 : vector<64x64xf32>
    %331 = arith.truncf %290 : vector<64x16xf32> to vector<64x16xbf16>
    %332 = arith.truncf %330 : vector<64x64xf32> to vector<64x64xbf16>
    %cst_288 = arith.constant dense<0.000000e+00> : vector<64x16xf32>
    %333 = tpu.matmul %332, %331, %cst_288 {dimension_numbers = #tpu.dot_dimension_numbers<[1], [0], [0], [1], [0, 0, 1, 1], [], []>} : vector<64x64xbf16>, vector<64x16xbf16>, vector<64x16xf32> -> vector<64x16xf32>
    %334 = arith.mulf %324, %328 : vector<64x1xf32>
    %335 = vector.broadcast %334 : vector<64x1xf32> to vector<64x16xf32>
    %336 = vector.broadcast %308 : vector<1x16xf32> to vector<64x16xf32>
    %337 = arith.mulf %335, %336 : vector<64x16xf32>
    %338 = arith.addf %333, %337 : vector<64x16xf32>
    %339 = vector.shape_cast %296 : vector<1x16xf32> to vector<1x16xf32>
    %340 = vector.broadcast %339 : vector<1x16xf32> to vector<4x16xf32>
    %341 = arith.truncf %340 : vector<4x16xf32> to vector<4x16xbf16>
    %342 = arith.truncf %283 : vector<64x16xf32> to vector<64x16xbf16>
    %cst_289 = arith.constant dense<0.000000e+00> : vector<4x64xf32>
    %343 = tpu.matmul %341, %342, %cst_289 {dimension_numbers = #tpu.dot_dimension_numbers<[1], [1], [0], [0], [0, 0, 1, 0], [], []>} : vector<4x16xbf16>, vector<64x16xbf16>, vector<4x64xf32> -> vector<4x64xf32>
    %344 = arith.addf %343, %267 : vector<4x64xf32>
    %345 = arith.mulf %296, %302 : vector<1x16xf32>
    %cst_290 = arith.constant dense<0.000000e+00> : vector<1xf32>
    %346 = vector.multi_reduction <add>, %345, %cst_290 [1] : vector<1x16xf32> to vector<1xf32>
    %347 = vector.shape_cast %346 : vector<1xf32> to vector<1x1xf32>
    %cst_291 = arith.constant dense<0xFF800000> : vector<4xf32>
    %348 = vector.multi_reduction <maximumf>, %344, %cst_291 [1] : vector<4x64xf32> to vector<4xf32>
    %349 = vector.shape_cast %348 : vector<4xf32> to vector<4x1xf32>
    %350 = vector.broadcast %347 : vector<1x1xf32> to vector<4x1xf32>
    %351 = arith.maximumf %349, %350 : vector<4x1xf32>
    %352 = vector.broadcast %351 : vector<4x1xf32> to vector<4x64xf32>
    %353 = arith.subf %344, %352 : vector<4x64xf32>
    %354 = math.exp %353 : vector<4x64xf32>
    %355 = vector.broadcast %347 : vector<1x1xf32> to vector<4x1xf32>
    %356 = arith.subf %355, %351 : vector<4x1xf32>
    %357 = math.exp %356 : vector<4x1xf32>
    %cst_292 = arith.constant dense<0.000000e+00> : vector<4xf32>
    %358 = vector.multi_reduction <add>, %354, %cst_292 [1] : vector<4x64xf32> to vector<4xf32>
    %359 = vector.shape_cast %358 : vector<4xf32> to vector<4x1xf32>
    %360 = arith.addf %359, %357 : vector<4x1xf32>
    %361 = tpu.reciprocal %360 {approx = true} : vector<4x1xf32> -> vector<4x1xf32>
    %362 = vector.broadcast %361 : vector<4x1xf32> to vector<4x64xf32>
    %363 = arith.mulf %354, %362 : vector<4x64xf32>
    %364 = arith.truncf %290 : vector<64x16xf32> to vector<64x16xbf16>
    %365 = arith.truncf %363 : vector<4x64xf32> to vector<4x64xbf16>
    %cst_293 = arith.constant dense<0.000000e+00> : vector<4x16xf32>
    %366 = tpu.matmul %365, %364, %cst_293 {dimension_numbers = #tpu.dot_dimension_numbers<[1], [0], [0], [1], [0, 0, 1, 1], [], []>} : vector<4x64xbf16>, vector<64x16xbf16>, vector<4x16xf32> -> vector<4x16xf32>
    %367 = arith.mulf %357, %361 : vector<4x1xf32>
    %368 = vector.broadcast %367 : vector<4x1xf32> to vector<4x16xf32>
    %369 = vector.broadcast %308 : vector<1x16xf32> to vector<4x16xf32>
    %370 = arith.mulf %368, %369 : vector<4x16xf32>
    %371 = arith.addf %366, %370 : vector<4x16xf32>
    %cst_294 = arith.constant dense<0.000000e+00> : vector<16xf32>
    %372 = vector.multi_reduction <add>, %371, %cst_294 [0] : vector<4x16xf32> to vector<16xf32>
    %373 = vector.shape_cast %372 : vector<16xf32> to vector<1x16xf32>
    %cst_295 = arith.constant 4.000000e+00 : f32
    %374 = vector.broadcast %cst_295 : f32 to vector<1x16xf32>
    %375 = arith.divf %373, %374 : vector<1x16xf32>
    %c0_296 = arith.constant 0 : index
    %c0_297 = arith.constant 0 : index
    %c0_298 = arith.constant 0 : index
    %c0_299 = arith.constant 0 : index
    %376 = vector.load %arg20[%c0_296, %c0_297, %c0_298, %c0_299] : memref<1x4x16x64xbf16, #tpu.memory_space<vmem>>, vector<1x1x16x64xbf16>
    %377 = vector.shape_cast %376 : vector<1x1x16x64xbf16> to vector<16x64xbf16>
    %378 = arith.truncf %338 : vector<64x16xf32> to vector<64x16xbf16>
    %cst_300 = arith.constant dense<0.000000e+00> : vector<64x64xf32>
    %379 = tpu.matmul %378, %377, %cst_300 {dimension_numbers = #tpu.dot_dimension_numbers<[1], [0], [0], [1], [0, 0, 1, 1], [], []>} : vector<64x16xbf16>, vector<16x64xbf16>, vector<64x64xf32> -> vector<64x64xf32>
    %380 = arith.addf %268, %379 : vector<64x64xf32>
    %c0_301 = arith.constant 0 : index
    %c0_302 = arith.constant 0 : index
    %c0_303 = arith.constant 0 : index
    %c0_304 = arith.constant 0 : index
    %381 = vector.load %arg20[%c0_301, %c0_302, %c0_303, %c0_304] : memref<1x4x16x64xbf16, #tpu.memory_space<vmem>>, vector<1x1x16x64xbf16>
    %382 = vector.shape_cast %381 : vector<1x1x16x64xbf16> to vector<16x64xbf16>
    %383 = arith.truncf %375 : vector<1x16xf32> to vector<1x16xbf16>
    %cst_305 = arith.constant dense<0.000000e+00> : vector<1x64xf32>
    %384 = tpu.matmul %383, %382, %cst_305 {dimension_numbers = #tpu.dot_dimension_numbers<[1], [0], [0], [1], [0, 0, 1, 1], [], []>} : vector<1x16xbf16>, vector<16x64xbf16>, vector<1x64xf32> -> vector<1x64xf32>
    %385 = arith.addf %269, %384 : vector<1x64xf32>
    %c0_306 = arith.constant 0 : index
    %c0_307 = arith.constant 0 : index
    %c1_308 = arith.constant 1 : index
    %c0_309 = arith.constant 0 : index
    %c0_310 = arith.constant 0 : index
    %386 = vector.load %arg18[%c0_306, %c0_307, %c1_308, %c0_309, %c0_310] : memref<1x3x4x64x16xbf16, #tpu.memory_space<vmem>>, vector<1x1x1x64x16xbf16>
    %387 = vector.shape_cast %386 : vector<1x1x1x64x16xbf16> to vector<64x16xbf16>
    %cst_311 = arith.constant dense<0.000000e+00> : vector<64x16xf32>
    %388 = tpu.matmul %264, %387, %cst_311 {dimension_numbers = #tpu.dot_dimension_numbers<[1], [0], [0], [1], [0, 0, 1, 1], [], []>} : vector<64x64xbf16>, vector<64x16xbf16>, vector<64x16xf32> -> vector<64x16xf32>
    %c0_312 = arith.constant 0 : index
    %c0_313 = arith.constant 0 : index
    %c1_314 = arith.constant 1 : index
    %c0_315 = arith.constant 0 : index
    %c0_316 = arith.constant 0 : index
    %389 = vector.load %arg19[%c0_312, %c0_313, %c1_314, %c0_315, %c0_316] : memref<1x3x4x1x16xf32, #tpu.memory_space<vmem>>, vector<1x1x1x1x16xf32>
    %390 = vector.shape_cast %389 : vector<1x1x1x1x16xf32> to vector<1x16xf32>
    %391 = vector.broadcast %390 : vector<1x16xf32> to vector<64x16xf32>
    %392 = arith.addf %388, %391 : vector<64x16xf32>
    %c0_317 = arith.constant 0 : index
    %c1_318 = arith.constant 1 : index
    %c1_319 = arith.constant 1 : index
    %c0_320 = arith.constant 0 : index
    %c0_321 = arith.constant 0 : index
    %393 = vector.load %arg18[%c0_317, %c1_318, %c1_319, %c0_320, %c0_321] : memref<1x3x4x64x16xbf16, #tpu.memory_space<vmem>>, vector<1x1x1x64x16xbf16>
    %394 = vector.shape_cast %393 : vector<1x1x1x64x16xbf16> to vector<64x16xbf16>
    %cst_322 = arith.constant dense<0.000000e+00> : vector<64x16xf32>
    %395 = tpu.matmul %264, %394, %cst_322 {dimension_numbers = #tpu.dot_dimension_numbers<[1], [0], [0], [1], [0, 0, 1, 1], [], []>} : vector<64x64xbf16>, vector<64x16xbf16>, vector<64x16xf32> -> vector<64x16xf32>
    %c0_323 = arith.constant 0 : index
    %c1_324 = arith.constant 1 : index
    %c1_325 = arith.constant 1 : index
    %c0_326 = arith.constant 0 : index
    %c0_327 = arith.constant 0 : index
    %396 = vector.load %arg19[%c0_323, %c1_324, %c1_325, %c0_326, %c0_327] : memref<1x3x4x1x16xf32, #tpu.memory_space<vmem>>, vector<1x1x1x1x16xf32>
    %397 = vector.shape_cast %396 : vector<1x1x1x1x16xf32> to vector<1x16xf32>
    %398 = vector.broadcast %397 : vector<1x16xf32> to vector<64x16xf32>
    %399 = arith.addf %395, %398 : vector<64x16xf32>
    %c0_328 = arith.constant 0 : index
    %c2_329 = arith.constant 2 : index
    %c1_330 = arith.constant 1 : index
    %c0_331 = arith.constant 0 : index
    %c0_332 = arith.constant 0 : index
    %400 = vector.load %arg18[%c0_328, %c2_329, %c1_330, %c0_331, %c0_332] : memref<1x3x4x64x16xbf16, #tpu.memory_space<vmem>>, vector<1x1x1x64x16xbf16>
    %401 = vector.shape_cast %400 : vector<1x1x1x64x16xbf16> to vector<64x16xbf16>
    %cst_333 = arith.constant dense<0.000000e+00> : vector<64x16xf32>
    %402 = tpu.matmul %264, %401, %cst_333 {dimension_numbers = #tpu.dot_dimension_numbers<[1], [0], [0], [1], [0, 0, 1, 1], [], []>} : vector<64x64xbf16>, vector<64x16xbf16>, vector<64x16xf32> -> vector<64x16xf32>
    %c0_334 = arith.constant 0 : index
    %c2_335 = arith.constant 2 : index
    %c1_336 = arith.constant 1 : index
    %c0_337 = arith.constant 0 : index
    %c0_338 = arith.constant 0 : index
    %403 = vector.load %arg19[%c0_334, %c2_335, %c1_336, %c0_337, %c0_338] : memref<1x3x4x1x16xf32, #tpu.memory_space<vmem>>, vector<1x1x1x1x16xf32>
    %404 = vector.shape_cast %403 : vector<1x1x1x1x16xf32> to vector<1x16xf32>
    %405 = vector.broadcast %404 : vector<1x16xf32> to vector<64x16xf32>
    %406 = arith.addf %402, %405 : vector<64x16xf32>
    %c0_339 = arith.constant 0 : index
    %c0_340 = arith.constant 0 : index
    %c1_341 = arith.constant 1 : index
    %c0_342 = arith.constant 0 : index
    %c0_343 = arith.constant 0 : index
    %407 = vector.load %arg18[%c0_339, %c0_340, %c1_341, %c0_342, %c0_343] : memref<1x3x4x64x16xbf16, #tpu.memory_space<vmem>>, vector<1x1x1x64x16xbf16>
    %408 = vector.shape_cast %407 : vector<1x1x1x64x16xbf16> to vector<64x16xbf16>
    %cst_344 = arith.constant dense<0.000000e+00> : vector<1x16xf32>
    %409 = tpu.matmul %265, %408, %cst_344 {dimension_numbers = #tpu.dot_dimension_numbers<[1], [0], [0], [1], [0, 0, 1, 1], [], []>} : vector<1x64xbf16>, vector<64x16xbf16>, vector<1x16xf32> -> vector<1x16xf32>
    %c0_345 = arith.constant 0 : index
    %c0_346 = arith.constant 0 : index
    %c1_347 = arith.constant 1 : index
    %c0_348 = arith.constant 0 : index
    %c0_349 = arith.constant 0 : index
    %410 = vector.load %arg19[%c0_345, %c0_346, %c1_347, %c0_348, %c0_349] : memref<1x3x4x1x16xf32, #tpu.memory_space<vmem>>, vector<1x1x1x1x16xf32>
    %411 = vector.shape_cast %410 : vector<1x1x1x1x16xf32> to vector<1x16xf32>
    %412 = arith.addf %409, %411 : vector<1x16xf32>
    %c0_350 = arith.constant 0 : index
    %c1_351 = arith.constant 1 : index
    %c1_352 = arith.constant 1 : index
    %c0_353 = arith.constant 0 : index
    %c0_354 = arith.constant 0 : index
    %413 = vector.load %arg18[%c0_350, %c1_351, %c1_352, %c0_353, %c0_354] : memref<1x3x4x64x16xbf16, #tpu.memory_space<vmem>>, vector<1x1x1x64x16xbf16>
    %414 = vector.shape_cast %413 : vector<1x1x1x64x16xbf16> to vector<64x16xbf16>
    %cst_355 = arith.constant dense<0.000000e+00> : vector<1x16xf32>
    %415 = tpu.matmul %265, %414, %cst_355 {dimension_numbers = #tpu.dot_dimension_numbers<[1], [0], [0], [1], [0, 0, 1, 1], [], []>} : vector<1x64xbf16>, vector<64x16xbf16>, vector<1x16xf32> -> vector<1x16xf32>
    %c0_356 = arith.constant 0 : index
    %c1_357 = arith.constant 1 : index
    %c1_358 = arith.constant 1 : index
    %c0_359 = arith.constant 0 : index
    %c0_360 = arith.constant 0 : index
    %416 = vector.load %arg19[%c0_356, %c1_357, %c1_358, %c0_359, %c0_360] : memref<1x3x4x1x16xf32, #tpu.memory_space<vmem>>, vector<1x1x1x1x16xf32>
    %417 = vector.shape_cast %416 : vector<1x1x1x1x16xf32> to vector<1x16xf32>
    %418 = arith.addf %415, %417 : vector<1x16xf32>
    %c0_361 = arith.constant 0 : index
    %c2_362 = arith.constant 2 : index
    %c1_363 = arith.constant 1 : index
    %c0_364 = arith.constant 0 : index
    %c0_365 = arith.constant 0 : index
    %419 = vector.load %arg18[%c0_361, %c2_362, %c1_363, %c0_364, %c0_365] : memref<1x3x4x64x16xbf16, #tpu.memory_space<vmem>>, vector<1x1x1x64x16xbf16>
    %420 = vector.shape_cast %419 : vector<1x1x1x64x16xbf16> to vector<64x16xbf16>
    %cst_366 = arith.constant dense<0.000000e+00> : vector<1x16xf32>
    %421 = tpu.matmul %265, %420, %cst_366 {dimension_numbers = #tpu.dot_dimension_numbers<[1], [0], [0], [1], [0, 0, 1, 1], [], []>} : vector<1x64xbf16>, vector<64x16xbf16>, vector<1x16xf32> -> vector<1x16xf32>
    %c0_367 = arith.constant 0 : index
    %c2_368 = arith.constant 2 : index
    %c1_369 = arith.constant 1 : index
    %c0_370 = arith.constant 0 : index
    %c0_371 = arith.constant 0 : index
    %422 = vector.load %arg19[%c0_367, %c2_368, %c1_369, %c0_370, %c0_371] : memref<1x3x4x1x16xf32, #tpu.memory_space<vmem>>, vector<1x1x1x1x16xf32>
    %423 = vector.shape_cast %422 : vector<1x1x1x1x16xf32> to vector<1x16xf32>
    %424 = arith.addf %421, %423 : vector<1x16xf32>
    %425 = arith.truncf %392 : vector<64x16xf32> to vector<64x16xbf16>
    %426 = arith.truncf %399 : vector<64x16xf32> to vector<64x16xbf16>
    %cst_372 = arith.constant dense<0.000000e+00> : vector<64x64xf32>
    %427 = tpu.matmul %425, %426, %cst_372 {dimension_numbers = #tpu.dot_dimension_numbers<[1], [1], [0], [0], [0, 0, 1, 0], [], []>} : vector<64x16xbf16>, vector<64x16xbf16>, vector<64x64xf32> -> vector<64x64xf32>
    %428 = arith.addf %427, %266 : vector<64x64xf32>
    %429 = vector.broadcast %418 : vector<1x16xf32> to vector<64x16xf32>
    %430 = arith.mulf %392, %429 : vector<64x16xf32>
    %cst_373 = arith.constant dense<0.000000e+00> : vector<64xf32>
    %431 = vector.multi_reduction <add>, %430, %cst_373 [1] : vector<64x16xf32> to vector<64xf32>
    %432 = vector.shape_cast %431 : vector<64xf32> to vector<64x1xf32>
    %cst_374 = arith.constant dense<0xFF800000> : vector<64xf32>
    %433 = vector.multi_reduction <maximumf>, %428, %cst_374 [1] : vector<64x64xf32> to vector<64xf32>
    %434 = vector.shape_cast %433 : vector<64xf32> to vector<64x1xf32>
    %435 = arith.maximumf %434, %432 : vector<64x1xf32>
    %436 = vector.broadcast %435 : vector<64x1xf32> to vector<64x64xf32>
    %437 = arith.subf %428, %436 : vector<64x64xf32>
    %438 = math.exp %437 : vector<64x64xf32>
    %439 = arith.subf %432, %435 : vector<64x1xf32>
    %440 = math.exp %439 : vector<64x1xf32>
    %cst_375 = arith.constant dense<0.000000e+00> : vector<64xf32>
    %441 = vector.multi_reduction <add>, %438, %cst_375 [1] : vector<64x64xf32> to vector<64xf32>
    %442 = vector.shape_cast %441 : vector<64xf32> to vector<64x1xf32>
    %443 = arith.addf %442, %440 : vector<64x1xf32>
    %444 = tpu.reciprocal %443 {approx = true} : vector<64x1xf32> -> vector<64x1xf32>
    %445 = vector.broadcast %444 : vector<64x1xf32> to vector<64x64xf32>
    %446 = arith.mulf %438, %445 : vector<64x64xf32>
    %447 = arith.truncf %406 : vector<64x16xf32> to vector<64x16xbf16>
    %448 = arith.truncf %446 : vector<64x64xf32> to vector<64x64xbf16>
    %cst_376 = arith.constant dense<0.000000e+00> : vector<64x16xf32>
    %449 = tpu.matmul %448, %447, %cst_376 {dimension_numbers = #tpu.dot_dimension_numbers<[1], [0], [0], [1], [0, 0, 1, 1], [], []>} : vector<64x64xbf16>, vector<64x16xbf16>, vector<64x16xf32> -> vector<64x16xf32>
    %450 = arith.mulf %440, %444 : vector<64x1xf32>
    %451 = vector.broadcast %450 : vector<64x1xf32> to vector<64x16xf32>
    %452 = vector.broadcast %424 : vector<1x16xf32> to vector<64x16xf32>
    %453 = arith.mulf %451, %452 : vector<64x16xf32>
    %454 = arith.addf %449, %453 : vector<64x16xf32>
    %455 = vector.shape_cast %412 : vector<1x16xf32> to vector<1x16xf32>
    %456 = vector.broadcast %455 : vector<1x16xf32> to vector<4x16xf32>
    %457 = arith.truncf %456 : vector<4x16xf32> to vector<4x16xbf16>
    %458 = arith.truncf %399 : vector<64x16xf32> to vector<64x16xbf16>
    %cst_377 = arith.constant dense<0.000000e+00> : vector<4x64xf32>
    %459 = tpu.matmul %457, %458, %cst_377 {dimension_numbers = #tpu.dot_dimension_numbers<[1], [1], [0], [0], [0, 0, 1, 0], [], []>} : vector<4x16xbf16>, vector<64x16xbf16>, vector<4x64xf32> -> vector<4x64xf32>
    %460 = arith.addf %459, %267 : vector<4x64xf32>
    %461 = arith.mulf %412, %418 : vector<1x16xf32>
    %cst_378 = arith.constant dense<0.000000e+00> : vector<1xf32>
    %462 = vector.multi_reduction <add>, %461, %cst_378 [1] : vector<1x16xf32> to vector<1xf32>
    %463 = vector.shape_cast %462 : vector<1xf32> to vector<1x1xf32>
    %cst_379 = arith.constant dense<0xFF800000> : vector<4xf32>
    %464 = vector.multi_reduction <maximumf>, %460, %cst_379 [1] : vector<4x64xf32> to vector<4xf32>
    %465 = vector.shape_cast %464 : vector<4xf32> to vector<4x1xf32>
    %466 = vector.broadcast %463 : vector<1x1xf32> to vector<4x1xf32>
    %467 = arith.maximumf %465, %466 : vector<4x1xf32>
    %468 = vector.broadcast %467 : vector<4x1xf32> to vector<4x64xf32>
    %469 = arith.subf %460, %468 : vector<4x64xf32>
    %470 = math.exp %469 : vector<4x64xf32>
    %471 = vector.broadcast %463 : vector<1x1xf32> to vector<4x1xf32>
    %472 = arith.subf %471, %467 : vector<4x1xf32>
    %473 = math.exp %472 : vector<4x1xf32>
    %cst_380 = arith.constant dense<0.000000e+00> : vector<4xf32>
    %474 = vector.multi_reduction <add>, %470, %cst_380 [1] : vector<4x64xf32> to vector<4xf32>
    %475 = vector.shape_cast %474 : vector<4xf32> to vector<4x1xf32>
    %476 = arith.addf %475, %473 : vector<4x1xf32>
    %477 = tpu.reciprocal %476 {approx = true} : vector<4x1xf32> -> vector<4x1xf32>
    %478 = vector.broadcast %477 : vector<4x1xf32> to vector<4x64xf32>
    %479 = arith.mulf %470, %478 : vector<4x64xf32>
    %480 = arith.truncf %406 : vector<64x16xf32> to vector<64x16xbf16>
    %481 = arith.truncf %479 : vector<4x64xf32> to vector<4x64xbf16>
    %cst_381 = arith.constant dense<0.000000e+00> : vector<4x16xf32>
    %482 = tpu.matmul %481, %480, %cst_381 {dimension_numbers = #tpu.dot_dimension_numbers<[1], [0], [0], [1], [0, 0, 1, 1], [], []>} : vector<4x64xbf16>, vector<64x16xbf16>, vector<4x16xf32> -> vector<4x16xf32>
    %483 = arith.mulf %473, %477 : vector<4x1xf32>
    %484 = vector.broadcast %483 : vector<4x1xf32> to vector<4x16xf32>
    %485 = vector.broadcast %424 : vector<1x16xf32> to vector<4x16xf32>
    %486 = arith.mulf %484, %485 : vector<4x16xf32>
    %487 = arith.addf %482, %486 : vector<4x16xf32>
    %cst_382 = arith.constant dense<0.000000e+00> : vector<16xf32>
    %488 = vector.multi_reduction <add>, %487, %cst_382 [0] : vector<4x16xf32> to vector<16xf32>
    %489 = vector.shape_cast %488 : vector<16xf32> to vector<1x16xf32>
    %cst_383 = arith.constant 4.000000e+00 : f32
    %490 = vector.broadcast %cst_383 : f32 to vector<1x16xf32>
    %491 = arith.divf %489, %490 : vector<1x16xf32>
    %c0_384 = arith.constant 0 : index
    %c1_385 = arith.constant 1 : index
    %c0_386 = arith.constant 0 : index
    %c0_387 = arith.constant 0 : index
    %492 = vector.load %arg20[%c0_384, %c1_385, %c0_386, %c0_387] : memref<1x4x16x64xbf16, #tpu.memory_space<vmem>>, vector<1x1x16x64xbf16>
    %493 = vector.shape_cast %492 : vector<1x1x16x64xbf16> to vector<16x64xbf16>
    %494 = arith.truncf %454 : vector<64x16xf32> to vector<64x16xbf16>
    %cst_388 = arith.constant dense<0.000000e+00> : vector<64x64xf32>
    %495 = tpu.matmul %494, %493, %cst_388 {dimension_numbers = #tpu.dot_dimension_numbers<[1], [0], [0], [1], [0, 0, 1, 1], [], []>} : vector<64x16xbf16>, vector<16x64xbf16>, vector<64x64xf32> -> vector<64x64xf32>
    %496 = arith.addf %380, %495 : vector<64x64xf32>
    %c0_389 = arith.constant 0 : index
    %c1_390 = arith.constant 1 : index
    %c0_391 = arith.constant 0 : index
    %c0_392 = arith.constant 0 : index
    %497 = vector.load %arg20[%c0_389, %c1_390, %c0_391, %c0_392] : memref<1x4x16x64xbf16, #tpu.memory_space<vmem>>, vector<1x1x16x64xbf16>
    %498 = vector.shape_cast %497 : vector<1x1x16x64xbf16> to vector<16x64xbf16>
    %499 = arith.truncf %491 : vector<1x16xf32> to vector<1x16xbf16>
    %cst_393 = arith.constant dense<0.000000e+00> : vector<1x64xf32>
    %500 = tpu.matmul %499, %498, %cst_393 {dimension_numbers = #tpu.dot_dimension_numbers<[1], [0], [0], [1], [0, 0, 1, 1], [], []>} : vector<1x16xbf16>, vector<16x64xbf16>, vector<1x64xf32> -> vector<1x64xf32>
    %501 = arith.addf %385, %500 : vector<1x64xf32>
    %c0_394 = arith.constant 0 : index
    %c0_395 = arith.constant 0 : index
    %c2_396 = arith.constant 2 : index
    %c0_397 = arith.constant 0 : index
    %c0_398 = arith.constant 0 : index
    %502 = vector.load %arg18[%c0_394, %c0_395, %c2_396, %c0_397, %c0_398] : memref<1x3x4x64x16xbf16, #tpu.memory_space<vmem>>, vector<1x1x1x64x16xbf16>
    %503 = vector.shape_cast %502 : vector<1x1x1x64x16xbf16> to vector<64x16xbf16>
    %cst_399 = arith.constant dense<0.000000e+00> : vector<64x16xf32>
    %504 = tpu.matmul %264, %503, %cst_399 {dimension_numbers = #tpu.dot_dimension_numbers<[1], [0], [0], [1], [0, 0, 1, 1], [], []>} : vector<64x64xbf16>, vector<64x16xbf16>, vector<64x16xf32> -> vector<64x16xf32>
    %c0_400 = arith.constant 0 : index
    %c0_401 = arith.constant 0 : index
    %c2_402 = arith.constant 2 : index
    %c0_403 = arith.constant 0 : index
    %c0_404 = arith.constant 0 : index
    %505 = vector.load %arg19[%c0_400, %c0_401, %c2_402, %c0_403, %c0_404] : memref<1x3x4x1x16xf32, #tpu.memory_space<vmem>>, vector<1x1x1x1x16xf32>
    %506 = vector.shape_cast %505 : vector<1x1x1x1x16xf32> to vector<1x16xf32>
    %507 = vector.broadcast %506 : vector<1x16xf32> to vector<64x16xf32>
    %508 = arith.addf %504, %507 : vector<64x16xf32>
    %c0_405 = arith.constant 0 : index
    %c1_406 = arith.constant 1 : index
    %c2_407 = arith.constant 2 : index
    %c0_408 = arith.constant 0 : index
    %c0_409 = arith.constant 0 : index
    %509 = vector.load %arg18[%c0_405, %c1_406, %c2_407, %c0_408, %c0_409] : memref<1x3x4x64x16xbf16, #tpu.memory_space<vmem>>, vector<1x1x1x64x16xbf16>
    %510 = vector.shape_cast %509 : vector<1x1x1x64x16xbf16> to vector<64x16xbf16>
    %cst_410 = arith.constant dense<0.000000e+00> : vector<64x16xf32>
    %511 = tpu.matmul %264, %510, %cst_410 {dimension_numbers = #tpu.dot_dimension_numbers<[1], [0], [0], [1], [0, 0, 1, 1], [], []>} : vector<64x64xbf16>, vector<64x16xbf16>, vector<64x16xf32> -> vector<64x16xf32>
    %c0_411 = arith.constant 0 : index
    %c1_412 = arith.constant 1 : index
    %c2_413 = arith.constant 2 : index
    %c0_414 = arith.constant 0 : index
    %c0_415 = arith.constant 0 : index
    %512 = vector.load %arg19[%c0_411, %c1_412, %c2_413, %c0_414, %c0_415] : memref<1x3x4x1x16xf32, #tpu.memory_space<vmem>>, vector<1x1x1x1x16xf32>
    %513 = vector.shape_cast %512 : vector<1x1x1x1x16xf32> to vector<1x16xf32>
    %514 = vector.broadcast %513 : vector<1x16xf32> to vector<64x16xf32>
    %515 = arith.addf %511, %514 : vector<64x16xf32>
    %c0_416 = arith.constant 0 : index
    %c2_417 = arith.constant 2 : index
    %c2_418 = arith.constant 2 : index
    %c0_419 = arith.constant 0 : index
    %c0_420 = arith.constant 0 : index
    %516 = vector.load %arg18[%c0_416, %c2_417, %c2_418, %c0_419, %c0_420] : memref<1x3x4x64x16xbf16, #tpu.memory_space<vmem>>, vector<1x1x1x64x16xbf16>
    %517 = vector.shape_cast %516 : vector<1x1x1x64x16xbf16> to vector<64x16xbf16>
    %cst_421 = arith.constant dense<0.000000e+00> : vector<64x16xf32>
    %518 = tpu.matmul %264, %517, %cst_421 {dimension_numbers = #tpu.dot_dimension_numbers<[1], [0], [0], [1], [0, 0, 1, 1], [], []>} : vector<64x64xbf16>, vector<64x16xbf16>, vector<64x16xf32> -> vector<64x16xf32>
    %c0_422 = arith.constant 0 : index
    %c2_423 = arith.constant 2 : index
    %c2_424 = arith.constant 2 : index
    %c0_425 = arith.constant 0 : index
    %c0_426 = arith.constant 0 : index
    %519 = vector.load %arg19[%c0_422, %c2_423, %c2_424, %c0_425, %c0_426] : memref<1x3x4x1x16xf32, #tpu.memory_space<vmem>>, vector<1x1x1x1x16xf32>
    %520 = vector.shape_cast %519 : vector<1x1x1x1x16xf32> to vector<1x16xf32>
    %521 = vector.broadcast %520 : vector<1x16xf32> to vector<64x16xf32>
    %522 = arith.addf %518, %521 : vector<64x16xf32>
    %c0_427 = arith.constant 0 : index
    %c0_428 = arith.constant 0 : index
    %c2_429 = arith.constant 2 : index
    %c0_430 = arith.constant 0 : index
    %c0_431 = arith.constant 0 : index
    %523 = vector.load %arg18[%c0_427, %c0_428, %c2_429, %c0_430, %c0_431] : memref<1x3x4x64x16xbf16, #tpu.memory_space<vmem>>, vector<1x1x1x64x16xbf16>
    %524 = vector.shape_cast %523 : vector<1x1x1x64x16xbf16> to vector<64x16xbf16>
    %cst_432 = arith.constant dense<0.000000e+00> : vector<1x16xf32>
    %525 = tpu.matmul %265, %524, %cst_432 {dimension_numbers = #tpu.dot_dimension_numbers<[1], [0], [0], [1], [0, 0, 1, 1], [], []>} : vector<1x64xbf16>, vector<64x16xbf16>, vector<1x16xf32> -> vector<1x16xf32>
    %c0_433 = arith.constant 0 : index
    %c0_434 = arith.constant 0 : index
    %c2_435 = arith.constant 2 : index
    %c0_436 = arith.constant 0 : index
    %c0_437 = arith.constant 0 : index
    %526 = vector.load %arg19[%c0_433, %c0_434, %c2_435, %c0_436, %c0_437] : memref<1x3x4x1x16xf32, #tpu.memory_space<vmem>>, vector<1x1x1x1x16xf32>
    %527 = vector.shape_cast %526 : vector<1x1x1x1x16xf32> to vector<1x16xf32>
    %528 = arith.addf %525, %527 : vector<1x16xf32>
    %c0_438 = arith.constant 0 : index
    %c1_439 = arith.constant 1 : index
    %c2_440 = arith.constant 2 : index
    %c0_441 = arith.constant 0 : index
    %c0_442 = arith.constant 0 : index
    %529 = vector.load %arg18[%c0_438, %c1_439, %c2_440, %c0_441, %c0_442] : memref<1x3x4x64x16xbf16, #tpu.memory_space<vmem>>, vector<1x1x1x64x16xbf16>
    %530 = vector.shape_cast %529 : vector<1x1x1x64x16xbf16> to vector<64x16xbf16>
    %cst_443 = arith.constant dense<0.000000e+00> : vector<1x16xf32>
    %531 = tpu.matmul %265, %530, %cst_443 {dimension_numbers = #tpu.dot_dimension_numbers<[1], [0], [0], [1], [0, 0, 1, 1], [], []>} : vector<1x64xbf16>, vector<64x16xbf16>, vector<1x16xf32> -> vector<1x16xf32>
    %c0_444 = arith.constant 0 : index
    %c1_445 = arith.constant 1 : index
    %c2_446 = arith.constant 2 : index
    %c0_447 = arith.constant 0 : index
    %c0_448 = arith.constant 0 : index
    %532 = vector.load %arg19[%c0_444, %c1_445, %c2_446, %c0_447, %c0_448] : memref<1x3x4x1x16xf32, #tpu.memory_space<vmem>>, vector<1x1x1x1x16xf32>
    %533 = vector.shape_cast %532 : vector<1x1x1x1x16xf32> to vector<1x16xf32>
    %534 = arith.addf %531, %533 : vector<1x16xf32>
    %c0_449 = arith.constant 0 : index
    %c2_450 = arith.constant 2 : index
    %c2_451 = arith.constant 2 : index
    %c0_452 = arith.constant 0 : index
    %c0_453 = arith.constant 0 : index
    %535 = vector.load %arg18[%c0_449, %c2_450, %c2_451, %c0_452, %c0_453] : memref<1x3x4x64x16xbf16, #tpu.memory_space<vmem>>, vector<1x1x1x64x16xbf16>
    %536 = vector.shape_cast %535 : vector<1x1x1x64x16xbf16> to vector<64x16xbf16>
    %cst_454 = arith.constant dense<0.000000e+00> : vector<1x16xf32>
    %537 = tpu.matmul %265, %536, %cst_454 {dimension_numbers = #tpu.dot_dimension_numbers<[1], [0], [0], [1], [0, 0, 1, 1], [], []>} : vector<1x64xbf16>, vector<64x16xbf16>, vector<1x16xf32> -> vector<1x16xf32>
    %c0_455 = arith.constant 0 : index
    %c2_456 = arith.constant 2 : index
    %c2_457 = arith.constant 2 : index
    %c0_458 = arith.constant 0 : index
    %c0_459 = arith.constant 0 : index
    %538 = vector.load %arg19[%c0_455, %c2_456, %c2_457, %c0_458, %c0_459] : memref<1x3x4x1x16xf32, #tpu.memory_space<vmem>>, vector<1x1x1x1x16xf32>
    %539 = vector.shape_cast %538 : vector<1x1x1x1x16xf32> to vector<1x16xf32>
    %540 = arith.addf %537, %539 : vector<1x16xf32>
    %541 = arith.truncf %508 : vector<64x16xf32> to vector<64x16xbf16>
    %542 = arith.truncf %515 : vector<64x16xf32> to vector<64x16xbf16>
    %cst_460 = arith.constant dense<0.000000e+00> : vector<64x64xf32>
    %543 = tpu.matmul %541, %542, %cst_460 {dimension_numbers = #tpu.dot_dimension_numbers<[1], [1], [0], [0], [0, 0, 1, 0], [], []>} : vector<64x16xbf16>, vector<64x16xbf16>, vector<64x64xf32> -> vector<64x64xf32>
    %544 = arith.addf %543, %266 : vector<64x64xf32>
    %545 = vector.broadcast %534 : vector<1x16xf32> to vector<64x16xf32>
    %546 = arith.mulf %508, %545 : vector<64x16xf32>
    %cst_461 = arith.constant dense<0.000000e+00> : vector<64xf32>
    %547 = vector.multi_reduction <add>, %546, %cst_461 [1] : vector<64x16xf32> to vector<64xf32>
    %548 = vector.shape_cast %547 : vector<64xf32> to vector<64x1xf32>
    %cst_462 = arith.constant dense<0xFF800000> : vector<64xf32>
    %549 = vector.multi_reduction <maximumf>, %544, %cst_462 [1] : vector<64x64xf32> to vector<64xf32>
    %550 = vector.shape_cast %549 : vector<64xf32> to vector<64x1xf32>
    %551 = arith.maximumf %550, %548 : vector<64x1xf32>
    %552 = vector.broadcast %551 : vector<64x1xf32> to vector<64x64xf32>
    %553 = arith.subf %544, %552 : vector<64x64xf32>
    %554 = math.exp %553 : vector<64x64xf32>
    %555 = arith.subf %548, %551 : vector<64x1xf32>
    %556 = math.exp %555 : vector<64x1xf32>
    %cst_463 = arith.constant dense<0.000000e+00> : vector<64xf32>
    %557 = vector.multi_reduction <add>, %554, %cst_463 [1] : vector<64x64xf32> to vector<64xf32>
    %558 = vector.shape_cast %557 : vector<64xf32> to vector<64x1xf32>
    %559 = arith.addf %558, %556 : vector<64x1xf32>
    %560 = tpu.reciprocal %559 {approx = true} : vector<64x1xf32> -> vector<64x1xf32>
    %561 = vector.broadcast %560 : vector<64x1xf32> to vector<64x64xf32>
    %562 = arith.mulf %554, %561 : vector<64x64xf32>
    %563 = arith.truncf %522 : vector<64x16xf32> to vector<64x16xbf16>
    %564 = arith.truncf %562 : vector<64x64xf32> to vector<64x64xbf16>
    %cst_464 = arith.constant dense<0.000000e+00> : vector<64x16xf32>
    %565 = tpu.matmul %564, %563, %cst_464 {dimension_numbers = #tpu.dot_dimension_numbers<[1], [0], [0], [1], [0, 0, 1, 1], [], []>} : vector<64x64xbf16>, vector<64x16xbf16>, vector<64x16xf32> -> vector<64x16xf32>
    %566 = arith.mulf %556, %560 : vector<64x1xf32>
    %567 = vector.broadcast %566 : vector<64x1xf32> to vector<64x16xf32>
    %568 = vector.broadcast %540 : vector<1x16xf32> to vector<64x16xf32>
    %569 = arith.mulf %567, %568 : vector<64x16xf32>
    %570 = arith.addf %565, %569 : vector<64x16xf32>
    %571 = vector.shape_cast %528 : vector<1x16xf32> to vector<1x16xf32>
    %572 = vector.broadcast %571 : vector<1x16xf32> to vector<4x16xf32>
    %573 = arith.truncf %572 : vector<4x16xf32> to vector<4x16xbf16>
    %574 = arith.truncf %515 : vector<64x16xf32> to vector<64x16xbf16>
    %cst_465 = arith.constant dense<0.000000e+00> : vector<4x64xf32>
    %575 = tpu.matmul %573, %574, %cst_465 {dimension_numbers = #tpu.dot_dimension_numbers<[1], [1], [0], [0], [0, 0, 1, 0], [], []>} : vector<4x16xbf16>, vector<64x16xbf16>, vector<4x64xf32> -> vector<4x64xf32>
    %576 = arith.addf %575, %267 : vector<4x64xf32>
    %577 = arith.mulf %528, %534 : vector<1x16xf32>
    %cst_466 = arith.constant dense<0.000000e+00> : vector<1xf32>
    %578 = vector.multi_reduction <add>, %577, %cst_466 [1] : vector<1x16xf32> to vector<1xf32>
    %579 = vector.shape_cast %578 : vector<1xf32> to vector<1x1xf32>
    %cst_467 = arith.constant dense<0xFF800000> : vector<4xf32>
    %580 = vector.multi_reduction <maximumf>, %576, %cst_467 [1] : vector<4x64xf32> to vector<4xf32>
    %581 = vector.shape_cast %580 : vector<4xf32> to vector<4x1xf32>
    %582 = vector.broadcast %579 : vector<1x1xf32> to vector<4x1xf32>
    %583 = arith.maximumf %581, %582 : vector<4x1xf32>
    %584 = vector.broadcast %583 : vector<4x1xf32> to vector<4x64xf32>
    %585 = arith.subf %576, %584 : vector<4x64xf32>
    %586 = math.exp %585 : vector<4x64xf32>
    %587 = vector.broadcast %579 : vector<1x1xf32> to vector<4x1xf32>
    %588 = arith.subf %587, %583 : vector<4x1xf32>
    %589 = math.exp %588 : vector<4x1xf32>
    %cst_468 = arith.constant dense<0.000000e+00> : vector<4xf32>
    %590 = vector.multi_reduction <add>, %586, %cst_468 [1] : vector<4x64xf32> to vector<4xf32>
    %591 = vector.shape_cast %590 : vector<4xf32> to vector<4x1xf32>
    %592 = arith.addf %591, %589 : vector<4x1xf32>
    %593 = tpu.reciprocal %592 {approx = true} : vector<4x1xf32> -> vector<4x1xf32>
    %594 = vector.broadcast %593 : vector<4x1xf32> to vector<4x64xf32>
    %595 = arith.mulf %586, %594 : vector<4x64xf32>
    %596 = arith.truncf %522 : vector<64x16xf32> to vector<64x16xbf16>
    %597 = arith.truncf %595 : vector<4x64xf32> to vector<4x64xbf16>
    %cst_469 = arith.constant dense<0.000000e+00> : vector<4x16xf32>
    %598 = tpu.matmul %597, %596, %cst_469 {dimension_numbers = #tpu.dot_dimension_numbers<[1], [0], [0], [1], [0, 0, 1, 1], [], []>} : vector<4x64xbf16>, vector<64x16xbf16>, vector<4x16xf32> -> vector<4x16xf32>
    %599 = arith.mulf %589, %593 : vector<4x1xf32>
    %600 = vector.broadcast %599 : vector<4x1xf32> to vector<4x16xf32>
    %601 = vector.broadcast %540 : vector<1x16xf32> to vector<4x16xf32>
    %602 = arith.mulf %600, %601 : vector<4x16xf32>
    %603 = arith.addf %598, %602 : vector<4x16xf32>
    %cst_470 = arith.constant dense<0.000000e+00> : vector<16xf32>
    %604 = vector.multi_reduction <add>, %603, %cst_470 [0] : vector<4x16xf32> to vector<16xf32>
    %605 = vector.shape_cast %604 : vector<16xf32> to vector<1x16xf32>
    %cst_471 = arith.constant 4.000000e+00 : f32
    %606 = vector.broadcast %cst_471 : f32 to vector<1x16xf32>
    %607 = arith.divf %605, %606 : vector<1x16xf32>
    %c0_472 = arith.constant 0 : index
    %c2_473 = arith.constant 2 : index
    %c0_474 = arith.constant 0 : index
    %c0_475 = arith.constant 0 : index
    %608 = vector.load %arg20[%c0_472, %c2_473, %c0_474, %c0_475] : memref<1x4x16x64xbf16, #tpu.memory_space<vmem>>, vector<1x1x16x64xbf16>
    %609 = vector.shape_cast %608 : vector<1x1x16x64xbf16> to vector<16x64xbf16>
    %610 = arith.truncf %570 : vector<64x16xf32> to vector<64x16xbf16>
    %cst_476 = arith.constant dense<0.000000e+00> : vector<64x64xf32>
    %611 = tpu.matmul %610, %609, %cst_476 {dimension_numbers = #tpu.dot_dimension_numbers<[1], [0], [0], [1], [0, 0, 1, 1], [], []>} : vector<64x16xbf16>, vector<16x64xbf16>, vector<64x64xf32> -> vector<64x64xf32>
    %612 = arith.addf %496, %611 : vector<64x64xf32>
    %c0_477 = arith.constant 0 : index
    %c2_478 = arith.constant 2 : index
    %c0_479 = arith.constant 0 : index
    %c0_480 = arith.constant 0 : index
    %613 = vector.load %arg20[%c0_477, %c2_478, %c0_479, %c0_480] : memref<1x4x16x64xbf16, #tpu.memory_space<vmem>>, vector<1x1x16x64xbf16>
    %614 = vector.shape_cast %613 : vector<1x1x16x64xbf16> to vector<16x64xbf16>
    %615 = arith.truncf %607 : vector<1x16xf32> to vector<1x16xbf16>
    %cst_481 = arith.constant dense<0.000000e+00> : vector<1x64xf32>
    %616 = tpu.matmul %615, %614, %cst_481 {dimension_numbers = #tpu.dot_dimension_numbers<[1], [0], [0], [1], [0, 0, 1, 1], [], []>} : vector<1x16xbf16>, vector<16x64xbf16>, vector<1x64xf32> -> vector<1x64xf32>
    %617 = arith.addf %501, %616 : vector<1x64xf32>
    %c0_482 = arith.constant 0 : index
    %c0_483 = arith.constant 0 : index
    %c3_484 = arith.constant 3 : index
    %c0_485 = arith.constant 0 : index
    %c0_486 = arith.constant 0 : index
    %618 = vector.load %arg18[%c0_482, %c0_483, %c3_484, %c0_485, %c0_486] : memref<1x3x4x64x16xbf16, #tpu.memory_space<vmem>>, vector<1x1x1x64x16xbf16>
    %619 = vector.shape_cast %618 : vector<1x1x1x64x16xbf16> to vector<64x16xbf16>
    %cst_487 = arith.constant dense<0.000000e+00> : vector<64x16xf32>
    %620 = tpu.matmul %264, %619, %cst_487 {dimension_numbers = #tpu.dot_dimension_numbers<[1], [0], [0], [1], [0, 0, 1, 1], [], []>} : vector<64x64xbf16>, vector<64x16xbf16>, vector<64x16xf32> -> vector<64x16xf32>
    %c0_488 = arith.constant 0 : index
    %c0_489 = arith.constant 0 : index
    %c3_490 = arith.constant 3 : index
    %c0_491 = arith.constant 0 : index
    %c0_492 = arith.constant 0 : index
    %621 = vector.load %arg19[%c0_488, %c0_489, %c3_490, %c0_491, %c0_492] : memref<1x3x4x1x16xf32, #tpu.memory_space<vmem>>, vector<1x1x1x1x16xf32>
    %622 = vector.shape_cast %621 : vector<1x1x1x1x16xf32> to vector<1x16xf32>
    %623 = vector.broadcast %622 : vector<1x16xf32> to vector<64x16xf32>
    %624 = arith.addf %620, %623 : vector<64x16xf32>
    %c0_493 = arith.constant 0 : index
    %c1_494 = arith.constant 1 : index
    %c3_495 = arith.constant 3 : index
    %c0_496 = arith.constant 0 : index
    %c0_497 = arith.constant 0 : index
    %625 = vector.load %arg18[%c0_493, %c1_494, %c3_495, %c0_496, %c0_497] : memref<1x3x4x64x16xbf16, #tpu.memory_space<vmem>>, vector<1x1x1x64x16xbf16>
    %626 = vector.shape_cast %625 : vector<1x1x1x64x16xbf16> to vector<64x16xbf16>
    %cst_498 = arith.constant dense<0.000000e+00> : vector<64x16xf32>
    %627 = tpu.matmul %264, %626, %cst_498 {dimension_numbers = #tpu.dot_dimension_numbers<[1], [0], [0], [1], [0, 0, 1, 1], [], []>} : vector<64x64xbf16>, vector<64x16xbf16>, vector<64x16xf32> -> vector<64x16xf32>
    %c0_499 = arith.constant 0 : index
    %c1_500 = arith.constant 1 : index
    %c3_501 = arith.constant 3 : index
    %c0_502 = arith.constant 0 : index
    %c0_503 = arith.constant 0 : index
    %628 = vector.load %arg19[%c0_499, %c1_500, %c3_501, %c0_502, %c0_503] : memref<1x3x4x1x16xf32, #tpu.memory_space<vmem>>, vector<1x1x1x1x16xf32>
    %629 = vector.shape_cast %628 : vector<1x1x1x1x16xf32> to vector<1x16xf32>
    %630 = vector.broadcast %629 : vector<1x16xf32> to vector<64x16xf32>
    %631 = arith.addf %627, %630 : vector<64x16xf32>
    %c0_504 = arith.constant 0 : index
    %c2_505 = arith.constant 2 : index
    %c3_506 = arith.constant 3 : index
    %c0_507 = arith.constant 0 : index
    %c0_508 = arith.constant 0 : index
    %632 = vector.load %arg18[%c0_504, %c2_505, %c3_506, %c0_507, %c0_508] : memref<1x3x4x64x16xbf16, #tpu.memory_space<vmem>>, vector<1x1x1x64x16xbf16>
    %633 = vector.shape_cast %632 : vector<1x1x1x64x16xbf16> to vector<64x16xbf16>
    %cst_509 = arith.constant dense<0.000000e+00> : vector<64x16xf32>
    %634 = tpu.matmul %264, %633, %cst_509 {dimension_numbers = #tpu.dot_dimension_numbers<[1], [0], [0], [1], [0, 0, 1, 1], [], []>} : vector<64x64xbf16>, vector<64x16xbf16>, vector<64x16xf32> -> vector<64x16xf32>
    %c0_510 = arith.constant 0 : index
    %c2_511 = arith.constant 2 : index
    %c3_512 = arith.constant 3 : index
    %c0_513 = arith.constant 0 : index
    %c0_514 = arith.constant 0 : index
    %635 = vector.load %arg19[%c0_510, %c2_511, %c3_512, %c0_513, %c0_514] : memref<1x3x4x1x16xf32, #tpu.memory_space<vmem>>, vector<1x1x1x1x16xf32>
    %636 = vector.shape_cast %635 : vector<1x1x1x1x16xf32> to vector<1x16xf32>
    %637 = vector.broadcast %636 : vector<1x16xf32> to vector<64x16xf32>
    %638 = arith.addf %634, %637 : vector<64x16xf32>
    %c0_515 = arith.constant 0 : index
    %c0_516 = arith.constant 0 : index
    %c3_517 = arith.constant 3 : index
    %c0_518 = arith.constant 0 : index
    %c0_519 = arith.constant 0 : index
    %639 = vector.load %arg18[%c0_515, %c0_516, %c3_517, %c0_518, %c0_519] : memref<1x3x4x64x16xbf16, #tpu.memory_space<vmem>>, vector<1x1x1x64x16xbf16>
    %640 = vector.shape_cast %639 : vector<1x1x1x64x16xbf16> to vector<64x16xbf16>
    %cst_520 = arith.constant dense<0.000000e+00> : vector<1x16xf32>
    %641 = tpu.matmul %265, %640, %cst_520 {dimension_numbers = #tpu.dot_dimension_numbers<[1], [0], [0], [1], [0, 0, 1, 1], [], []>} : vector<1x64xbf16>, vector<64x16xbf16>, vector<1x16xf32> -> vector<1x16xf32>
    %c0_521 = arith.constant 0 : index
    %c0_522 = arith.constant 0 : index
    %c3_523 = arith.constant 3 : index
    %c0_524 = arith.constant 0 : index
    %c0_525 = arith.constant 0 : index
    %642 = vector.load %arg19[%c0_521, %c0_522, %c3_523, %c0_524, %c0_525] : memref<1x3x4x1x16xf32, #tpu.memory_space<vmem>>, vector<1x1x1x1x16xf32>
    %643 = vector.shape_cast %642 : vector<1x1x1x1x16xf32> to vector<1x16xf32>
    %644 = arith.addf %641, %643 : vector<1x16xf32>
    %c0_526 = arith.constant 0 : index
    %c1_527 = arith.constant 1 : index
    %c3_528 = arith.constant 3 : index
    %c0_529 = arith.constant 0 : index
    %c0_530 = arith.constant 0 : index
    %645 = vector.load %arg18[%c0_526, %c1_527, %c3_528, %c0_529, %c0_530] : memref<1x3x4x64x16xbf16, #tpu.memory_space<vmem>>, vector<1x1x1x64x16xbf16>
    %646 = vector.shape_cast %645 : vector<1x1x1x64x16xbf16> to vector<64x16xbf16>
    %cst_531 = arith.constant dense<0.000000e+00> : vector<1x16xf32>
    %647 = tpu.matmul %265, %646, %cst_531 {dimension_numbers = #tpu.dot_dimension_numbers<[1], [0], [0], [1], [0, 0, 1, 1], [], []>} : vector<1x64xbf16>, vector<64x16xbf16>, vector<1x16xf32> -> vector<1x16xf32>
    %c0_532 = arith.constant 0 : index
    %c1_533 = arith.constant 1 : index
    %c3_534 = arith.constant 3 : index
    %c0_535 = arith.constant 0 : index
    %c0_536 = arith.constant 0 : index
    %648 = vector.load %arg19[%c0_532, %c1_533, %c3_534, %c0_535, %c0_536] : memref<1x3x4x1x16xf32, #tpu.memory_space<vmem>>, vector<1x1x1x1x16xf32>
    %649 = vector.shape_cast %648 : vector<1x1x1x1x16xf32> to vector<1x16xf32>
    %650 = arith.addf %647, %649 : vector<1x16xf32>
    %c0_537 = arith.constant 0 : index
    %c2_538 = arith.constant 2 : index
    %c3_539 = arith.constant 3 : index
    %c0_540 = arith.constant 0 : index
    %c0_541 = arith.constant 0 : index
    %651 = vector.load %arg18[%c0_537, %c2_538, %c3_539, %c0_540, %c0_541] : memref<1x3x4x64x16xbf16, #tpu.memory_space<vmem>>, vector<1x1x1x64x16xbf16>
    %652 = vector.shape_cast %651 : vector<1x1x1x64x16xbf16> to vector<64x16xbf16>
    %cst_542 = arith.constant dense<0.000000e+00> : vector<1x16xf32>
    %653 = tpu.matmul %265, %652, %cst_542 {dimension_numbers = #tpu.dot_dimension_numbers<[1], [0], [0], [1], [0, 0, 1, 1], [], []>} : vector<1x64xbf16>, vector<64x16xbf16>, vector<1x16xf32> -> vector<1x16xf32>
    %c0_543 = arith.constant 0 : index
    %c2_544 = arith.constant 2 : index
    %c3_545 = arith.constant 3 : index
    %c0_546 = arith.constant 0 : index
    %c0_547 = arith.constant 0 : index
    %654 = vector.load %arg19[%c0_543, %c2_544, %c3_545, %c0_546, %c0_547] : memref<1x3x4x1x16xf32, #tpu.memory_space<vmem>>, vector<1x1x1x1x16xf32>
    %655 = vector.shape_cast %654 : vector<1x1x1x1x16xf32> to vector<1x16xf32>
    %656 = arith.addf %653, %655 : vector<1x16xf32>
    %657 = arith.truncf %624 : vector<64x16xf32> to vector<64x16xbf16>
    %658 = arith.truncf %631 : vector<64x16xf32> to vector<64x16xbf16>
    %cst_548 = arith.constant dense<0.000000e+00> : vector<64x64xf32>
    %659 = tpu.matmul %657, %658, %cst_548 {dimension_numbers = #tpu.dot_dimension_numbers<[1], [1], [0], [0], [0, 0, 1, 0], [], []>} : vector<64x16xbf16>, vector<64x16xbf16>, vector<64x64xf32> -> vector<64x64xf32>
    %660 = arith.addf %659, %266 : vector<64x64xf32>
    %661 = vector.broadcast %650 : vector<1x16xf32> to vector<64x16xf32>
    %662 = arith.mulf %624, %661 : vector<64x16xf32>
    %cst_549 = arith.constant dense<0.000000e+00> : vector<64xf32>
    %663 = vector.multi_reduction <add>, %662, %cst_549 [1] : vector<64x16xf32> to vector<64xf32>
    %664 = vector.shape_cast %663 : vector<64xf32> to vector<64x1xf32>
    %cst_550 = arith.constant dense<0xFF800000> : vector<64xf32>
    %665 = vector.multi_reduction <maximumf>, %660, %cst_550 [1] : vector<64x64xf32> to vector<64xf32>
    %666 = vector.shape_cast %665 : vector<64xf32> to vector<64x1xf32>
    %667 = arith.maximumf %666, %664 : vector<64x1xf32>
    %668 = vector.broadcast %667 : vector<64x1xf32> to vector<64x64xf32>
    %669 = arith.subf %660, %668 : vector<64x64xf32>
    %670 = math.exp %669 : vector<64x64xf32>
    %671 = arith.subf %664, %667 : vector<64x1xf32>
    %672 = math.exp %671 : vector<64x1xf32>
    %cst_551 = arith.constant dense<0.000000e+00> : vector<64xf32>
    %673 = vector.multi_reduction <add>, %670, %cst_551 [1] : vector<64x64xf32> to vector<64xf32>
    %674 = vector.shape_cast %673 : vector<64xf32> to vector<64x1xf32>
    %675 = arith.addf %674, %672 : vector<64x1xf32>
    %676 = tpu.reciprocal %675 {approx = true} : vector<64x1xf32> -> vector<64x1xf32>
    %677 = vector.broadcast %676 : vector<64x1xf32> to vector<64x64xf32>
    %678 = arith.mulf %670, %677 : vector<64x64xf32>
    %679 = arith.truncf %638 : vector<64x16xf32> to vector<64x16xbf16>
    %680 = arith.truncf %678 : vector<64x64xf32> to vector<64x64xbf16>
    %cst_552 = arith.constant dense<0.000000e+00> : vector<64x16xf32>
    %681 = tpu.matmul %680, %679, %cst_552 {dimension_numbers = #tpu.dot_dimension_numbers<[1], [0], [0], [1], [0, 0, 1, 1], [], []>} : vector<64x64xbf16>, vector<64x16xbf16>, vector<64x16xf32> -> vector<64x16xf32>
    %682 = arith.mulf %672, %676 : vector<64x1xf32>
    %683 = vector.broadcast %682 : vector<64x1xf32> to vector<64x16xf32>
    %684 = vector.broadcast %656 : vector<1x16xf32> to vector<64x16xf32>
    %685 = arith.mulf %683, %684 : vector<64x16xf32>
    %686 = arith.addf %681, %685 : vector<64x16xf32>
    %687 = vector.shape_cast %644 : vector<1x16xf32> to vector<1x16xf32>
    %688 = vector.broadcast %687 : vector<1x16xf32> to vector<4x16xf32>
    %689 = arith.truncf %688 : vector<4x16xf32> to vector<4x16xbf16>
    %690 = arith.truncf %631 : vector<64x16xf32> to vector<64x16xbf16>
    %cst_553 = arith.constant dense<0.000000e+00> : vector<4x64xf32>
    %691 = tpu.matmul %689, %690, %cst_553 {dimension_numbers = #tpu.dot_dimension_numbers<[1], [1], [0], [0], [0, 0, 1, 0], [], []>} : vector<4x16xbf16>, vector<64x16xbf16>, vector<4x64xf32> -> vector<4x64xf32>
    %692 = arith.addf %691, %267 : vector<4x64xf32>
    %693 = arith.mulf %644, %650 : vector<1x16xf32>
    %cst_554 = arith.constant dense<0.000000e+00> : vector<1xf32>
    %694 = vector.multi_reduction <add>, %693, %cst_554 [1] : vector<1x16xf32> to vector<1xf32>
    %695 = vector.shape_cast %694 : vector<1xf32> to vector<1x1xf32>
    %cst_555 = arith.constant dense<0xFF800000> : vector<4xf32>
    %696 = vector.multi_reduction <maximumf>, %692, %cst_555 [1] : vector<4x64xf32> to vector<4xf32>
    %697 = vector.shape_cast %696 : vector<4xf32> to vector<4x1xf32>
    %698 = vector.broadcast %695 : vector<1x1xf32> to vector<4x1xf32>
    %699 = arith.maximumf %697, %698 : vector<4x1xf32>
    %700 = vector.broadcast %699 : vector<4x1xf32> to vector<4x64xf32>
    %701 = arith.subf %692, %700 : vector<4x64xf32>
    %702 = math.exp %701 : vector<4x64xf32>
    %703 = vector.broadcast %695 : vector<1x1xf32> to vector<4x1xf32>
    %704 = arith.subf %703, %699 : vector<4x1xf32>
    %705 = math.exp %704 : vector<4x1xf32>
    %cst_556 = arith.constant dense<0.000000e+00> : vector<4xf32>
    %706 = vector.multi_reduction <add>, %702, %cst_556 [1] : vector<4x64xf32> to vector<4xf32>
    %707 = vector.shape_cast %706 : vector<4xf32> to vector<4x1xf32>
    %708 = arith.addf %707, %705 : vector<4x1xf32>
    %709 = tpu.reciprocal %708 {approx = true} : vector<4x1xf32> -> vector<4x1xf32>
    %710 = vector.broadcast %709 : vector<4x1xf32> to vector<4x64xf32>
    %711 = arith.mulf %702, %710 : vector<4x64xf32>
    %712 = arith.truncf %638 : vector<64x16xf32> to vector<64x16xbf16>
    %713 = arith.truncf %711 : vector<4x64xf32> to vector<4x64xbf16>
    %cst_557 = arith.constant dense<0.000000e+00> : vector<4x16xf32>
    %714 = tpu.matmul %713, %712, %cst_557 {dimension_numbers = #tpu.dot_dimension_numbers<[1], [0], [0], [1], [0, 0, 1, 1], [], []>} : vector<4x64xbf16>, vector<64x16xbf16>, vector<4x16xf32> -> vector<4x16xf32>
    %715 = arith.mulf %705, %709 : vector<4x1xf32>
    %716 = vector.broadcast %715 : vector<4x1xf32> to vector<4x16xf32>
    %717 = vector.broadcast %656 : vector<1x16xf32> to vector<4x16xf32>
    %718 = arith.mulf %716, %717 : vector<4x16xf32>
    %719 = arith.addf %714, %718 : vector<4x16xf32>
    %cst_558 = arith.constant dense<0.000000e+00> : vector<16xf32>
    %720 = vector.multi_reduction <add>, %719, %cst_558 [0] : vector<4x16xf32> to vector<16xf32>
    %721 = vector.shape_cast %720 : vector<16xf32> to vector<1x16xf32>
    %cst_559 = arith.constant 4.000000e+00 : f32
    %722 = vector.broadcast %cst_559 : f32 to vector<1x16xf32>
    %723 = arith.divf %721, %722 : vector<1x16xf32>
    %c0_560 = arith.constant 0 : index
    %c3_561 = arith.constant 3 : index
    %c0_562 = arith.constant 0 : index
    %c0_563 = arith.constant 0 : index
    %724 = vector.load %arg20[%c0_560, %c3_561, %c0_562, %c0_563] : memref<1x4x16x64xbf16, #tpu.memory_space<vmem>>, vector<1x1x16x64xbf16>
    %725 = vector.shape_cast %724 : vector<1x1x16x64xbf16> to vector<16x64xbf16>
    %726 = arith.truncf %686 : vector<64x16xf32> to vector<64x16xbf16>
    %cst_564 = arith.constant dense<0.000000e+00> : vector<64x64xf32>
    %727 = tpu.matmul %726, %725, %cst_564 {dimension_numbers = #tpu.dot_dimension_numbers<[1], [0], [0], [1], [0, 0, 1, 1], [], []>} : vector<64x16xbf16>, vector<16x64xbf16>, vector<64x64xf32> -> vector<64x64xf32>
    %728 = arith.addf %612, %727 : vector<64x64xf32>
    %c0_565 = arith.constant 0 : index
    %c3_566 = arith.constant 3 : index
    %c0_567 = arith.constant 0 : index
    %c0_568 = arith.constant 0 : index
    %729 = vector.load %arg20[%c0_565, %c3_566, %c0_567, %c0_568] : memref<1x4x16x64xbf16, #tpu.memory_space<vmem>>, vector<1x1x16x64xbf16>
    %730 = vector.shape_cast %729 : vector<1x1x16x64xbf16> to vector<16x64xbf16>
    %731 = arith.truncf %723 : vector<1x16xf32> to vector<1x16xbf16>
    %cst_569 = arith.constant dense<0.000000e+00> : vector<1x64xf32>
    %732 = tpu.matmul %731, %730, %cst_569 {dimension_numbers = #tpu.dot_dimension_numbers<[1], [0], [0], [1], [0, 0, 1, 1], [], []>} : vector<1x16xbf16>, vector<16x64xbf16>, vector<1x64xf32> -> vector<1x64xf32>
    %733 = arith.addf %617, %732 : vector<1x64xf32>
    %734 = arith.addf %217, %728 : vector<64x64xf32>
    %c0_570 = arith.constant 0 : index
    %c0_571 = arith.constant 0 : index
    %c0_572 = arith.constant 0 : index
    %735 = vector.load %arg21[%c0_570, %c0_571, %c0_572] : memref<1x1x64xf32, #tpu.memory_space<vmem>>, vector<1x1x64xf32>
    %736 = vector.shape_cast %735 : vector<1x1x64xf32> to vector<1x64xf32>
    %737 = vector.broadcast %736 : vector<1x64xf32> to vector<64x64xf32>
    %738 = arith.addf %734, %737 : vector<64x64xf32>
    %739 = arith.addf %5, %733 : vector<1x64xf32>
    %c0_573 = arith.constant 0 : index
    %c0_574 = arith.constant 0 : index
    %c0_575 = arith.constant 0 : index
    %740 = vector.load %arg21[%c0_573, %c0_574, %c0_575] : memref<1x1x64xf32, #tpu.memory_space<vmem>>, vector<1x1x64xf32>
    %741 = vector.shape_cast %740 : vector<1x1x64xf32> to vector<1x64xf32>
    %742 = arith.addf %739, %741 : vector<1x64xf32>
    %c0_576 = arith.constant 0 : index
    %c0_577 = arith.constant 0 : index
    %743 = vector.load %arg33[%c0_576, %c0_577] : memref<72x64xf32, #tpu.memory_space<vmem>>, vector<64x64xf32>
    tpu.vector_store %arg33[%c0_576, %c0_577], %738 {strides = array<i32>} : memref<72x64xf32, #tpu.memory_space<vmem>>, vector<64x64xf32>,
    %c64 = arith.constant 64 : index
    %c0_578 = arith.constant 0 : index
    %744 = vector.load %arg33[%c64, %c0_578] : memref<72x64xf32, #tpu.memory_space<vmem>>, vector<1x64xf32>
    tpu.vector_store %arg33[%c64, %c0_578], %742 {strides = array<i32>} : memref<72x64xf32, #tpu.memory_space<vmem>>, vector<1x64xf32>,
    %c0_579 = arith.constant 0 : index
    %c0_580 = arith.constant 0 : index
    %745 = vector.load %arg33[%c0_579, %c0_580] : memref<72x64xf32, #tpu.memory_space<vmem>>, vector<72x64xf32>
    %c0_581 = arith.constant 0 : index
    %c0_582 = arith.constant 0 : index
    %c0_583 = arith.constant 0 : index
    %746 = vector.load %arg22[%c0_581, %c0_582, %c0_583] : memref<1x1x64xf32, #tpu.memory_space<vmem>>, vector<1x1x64xf32>
    %747 = vector.shape_cast %746 : vector<1x1x64xf32> to vector<1x64xf32>
    %c0_584 = arith.constant 0 : index
    %c0_585 = arith.constant 0 : index
    %c0_586 = arith.constant 0 : index
    %748 = vector.load %arg23[%c0_584, %c0_585, %c0_586] : memref<1x1x64xf32, #tpu.memory_space<vmem>>, vector<1x1x64xf32>
    %749 = vector.shape_cast %748 : vector<1x1x64xf32> to vector<1x64xf32>
    %cst_587 = arith.constant dense<0.000000e+00> : vector<72xf32>
    %750 = vector.multi_reduction <add>, %745, %cst_587 [1] : vector<72x64xf32> to vector<72xf32>
    %751 = vector.shape_cast %750 : vector<72xf32> to vector<72x1xf32>
    %cst_588 = arith.constant 6.400000e+01 : f32
    %752 = vector.broadcast %cst_588 : f32 to vector<72x1xf32>
    %753 = arith.divf %751, %752 : vector<72x1xf32>
    %754 = vector.broadcast %753 : vector<72x1xf32> to vector<72x64xf32>
    %755 = arith.subf %745, %754 : vector<72x64xf32>
    %756 = arith.mulf %755, %755 : vector<72x64xf32>
    %cst_589 = arith.constant dense<0.000000e+00> : vector<72xf32>
    %757 = vector.multi_reduction <add>, %756, %cst_589 [1] : vector<72x64xf32> to vector<72xf32>
    %758 = vector.shape_cast %757 : vector<72xf32> to vector<72x1xf32>
    %cst_590 = arith.constant 6.400000e+01 : f32
    %759 = vector.broadcast %cst_590 : f32 to vector<72x1xf32>
    %760 = arith.divf %758, %759 : vector<72x1xf32>
    %cst_591 = arith.constant 9.99999997E-7 : f32
    %761 = vector.broadcast %cst_591 : f32 to vector<72x1xf32>
    %762 = arith.addf %760, %761 : vector<72x1xf32>
    %763 = math.rsqrt %762 : vector<72x1xf32>
    %764 = vector.broadcast %763 : vector<72x1xf32> to vector<72x64xf32>
    %765 = arith.mulf %755, %764 : vector<72x64xf32>
    %766 = vector.broadcast %747 : vector<1x64xf32> to vector<72x64xf32>
    %767 = arith.mulf %765, %766 : vector<72x64xf32>
    %768 = vector.broadcast %749 : vector<1x64xf32> to vector<72x64xf32>
    %769 = arith.addf %767, %768 : vector<72x64xf32>
    %c0_592 = arith.constant 0 : index
    %c0_593 = arith.constant 0 : index
    %c0_594 = arith.constant 0 : index
    %770 = vector.load %arg24[%c0_592, %c0_593, %c0_594] : memref<1x64x256xbf16, #tpu.memory_space<vmem>>, vector<1x64x256xbf16>
    %771 = vector.shape_cast %770 : vector<1x64x256xbf16> to vector<64x256xbf16>
    %772 = arith.truncf %769 : vector<72x64xf32> to vector<72x64xbf16>
    %cst_595 = arith.constant dense<0.000000e+00> : vector<72x256xf32>
    %773 = tpu.matmul %772, %771, %cst_595 {dimension_numbers = #tpu.dot_dimension_numbers<[1], [0], [0], [1], [0, 0, 1, 1], [], []>} : vector<72x64xbf16>, vector<64x256xbf16>, vector<72x256xf32> -> vector<72x256xf32>
    %c0_596 = arith.constant 0 : index
    %c0_597 = arith.constant 0 : index
    %c0_598 = arith.constant 0 : index
    %774 = vector.load %arg25[%c0_596, %c0_597, %c0_598] : memref<1x1x256xf32, #tpu.memory_space<vmem>>, vector<1x1x256xf32>
    %775 = vector.shape_cast %774 : vector<1x1x256xf32> to vector<1x256xf32>
    %776 = vector.broadcast %775 : vector<1x256xf32> to vector<72x256xf32>
    %777 = arith.addf %773, %776 : vector<72x256xf32>
    %cst_599 = arith.constant 5.000000e-01 : f32
    %778 = vector.broadcast %cst_599 : f32 to vector<72x256xf32>
    %779 = arith.mulf %778, %777 : vector<72x256xf32>
    %cst_600 = arith.constant 0.707106769 : f32
    %780 = vector.broadcast %cst_600 : f32 to vector<72x256xf32>
    %781 = arith.mulf %777, %780 : vector<72x256xf32>
    %cst_601 = arith.constant 0.000000e+00 : f32
    %782 = vector.broadcast %cst_601 : f32 to vector<72x256xf32>
    %783 = arith.cmpf olt, %781, %782 : vector<72x256xf32>
    %cst_602 = arith.constant -1.000000e+00 : f32
    %cst_603 = arith.constant 1.000000e+00 : f32
    %784 = vector.broadcast %cst_602 : f32 to vector<72x256xf32>
    %785 = vector.broadcast %cst_603 : f32 to vector<72x256xf32>
    %786 = arith.select %783, %784, %785 : vector<72x256xi1>, vector<72x256xf32>
    %787 = math.absf %781 : vector<72x256xf32>
    %cst_604 = arith.constant 0.327591091 : f32
    %788 = vector.broadcast %cst_604 : f32 to vector<72x256xf32>
    %789 = arith.mulf %788, %787 : vector<72x256xf32>
    %cst_605 = arith.constant 1.000000e+00 : f32
    %790 = vector.broadcast %cst_605 : f32 to vector<72x256xf32>
    %791 = arith.addf %790, %789 : vector<72x256xf32>
    %cst_606 = arith.constant 1.000000e+00 : f32
    %792 = vector.broadcast %cst_606 : f32 to vector<72x256xf32>
    %793 = arith.divf %792, %791 : vector<72x256xf32>
    %cst_607 = arith.constant 1.06140542 : f32
    %794 = vector.broadcast %cst_607 : f32 to vector<72x256xf32>
    %795 = arith.mulf %794, %793 : vector<72x256xf32>
    %cst_608 = arith.constant -1.45315206 : f32
    %796 = vector.broadcast %cst_608 : f32 to vector<72x256xf32>
    %797 = arith.addf %795, %796 : vector<72x256xf32>
    %798 = arith.mulf %797, %793 : vector<72x256xf32>
    %cst_609 = arith.constant 1.42141378 : f32
    %799 = vector.broadcast %cst_609 : f32 to vector<72x256xf32>
    %800 = arith.addf %798, %799 : vector<72x256xf32>
    %801 = arith.mulf %800, %793 : vector<72x256xf32>
    %cst_610 = arith.constant -0.284496725 : f32
    %802 = vector.broadcast %cst_610 : f32 to vector<72x256xf32>
    %803 = arith.addf %801, %802 : vector<72x256xf32>
    %804 = arith.mulf %803, %793 : vector<72x256xf32>
    %cst_611 = arith.constant 0.254829586 : f32
    %805 = vector.broadcast %cst_611 : f32 to vector<72x256xf32>
    %806 = arith.addf %804, %805 : vector<72x256xf32>
    %807 = arith.mulf %806, %793 : vector<72x256xf32>
    %cst_612 = arith.constant 0.000000e+00 : f32
    %808 = vector.broadcast %cst_612 : f32 to vector<72x256xf32>
    %809 = arith.subf %808, %787 : vector<72x256xf32>
    %810 = arith.mulf %809, %787 : vector<72x256xf32>
    %811 = math.exp %810 : vector<72x256xf32>
    %812 = arith.mulf %807, %811 : vector<72x256xf32>
    %cst_613 = arith.constant 1.000000e+00 : f32
    %813 = vector.broadcast %cst_613 : f32 to vector<72x256xf32>
    %814 = arith.subf %813, %812 : vector<72x256xf32>
    %815 = arith.mulf %786, %814 : vector<72x256xf32>
    %cst_614 = arith.constant 1.000000e+00 : f32
    %816 = vector.broadcast %cst_614 : f32 to vector<72x256xf32>
    %817 = arith.addf %816, %815 : vector<72x256xf32>
    %818 = arith.mulf %779, %817 : vector<72x256xf32>
    %c0_615 = arith.constant 0 : index
    %c0_616 = arith.constant 0 : index
    %c0_617 = arith.constant 0 : index
    %819 = vector.load %arg26[%c0_615, %c0_616, %c0_617] : memref<1x256x64xbf16, #tpu.memory_space<vmem>>, vector<1x256x64xbf16>
    %820 = vector.shape_cast %819 : vector<1x256x64xbf16> to vector<256x64xbf16>
    %821 = arith.truncf %818 : vector<72x256xf32> to vector<72x256xbf16>
    %cst_618 = arith.constant dense<0.000000e+00> : vector<72x64xf32>
    %822 = tpu.matmul %821, %820, %cst_618 {dimension_numbers = #tpu.dot_dimension_numbers<[1], [0], [0], [1], [0, 0, 1, 1], [], []>} : vector<72x256xbf16>, vector<256x64xbf16>, vector<72x64xf32> -> vector<72x64xf32>
    %c0_619 = arith.constant 0 : index
    %c0_620 = arith.constant 0 : index
    %c0_621 = arith.constant 0 : index
    %823 = vector.load %arg27[%c0_619, %c0_620, %c0_621] : memref<1x1x64xf32, #tpu.memory_space<vmem>>, vector<1x1x64xf32>
    %824 = vector.shape_cast %823 : vector<1x1x64xf32> to vector<1x64xf32>
    %825 = vector.broadcast %824 : vector<1x64xf32> to vector<72x64xf32>
    %826 = arith.addf %822, %825 : vector<72x64xf32>
    %827 = arith.addf %745, %826 : vector<72x64xf32>
    %c0_622 = arith.constant 0 : index
    %c0_623 = arith.constant 0 : index
    %828 = vector.load %arg33[%c0_622, %c0_623] : memref<72x64xf32, #tpu.memory_space<vmem>>, vector<72x64xf32>
    tpu.vector_store %arg33[%c0_622, %c0_623], %827 {strides = array<i32>} : memref<72x64xf32, #tpu.memory_space<vmem>>, vector<72x64xf32>,
    %c3_i32 = arith.constant 3 : i32
    %829 = arith.cmpi eq, %arg1, %c3_i32 : i32
    %830 = arith.extui %829 : i1 to i32
    %c0_i32_624 = arith.constant 0 : i32
    %831 = arith.cmpi ne, %830, %c0_i32_624 : i32
    scf.if %831 {
      %832 = vector.extract_strided_slice %827 {offsets = [0, 0], sizes = [64, 64], strides = [1, 1]} : vector<72x64xf32> to vector<64x64xf32>
      %c0_625 = arith.constant 0 : index
      %c0_626 = arith.constant 0 : index
      %833 = vector.load %arg28[%c0_625, %c0_626] : memref<1x64xf32, #tpu.memory_space<vmem>>, vector<1x64xf32>
      %c0_627 = arith.constant 0 : index
      %c0_628 = arith.constant 0 : index
      %834 = vector.load %arg29[%c0_627, %c0_628] : memref<1x64xf32, #tpu.memory_space<vmem>>, vector<1x64xf32>
      %cst_629 = arith.constant dense<0.000000e+00> : vector<64xf32>
      %835 = vector.multi_reduction <add>, %832, %cst_629 [1] : vector<64x64xf32> to vector<64xf32>
      %836 = vector.shape_cast %835 : vector<64xf32> to vector<64x1xf32>
      %cst_630 = arith.constant 6.400000e+01 : f32
      %837 = vector.broadcast %cst_630 : f32 to vector<64x1xf32>
      %838 = arith.divf %836, %837 : vector<64x1xf32>
      %839 = vector.broadcast %838 : vector<64x1xf32> to vector<64x64xf32>
      %840 = arith.subf %832, %839 : vector<64x64xf32>
      %841 = arith.mulf %840, %840 : vector<64x64xf32>
      %cst_631 = arith.constant dense<0.000000e+00> : vector<64xf32>
      %842 = vector.multi_reduction <add>, %841, %cst_631 [1] : vector<64x64xf32> to vector<64xf32>
      %843 = vector.shape_cast %842 : vector<64xf32> to vector<64x1xf32>
      %cst_632 = arith.constant 6.400000e+01 : f32
      %844 = vector.broadcast %cst_632 : f32 to vector<64x1xf32>
      %845 = arith.divf %843, %844 : vector<64x1xf32>
      %cst_633 = arith.constant 9.99999997E-7 : f32
      %846 = vector.broadcast %cst_633 : f32 to vector<64x1xf32>
      %847 = arith.addf %845, %846 : vector<64x1xf32>
      %848 = math.rsqrt %847 : vector<64x1xf32>
      %849 = vector.broadcast %848 : vector<64x1xf32> to vector<64x64xf32>
      %850 = arith.mulf %840, %849 : vector<64x64xf32>
      %851 = vector.broadcast %833 : vector<1x64xf32> to vector<64x64xf32>
      %852 = arith.mulf %850, %851 : vector<64x64xf32>
      %853 = vector.broadcast %834 : vector<1x64xf32> to vector<64x64xf32>
      %854 = arith.addf %852, %853 : vector<64x64xf32>
      %c0_634 = arith.constant 0 : index
      %c0_635 = arith.constant 0 : index
      %855 = vector.load %arg30[%c0_634, %c0_635] : memref<64x128xbf16, #tpu.memory_space<vmem>>, vector<64x128xbf16>
      %856 = arith.truncf %854 : vector<64x64xf32> to vector<64x64xbf16>
      %cst_636 = arith.constant dense<0.000000e+00> : vector<64x128xf32>
      %857 = tpu.matmul %856, %855, %cst_636 {dimension_numbers = #tpu.dot_dimension_numbers<[1], [0], [0], [1], [0, 0, 1, 1], [], []>} : vector<64x64xbf16>, vector<64x128xbf16>, vector<64x128xf32> -> vector<64x128xf32>
      %c0_637 = arith.constant 0 : index
      %c0_638 = arith.constant 0 : index
      %858 = vector.load %arg31[%c0_637, %c0_638] : memref<1x128xf32, #tpu.memory_space<vmem>>, vector<1x128xf32>
      %859 = vector.broadcast %858 : vector<1x128xf32> to vector<64x128xf32>
      %860 = arith.addf %857, %859 : vector<64x128xf32>
      %c0_639 = arith.constant 0 : index
      %c0_640 = arith.constant 0 : index
      %c0_641 = arith.constant 0 : index
      %861 = vector.load %arg32[%c0_639, %c0_640, %c0_641] : memref<1x64x128xf32, #tpu.memory_space<vmem>>, vector<1x64x128xf32>
      %862 = vector.shape_cast %861 : vector<1x64x128xf32> to vector<64x128xf32>
      %863 = vector.shape_cast %860 : vector<64x128xf32> to vector<1x64x128xf32>
      tpu.vector_store %arg32[%c0_639, %c0_640, %c0_641], %863 {strides = array<i32>} : memref<1x64x128xf32, #tpu.memory_space<vmem>>, vector<1x64x128xf32>,
    } else {
    }
    return
  }
  func.func @transform_0(%arg0: i32, %arg1: i32) -> (i32, i32, i32) {
    %c0_i32 = arith.constant 0 : i32
    %c0_i32_0 = arith.constant 0 : i32
    %c0_i32_1 = arith.constant 0 : i32
    return %arg0, %c0_i32, %c0_i32_0 : i32, i32, i32
  }
  func.func @transform_1(%arg0: i32, %arg1: i32) -> (i32, i32) {
    %c0_i32 = arith.constant 0 : i32
    %c0_i32_0 = arith.constant 0 : i32
    %c0_i32_1 = arith.constant 0 : i32
    return %c0_i32, %c0_i32_0 : i32, i32
  }
  func.func @transform_2(%arg0: i32, %arg1: i32) -> (i32, i32) {
    %c0_i32 = arith.constant 0 : i32
    %c0_i32_0 = arith.constant 0 : i32
    %c0_i32_1 = arith.constant 0 : i32
    return %c0_i32, %c0_i32_0 : i32, i32
  }
  func.func @transform_3(%arg0: i32, %arg1: i32) -> (i32, i32) {
    %c0_i32 = arith.constant 0 : i32
    %c0_i32_0 = arith.constant 0 : i32
    %c0_i32_1 = arith.constant 0 : i32
    return %c0_i32, %c0_i32_0 : i32, i32
  }
  func.func @transform_4(%arg0: i32, %arg1: i32) -> (i32, i32) {
    %c0_i32 = arith.constant 0 : i32
    %c0_i32_0 = arith.constant 0 : i32
    %c0_i32_1 = arith.constant 0 : i32
    return %c0_i32, %c0_i32_0 : i32, i32
  }
  func.func @transform_5(%arg0: i32, %arg1: i32) -> (i32, i32) {
    %c0_i32 = arith.constant 0 : i32
    %c0_i32_0 = arith.constant 0 : i32
    %c0_i32_1 = arith.constant 0 : i32
    return %c0_i32, %c0_i32_0 : i32, i32
  }
  func.func @transform_6(%arg0: i32, %arg1: i32) -> (i32, i32, i32) {
    %c0_i32 = arith.constant 0 : i32
    %c0_i32_0 = arith.constant 0 : i32
    %c0_i32_1 = arith.constant 0 : i32
    return %arg1, %c0_i32, %c0_i32_0 : i32, i32, i32
  }
  func.func @transform_7(%arg0: i32, %arg1: i32) -> (i32, i32, i32) {
    %c0_i32 = arith.constant 0 : i32
    %c0_i32_0 = arith.constant 0 : i32
    %c0_i32_1 = arith.constant 0 : i32
    return %arg1, %c0_i32, %c0_i32_0 : i32, i32, i32
  }
  func.func @transform_8(%arg0: i32, %arg1: i32) -> (i32, i32, i32, i32, i32) {
    %c0_i32 = arith.constant 0 : i32
    %c0_i32_0 = arith.constant 0 : i32
    %c0_i32_1 = arith.constant 0 : i32
    %c0_i32_2 = arith.constant 0 : i32
    %c0_i32_3 = arith.constant 0 : i32
    return %arg1, %c0_i32, %c0_i32_0, %c0_i32_1, %c0_i32_2 : i32, i32, i32, i32, i32
  }
  func.func @transform_9(%arg0: i32, %arg1: i32) -> (i32, i32, i32, i32, i32) {
    %c0_i32 = arith.constant 0 : i32
    %c0_i32_0 = arith.constant 0 : i32
    %c0_i32_1 = arith.constant 0 : i32
    %c0_i32_2 = arith.constant 0 : i32
    %c0_i32_3 = arith.constant 0 : i32
    return %arg1, %c0_i32, %c0_i32_0, %c0_i32_1, %c0_i32_2 : i32, i32, i32, i32, i32
  }
  func.func @transform_10(%arg0: i32, %arg1: i32) -> (i32, i32, i32, i32) {
    %c0_i32 = arith.constant 0 : i32
    %c0_i32_0 = arith.constant 0 : i32
    %c0_i32_1 = arith.constant 0 : i32
    %c0_i32_2 = arith.constant 0 : i32
    return %arg1, %c0_i32, %c0_i32_0, %c0_i32_1 : i32, i32, i32, i32
  }
  func.func @transform_11(%arg0: i32, %arg1: i32) -> (i32, i32, i32) {
    %c0_i32 = arith.constant 0 : i32
    %c0_i32_0 = arith.constant 0 : i32
    %c0_i32_1 = arith.constant 0 : i32
    return %arg1, %c0_i32, %c0_i32_0 : i32, i32, i32
  }
  func.func @transform_12(%arg0: i32, %arg1: i32) -> (i32, i32, i32) {
    %c0_i32 = arith.constant 0 : i32
    %c0_i32_0 = arith.constant 0 : i32
    %c0_i32_1 = arith.constant 0 : i32
    return %arg1, %c0_i32, %c0_i32_0 : i32, i32, i32
  }
  func.func @transform_13(%arg0: i32, %arg1: i32) -> (i32, i32, i32) {
    %c0_i32 = arith.constant 0 : i32
    %c0_i32_0 = arith.constant 0 : i32
    %c0_i32_1 = arith.constant 0 : i32
    return %arg1, %c0_i32, %c0_i32_0 : i32, i32, i32
  }
  func.func @transform_14(%arg0: i32, %arg1: i32) -> (i32, i32, i32) {
    %c0_i32 = arith.constant 0 : i32
    %c0_i32_0 = arith.constant 0 : i32
    %c0_i32_1 = arith.constant 0 : i32
    return %arg1, %c0_i32, %c0_i32_0 : i32, i32, i32
  }
  func.func @transform_15(%arg0: i32, %arg1: i32) -> (i32, i32, i32) {
    %c0_i32 = arith.constant 0 : i32
    %c0_i32_0 = arith.constant 0 : i32
    %c0_i32_1 = arith.constant 0 : i32
    return %arg1, %c0_i32, %c0_i32_0 : i32, i32, i32
  }
  func.func @transform_16(%arg0: i32, %arg1: i32) -> (i32, i32, i32, i32, i32) {
    %c0_i32 = arith.constant 0 : i32
    %c0_i32_0 = arith.constant 0 : i32
    %c0_i32_1 = arith.constant 0 : i32
    %c0_i32_2 = arith.constant 0 : i32
    %c0_i32_3 = arith.constant 0 : i32
    return %arg1, %c0_i32, %c0_i32_0, %c0_i32_1, %c0_i32_2 : i32, i32, i32, i32, i32
  }
  func.func @transform_17(%arg0: i32, %arg1: i32) -> (i32, i32, i32, i32, i32) {
    %c0_i32 = arith.constant 0 : i32
    %c0_i32_0 = arith.constant 0 : i32
    %c0_i32_1 = arith.constant 0 : i32
    %c0_i32_2 = arith.constant 0 : i32
    %c0_i32_3 = arith.constant 0 : i32
    return %arg1, %c0_i32, %c0_i32_0, %c0_i32_1, %c0_i32_2 : i32, i32, i32, i32, i32
  }
  func.func @transform_18(%arg0: i32, %arg1: i32) -> (i32, i32, i32, i32) {
    %c0_i32 = arith.constant 0 : i32
    %c0_i32_0 = arith.constant 0 : i32
    %c0_i32_1 = arith.constant 0 : i32
    %c0_i32_2 = arith.constant 0 : i32
    return %arg1, %c0_i32, %c0_i32_0, %c0_i32_1 : i32, i32, i32, i32
  }
  func.func @transform_19(%arg0: i32, %arg1: i32) -> (i32, i32, i32) {
    %c0_i32 = arith.constant 0 : i32
    %c0_i32_0 = arith.constant 0 : i32
    %c0_i32_1 = arith.constant 0 : i32
    return %arg1, %c0_i32, %c0_i32_0 : i32, i32, i32
  }
  func.func @transform_20(%arg0: i32, %arg1: i32) -> (i32, i32, i32) {
    %c0_i32 = arith.constant 0 : i32
    %c0_i32_0 = arith.constant 0 : i32
    %c0_i32_1 = arith.constant 0 : i32
    return %arg1, %c0_i32, %c0_i32_0 : i32, i32, i32
  }
  func.func @transform_21(%arg0: i32, %arg1: i32) -> (i32, i32, i32) {
    %c0_i32 = arith.constant 0 : i32
    %c0_i32_0 = arith.constant 0 : i32
    %c0_i32_1 = arith.constant 0 : i32
    return %arg1, %c0_i32, %c0_i32_0 : i32, i32, i32
  }
  func.func @transform_22(%arg0: i32, %arg1: i32) -> (i32, i32, i32) {
    %c0_i32 = arith.constant 0 : i32
    %c0_i32_0 = arith.constant 0 : i32
    %c0_i32_1 = arith.constant 0 : i32
    return %arg1, %c0_i32, %c0_i32_0 : i32, i32, i32
  }
  func.func @transform_23(%arg0: i32, %arg1: i32) -> (i32, i32, i32) {
    %c0_i32 = arith.constant 0 : i32
    %c0_i32_0 = arith.constant 0 : i32
    %c0_i32_1 = arith.constant 0 : i32
    return %arg1, %c0_i32, %c0_i32_0 : i32, i32, i32
  }
  func.func @transform_24(%arg0: i32, %arg1: i32) -> (i32, i32, i32) {
    %c0_i32 = arith.constant 0 : i32
    %c0_i32_0 = arith.constant 0 : i32
    %c0_i32_1 = arith.constant 0 : i32
    return %arg1, %c0_i32, %c0_i32_0 : i32, i32, i32
  }
  func.func @transform_25(%arg0: i32, %arg1: i32) -> (i32, i32, i32) {
    %c0_i32 = arith.constant 0 : i32
    %c0_i32_0 = arith.constant 0 : i32
    %c0_i32_1 = arith.constant 0 : i32
    return %arg1, %c0_i32, %c0_i32_0 : i32, i32, i32
  }
  func.func @transform_26(%arg0: i32, %arg1: i32) -> (i32, i32) {
    %c0_i32 = arith.constant 0 : i32
    %c0_i32_0 = arith.constant 0 : i32
    %c0_i32_1 = arith.constant 0 : i32
    return %c0_i32, %c0_i32_0 : i32, i32
  }
  func.func @transform_27(%arg0: i32, %arg1: i32) -> (i32, i32) {
    %c0_i32 = arith.constant 0 : i32
    %c0_i32_0 = arith.constant 0 : i32
    %c0_i32_1 = arith.constant 0 : i32
    return %c0_i32, %c0_i32_0 : i32, i32
  }
  func.func @transform_28(%arg0: i32, %arg1: i32) -> (i32, i32) {
    %c0_i32 = arith.constant 0 : i32
    %c0_i32_0 = arith.constant 0 : i32
    %c0_i32_1 = arith.constant 0 : i32
    return %c0_i32, %c0_i32_0 : i32, i32
  }
  func.func @transform_29(%arg0: i32, %arg1: i32) -> (i32, i32) {
    %c0_i32 = arith.constant 0 : i32
    %c0_i32_0 = arith.constant 0 : i32
    %c0_i32_1 = arith.constant 0 : i32
    return %c0_i32, %c0_i32_0 : i32, i32
  }
  func.func @transform_30(%arg0: i32, %arg1: i32) -> (i32, i32, i32) {
    %c0_i32 = arith.constant 0 : i32
    %c0_i32_0 = arith.constant 0 : i32
    %c0_i32_1 = arith.constant 0 : i32
    return %arg0, %c0_i32, %c0_i32_0 : i32, i32, i32
  }
}

</mosaic_0001>

<bundles_post_ra>
// kernel: segmentformer_forward.1
= control target key start
LH: loop header
LB: loop body
LE: loop exit
PB: predicated region body
PF: predicated region fallthrough
CT: control target
= control target key end

     0   :  { %s10324_s6 = smov 1   ;;  %s10325_s10 = smov 2   ;;  %s13883_s0 = inlined_call_operand.smem [shape: u32[31], index: -1, kind: input, shape index: {}] }
   0x1   :  { %s10365_s5 = sld [smem:[%s13883_s0]]   ;;  %s10326_s14 = smov 3  }
   0x2   :  { %s10370_s9 = sld [smem:[%s13883_s0 + %s10324_s6]]   ;;  %s10327_s18 = smov 4  }
   0x3   :  { %s10375_s13 = sld [smem:[%s13883_s0 + %s10325_s10]]   ;;  %s10328_s22 = smov 5  }
   0x4   :  { %s10380_s17 = sld [smem:[%s13883_s0 + %s10326_s14]]   ;;  %s10329_s26 = smov 6  }
   0x5   :  { %s10385_s21 = sld [smem:[%s13883_s0 + %s10327_s18]]   ;;  %s10330_s30 = smov 7  }
   0x6   :  { %s10390_s25 = sld [smem:[%s13883_s0 + %s10328_s22]]   ;;  %s10331_s4 = smov 8  }
   0x7   :  { %13918 = sst [smem:[#allocation3_spill]] %s10365_s5  ;;  %s10332_s10 = smov 9  }
   0x8   :  { %13919 = sst [smem:[#allocation4_spill]] %s10370_s9  ;;  %s10333_s15 = smov 10  }
   0x9   :  { %13920 = sst [smem:[#allocation5_spill]] %s10375_s13  ;;  %s10334_s20 = smov 11  }
   0xa   :  { %13921 = sst [smem:[#allocation6_spill]] %s10380_s17  ;;  %s10336_s1 = smov 13  }
   0xb   :  { %13922 = sst [smem:[#allocation7_spill]] %s10385_s21  ;;  %s10337_s7 = smov 14  }
   0xc   :  { %13923 = sst [smem:[#allocation8_spill]] %s10390_s25  ;;  %s10339_s22 = smov 16  }
   0xd   :  { %s10395_s29 = sld [smem:[%s13883_s0 + %s10329_s26]]   ;;  %s10335_s26 = smov 12  }
   0xe   :  { %s10400_s3 = sld [smem:[%s13883_s0 + %s10330_s30]]   ;;  %s10340_s28 = smov 17  }
   0xf   :  { %s10405_s8 = sld [smem:[%s13883_s0 + %s10331_s4]]   ;;  %s10519_s16 = smov 0  }
  0x10   :  { %s10410_s14 = sld [smem:[%s13883_s0 + %s10332_s10]]   ;;  %s10521_s18 = smov 0  }
  0x11   :  { %s10415_s19 = sld [smem:[%s13883_s0 + %s10333_s15]]   ;;  %s10338_s15 = smov 15  }
  0x12   :  { %s10420_s24 = sld [smem:[%s13883_s0 + %s10334_s20]]   ;;  %s10525_s23 = smov 0  }
  0x13   :  { %13924 = sst [smem:[#allocation9_spill]] %s10395_s29 }
  0x14   :  { %13925 = sst [smem:[#allocation10_spill]] %s10400_s3 }
  0x15   :  { %13926 = sst [smem:[#allocation11_spill]] %s10405_s8 }
  0x16   :  { %13927 = sst [smem:[#allocation12_spill]] %s10410_s14 }
  0x17   :  { %13928 = sst [smem:[#allocation13_spill]] %s10415_s19 }
  0x18   :  { %13929 = sst [smem:[#allocation14_spill]] %s10420_s24 }
  0x19   :  { %s10425_s30 = sld [smem:[%s13883_s0 + %s10335_s26]]  }
  0x1a   :  { %s10430_s6 = sld [smem:[%s13883_s0 + %s10336_s1]]  }
  0x1b   :  { %s10435_s12 = sld [smem:[%s13883_s0 + %s10337_s7]]   ;;  %s10341_s7 = smov 18  }
  0x1c   :  { %s10440_s20 = sld [smem:[%s13883_s0 + %s10338_s15]]   ;;  %s10342_s15 = smov 19  }
  0x1d   :  { %s10445_s27 = sld [smem:[%s13883_s0 + %s10339_s22]]   ;;  %s10343_s22 = smov 20  }
  0x1e   :  { %s10450_s4 = sld [smem:[%s13883_s0 + %s10340_s28]]   ;;  %s10344_s28 = smov 21  }
  0x1f   :  { %13930 = sst [smem:[#allocation15_spill]] %s10425_s30 }
  0x20   :  { %s10455_s21 = sld [smem:[%s13883_s0 + %s10341_s7]]   ;;  %s10345_s7 = smov 22  }
  0x21   :  { %13931 = sst [smem:[#allocation16_spill]] %s10435_s12 }
  0x22   :  { %13932 = sst [smem:[#allocation17_spill]] %s10440_s20 }
  0x23   :  { %s10460_s25 = sld [smem:[%s13883_s0 + %s10342_s15]]   ;;  %s10346_s15 = smov 23  }
  0x24   :  { %13933 = sst [smem:[#allocation18_spill]] %s10450_s4 }
  0x25   :  { %s10465_s17 = sld [smem:[%s13883_s0 + %s10343_s22]]   ;;  %s10347_s22 = smov 24  }
  0x26   :  { %s10470_s13 = sld [smem:[%s13883_s0 + %s10344_s28]]   ;;  %s10348_s28 = smov 25  }
  0x27   :  { %s10475_s9 = sld [smem:[%s13883_s0 + %s10345_s7]]   ;;  %s10349_s7 = smov 26  }
  0x29   :  { %13934 = sst [smem:[#allocation19_spill]] %s10460_s25 }
  0x2a   :  { %s10480_s25 = sld [smem:[%s13883_s0 + %s10346_s15]]   ;;  %s10350_s15 = smov 27  }
  0x2b   :  { %13935 = sst [smem:[#allocation20_spill]] %s10465_s17 }
  0x2c   :  { %13936 = sst [smem:[#allocation21_spill]] %s10470_s13 }
  0x2d   :  { %13937 = sst [smem:[#allocation22_spill]] %s10475_s9 }
  0x2e   :  { %s10485_s17 = sld [smem:[%s13883_s0 + %s10347_s22]]   ;;  %s10351_s22 = smov 28  }
  0x2f   :  { %s10490_s13 = sld [smem:[%s13883_s0 + %s10348_s28]]   ;;  %s10352_s28 = smov 29  }
  0x30   :  { %13938 = sst [smem:[#allocation23_spill]] %s10480_s25 }
  0x31   :  { %s10495_s9 = sld [smem:[%s13883_s0 + %s10349_s7]]   ;;  %s10353_s7 = smov 30  }
  0x32   :  { %s10500_s25 = sld [smem:[%s13883_s0 + %s10350_s15]]   ;;  %s10517_s15 = smov 0  }
  0x34   :  { %13939 = sst [smem:[#allocation24_spill]] %s10485_s17 }
  0x35   :  { %13940 = sst [smem:[#allocation25_spill]] %s10490_s13 }
  0x36   :  { %s10505_s17 = sld [smem:[%s13883_s0 + %s10351_s22]]   ;;  %s10523_s22 = smov 0  }
  0x37   :  { %13941 = sst [smem:[#allocation26_spill]] %s10495_s9 }
  0x38   :  { %13942 = sst [smem:[#allocation27_spill]] %s10500_s25 }
  0x39   :  { %s10510_s13 = sld [smem:[%s13883_s0 + %s10352_s28]]  }
  0x3a   :  { %s10515_s9 = sld [smem:[%s13883_s0 + %s10353_s7]]  }
  0x3c   :  { %13943 = sst [smem:[#allocation28_spill]] %s10505_s17 }
  0x3f   :  { %13944 = sst [smem:[#allocation29_spill]] %s10510_s13 }
  0x40 LB: > { %13945 = sst [smem:[#allocation30_spill]] %s10306_s15  ;;  %s80_s0 = sadd.s32 1, %s10314_s18  ;;  %s10322_s23 = sphi %s10525_s23, %s71_s23   ;;  %s10318_s22 = sphi %s10523_s22, %s14075_s22   ;;  %s10314_s18 = sphi %s10521_s18, %s14074_s18   ;;  %s10310_s16 = sphi %s10519_s16, %s14073_s16   ;;  %s10306_s15 = sphi %s10517_s15, %s14072_s15  }
  0x41   : > { %13946 = sst [smem:[#allocation31_spill]] %s10314_s18  ;;  %s83_s26 = sadd.s32 1, %s10318_s22 }
  0x42   : > { %13947 = sst [smem:[#allocation32_spill]] %s10318_s22  ;;  %p81_p0 = scmp.ge.s32.totalorder %s80_s0, 4 }
  0x43   : > { %13948 = sst [smem:[#allocation33_spill]] %s10322_s23  ;;  %p8443_p1 = scmp.ge.s32.totalorder %s10322_s23, 1 }
  0x44   : > { %p1032_p2 = scmp.lt.s32.totalorder %s10322_s23, 9  ;;  %s14077_s0 = smov (%p81_p0, %s80_s0), 0 }
  0x45   : > { %13949 = sst [smem:[#allocation34_spill]] %s14077_s0  ;;  %s14079_s26 = smov (!%p81_p0, %s83_s26), %s10318_s22 }
  0x46   : > { %p1033_p3 = pnand %p8443_p1, %p1032_p2  ;;  %p85_p4 = scmp.ge.s32.totalorder %s14079_s26, 2 }
  0x48   : > { %s14081_s26 = smov (%p85_p4, %s14079_s26), 0  ;;  %1036 = sbr.rel (%p1033_p3) target bundleno = 7816 (0x1e88), region = 140 }
  0x49   : > { %13950 = sst [smem:[#allocation35_spill]] %s14081_s26 }
  0x4d   : > { %p1187_p5 = scmp.lt.s32.totalorder %s10310_s16, 1  ;;  %s13951_s5 = sld [smem:[#allocation3_spill]] }
  0x4e   : > { %s13954_s8 = sld [smem:[#allocation11_spill]]  ;;  %p1192_p6 = scmp.lt.s32.totalorder %s10306_s15, 3 }
  0x4f   : > { %s13955_s19 = sld [smem:[#allocation13_spill]]  ;;  %s14083_s16 = smov (!%p1187_p5, %s10310_s16), 1 }
  0x50   : > { %s13956_s14 = sld [smem:[#allocation12_spill]]  ;;  %s9473_s1 = sshll.u32 %s14083_s16, 6 }
  0x51   : > { %s13958_s30 = sld [smem:[#allocation15_spill]] }
  0x52   : > { %s13959_s12 = sld [smem:[#allocation16_spill]] }
  0x53   : > { %s13960_s20 = sld [smem:[#allocation17_spill]]  ;;  %s10557_s2 = scalar_lea.vmem %s13951_s5, %s9473_s1 }
  0x54   : > { %s10553_s28 = scalar_select %p1192_p6, %s10306_s15, 3 }
  0x55   : > { %s13961_s4 = sld [smem:[#allocation18_spill]] }
  0x56   : > { %13962 = sst [smem:[#allocation36_spill]] %s10557_s2  ;;  %s9648_s0 = smul.u32 384, %s10553_s28 }
  0x57   : > { %s13963_s10 = sld [smem:[#allocation19_spill]]  ;;  %s9649_s18 = smul.u32 12, %s10553_s28 }
  0x58   : > { %s13964_s26 = sld [smem:[#allocation20_spill]]  ;;  %s9474_s23 = sshll.u32 %s10553_s28, 5 }
  0x59   : > { %s13965_s22 = sld [smem:[#allocation21_spill]]  ;;  %s10567_s13 = scalar_lea.vmem %s13954_s8, %s9648_s0 }
  0x5a   : > { %13966 = sst [smem:[#allocation37_spill]] %s10567_s13  ;;  %s10570_s25 = scalar_lea.vmem %s13955_s19, %s9474_s23 }
  0x5b   : > { %s13967_s16 = sld [smem:[#allocation22_spill]]  ;;  %s10573_s17 = scalar_lea.vmem %s13956_s14, %s9649_s18 }
  0x5c   : > { %13968 = sst [smem:[#allocation38_spill]] %s10570_s25  ;;  %s10578_s3 = scalar_lea.vmem %s13958_s30, %s9474_s23 }
  0x5d   : > { %s13969_s5 = sld [smem:[#allocation23_spill]]  ;;  %s10584_s15 = scalar_lea.vmem %s13959_s12, %s10553_s28 }
  0x5e   : > { %13970 = sst [smem:[#allocation39_spill]] %s10573_s17  ;;  %s10588_s8 = scalar_lea.vmem %s13960_s20, %s10553_s28 }
  0x5f   : > { %s13971_s11 = sld [smem:[#allocation25_spill]]  ;;  %s10591_s13 = scalar_lea.vmem %s10445_s27, %s9648_s0 }
  0x60   : > { %13972 = sst [smem:[#allocation40_spill]] %s10578_s3  ;;  %s10594_s19 = scalar_lea.vmem %s13961_s4, %s9649_s18 }
  0x61   : > { %s13973_s29 = sld [smem:[#allocation24_spill]]  ;;  %s10597_s25 = scalar_lea.vmem %s10455_s21, %s9474_s23 }
  0x62   : > { %13974 = sst [smem:[#allocation41_spill]] %s10584_s15  ;;  %s10601_s14 = scalar_lea.vmem %s13963_s10, %s10553_s28 }
  0x63   : > { %s1248_s7 = scalar_lea.vmem %s13964_s26, %s10553_s28  ;;  %s1251_s24 = scalar_lea.vmem %s13965_s22, %s10553_s28 }
  0x64   : > { %s9477_s17 = sshll.u32 %s10553_s28, 6  ;;  %s8456_s30 = sshll.u32 %s10553_s28, 1 }
  0x65   : > { %s10610_s3 = scalar_lea.vmem %s13967_s16, %s9477_s17  ;;  %s10613_s2 = scalar_lea.vmem %s13969_s5, %s8456_s30 }
  0x66   : > { %s9478_s12 = sshll.u32 %s10553_s28, 7  ;;  %s1268_s15 = scalar_lea.vmem %s13971_s11, %s10553_s28 }
  0x67   : > { %s10619_s20 = scalar_lea.vmem %s13973_s29, %s9478_s12  ;;  %s10622_s0 = scalar_lea.vmem %s10515_s9, %s9473_s1 }
  0x68   : > { %s13975_s18 = sld [smem:[#allocation30_spill]] }
  0x6e   : > { %p8461_p7 = scmp.ne.s32.totalorder %s13975_s18, 0 }
  0x6f   : > { %s13976_s23 = sld [smem:[#allocation4_spill]] (!%p8461_p7) }
  0x70   : > { %1278 = sbr.rel (%p8461_p7) target bundleno = 278 (0x116), region = 144  ;;  %s13978_s10 = sld [smem:[#allocation5_spill]] (!%p8461_p7) }
  0x71   : > { %s13979_s22 = sld [smem:[#allocation36_spill]] (!%p8461_p7) }
  0x75   : > { %s13977_s4 = smov %s13976_s23  ;;  %v9483_v0 = vld [vmem:[%s13976_s23 + $0x18] sm:$0xff]  ;;  %vm1332_vm0 = vcmask 523264  }
  0x76   : > { %1349 = vmatpush.bf16.msra.mxu0 %v9483_v0  ;;  %9620 = vmatpush.bf16.msra.mxu1 %v9483_v0  ;;  %v9482_v1 = vld [vmem:[%s13977_s4 + $0x10] sm:$0xff]  ;;  %v1307_v2 = vld [vmem:[%s13978_s10 + $0x40] sm:$0xff]  ;;  %v9481_v3 = vld [vmem:[%s13977_s4 + $0x8] sm:$0xff] }
  0x77   : > { %9621 = vmatpush.bf16.msra.mxu2 %v9483_v0  ;;  %9622 = vmatpush.bf16.msra.mxu3 %v9483_v0  ;;  %1382 = vst.msk [vmem:[#allocation2 + $0x40] sm:$0xff] %vm1332_vm0, %v1307_v2  ;;  %v9480_v4 = vld [vmem:[%s13977_s4] sm:$0xff]  ;;  %v1280_v6 = vld [vmem:[%s13979_s22 + $0x8] sm:$0xff]  ;;  %v1281_v7 = vld [vmem:[%s13979_s22 + $0x10] sm:$0xff] }
  0x78   : > { %v1279_v5 = vld [vmem:[%s13979_s22] sm:$0xff]  ;;  %v1282_v8 = vld [vmem:[%s13979_s22 + $0x18] sm:$0xff]  ;;  %v1284_v10 = vld [vmem:[%s13979_s22 + $0x28] sm:$0xff] }
  0x79   : > { %v1283_v9 = vld [vmem:[%s13979_s22 + $0x20] sm:$0xff]  ;;  %v1285_v11 = vld [vmem:[%s13979_s22 + $0x30] sm:$0xff]  ;;  %v1286_v12 = vld [vmem:[%s13979_s22 + $0x38] sm:$0xff]  ;;  %v1295_v13 = vpack.c.bf16 %v1280_v6, %v1279_v5  ;;  %v1296_v14 = vpack.c.bf16 %v1282_v8, %v1281_v7 }
  0x7a   : > { %1350 = vmatpush.bf16.msra.mxu0 %v9482_v1  ;;  %9623 = vmatpush.bf16.msra.mxu1 %v9482_v1  ;;  %v1297_v15 = vpack.c.bf16 %v1284_v10, %v1283_v9  ;;  %v1298_v16 = vpack.c.bf16 %v1286_v12, %v1285_v11  ;;  %v1299_v17 = vld [vmem:[%s13978_s10] sm:$0xff]  ;;  %v1301_v18 = vld [vmem:[%s13978_s10 + $0x10] sm:$0xff]  ;;  %v1300_v25 = vld [vmem:[%s13978_s10 + $0x8] sm:$0xff] }
  0x7b   : > { %9624 = vmatpush.bf16.msra.mxu2 %v9482_v1  ;;  %9625 = vmatpush.bf16.msra.mxu3 %v9482_v1  ;;  %v1303_v23 = vld [vmem:[%s13978_s10 + $0x20] sm:$0xff]  ;;  %v1305_v24 = vld [vmem:[%s13978_s10 + $0x30] sm:$0xff]  ;;  %v1302_v26 = vld [vmem:[%s13978_s10 + $0x18] sm:$0xff] }
  0x7c   : > { %v1304_v35 = vld [vmem:[%s13978_s10 + $0x28] sm:$0xff]  ;;  %v1306_v36 = vld [vmem:[%s13978_s10 + $0x38] sm:$0xff] }
  0x7e   : > { %1351 = vmatpush.bf16.msra.mxu0 %v9481_v3  ;;  %9626 = vmatpush.bf16.msra.mxu1 %v9481_v3 }
  0x7f   : > { %9627 = vmatpush.bf16.msra.mxu2 %v9481_v3  ;;  %9628 = vmatpush.bf16.msra.mxu3 %v9481_v3 }
  0x82   : > { %1352 = vmatpush.bf16.msra.mxu0 %v9480_v4  ;;  %9629 = vmatpush.bf16.msra.mxu1 %v9480_v4 }
  0x83   : > { %9630 = vmatpush.bf16.msra.mxu2 %v9480_v4  ;;  %9631 = vmatpush.bf16.msra.mxu3 %v9480_v4 }
  0x85   : > { %8478 = vmatmul.msk.bf16.vlgmr.msra.gmra.mxu0 %vm1332_vm0, %v1295_v13  ;;  %8479 = vmatmul.msk.bf16.vlgmr.msra.gmra.mxu1 %vm1332_vm0, %v1296_v14 }
  0x86   : > { %8480 = vmatmul.msk.bf16.vlgmr.msra.gmra.mxu2 %vm1332_vm0, %v1297_v15  ;;  %8481 = vmatmul.msk.bf16.vlgmr.msra.gmra.mxu3 %vm1332_vm0, %v1298_v16 }
 0x102   : > { %v1354_v19 = vpop.f32.mrf.mxu0  ;;  %v1359_v20 = vpop.f32.mrf.mxu1 }
 0x103   : > { %v1355_v21 = vadd.f32 %v1354_v19, %v1299_v17  ;;  %v1360_v22 = vadd.f32 %v1359_v20, %v1301_v18 }
 0x105   : > { %1374 = vst.msk [vmem:[#allocation2] sm:$0xff] %vm1332_vm0, %v1355_v21 }
 0x106   : > { %1376 = vst.msk [vmem:[#allocation2 + $0x10] sm:$0xff] %vm1332_vm0, %v1360_v22 }
 0x109   : > { %v1364_v27 = vpop.f32.mrf.mxu2  ;;  %v1369_v28 = vpop.f32.mrf.mxu3 }
 0x10a   : > { %v1365_v29 = vadd.f32 %v1364_v27, %v1303_v23  ;;  %v1370_v30 = vadd.f32 %v1369_v28, %v1305_v24  ;;  %v1356_v31 = vpop.f32.mrf.mxu0  ;;  %v1361_v32 = vpop.f32.mrf.mxu1 }
 0x10b   : > { %v1357_v33 = vadd.f32 %v1356_v31, %v1300_v25  ;;  %v1362_v34 = vadd.f32 %v1361_v32, %v1302_v26 }
 0x10c   : > { %1378 = vst.msk [vmem:[#allocation2 + $0x20] sm:$0xff] %vm1332_vm0, %v1365_v29 }
 0x10d   : > { %1380 = vst.msk [vmem:[#allocation2 + $0x30] sm:$0xff] %vm1332_vm0, %v1370_v30 }
 0x10e   : > { %1375 = vst.msk [vmem:[#allocation2 + $0x8] sm:$0xff] %vm1332_vm0, %v1357_v33 }
 0x10f   : > { %1377 = vst.msk [vmem:[#allocation2 + $0x18] sm:$0xff] %vm1332_vm0, %v1362_v34 }
 0x111   : > { %v1366_v37 = vpop.f32.mrf.mxu2  ;;  %v1371_v38 = vpop.f32.mrf.mxu3 }
 0x112   : > { %v1367_v39 = vadd.f32 %v1366_v37, %v1304_v35  ;;  %v1372_v40 = vadd.f32 %v1371_v38, %v1306_v36 }
 0x114   : > { %1379 = vst.msk [vmem:[#allocation2 + $0x28] sm:$0xff] %vm1332_vm0, %v1367_v39 }
 0x115   : > { %1381 = vst.msk [vmem:[#allocation2 + $0x38] sm:$0xff] %vm1332_vm0, %v1372_v40 }
 0x116 PF: > { %v1387_v41 = vld [vmem:[#allocation2 + $0x20] sm:$0xff]  ;;  %vm1394_vm1 = vcmask 523264   ;;  %v1385_v42 = vld [vmem:[#allocation2 + $0x10] sm:$0xff]  ;;  %v1386_v48 = vld [vmem:[#allocation2 + $0x18] sm:$0xff]  ;;  %v10354_v55 = vmov 64.0   ;;  %s13981_s5 = sld [smem:[#allocation37_spill]]  ;;  %s13994_s22 = scalar_lea.vmem %s10430_s6, %s10553_s28 }
 0x117   : > { %v1383_v43 = vld [vmem:[#allocation2] sm:$0xff]  ;;  %v1407_v44 = vsel %vm1394_vm1, %v1387_v41, 0.0  ;;  %v1401_v45 = vsel %vm1394_vm1, %v1385_v42, 0.0  ;;  %v1404_v50 = vsel %vm1394_vm1, %v1386_v48, 0.0  ;;  %v1384_v51 = vld [vmem:[#allocation2 + $0x8] sm:$0xff]  ;;  %v1389_v53 = vld [vmem:[#allocation2 + $0x30] sm:$0xff]  ;;  %9757 = vrcp.f32 %v10354_v55 }
 0x118   : > { %v1395_v46 = vsel %vm1394_vm1, %v1383_v43, 0.0  ;;  %1408 = vadd.xlane.f32.xlu2 %v1407_v44  ;;  %1402 = vadd.xlane.f32.xlu1 %v1401_v45  ;;  %v1398_v52 = vsel %vm1394_vm1, %v1384_v51, 0.0  ;;  %v1413_v54 = vsel %vm1394_vm1, %v1389_v53, 0.0  ;;  %s13982_s17 = sld [smem:[#allocation9_spill]] }
 0x119   : > { %1396 = vadd.xlane.f32.xlu0 %v1395_v46  ;;  %s13983_s29 = sld [smem:[#allocation10_spill]] }
 0x11a   : > { %s13988_s26 = sld [smem:[#allocation39_spill]] }
 0x11b   : > { %v1388_v47 = vld [vmem:[#allocation2 + $0x28] sm:$0xff]  ;;  %s13989_s1 = sld [smem:[#allocation6_spill]] }
 0x11c   : > { %v1410_v49 = vsel %vm1394_vm1, %v1388_v47, 0.0  ;;  %v10680_v13 = vld [vmem:[#allocation2 + $0x38] sm:$0xff]  ;;  %v9486_v38 = vld [vmem:[%s13981_s5 + $0x10] sm:$0xff]  ;;  %s13990_s11 = sld [smem:[#allocation38_spill]] }
 0x11d   : > { %v9758_v56 = vpop.eup %9757  ;;  %v1416_v18 = vsel %vm1394_vm1, %v10680_v13, 0.0  ;;  %v9487_v35 = vld [vmem:[%s13981_s5 + $0x18] sm:$0xff]  ;;  %v9490_v39 = vld [vmem:[%s13981_s5 + $0x90] sm:$0xff]  ;;  %s13991_s16 = sld [smem:[#allocation40_spill]] }
 0x11e   : > { %v1420_v57 = vmul.f32 64.0, %v9758_v56  ;;  %vm1424_vm2 = vweird.f32 %v9758_v56  ;;  %v9491_v36 = vld [vmem:[%s13981_s5 + $0x98] sm:$0xff]  ;;  %1664 = vmatpush.bf16.msra.mxu0 %v9487_v35  ;;  %v9494_v40 = vld [vmem:[%s13981_s5 + $0x110] sm:$0xff]  ;;  %s13984_s30 = scalar_lea.vmem %s13982_s17, %s10553_s28  ;;  %s13992_s18 = sld [smem:[#allocation14_spill]] }
 0x11f   : > { %v9495_v37 = vld [vmem:[%s13981_s5 + $0x118] sm:$0xff]  ;;  %1731 = vmatpush.bf16.msra.mxu1 %v9491_v36  ;;  %v10749_v35 = vld [vmem:[%s13984_s30] ss:$0 sm:$0xff]  ;;  %s13987_s12 = scalar_lea.vmem %s13983_s29, %s10553_s28  ;;  %s14005_s17 = sld [smem:[#allocation7_spill]] }
 0x120   : > { %1411 = vadd.xlane.f32.xlu2 %v1410_v49  ;;  %1405 = vadd.xlane.f32.xlu1 %v1404_v50  ;;  %v1421_v58 = vsub.f32 1.0, %v1420_v57  ;;  %v9492_v49 = vld [vmem:[%s13981_s5 + $0x100] sm:$0xff] }
 0x121   : > { %1399 = vadd.xlane.f32.xlu0 %v1398_v52  ;;  %1798 = vmatpush.bf16.msra.mxu2 %v9495_v37 }
 0x122   : > { %v1422_v59 = vmul.f32 %v9758_v56, %v1421_v58  ;;  %9632 = vmatpush.bf16.msra.mxu3 %v9495_v37  ;;  %1665 = vmatpush.bf16.msra.mxu0 %v9486_v38 }
 0x123   : > { %1732 = vmatpush.bf16.msra.mxu1 %v9490_v39 }
 0x124   : > { %v1423_v60 = vadd.f32 %v9758_v56, %v1422_v59  ;;  %s13993_s23 = scalar_lea.vmem %s13992_s18, %s10553_s28 }
 0x125   : > { %1799 = vmatpush.bf16.msra.mxu2 %v9494_v40 }
 0x126   : > { %v10666_v61 = vsel %vm1424_vm2, %v9758_v56, %v1423_v60  ;;  %9633 = vmatpush.bf16.msra.mxu3 %v9494_v40 }
 0x127   : > { %13980 = vst [vmem:[#allocation42_spill] sm:$0xff] %v10666_v61 }
 0x128   : > { %1414 = vadd.xlane.f32.xlu2 %v1413_v54 }
 0x18b   : > { %v1409_v62 = vpop.xlane.xlu2 %1408  ;;  %v1403_v63 = vpop.xlane.xlu1 %1402 }
 0x18c   : > { %v1397_v0 = vpop.xlane.xlu0 %1396  ;;  %v1430_v9 = vmul.f32 %v10666_v61, %v1409_v62  ;;  %v1428_v10 = vmul.f32 %v10666_v61, %v1403_v63  ;;  %v9503_v62 = vld [vmem:[%s13981_s5 + $0xb0] sm:$0xff] }
 0x18d   : > { %v1426_v1 = vmul.f32 %v10666_v61, %v1397_v0 }
 0x18e   : > { %v10686_v16 = vsub.f32 %v1387_v41, %v1430_v9  ;;  %v10688_v17 = vsub.f32 %v1385_v42, %v1428_v10  ;;  %v9485_v41 = vld [vmem:[%s13981_s5 + $0x8] sm:$0xff] }
 0x18f   : > { %v10669_v2 = vsub.f32 %v1383_v43, %v1426_v1  ;;  %v9489_v42 = vld [vmem:[%s13981_s5 + $0x88] sm:$0xff]  ;;  %1666 = vmatpush.bf16.msra.mxu0 %v9485_v41 }
 0x190   : > { %v1446_v25 = vmul.f32 %v10686_v16, %v10686_v16  ;;  %v1444_v26 = vmul.f32 %v10688_v17, %v10688_v17  ;;  %v9493_v43 = vld [vmem:[%s13981_s5 + $0x108] sm:$0xff]  ;;  %1733 = vmatpush.bf16.msra.mxu1 %v9489_v42 }
 0x191   : > { %v1442_v3 = vmul.f32 %v10669_v2, %v10669_v2  ;;  %1800 = vmatpush.bf16.msra.mxu2 %v9493_v43  ;;  %9634 = vmatpush.bf16.msra.mxu3 %v9493_v43 }
 0x192   : > { %v1462_v30 = vsel %vm1394_vm1, %v1446_v25, 0.0  ;;  %v1456_v31 = vsel %vm1394_vm1, %v1444_v26, 0.0 }
 0x193   : > { %v1412_v4 = vpop.xlane.xlu2 %1411  ;;  %v1406_v5 = vpop.xlane.xlu1 %1405  ;;  %v1450_v6 = vsel %vm1394_vm1, %v1442_v3, 0.0 }
 0x194   : > { %v1429_v7 = vmul.f32 %v10666_v61, %v1406_v5  ;;  %1451 = vadd.xlane.f32.xlu0 %v1450_v6  ;;  %v1400_v8 = vpop.xlane.xlu0 %1399  ;;  %v1431_v24 = vmul.f32 %v10666_v61, %v1412_v4  ;;  %v9502_v4 = vld [vmem:[%s13981_s5 + $0xa8] sm:$0xff] }
 0x195   : > { %v1427_v11 = vmul.f32 %v10666_v61, %v1400_v8  ;;  %1801 = vmatpush.bf16.msra.mxu2 %v9492_v49  ;;  %9635 = vmatpush.bf16.msra.mxu3 %v9492_v49 }
 0x196   : > { %v10678_v12 = vsub.f32 %v1386_v48, %v1429_v7  ;;  %v10706_v29 = vsub.f32 %v1388_v47, %v1431_v24  ;;  %v9484_v47 = vld [vmem:[%s13981_s5] sm:$0xff] }
 0x197   : > { %v10682_v14 = vsub.f32 %v1384_v51, %v1427_v11  ;;  %v9488_v48 = vld [vmem:[%s13981_s5 + $0x80] sm:$0xff]  ;;  %1667 = vmatpush.bf16.msra.mxu0 %v9484_v47  ;;  %v9504_v51 = vld [vmem:[%s13981_s5 + $0xb8] sm:$0xff] }
 0x198   : > { %v1445_v15 = vmul.f32 %v10678_v12, %v10678_v12  ;;  %v1447_v33 = vmul.f32 %v10706_v29, %v10706_v29  ;;  %1734 = vmatpush.bf16.msra.mxu1 %v9488_v48 }
 0x199   : > { %v1443_v19 = vmul.f32 %v10682_v14, %v10682_v14  ;;  %2137 = vmatpush.bf16.msrb.mxu2 %v9504_v51 }
 0x19a   : > { %v1459_v20 = vsel %vm1394_vm1, %v1445_v15, 0.0  ;;  %v1465_v34 = vsel %vm1394_vm1, %v1447_v33, 0.0 }
 0x19b   : > { %v1415_v21 = vpop.xlane.xlu2 %1414  ;;  %1460 = vadd.xlane.f32.xlu2 %v1459_v20  ;;  %v1453_v22 = vsel %vm1394_vm1, %v1443_v19, 0.0  ;;  %v9501_v20 = vld [vmem:[%s13981_s5 + $0xa0] sm:$0xff] }
 0x19c   : > { %v1432_v23 = vmul.f32 %v10666_v61, %v1415_v21  ;;  %1417 = vadd.xlane.f32.xlu0 %v1416_v18  ;;  %1454 = vadd.xlane.f32.xlu1 %v1453_v22 }
 0x19d   : > { %2138 = vmatpush.bf16.msrb.mxu2 %v9503_v62 }
 0x19e   : > { %v10702_v27 = vsub.f32 %v1389_v53, %v1432_v23 }
 0x1a0   : > { %v1448_v28 = vmul.f32 %v10702_v27, %v10702_v27 }
 0x1a1   : > { %2139 = vmatpush.bf16.msrb.mxu2 %v9502_v4 }
 0x1a2   : > { %v1468_v32 = vsel %vm1394_vm1, %v1448_v28, 0.0 }
 0x1a3   : > { %1469 = vadd.xlane.f32.xlu2 %v1468_v32 }
 0x1a4   : > { %1463 = vadd.xlane.f32.xlu0 %v1462_v30  ;;  %1457 = vadd.xlane.f32.xlu1 %v1456_v31 }
 0x1a5   : > { %2140 = vmatpush.bf16.msrb.mxu2 %v9501_v20 }
 0x1ac   : > { %1466 = vadd.xlane.f32.xlu1 %v1465_v34 }
 0x207   : > { %v1452_v44 = vpop.xlane.xlu0 %1451 }
 0x208   : > { %v1474_v45 = vmul.f32 %v1452_v44, %v10666_v61 }
 0x20a   : > { %v1482_v46 = vadd.f32 1e-06, %v1474_v45 }
 0x20c   : > { %9759 = vrsqrt.f32 %v1482_v46  ;;  %vm1496_vm4 = vweird.f32 %v1482_v46 }
 0x20e   : > { %v1461_v50 = vpop.xlane.xlu2 %1460 }
 0x20f   : > { %v1477_v52 = vmul.f32 %v1461_v50, %v10666_v61  ;;  %v1455_v53 = vpop.xlane.xlu1 %1454  ;;  %v1418_v54 = vpop.xlane.xlu0 %1417 }
 0x210   : > { %v1475_v55 = vmul.f32 %v1455_v53, %v10666_v61  ;;  %v1433_v56 = vmul.f32 %v10666_v61, %v1418_v54 }
 0x211   : > { %v1485_v57 = vadd.f32 1e-06, %v1477_v52 }
 0x212   : > { %v9760_v58 = vpop.eup %9759  ;;  %v1483_v59 = vadd.f32 1e-06, %v1475_v55  ;;  %v10732_v60 = vsub.f32 %v10680_v13, %v1433_v56 }
 0x213   : > { %v1491_v63 = vmul.f32 %v9760_v58, %v1482_v46  ;;  %9761 = vrsqrt.f32 %v1485_v57  ;;  %vm1497_vm3 = vweird.f32 %v9760_v58  ;;  %vm1526_vm8 = vweird.f32 %v1485_v57  ;;  %v10760_v46 = vld [vmem:[%s13987_s12] ss:$0 sm:$0xff] }
 0x214   : > { %9763 = vrsqrt.f32 %v1483_v59  ;;  %v1449_v0 = vmul.f32 %v10732_v60, %v10732_v60  ;;  %vm1498_vm5 = vmor %vm1496_vm4, %vm1497_vm3  ;;  %vm1506_vm6 = vweird.f32 %v1483_v59 }
 0x215   : > { %v1492_v1 = vmul.f32 %v9760_v58, %v1491_v63 }
 0x216   : > { %v1471_v3 = vsel %vm1394_vm1, %v1449_v0, 0.0 }
 0x217   : > { %v1493_v5 = vmul.f32 0.5, %v1492_v1  ;;  %v1458_v6 = vpop.xlane.xlu1 %1457  ;;  %1472 = vadd.xlane.f32.xlu0 %v1471_v3  ;;  %v1464_v7 = vpop.xlane.xlu0 %1463 }
 0x218   : > { %v1476_v8 = vmul.f32 %v1458_v6, %v10666_v61  ;;  %v1478_v9 = vmul.f32 %v1464_v7, %v10666_v61 }
 0x219   : > { %v9762_v10 = vpop.eup %9761  ;;  %v1494_v11 = vsub.f32 1.5, %v1493_v5 }
 0x21a   : > { %v9764_v13 = vpop.eup %9763  ;;  %v1521_v15 = vmul.f32 %v9762_v10, %v1485_v57  ;;  %v1484_v18 = vadd.f32 1e-06, %v1476_v8  ;;  %v10741_v19 = vadd.f32 1e-06, %v1478_v9  ;;  %vm1527_vm9 = vweird.f32 %v9762_v10 }
 0x21b   : > { %v1495_v21 = vmul.f32 %v9760_v58, %v1494_v11  ;;  %v1501_v22 = vmul.f32 %v9764_v13, %v1483_v59  ;;  %vm1507_vm7 = vweird.f32 %v9764_v13  ;;  %vm10752_vm11 = vmor %vm1526_vm8, %vm1527_vm9 }
 0x21c   : > { %v1522_v23 = vmul.f32 %v9762_v10, %v1521_v15  ;;  %9765 = vrsqrt.f32 %v1484_v18  ;;  %vm1508_vm10 = vmor %vm1506_vm6, %vm1507_vm7  ;;  %vm1516_vm12 = vweird.f32 %v1484_v18  ;;  %vm1536_vm2 = vweird.f32 %v10741_v19 }
 0x21d   : > { %v1502_v24 = vmul.f32 %v9764_v13, %v1501_v22  ;;  %9767 = vrsqrt.f32 %v10741_v19  ;;  %v1499_v26 = vsel %vm1498_vm5, %v9760_v58, %v1495_v21 }
 0x21e   : > { %v1523_v25 = vmul.f32 0.5, %v1522_v23  ;;  %v1570_v36 = vmul.f32 %v1499_v26, %v10669_v2  ;;  %v9500_v26 = vld [vmem:[%s13981_s5 + $0x38] sm:$0xff] }
 0x21f   : > { %v1503_v28 = vmul.f32 0.5, %v1502_v24  ;;  %v1467_v30 = vpop.xlane.xlu1 %1466  ;;  %2070 = vmatpush.bf16.msrb.mxu1 %v9500_v26 }
 0x220   : > { %v1524_v31 = vsub.f32 1.5, %v1523_v25  ;;  %v1479_v32 = vmul.f32 %v1467_v30, %v10666_v61  ;;  %v1581_v2 = vmul.f32 %v10749_v35, %v1570_v36  ;;  %v9498_v36 = vld [vmem:[%s13981_s5 + $0x28] sm:$0xff] }
 0x221   : > { %v1504_v33 = vsub.f32 1.5, %v1503_v28 }
 0x222   : > { %v9766_v34 = vpop.eup %9765  ;;  %v1525_v38 = vmul.f32 %v9762_v10, %v1524_v31  ;;  %v1487_v41 = vadd.f32 1e-06, %v1479_v32  ;;  %v1592_v53 = vadd.f32 %v10760_v46, %v1581_v2  ;;  %v9499_v32 = vld [vmem:[%s13981_s5 + $0x30] sm:$0xff] }
 0x223   : > { %v9768_v37 = vpop.eup %9767  ;;  %v1505_v39 = vmul.f32 %v9764_v13, %v1504_v33  ;;  %v1511_v40 = vmul.f32 %v9766_v34, %v1484_v18  ;;  %vm1517_vm13 = vweird.f32 %v9766_v34  ;;  %2071 = vmatpush.bf16.msrb.mxu1 %v9499_v32 }
 0x224   : > { %v1531_v43 = vmul.f32 %v9768_v37, %v10741_v19  ;;  %9769 = vrsqrt.f32 %v1487_v41  ;;  %v1529_v48 = vsel %vm10752_vm11, %v9762_v10, %v1525_v38  ;;  %vm1518_vm14 = vmor %vm1516_vm12, %vm1517_vm13  ;;  %vm1546_vm15 = vweird.f32 %v1487_v41 }
 0x225   : > { %v1509_v44 = vsel %vm1508_vm10, %v9764_v13, %v1505_v39  ;;  %v1512_v45 = vmul.f32 %v9766_v34, %v1511_v40  ;;  %v1573_v54 = vmul.f32 %v1529_v48, %v10678_v12  ;;  %vm1537_vm3 = vweird.f32 %v9768_v37  ;;  %v9497_v39 = vld [vmem:[%s13981_s5 + $0x20] sm:$0xff] }
 0x226   : > { %v1571_v47 = vmul.f32 %v1509_v44, %v10682_v14  ;;  %v1532_v50 = vmul.f32 %v9768_v37, %v1531_v43  ;;  %vm1538_vm5 = vmor %vm1536_vm2, %vm1537_vm3  ;;  %vm1831_vm12 = vcmask 130048   ;;  %vm3751_vm13 = vcmask 516096  }
 0x227   : > { %v1513_v49 = vmul.f32 0.5, %v1512_v45  ;;  %v1584_v63 = vmul.f32 %v10749_v35, %v1573_v54  ;;  %2072 = vmatpush.bf16.msrb.mxu1 %v9498_v36 }
 0x228   : > { %v1582_v51 = vmul.f32 %v10749_v35, %v1571_v47  ;;  %v1533_v14 = vmul.f32 0.5, %v1532_v50 }
 0x229   : > { %v1514_v52 = vsub.f32 1.5, %v1513_v49 }
 0x22a   : > { %v1593_v55 = vadd.f32 %v10760_v46, %v1582_v51  ;;  %v9770_v56 = vpop.eup %9769  ;;  %v1534_v12 = vsub.f32 1.5, %v1533_v14 }
 0x22b   : > { %v1515_v57 = vmul.f32 %v9766_v34, %v1514_v52  ;;  %v1541_v59 = vmul.f32 %v9770_v56, %v1487_v41  ;;  %vm1547_vm0 = vweird.f32 %v9770_v56  ;;  %2073 = vmatpush.bf16.msrb.mxu1 %v9497_v39 }
 0x22c   : > { %v10770_v58 = vpack.c.bf16 %v1593_v55, %v1592_v53  ;;  %v1535_v7 = vmul.f32 %v9768_v37, %v1534_v12  ;;  %vm1548_vm4 = vmor %vm1546_vm15, %vm1547_vm0 }
 0x22d   : > { %v1519_v62 = vsel %vm1518_vm14, %v9766_v34, %v1515_v57  ;;  %v1542_v1 = vmul.f32 %v9770_v56, %v1541_v59 }
 0x22e   : > { %v1572_v0 = vmul.f32 %v1519_v62, %v10688_v17  ;;  %8498 = vmatmul.msk.bf16.vlgmr.msra.gmra.mxu0 %vm1394_vm1, %v10770_v58  ;;  %8527 = vmatmul.msk.bf16.vlgmr.msra.gmra.mxu1 %vm1394_vm1, %v10770_v58  ;;  %v1595_v17 = vadd.f32 %v10760_v46, %v1584_v63  ;;  %v1539_v11 = vsel %vm1538_vm5, %v9768_v37, %v1535_v7  ;;  %v9726_v7 = vld [vmem:[%s13988_s26 + $0x4] ss:$0 sm:$0xff] }
 0x22f   : > { %8556 = vmatmul.msk.bf16.vlgmr.msra.gmra.mxu2 %vm1394_vm1, %v10770_v58  ;;  %v1543_v4 = vmul.f32 0.5, %v1542_v1  ;;  %v1574_v15 = vmul.f32 %v1539_v11, %v10686_v16  ;;  %v1470_v16 = vpop.xlane.xlu2 %1469 }
 0x230   : > { %v1583_v3 = vmul.f32 %v10749_v35, %v1572_v0  ;;  %v1480_v22 = vmul.f32 %v1470_v16, %v10666_v61 }
 0x231   : > { %v1544_v6 = vsub.f32 1.5, %v1543_v4  ;;  %v1585_v19 = vmul.f32 %v10749_v35, %v1574_v15 }
 0x232   : > { %v1594_v5 = vadd.f32 %v10760_v46, %v1583_v3  ;;  %v1488_v23 = vadd.f32 1e-06, %v1480_v22 }
 0x233   : > { %v1545_v9 = vmul.f32 %v9770_v56, %v1544_v6 }
 0x234   : > { %v10784_v8 = vpack.c.bf16 %v1595_v17, %v1594_v5  ;;  %9771 = vrsqrt.f32 %v1488_v23  ;;  %vm1556_vm6 = vweird.f32 %v1488_v23 }
 0x235   : > { %v1549_v10 = vsel %vm1548_vm4, %v9770_v56, %v1545_v9 }
 0x236   : > { %8557 = vmatmul.msk.bf16.vlgmr.msra.gmra.mxu3 %vm1394_vm1, %v10784_v8  ;;  %v1575_v13 = vmul.f32 %v1549_v10, %v10706_v29  ;;  %v1596_v29 = vadd.f32 %v10760_v46, %v1585_v19 }
 0x238   : > { %v1586_v18 = vmul.f32 %v10749_v35, %v1575_v13 }
 0x23a   : > { %v1597_v20 = vadd.f32 %v10760_v46, %v1586_v18  ;;  %v9772_v24 = vpop.eup %9771 }
 0x23b   : > { %v1551_v25 = vmul.f32 %v9772_v24, %v1488_v23  ;;  %vm1557_vm7 = vweird.f32 %v9772_v24 }
 0x23c   : > { %v10800_v21 = vpack.c.bf16 %v1597_v20, %v1596_v29  ;;  %vm1558_vm8 = vmor %vm1556_vm6, %vm1557_vm7  ;;  %v9727_v29 = vld [vmem:[%s13988_s26 + $0x8] ss:$0 sm:$0xff] }
 0x23d   : > { %v1552_v28 = vmul.f32 %v9772_v24, %v1551_v25 }
 0x23e   : > { %8499 = vmatmul.msk.bf16.gmra.mxu0 %vm1394_vm1, %v10784_v8  ;;  %8528 = vmatmul.msk.bf16.gmra.mxu1 %vm1394_vm1, %v10784_v8 }
 0x23f   : > { %8622 = vmatmul.msk.bf16.vlgmr.msrb.gmra.mxu2 %vm1394_vm1, %v10770_v58  ;;  %v1553_v34 = vmul.f32 0.5, %v1552_v28 }
 0x241   : > { %v1554_v37 = vsub.f32 1.5, %v1553_v34 }
 0x243   : > { %v1555_v40 = vmul.f32 %v9772_v24, %v1554_v37  ;;  %v9728_v37 = vld [vmem:[%s13988_s26 + $0x5] ss:$0 sm:$0xff] }
 0x245   : > { %v1559_v43 = vsel %vm1558_vm8, %v9772_v24, %v1555_v40 }
 0x246   : > { %8558 = vmatmul.msk.bf16.gmra.mxu3 %vm1394_vm1, %v10800_v21  ;;  %v1576_v2 = vmul.f32 %v1559_v43, %v10702_v27 }
 0x248   : > { %v1587_v49 = vmul.f32 %v10749_v35, %v1576_v2 }
 0x24a   : > { %v1598_v52 = vadd.f32 %v10760_v46, %v1587_v49 }
 0x24e   : > { %8500 = vmatmul.msk.bf16.gmra.mxu0 %vm1394_vm1, %v10800_v21  ;;  %8529 = vmatmul.msk.bf16.gmra.mxu1 %vm1394_vm1, %v10800_v21 }
 0x24f   : > { %8623 = vmatmul.msk.bf16.gmra.mxu2 %vm1394_vm1, %v10784_v8 }
 0x25f   : > { %8624 = vmatmul.msk.bf16.gmra.mxu2 %vm1394_vm1, %v10800_v21 }
 0x28a   : > { %v1473_v30 = vpop.xlane.xlu0 %1472 }
 0x28b   : > { %v1481_v31 = vmul.f32 %v1473_v30, %v10666_v61 }
 0x28d   : > { %v1489_v33 = vadd.f32 1e-06, %v1481_v31 }
 0x28f   : > { %9773 = vrsqrt.f32 %v1489_v33  ;;  %vm1566_vm10 = vweird.f32 %v1489_v33 }
 0x295   : > { %v9774_v38 = vpop.eup %9773 }
 0x296   : > { %v1561_v41 = vmul.f32 %v9774_v38, %v1489_v33  ;;  %vm1567_vm9 = vweird.f32 %v9774_v38 }
 0x297   : > { %vm1568_vm11 = vmor %vm1566_vm10, %vm1567_vm9 }
 0x298   : > { %v1562_v42 = vmul.f32 %v9774_v38, %v1561_v41 }
 0x29a   : > { %v1563_v44 = vmul.f32 0.5, %v1562_v42 }
 0x29c   : > { %v1564_v45 = vsub.f32 1.5, %v1563_v44 }
 0x29e   : > { %v1565_v47 = vmul.f32 %v9774_v38, %v1564_v45 }
 0x2a0   : > { %v1569_v48 = vsel %vm1568_vm11, %v9774_v38, %v1565_v47 }
 0x2a1   : > { %v1577_v50 = vmul.f32 %v1569_v48, %v10732_v60 }
 0x2a3   : > { %v1588_v51 = vmul.f32 %v10749_v35, %v1577_v50 }
 0x2a5   : > { %v1599_v53 = vadd.f32 %v10760_v46, %v1588_v51 }
 0x2a7   : > { %v10824_v54 = vpack.c.bf16 %v1599_v53, %v1598_v52 }
 0x2a9   : > { %8501 = vmatmul.msk.bf16.gmra.mxu0 %vm1394_vm1, %v10824_v54  ;;  %8530 = vmatmul.msk.bf16.gmra.mxu1 %vm1394_vm1, %v10824_v54 }
 0x2aa   : > { %8559 = vmatmul.msk.bf16.gmra.mxu3 %vm1394_vm1, %v10824_v54  ;;  %8625 = vmatmul.msk.bf16.gmra.mxu2 %vm1394_vm1, %v10824_v54 }
 0x2ab   : > { %v10842_v60 = vpop.f32.mrf.mxu1  ;;  %v1669_v23 = vpop.f32.mrf.mxu0 }
 0x2ac   : > { %v1737_v52 = vadd.f32 %v9726_v7, %v10842_v60 }
 0x2b2   : > { %v1803_v27 = vpop.f32.mrf.mxu2 }
 0x2b3   : > { %v1738_v46 = vpop.f32.mrf.mxu1  ;;  %v1671_v43 = vpop.f32.mrf.mxu0  ;;  %v1804_v47 = vadd.f32 %v9727_v29, %v1803_v27  ;;  %v9725_v27 = vld [vmem:[%s13988_s26] ss:$0 sm:$0xff] }
 0x2b4   : > { %v1739_v49 = vadd.f32 %v9726_v7, %v1738_v46  ;;  %v1672_v46 = vadd.f32 %v9725_v27, %v1671_v43 }
 0x2b9   : > { %8593 = vmatmul.msk.bf16.vlgmr.msrb.gmra.mxu1 %vm1394_vm1, %v10770_v58  ;;  %v1808_v14 = vpop.f32.mrf.mxu3 }
 0x2ba   : > { %v1805_v35 = vpop.f32.mrf.mxu2  ;;  %v1809_v40 = vadd.f32 %v9727_v29, %v1808_v14  ;;  %v1827_v14 = vpack.c.bf16 %v1739_v49, %v1737_v52  ;;  %v10920_v52 = vld [vmem:[%s13989_s1 + $0x28] sm:$0xff] }
 0x2bb   : > { %v1741_v56 = vpop.f32.mrf.mxu1  ;;  %v1806_v44 = vadd.f32 %v9727_v29, %v1805_v35 }
 0x2bc   : > { %v1742_v39 = vadd.f32 %v9726_v7, %v1741_v56 }
 0x2bd   : > { %v1973_v51 = vpack.c.bf16 %v1806_v44, %v1804_v47  ;;  %v10904_v44 = vld [vmem:[%s13989_s1 + $0x18] sm:$0xff] }
 0x2c1   : > { %v1810_v63 = vpop.f32.mrf.mxu3 }
 0x2c2   : > { %v10844_v55 = vpop.f32.mrf.mxu2  ;;  %v1811_v36 = vadd.f32 %v9727_v29, %v1810_v63 }
 0x2c3   : > { %v1743_v59 = vpop.f32.mrf.mxu1 }
 0x2c4   : > { %v1744_v32 = vadd.f32 %v9726_v7, %v1743_v59  ;;  %v1974_v2 = vpack.c.bf16 %v1811_v36, %v1809_v40  ;;  %v1674_v59 = vpop.f32.mrf.mxu0  ;;  %v10891_v36 = vld [vmem:[%s13989_s1 + $0x8] sm:$0xff]  ;;  %v10896_v40 = vld [vmem:[%s13989_s1 + $0x10] sm:$0xff] }
 0x2c6   : > { %v1828_v42 = vpack.c.bf16 %v1744_v32, %v1742_v39 }
 0x2c8   : > { %v1848_v50 = vsel %vm1831_vm12, %v1828_v42, 0 }
 0x2c9   : > { %8594 = vmatmul.msk.bf16.gmra.mxu1 %vm1394_vm1, %v10784_v8  ;;  %v1813_v12 = vpop.f32.mrf.mxu3 }
 0x2ca   : > { %v10846_v57 = vpop.f32.mrf.mxu2  ;;  %v1814_v31 = vadd.f32 %v9727_v29, %v1813_v12 }
 0x2cb   : > { %v1746_v0 = vpop.f32.mrf.mxu1 }
 0x2cc   : > { %v1747_v16 = vadd.f32 %v9726_v7, %v1746_v0  ;;  %v1845_v0 = vsel %vm1831_vm12, %v1827_v14, 0 }
 0x2d1   : > { %v1815_v17 = vpop.f32.mrf.mxu3 }
 0x2d2   : > { %v10848_v62 = vpop.f32.mrf.mxu2  ;;  %v1816_v28 = vadd.f32 %v9727_v29, %v1815_v17  ;;  %v1670_v17 = vadd.f32 %v9725_v27, %v1669_v23 }
 0x2d3   : > { %v1748_v3 = vpop.f32.mrf.mxu1  ;;  %v2148_v60 = vadd.f32 %v9728_v37, %v10848_v62 }
 0x2d4   : > { %v1749_v19 = vadd.f32 %v9726_v7, %v1748_v3  ;;  %v1975_v38 = vpack.c.bf16 %v1816_v28, %v1814_v31  ;;  %v10886_v31 = vld [vmem:[%s13989_s1] sm:$0xff] }
 0x2d6   : > { %v1829_v26 = vpack.c.bf16 %v1749_v19, %v1747_v16  ;;  %v9508_v19 = vld [vmem:[%s13981_s5 + $0x138] sm:$0xff] }
 0x2d8   : > { %v1851_v34 = vsel %vm1831_vm12, %v1829_v26, 0 }
 0x2d9   : > { %8595 = vmatmul.msk.bf16.gmra.mxu1 %vm1394_vm1, %v10800_v21 }
 0x2da   : > { %v10850_v1 = vpop.f32.mrf.mxu2 }
 0x2db   : > { %v2150_v12 = vadd.f32 %v9728_v37, %v10850_v1  ;;  %v2143_v1 = vadd.f32 %v9728_v37, %v10844_v55  ;;  %v9505_v55 = vld [vmem:[%s13981_s5 + $0x120] sm:$0xff] }
 0x2e2   : > { %v2152_v4 = vpop.f32.mrf.mxu2 }
 0x2e3   : > { %v2153_v35 = vadd.f32 %v9728_v37, %v2152_v4  ;;  %v1676_v4 = vpop.f32.mrf.mxu0 }
 0x2e9   : > { %8596 = vmatmul.msk.bf16.gmra.mxu1 %vm1394_vm1, %v10824_v54 }
 0x2ea   : > { %v2154_v6 = vpop.f32.mrf.mxu2 }
 0x2eb   : > { %v2155_v53 = vadd.f32 %v9728_v37, %v2154_v6  ;;  %v2234_v6 = vpack.c.bf16 %v2150_v12, %v2148_v60 }
 0x2ed   : > { %v2235_v63 = vpack.c.bf16 %v2155_v53, %v2153_v35  ;;  %v10928_v35 = vld [vmem:[%s13989_s1 + $0x30] sm:$0xff] }
 0x2ef   : > { %v2256_v3 = vsel %vm1831_vm12, %v2235_v63, 0 }
 0x326   : > { %v1751_v5 = vpop.f32.mrf.mxu1 }
 0x327   : > { %v1752_v11 = vadd.f32 %v9726_v7, %v1751_v5  ;;  %v1823_v5 = vpack.c.bf16 %v1672_v46, %v1670_v17 }
 0x32d   : > { %v1818_v9 = vpop.f32.mrf.mxu3  ;;  %v2157_v15 = vpop.f32.mrf.mxu2 }
 0x32e   : > { %v1753_v10 = vpop.f32.mrf.mxu1  ;;  %v1819_v24 = vadd.f32 %v9727_v29, %v1818_v9  ;;  %v2158_v45 = vadd.f32 %v9728_v37, %v2157_v15  ;;  %v2253_v9 = vsel %vm1831_vm12, %v2234_v6, 0  ;;  %v1675_v15 = vadd.f32 %v9725_v27, %v1674_v59 }
 0x32f   : > { %v1754_v13 = vadd.f32 %v9726_v7, %v1753_v10  ;;  %v2145_v7 = vadd.f32 %v9728_v37, %v10846_v57  ;;  %v9507_v57 = vld [vmem:[%s13981_s5 + $0x130] sm:$0xff] }
 0x331   : > { %v1830_v18 = vpack.c.bf16 %v1754_v13, %v1752_v11  ;;  %v2233_v10 = vpack.c.bf16 %v2145_v7, %v2143_v1  ;;  %v1677_v11 = vadd.f32 %v9725_v27, %v1676_v4  ;;  %v1679_v13 = vpop.f32.mrf.mxu0  ;;  %v9730_v1 = vld [vmem:[%s13988_s26 + $0x9] ss:$0 sm:$0xff] }
 0x333   : > { %v1854_v20 = vsel %vm1831_vm12, %v1830_v18, 0  ;;  %v2250_v62 = vsel %vm1831_vm12, %v2233_v10, 0  ;;  %v1824_v18 = vpack.c.bf16 %v1677_v11, %v1675_v15 }
 0x334   : > { %1860 = vmatpush.bf16.xpose.msrb.mxu3 %v1854_v20 }
 0x335   : > { %v1820_v22 = vpop.f32.mrf.mxu3  ;;  %v2159_v33 = vpop.f32.mrf.mxu2 }
 0x336   : > { %v1821_v25 = vadd.f32 %v9727_v29, %v1820_v22  ;;  %v2160_v41 = vadd.f32 %v9728_v37, %v2159_v33  ;;  %v9506_v29 = vld [vmem:[%s13981_s5 + $0x128] sm:$0xff]  ;;  %v1680_v22 = vadd.f32 %v9725_v27, %v1679_v13 }
 0x338   : > { %v1976_v30 = vpack.c.bf16 %v1821_v25, %v1819_v24  ;;  %v2236_v48 = vpack.c.bf16 %v2160_v41, %v2158_v45 }
 0x339   : > { %v1681_v20 = vpop.f32.mrf.mxu0 }
 0x33a   : > { %1997 = vmatpush.bf16.msrb.mxu0 %v1976_v30  ;;  %v2259_v56 = vsel %vm1831_vm12, %v2236_v48, 0  ;;  %v1682_v16 = vadd.f32 %v9725_v27, %v1681_v20  ;;  %v10912_v48 = vld [vmem:[%s13989_s1 + $0x20] sm:$0xff] }
 0x33c   : > { %1861 = vmatpush.bf16.xpose.msrb.mxu3 %v1851_v34  ;;  %v1825_v24 = vpack.c.bf16 %v1682_v16, %v1680_v22 }
 0x33e   : > { %1998 = vmatpush.bf16.msrb.mxu0 %v1975_v38 }
 0x341   : > { %v1684_v23 = vpop.f32.mrf.mxu0 }
 0x342   : > { %1999 = vmatpush.bf16.msrb.mxu0 %v1974_v2  ;;  %v1685_v28 = vadd.f32 %v9725_v27, %v1684_v23 }
 0x344   : > { %1862 = vmatpush.bf16.xpose.msrb.mxu3 %v1848_v50 }
 0x346   : > { %2000 = vmatpush.bf16.msrb.mxu0 %v1973_v51 }
 0x349   : > { %v1686_v25 = vpop.f32.mrf.mxu0 }
 0x34a   : > { %2265 = vmatpush.bf16.xpose.msra.mxu0 %v2259_v56  ;;  %v1687_v26 = vadd.f32 %v9725_v27, %v1686_v25 }
 0x34c   : > { %1863 = vmatpush.bf16.xpose.msrb.mxu3 %v1845_v0  ;;  %v1826_v30 = vpack.c.bf16 %v1687_v26, %v1685_v28  ;;  %v10936_v0 = vld [vmem:[%s13989_s1 + $0x38] sm:$0xff] }
 0x352   : > { %2266 = vmatpush.bf16.xpose.msra.mxu0 %v2256_v3 }
 0x353   : > { %8560 = vmatmul.msk.bf16.vlgmr.msrb.gmra.mxu3 %vm1831_vm12, %v1823_v5 }
 0x354   : > { %2204 = vmatpush.bf16.msra.mxu3 %v9508_v19 }
 0x358   : > { %2205 = vmatpush.bf16.msra.mxu3 %v9507_v57 }
 0x35a   : > { %2267 = vmatpush.bf16.xpose.msra.mxu0 %v2253_v9 }
 0x35c   : > { %2206 = vmatpush.bf16.msra.mxu3 %v9506_v29 }
 0x360   : > { %2207 = vmatpush.bf16.msra.mxu3 %v9505_v55 }
 0x362   : > { %2268 = vmatpush.bf16.xpose.msra.mxu0 %v2250_v62 }
 0x363   : > { %8561 = vmatmul.msk.bf16.gmra.mxu3 %vm1831_vm12, %v1824_v18 }
 0x373   : > { %8562 = vmatmul.msk.bf16.gmra.mxu3 %vm1831_vm12, %v1825_v24 }
 0x383   : > { %8563 = vmatmul.msk.bf16.gmra.mxu3 %vm1831_vm12, %v1826_v30 }
 0x393   : > { %8651 = vmatmul.msk.bf16.vlgmr.msra.gmra.mxu3 %vm1394_vm1, %v10770_v58 }
 0x3a3   : > { %8652 = vmatmul.msk.bf16.gmra.mxu3 %vm1394_vm1, %v10784_v8 }
 0x3b3   : > { %8653 = vmatmul.msk.bf16.gmra.mxu3 %vm1394_vm1, %v10800_v21 }
 0x3c3   : > { %8654 = vmatmul.msk.bf16.gmra.mxu3 %vm1394_vm1, %v10824_v54 }
 0x3d6   : > { %v1865_v32 = vpop.f32.mrf.mxu3 }
 0x3d7   : > { %v1866_v33 = vadd.f32 %v1865_v32, %v10886_v31 }
 0x3d9   : > { %v1885_v34 = vsel %vm1394_vm1, %v1866_v33, -inf }
 0x3da   : > { %1886 = vmax.xlane.f32.xlu1 %v1885_v34 }
 0x3de   : > { %v1867_v37 = vpop.f32.mrf.mxu3 }
 0x3df   : > { %v1868_v38 = vadd.f32 %v1867_v37, %v10891_v36 }
 0x3e1   : > { %v1888_v39 = vsel %vm1394_vm1, %v1868_v38, -inf }
 0x3e2   : > { %1889 = vmax.xlane.f32.xlu2 %v1888_v39 }
 0x3e6   : > { %v1870_v41 = vpop.f32.mrf.mxu3 }
 0x3e7   : > { %v10899_v42 = vadd.f32 %v1870_v41, %v10896_v40 }
 0x3e9   : > { %v1891_v43 = vsel %vm1394_vm1, %v10899_v42, -inf }
 0x3ea   : > { %1892 = vmax.xlane.f32.xlu0 %v1891_v43 }
 0x3ee   : > { %v1872_v45 = vpop.f32.mrf.mxu3 }
 0x3ef   : > { %v10907_v2 = vadd.f32 %v1872_v45, %v10904_v44 }
 0x3f1   : > { %v1894_v47 = vsel %vm1394_vm1, %v10907_v2, -inf }
 0x3f2   : > { %1895 = vmax.xlane.f32.xlu1 %v1894_v47 }
 0x3f6   : > { %v1875_v49 = vpop.f32.mrf.mxu3 }
 0x3f7   : > { %v10915_v50 = vadd.f32 %v1875_v49, %v10912_v48 }
 0x3f9   : > { %v1897_v51 = vsel %vm1394_vm1, %v10915_v50, -inf }
 0x3fa   : > { %1898 = vmax.xlane.f32.xlu2 %v1897_v51 }
 0x3fe   : > { %v1877_v53 = vpop.f32.mrf.mxu3 }
 0x3ff   : > { %v10923_v56 = vadd.f32 %v1877_v53, %v10920_v52 }
 0x401   : > { %v1900_v14 = vsel %vm1394_vm1, %v10923_v56, -inf }
 0x402   : > { %1901 = vmax.xlane.f32.xlu0 %v1900_v14 }
 0x406   : > { %v1880_v59 = vpop.f32.mrf.mxu3 }
 0x407   : > { %v10931_v63 = vadd.f32 %v1880_v59, %v10928_v35 }
 0x409   : > { %v1903_v27 = vsel %vm1394_vm1, %v10931_v63, -inf }
 0x40a   : > { %1904 = vmax.xlane.f32.xlu1 %v1903_v27 }
 0x40e   : > { %v1882_v46 = vpop.f32.mrf.mxu3 }
 0x40f   : > { %v10939_v12 = vadd.f32 %v1882_v46, %v10936_v0 }
 0x411   : > { %v1906_v3 = vsel %vm1394_vm1, %v10939_v12, -inf }
 0x412   : > { %1907 = vmax.xlane.f32.xlu2 %v1906_v3 }
 0x416   : > { %v2209_v17 = vpop.f32.mrf.mxu3 }
 0x417   : > { %v2210_v32 = vadd.f32 %v9730_v1, %v2209_v17 }
 0x41e   : > { %v2211_v60 = vpop.f32.mrf.mxu3 }
 0x41f   : > { %v2212_v26 = vadd.f32 %v9730_v1, %v2211_v60 }
 0x426   : > { %v2214_v5 = vpop.f32.mrf.mxu3 }
 0x427   : > { %v2215_v23 = vadd.f32 %v9730_v1, %v2214_v5 }
 0x42e   : > { %v2216_v6 = vpop.f32.mrf.mxu3 }
 0x42f   : > { %v2217_v29 = vadd.f32 %v9730_v1, %v2216_v6 }
 0x431   : > { %v2379_v28 = vpack.c.bf16 %v2217_v29, %v2215_v23 }
 0x436   : > { %v2219_v4 = vpop.f32.mrf.mxu3 }
 0x437   : > { %v2220_v20 = vadd.f32 %v9730_v1, %v2219_v4 }
 0x43e   : > { %v2221_v7 = vpop.f32.mrf.mxu3 }
 0x43f   : > { %v2222_v19 = vadd.f32 %v9730_v1, %v2221_v7 }
 0x441   : > { %v2380_v16 = vpack.c.bf16 %v2222_v19, %v2220_v20 }
 0x446   : > { %v2224_v9 = vpop.f32.mrf.mxu3 }
 0x447   : > { %v2225_v62 = vadd.f32 %v9730_v1, %v2224_v9 }
 0x44d   : > { %v1887_v10 = vpop.xlane.xlu1 %1886 }
 0x44e   : > { %v1909_v11 = vsub.f32 %v1866_v33, %v1887_v10  ;;  %v2226_v13 = vpop.f32.mrf.mxu3  ;;  %v2378_v33 = vpack.c.bf16 %v2212_v26, %v2210_v32 }
 0x44f   : > { %v2227_v15 = vadd.f32 %v9730_v1, %v2226_v13 }
 0x450   : > { %v1917_v18 = vmul.f32 1.442695, %v1909_v11 }
 0x451   : > { %v2381_v57 = vpack.c.bf16 %v2227_v15, %v2225_v62 }
 0x452   : > { %9775 = vpow2.f32 %v1917_v18 }
 0x453   : > { %2402 = vmatpush.bf16.msra.mxu1 %v2381_v57 }
 0x455   : > { %v1890_v55 = vpop.xlane.xlu2 %1889 }
 0x456   : > { %v1910_v22 = vsub.f32 %v1868_v38, %v1890_v55 }
 0x457   : > { %2403 = vmatpush.bf16.msra.mxu1 %v2380_v16 }
 0x458   : > { %v9776_v24 = vpop.eup %9775  ;;  %v1919_v25 = vmul.f32 1.442695, %v1910_v22 }
 0x459   : > { %v1933_v30 = vsel %vm1394_vm1, %v9776_v24, 0.0 }
 0x45a   : > { %9777 = vpow2.f32 %v1919_v25  ;;  %1934 = vadd.xlane.f32.xlu0 %v1933_v30 }
 0x45b   : > { %2404 = vmatpush.bf16.msra.mxu1 %v2379_v28 }
 0x45d   : > { %v1893_v34 = vpop.xlane.xlu0 %1892 }
 0x45e   : > { %v1911_v37 = vsub.f32 %v10899_v42, %v1893_v34 }
 0x45f   : > { %2405 = vmatpush.bf16.msra.mxu1 %v2378_v33 }
 0x460   : > { %v9778_v39 = vpop.eup %9777  ;;  %v1921_v41 = vmul.f32 1.442695, %v1911_v37 }
 0x461   : > { %v1936_v38 = vsel %vm1394_vm1, %v9778_v39, 0.0 }
 0x462   : > { %9779 = vpow2.f32 %v1921_v41  ;;  %1937 = vadd.xlane.f32.xlu1 %v1936_v38  ;;  %v2075_v41 = vpop.f32.mrf.mxu1 }
 0x465   : > { %v1896_v43 = vpop.xlane.xlu1 %1895 }
 0x466   : > { %v1912_v45 = vsub.f32 %v10907_v2, %v1896_v43 }
 0x468   : > { %v9780_v47 = vpop.eup %9779  ;;  %v1923_v49 = vmul.f32 1.442695, %v1912_v45 }
 0x469   : > { %v1939_v51 = vsel %vm1394_vm1, %v9780_v47, 0.0 }
 0x46a   : > { %9781 = vpow2.f32 %v1923_v49  ;;  %1940 = vadd.xlane.f32.xlu2 %v1939_v51 }
 0x46d   : > { %v1899_v53 = vpop.xlane.xlu2 %1898 }
 0x46e   : > { %v1913_v14 = vsub.f32 %v10915_v50, %v1899_v53 }
 0x470   : > { %v9782_v42 = vpop.eup %9781  ;;  %v1925_v59 = vmul.f32 1.442695, %v1913_v14 }
 0x471   : > { %v1942_v27 = vsel %vm1394_vm1, %v9782_v42, 0.0 }
 0x472   : > { %9783 = vpow2.f32 %v1925_v59  ;;  %1943 = vadd.xlane.f32.xlu0 %v1942_v27 }
 0x475   : > { %v1902_v46 = vpop.xlane.xlu0 %1901 }
 0x476   : > { %v1914_v3 = vsub.f32 %v10923_v56, %v1902_v46 }
 0x478   : > { %v9784_v17 = vpop.eup %9783  ;;  %v1927_v2 = vmul.f32 1.442695, %v1914_v3 }
 0x479   : > { %v1945_v60 = vsel %vm1394_vm1, %v9784_v17, 0.0 }
 0x47a   : > { %9785 = vpow2.f32 %v1927_v2  ;;  %1946 = vadd.xlane.f32.xlu1 %v1945_v60 }
 0x47d   : > { %v1905_v5 = vpop.xlane.xlu1 %1904 }
 0x47e   : > { %v1915_v6 = vsub.f32 %v10931_v63, %v1905_v5 }
 0x480   : > { %v9786_v4 = vpop.eup %9785  ;;  %v1929_v50 = vmul.f32 1.442695, %v1915_v6  ;;  %v9513_v6 = vld [vmem:[%s13981_s5 + $0x58] sm:$0xff] }
 0x481   : > { %v1948_v7 = vsel %vm1394_vm1, %v9786_v4, 0.0 }
 0x482   : > { %9787 = vpow2.f32 %v1929_v50  ;;  %1949 = vadd.xlane.f32.xlu2 %v1948_v7  ;;  %v9511_v7 = vld [vmem:[%s13981_s5 + $0x48] sm:$0xff] }
 0x485   : > { %v1908_v9 = vpop.xlane.xlu2 %1907 }
 0x486   : > { %v1916_v1 = vsub.f32 %v10939_v12, %v1908_v9 }
 0x488   : > { %v9788_v10 = vpop.eup %9787  ;;  %v1931_v56 = vmul.f32 1.442695, %v1916_v1 }
 0x489   : > { %v1951_v11 = vsel %vm1394_vm1, %v9788_v10, 0.0 }
 0x48a   : > { %9789 = vpow2.f32 %v1931_v56  ;;  %1952 = vadd.xlane.f32.xlu0 %v1951_v11 }
 0x490   : > { %v9790_v13 = vpop.eup %9789 }
 0x491   : > { %v1954_v62 = vsel %vm1394_vm1, %v9790_v13, 0.0 }
 0x492   : > { %1955 = vadd.xlane.f32.xlu1 %v1954_v62 }
 0x4cd   : > { %v1935_v63 = vpop.xlane.xlu0 %1934 }
 0x4ce   : > { %9791 = vrcp.f32 %v1935_v63 }
 0x4d4   : > { %v9792_v18 = vpop.eup %9791 }
 0x4d5   : > { %v1938_v15 = vpop.xlane.xlu1 %1937  ;;  %v1965_v57 = vmul.f32 %v9792_v18, %v9776_v24 }
 0x4d6   : > { %9793 = vrcp.f32 %v1938_v15 }
 0x4dc   : > { %v9794_v19 = vpop.eup %9793 }
 0x4dd   : > { %v1966_v20 = vmul.f32 %v9794_v19, %v9778_v39  ;;  %v1941_v12 = vpop.xlane.xlu2 %1940 }
 0x4de   : > { %9795 = vrcp.f32 %v1941_v12 }
 0x4df   : > { %v1977_v29 = vpack.c.bf16 %v1966_v20, %v1965_v57 }
 0x4e1   : > { %8564 = vmatmul.msk.bf16.vlgmr.msrb.gmra.mxu0 %vm1394_vm1, %v1977_v29 }
 0x4e2   : > { %2570 = vmatpush.bf16.msrb.mxu0 %v9513_v6 }
 0x4e4   : > { %v9796_v55 = vpop.eup %9795 }
 0x4e5   : > { %v1944_v16 = vpop.xlane.xlu0 %1943  ;;  %v1967_v23 = vmul.f32 %v9796_v55, %v9780_v47  ;;  %v2077_v47 = vpop.f32.mrf.mxu1 }
 0x4e6   : > { %9797 = vrcp.f32 %v1944_v16 }
 0x4ec   : > { %v9798_v22 = vpop.eup %9797 }
 0x4ed   : > { %v1968_v25 = vmul.f32 %v9798_v22, %v9782_v42  ;;  %v1947_v28 = vpop.xlane.xlu1 %1946  ;;  %v2080_v14 = vpop.f32.mrf.mxu1  ;;  %v9729_v42 = vld [vmem:[%s13988_s26 + $0x1] ss:$0 sm:$0xff] }
 0x4ee   : > { %9799 = vrcp.f32 %v1947_v28  ;;  %v2078_v59 = vadd.f32 %v9729_v42, %v2077_v47  ;;  %v2076_v27 = vadd.f32 %v9729_v42, %v2075_v41  ;;  %v2081_v60 = vadd.f32 %v9729_v42, %v2080_v14 }
 0x4ef   : > { %v1978_v26 = vpack.c.bf16 %v1968_v25, %v1967_v23 }
 0x4f0   : > { %v2229_v46 = vpack.c.bf16 %v2078_v59, %v2076_v27 }
 0x4f1   : > { %8565 = vmatmul.msk.bf16.gmra.mxu0 %vm1394_vm1, %v1978_v26 }
 0x4f4   : > { %v9800_v24 = vpop.eup %9799 }
 0x4f5   : > { %v1950_v30 = vpop.xlane.xlu2 %1949  ;;  %v1969_v33 = vmul.f32 %v9800_v24, %v9784_v17  ;;  %v2082_v3 = vpop.f32.mrf.mxu1 }
 0x4f6   : > { %9801 = vrcp.f32 %v1950_v30  ;;  %v2083_v2 = vadd.f32 %v9729_v42, %v2082_v3 }
 0x4f8   : > { %v2230_v5 = vpack.c.bf16 %v2083_v2, %v2081_v60 }
 0x4fc   : > { %v9802_v32 = vpop.eup %9801 }
 0x4fd   : > { %v1970_v34 = vmul.f32 %v9802_v32, %v9786_v4  ;;  %v1953_v39 = vpop.xlane.xlu0 %1952  ;;  %v2085_v17 = vpop.f32.mrf.mxu1  ;;  %v9512_v4 = vld [vmem:[%s13981_s5 + $0x50] sm:$0xff] }
 0x4fe   : > { %9803 = vrcp.f32 %v1953_v39  ;;  %2571 = vmatpush.bf16.msrb.mxu0 %v9512_v4  ;;  %v2086_v1 = vadd.f32 %v9729_v42, %v2085_v17 }
 0x4ff   : > { %v1979_v37 = vpack.c.bf16 %v1970_v34, %v1969_v33 }
 0x501   : > { %8566 = vmatmul.msk.bf16.gmra.mxu0 %vm1394_vm1, %v1979_v37 }
 0x502   : > { %2572 = vmatpush.bf16.msrb.mxu0 %v9511_v7 }
 0x504   : > { %v9804_v43 = vpop.eup %9803 }
 0x505   : > { %v1956_v38 = vpop.xlane.xlu1 %1955  ;;  %v1971_v49 = vmul.f32 %v9804_v43, %v9788_v10  ;;  %v2087_v50 = vpop.f32.mrf.mxu1  ;;  %v9510_v10 = vld [vmem:[%s13981_s5 + $0x40] sm:$0xff] }
 0x506   : > { %9805 = vrcp.f32 %v1956_v38  ;;  %v2088_v9 = vadd.f32 %v9729_v42, %v2087_v50  ;;  %2573 = vmatpush.bf16.msrb.mxu0 %v9510_v10 }
 0x508   : > { %v2231_v11 = vpack.c.bf16 %v2088_v9, %v2086_v1 }
 0x50c   : > { %v9806_v45 = vpop.eup %9805 }
 0x50d   : > { %v1972_v51 = vmul.f32 %v9806_v45, %v9790_v13  ;;  %v2090_v56 = vpop.f32.mrf.mxu1  ;;  %v9496_v13 = vld [vmem:[%s13990_s11] sm:$0xff] }
 0x50e   : > { %2506 = vmatpush.bf16.msrb.mxu3 %v9496_v13  ;;  %v2091_v15 = vadd.f32 %v9729_v42, %v2090_v56 }
 0x50f   : > { %v1980_v53 = vpack.c.bf16 %v1972_v51, %v1971_v49 }
 0x511   : > { %8567 = vmatmul.msk.bf16.gmra.mxu0 %vm1394_vm1, %v1980_v53 }
 0x515   : > { %v2092_v62 = vpop.f32.mrf.mxu1 }
 0x516   : > { %v2093_v63 = vadd.f32 %v9729_v42, %v2092_v62 }
 0x518   : > { %v2232_v18 = vpack.c.bf16 %v2093_v63, %v2091_v15 }
 0x521   : > { %8655 = vmatmul.msk.bf16.vlgmr.msra.gmra.mxu0 %vm1831_vm12, %v2229_v46 }
 0x531   : > { %8656 = vmatmul.msk.bf16.gmra.mxu0 %vm1831_vm12, %v2230_v5 }
 0x541   : > { %8657 = vmatmul.msk.bf16.gmra.mxu0 %vm1831_vm12, %v2231_v11 }
 0x551   : > { %8658 = vmatmul.msk.bf16.gmra.mxu0 %vm1831_vm12, %v2232_v18 }
 0x55e   : > { %v2002_v19 = vpop.f32.mrf.mxu0 }
 0x561   : > { %8706 = vmatmul.msk.bf16.vlgmr.msrb.gmra.mxu0 %vm1394_vm1, %v10770_v58 }
 0x566   : > { %v2004_v57 = vpop.f32.mrf.mxu0 }
 0x567   : > { %v2024_v20 = vpack.c.bf16 %v2004_v57, %v2002_v19 }
 0x569   : > { %8677 = vmatmul.msk.bf16.vlgmr.msrb.gmra.mxu3 %vm1831_vm12, %v2024_v20 }
 0x56e   : > { %v2007_v29 = vpop.f32.mrf.mxu0 }
 0x571   : > { %8707 = vmatmul.msk.bf16.gmra.mxu0 %vm1394_vm1, %v10784_v8 }
 0x576   : > { %v2009_v12 = vpop.f32.mrf.mxu0 }
 0x577   : > { %v2025_v16 = vpack.c.bf16 %v2009_v12, %v2007_v29 }
 0x579   : > { %8678 = vmatmul.msk.bf16.gmra.mxu3 %vm1831_vm12, %v2025_v16 }
 0x57e   : > { %v2012_v55 = vpop.f32.mrf.mxu0 }
 0x581   : > { %8708 = vmatmul.msk.bf16.gmra.mxu0 %vm1394_vm1, %v10800_v21 }
 0x586   : > { %v2014_v22 = vpop.f32.mrf.mxu0 }
 0x587   : > { %v2026_v23 = vpack.c.bf16 %v2014_v22, %v2012_v55 }
 0x589   : > { %8679 = vmatmul.msk.bf16.gmra.mxu3 %vm1831_vm12, %v2026_v23 }
 0x58e   : > { %v2017_v25 = vpop.f32.mrf.mxu0 }
 0x591   : > { %8709 = vmatmul.msk.bf16.gmra.mxu0 %vm1394_vm1, %v10824_v54 }
 0x596   : > { %v2019_v26 = vpop.f32.mrf.mxu0 }
 0x597   : > { %v2027_v28 = vpack.c.bf16 %v2019_v26, %v2017_v25 }
 0x599   : > { %8680 = vmatmul.msk.bf16.gmra.mxu3 %vm1831_vm12, %v2027_v28 }
 0x59e   : > { %v2270_v30 = vpop.f32.mrf.mxu0 }
 0x59f   : > { %v2271_v24 = vadd.f32 %v2270_v30, %v10886_v31 }
 0x5a1   : > { %v2290_v32 = vsel %vm1394_vm1, %v2271_v24, -inf }
 0x5a2   : > { %2291 = vmax.xlane.f32.xlu2 %v2290_v32 }
 0x5a6   : > { %v2272_v33 = vpop.f32.mrf.mxu0 }
 0x5a7   : > { %v2273_v34 = vadd.f32 %v2272_v33, %v10891_v36 }
 0x5a9   : > { %v2293_v37 = vsel %vm1394_vm1, %v2273_v34, -inf }
 0x5aa   : > { %2294 = vmax.xlane.f32.xlu0 %v2293_v37 }
 0x5ae   : > { %v2275_v39 = vpop.f32.mrf.mxu0 }
 0x5af   : > { %v2276_v41 = vadd.f32 %v2275_v39, %v10896_v40 }
 0x5b1   : > { %v2296_v38 = vsel %vm1394_vm1, %v2276_v41, -inf }
 0x5b2   : > { %2297 = vmax.xlane.f32.xlu1 %v2296_v38 }
 0x5b6   : > { %v2277_v43 = vpop.f32.mrf.mxu0 }
 0x5b7   : > { %v2278_v45 = vadd.f32 %v2277_v43, %v10904_v44 }
 0x5b9   : > { %v2299_v47 = vsel %vm1394_vm1, %v2278_v45, -inf }
 0x5ba   : > { %2300 = vmax.xlane.f32.xlu2 %v2299_v47 }
 0x5be   : > { %v2280_v49 = vpop.f32.mrf.mxu0 }
 0x5bf   : > { %v2281_v51 = vadd.f32 %v2280_v49, %v10912_v48 }
 0x5c1   : > { %v2302_v53 = vsel %vm1394_vm1, %v2281_v51, -inf }
 0x5c2   : > { %2303 = vmax.xlane.f32.xlu0 %v2302_v53 }
 0x5c6   : > { %v2282_v14 = vpop.f32.mrf.mxu0 }
 0x5c7   : > { %v2283_v42 = vadd.f32 %v2282_v14, %v10920_v52 }
 0x5c9   : > { %v2305_v59 = vsel %vm1394_vm1, %v2283_v42, -inf }
 0x5ca   : > { %2306 = vmax.xlane.f32.xlu1 %v2305_v59 }
 0x5ce   : > { %v2285_v27 = vpop.f32.mrf.mxu0 }
 0x5cf   : > { %v2286_v46 = vadd.f32 %v2285_v27, %v10928_v35 }
 0x5d1   : > { %v2308_v3 = vsel %vm1394_vm1, %v2286_v46, -inf }
 0x5d2   : > { %2309 = vmax.xlane.f32.xlu2 %v2308_v3 }
 0x5d6   : > { %v2287_v17 = vpop.f32.mrf.mxu0 }
 0x5d7   : > { %v2288_v2 = vadd.f32 %v2287_v17, %v10936_v0  ;;  %v9517_v17 = vld [vmem:[%s13981_s5 + $0xd8] sm:$0xff] }
 0x5d8   : > { %2637 = vmatpush.bf16.msrb.mxu1 %v9517_v17 }
 0x5d9   : > { %v2311_v60 = vsel %vm1394_vm1, %v2288_v2, -inf }
 0x5da   : > { %2312 = vmax.xlane.f32.xlu0 %v2311_v60 }
 0x615   : > { %v2292_v5 = vpop.xlane.xlu2 %2291 }
 0x616   : > { %v2314_v6 = vsub.f32 %v2271_v24, %v2292_v5 }
 0x618   : > { %v2322_v4 = vmul.f32 1.442695, %v2314_v6 }
 0x61a   : > { %9807 = vpow2.f32 %v2322_v4 }
 0x61d   : > { %v2295_v50 = vpop.xlane.xlu0 %2294 }
 0x61e   : > { %v2315_v7 = vsub.f32 %v2273_v34, %v2295_v50 }
 0x620   : > { %v9808_v9 = vpop.eup %9807  ;;  %v2324_v1 = vmul.f32 1.442695, %v2315_v7 }
 0x621   : > { %v2338_v10 = vsel %vm1394_vm1, %v9808_v9, 0.0 }
 0x622   : > { %9809 = vpow2.f32 %v2324_v1  ;;  %2339 = vadd.xlane.f32.xlu1 %v2338_v10  ;;  %v9515_v1 = vld [vmem:[%s13981_s5 + $0xc8] sm:$0xff] }
 0x625   : > { %v2298_v56 = vpop.xlane.xlu1 %2297 }
 0x626   : > { %v2316_v11 = vsub.f32 %v2276_v41, %v2298_v56  ;;  %v9514_v56 = vld [vmem:[%s13981_s5 + $0xc0] sm:$0xff] }
 0x628   : > { %v9810_v13 = vpop.eup %9809  ;;  %v2326_v62 = vmul.f32 1.442695, %v2316_v11 }
 0x629   : > { %v2341_v63 = vsel %vm1394_vm1, %v9810_v13, 0.0 }
 0x62a   : > { %9811 = vpow2.f32 %v2326_v62  ;;  %2342 = vadd.xlane.f32.xlu2 %v2341_v63 }
 0x62d   : > { %v2301_v15 = vpop.xlane.xlu2 %2300 }
 0x62e   : > { %v2317_v18 = vsub.f32 %v2278_v45, %v2301_v15 }
 0x630   : > { %v9812_v19 = vpop.eup %9811  ;;  %v2328_v57 = vmul.f32 1.442695, %v2317_v18 }
 0x631   : > { %v2344_v20 = vsel %vm1394_vm1, %v9812_v19, 0.0 }
 0x632   : > { %9813 = vpow2.f32 %v2328_v57  ;;  %2345 = vadd.xlane.f32.xlu0 %v2344_v20 }
 0x635   : > { %v2304_v29 = vpop.xlane.xlu0 %2303 }
 0x636   : > { %v2318_v12 = vsub.f32 %v2281_v51, %v2304_v29 }
 0x638   : > { %v9814_v16 = vpop.eup %9813  ;;  %v2330_v55 = vmul.f32 1.442695, %v2318_v12 }
 0x639   : > { %v2347_v22 = vsel %vm1394_vm1, %v9814_v16, 0.0 }
 0x63a   : > { %9815 = vpow2.f32 %v2330_v55  ;;  %2348 = vadd.xlane.f32.xlu1 %v2347_v22  ;;  %v9509_v55 = vld [vmem:[%s13990_s11 + $0x8] sm:$0xff] }
 0x63b   : > { %2459 = vmatpush.bf16.msra.mxu2 %v9509_v55 }
 0x63d   : > { %v2307_v23 = vpop.xlane.xlu1 %2306 }
 0x63e   : > { %v2319_v25 = vsub.f32 %v2283_v42, %v2307_v23 }
 0x640   : > { %v9816_v26 = vpop.eup %9815  ;;  %v2332_v28 = vmul.f32 1.442695, %v2319_v25 }
 0x641   : > { %v2350_v30 = vsel %vm1394_vm1, %v9816_v26, 0.0 }
 0x642   : > { %9817 = vpow2.f32 %v2332_v28  ;;  %2351 = vadd.xlane.f32.xlu2 %v2350_v30 }
 0x645   : > { %v2310_v24 = vpop.xlane.xlu2 %2309 }
 0x646   : > { %v2320_v32 = vsub.f32 %v2286_v46, %v2310_v24  ;;  %v9521_v24 = vld [vmem:[%s13981_s5 + $0x158] sm:$0xff] }
 0x647   : > { %2704 = vmatpush.bf16.msrb.mxu2 %v9521_v24 }
 0x648   : > { %v9818_v33 = vpop.eup %9817  ;;  %v2334_v34 = vmul.f32 1.442695, %v2320_v32  ;;  %v9520_v32 = vld [vmem:[%s13981_s5 + $0x150] sm:$0xff] }
 0x649   : > { %v2353_v37 = vsel %vm1394_vm1, %v9818_v33, 0.0 }
 0x64a   : > { %9819 = vpow2.f32 %v2334_v34  ;;  %2354 = vadd.xlane.f32.xlu0 %v2353_v37  ;;  %v9519_v34 = vld [vmem:[%s13981_s5 + $0x148] sm:$0xff]  ;;  %v9518_v37 = vld [vmem:[%s13981_s5 + $0x140] sm:$0xff] }
 0x64b   : > { %2705 = vmatpush.bf16.msrb.mxu2 %v9520_v32 }
 0x64d   : > { %v2313_v39 = vpop.xlane.xlu0 %2312 }
 0x64e   : > { %v2321_v41 = vsub.f32 %v2288_v2, %v2313_v39 }
 0x64f   : > { %2706 = vmatpush.bf16.msrb.mxu2 %v9519_v34 }
 0x650   : > { %v9820_v38 = vpop.eup %9819  ;;  %v2336_v43 = vmul.f32 1.442695, %v2321_v41 }
 0x651   : > { %v2356_v45 = vsel %vm1394_vm1, %v9820_v38, 0.0 }
 0x652   : > { %9821 = vpow2.f32 %v2336_v43  ;;  %2357 = vadd.xlane.f32.xlu1 %v2356_v45 }
 0x653   : > { %2707 = vmatpush.bf16.msrb.mxu2 %v9518_v37  ;;  %v9530_v37 = vld [vmem:[%s13981_s5 + $0xf8] sm:$0xff] }
 0x658   : > { %v9822_v47 = vpop.eup %9821 }
 0x659   : > { %v2359_v49 = vsel %vm1394_vm1, %v9822_v47, 0.0 }
 0x65a   : > { %2360 = vadd.xlane.f32.xlu2 %v2359_v49 }
 0x695   : > { %v2340_v51 = vpop.xlane.xlu1 %2339 }
 0x696   : > { %9823 = vrcp.f32 %v2340_v51 }
 0x69c   : > { %v9824_v14 = vpop.eup %9823 }
 0x69d   : > { %v2343_v53 = vpop.xlane.xlu2 %2342  ;;  %v2370_v59 = vmul.f32 %v9824_v14, %v9808_v9  ;;  %v9516_v9 = vld [vmem:[%s13981_s5 + $0xd0] sm:$0xff]  ;;  %v9526_v14 = vld [vmem:[%s13981_s5 + $0x78] sm:$0xff] }
 0x69e   : > { %9825 = vrcp.f32 %v2343_v53  ;;  %2638 = vmatpush.bf16.msrb.mxu1 %v9516_v9  ;;  %v2575_v9 = vpop.f32.mrf.mxu0 }
 0x6a2   : > { %2639 = vmatpush.bf16.msrb.mxu1 %v9515_v1 }
 0x6a4   : > { %v9826_v42 = vpop.eup %9825 }
 0x6a5   : > { %v2371_v27 = vmul.f32 %v9826_v42, %v9810_v13  ;;  %v2346_v3 = vpop.xlane.xlu0 %2345  ;;  %v9525_v42 = vld [vmem:[%s13981_s5 + $0x70] sm:$0xff] }
 0x6a6   : > { %9827 = vrcp.f32 %v2346_v3  ;;  %2640 = vmatpush.bf16.msrb.mxu1 %v9514_v56 }
 0x6a7   : > { %v2382_v46 = vpack.c.bf16 %v2371_v27, %v2370_v59  ;;  %v9524_v27 = vld [vmem:[%s13981_s5 + $0x68] sm:$0xff] }
 0x6a9   : > { %8659 = vmatmul.msk.bf16.vlgmr.msra.gmra.mxu1 %vm1394_vm1, %v2382_v46  ;;  %v9523_v46 = vld [vmem:[%s13981_s5 + $0x60] sm:$0xff] }
 0x6ac   : > { %v9828_v60 = vpop.eup %9827 }
 0x6ad   : > { %v2349_v2 = vpop.xlane.xlu1 %2348  ;;  %v2372_v6 = vmul.f32 %v9828_v60, %v9812_v19 }
 0x6ae   : > { %9829 = vrcp.f32 %v2349_v2  ;;  %v9732_v2 = vld [vmem:[%s13988_s26 + $0x6] ss:$0 sm:$0xff] }
 0x6b4   : > { %v9830_v5 = vpop.eup %9829 }
 0x6b5   : > { %v2373_v4 = vmul.f32 %v9830_v5, %v9814_v16  ;;  %v2352_v7 = vpop.xlane.xlu2 %2351 }
 0x6b6   : > { %9831 = vrcp.f32 %v2352_v7 }
 0x6b7   : > { %v2383_v50 = vpack.c.bf16 %v2373_v4, %v2372_v6 }
 0x6b9   : > { %8660 = vmatmul.msk.bf16.gmra.mxu1 %vm1394_vm1, %v2383_v50 }
 0x6bc   : > { %v9832_v11 = vpop.eup %9831 }
 0x6bd   : > { %v2355_v10 = vpop.xlane.xlu0 %2354  ;;  %v2374_v62 = vmul.f32 %v9832_v11, %v9816_v26 }
 0x6be   : > { %9833 = vrcp.f32 %v2355_v10 }
 0x6c4   : > { %v9834_v13 = vpop.eup %9833 }
 0x6c5   : > { %v2375_v63 = vmul.f32 %v9834_v13, %v9818_v33  ;;  %v2358_v18 = vpop.xlane.xlu1 %2357 }
 0x6c6   : > { %9835 = vrcp.f32 %v2358_v18 }
 0x6c7   : > { %v2384_v15 = vpack.c.bf16 %v2375_v63, %v2374_v62  ;;  %v2577_v62 = vpop.f32.mrf.mxu0 }
 0x6c9   : > { %8661 = vmatmul.msk.bf16.gmra.mxu1 %vm1394_vm1, %v2384_v15 }
 0x6cc   : > { %v9836_v57 = vpop.eup %9835 }
 0x6cd   : > { %v2361_v19 = vpop.xlane.xlu2 %2360  ;;  %v2376_v29 = vmul.f32 %v9836_v57, %v9820_v38 }
 0x6ce   : > { %9837 = vrcp.f32 %v2361_v19 }
 0x6d4   : > { %v9838_v20 = vpop.eup %9837 }
 0x6d5   : > { %v2377_v12 = vmul.f32 %v9838_v20, %v9822_v47 }
 0x6d7   : > { %v2385_v16 = vpack.c.bf16 %v2377_v12, %v2376_v29  ;;  %v2580_v29 = vpop.f32.mrf.mxu0  ;;  %v9731_v12 = vld [vmem:[%s13988_s26 + $0x2] ss:$0 sm:$0xff] }
 0x6d9   : > { %8662 = vmatmul.msk.bf16.gmra.mxu1 %vm1394_vm1, %v2385_v16 }
 0x6e9   : > { %8735 = vmatmul.msk.bf16.vlgmr.msrb.gmra.mxu1 %vm1394_vm1, %v10770_v58 }
 0x6f9   : > { %8736 = vmatmul.msk.bf16.gmra.mxu1 %vm1394_vm1, %v10784_v8 }
 0x709   : > { %8737 = vmatmul.msk.bf16.gmra.mxu1 %vm1394_vm1, %v10800_v21 }
 0x719   : > { %8738 = vmatmul.msk.bf16.gmra.mxu1 %vm1394_vm1, %v10824_v54 }
 0x726   : > { %v2407_v22 = vpop.f32.mrf.mxu1 }
 0x72e   : > { %v2409_v23 = vpop.f32.mrf.mxu1 }
 0x72f   : > { %v2430_v25 = vpack.c.bf16 %v2409_v23, %v2407_v22  ;;  %v2578_v22 = vadd.f32 %v9731_v12, %v2577_v62  ;;  %v2576_v23 = vadd.f32 %v9731_v12, %v2575_v9  ;;  %v9733_v62 = vld [vmem:[%s13988_s26 + $0xa] ss:$0 sm:$0xff] }
 0x731   : > { %8669 = vmatmul.msk.bf16.vlgmr.msra.gmra.mxu2 %vm1831_vm12, %v2430_v25  ;;  %v2729_v25 = vpack.c.bf16 %v2578_v22, %v2576_v23 }
 0x732   : > { %3031 = vmatpush.bf16.msra.mxu2 %v9526_v14 }
 0x736   : > { %v2412_v26 = vpop.f32.mrf.mxu1  ;;  %3032 = vmatpush.bf16.msra.mxu2 %v9525_v42 }
 0x73a   : > { %3033 = vmatpush.bf16.msra.mxu2 %v9524_v27 }
 0x73e   : > { %v2414_v28 = vpop.f32.mrf.mxu1  ;;  %3034 = vmatpush.bf16.msra.mxu2 %v9523_v46 }
 0x73f   : > { %v2431_v30 = vpack.c.bf16 %v2414_v28, %v2412_v26  ;;  %v2582_v26 = vpop.f32.mrf.mxu0 }
 0x740   : > { %v2583_v32 = vadd.f32 %v9731_v12, %v2582_v26 }
 0x741   : > { %8670 = vmatmul.msk.bf16.gmra.mxu2 %vm1831_vm12, %v2431_v30 }
 0x746   : > { %v2417_v33 = vpop.f32.mrf.mxu1 }
 0x747   : > { %v2585_v30 = vpop.f32.mrf.mxu0 }
 0x74e   : > { %v2419_v39 = vpop.f32.mrf.mxu1 }
 0x74f   : > { %v2432_v41 = vpack.c.bf16 %v2419_v39, %v2417_v33  ;;  %v2581_v33 = vadd.f32 %v9731_v12, %v2580_v29 }
 0x751   : > { %8671 = vmatmul.msk.bf16.gmra.mxu2 %vm1831_vm12, %v2432_v41  ;;  %v2730_v34 = vpack.c.bf16 %v2583_v32, %v2581_v33  ;;  %v9529_v41 = vld [vmem:[%s13981_s5 + $0xf0] sm:$0xff] }
 0x756   : > { %v2422_v38 = vpop.f32.mrf.mxu1 }
 0x75e   : > { %v2424_v43 = vpop.f32.mrf.mxu1 }
 0x75f   : > { %v2433_v45 = vpack.c.bf16 %v2424_v43, %v2422_v38  ;;  %v2587_v38 = vpop.f32.mrf.mxu0  ;;  %v9528_v43 = vld [vmem:[%s13981_s5 + $0xe8] sm:$0xff] }
 0x761   : > { %8672 = vmatmul.msk.bf16.gmra.mxu2 %vm1831_vm12, %v2433_v45 }
 0x766   : > { %v2642_v47 = vpop.f32.mrf.mxu1 }
 0x767   : > { %v2643_v57 = vadd.f32 %v9732_v2, %v2642_v47  ;;  %v2588_v47 = vadd.f32 %v9731_v12, %v2587_v38 }
 0x76e   : > { %v2644_v49 = vpop.f32.mrf.mxu1 }
 0x76f   : > { %v2645_v15 = vadd.f32 %v9732_v2, %v2644_v49  ;;  %v2586_v49 = vadd.f32 %v9731_v12, %v2585_v30 }
 0x771   : > { %8764 = vmatmul.msk.bf16.vlgmr.msrb.gmra.mxu2 %vm1394_vm1, %v10770_v58  ;;  %v2733_v20 = vpack.c.bf16 %v2645_v15, %v2643_v57  ;;  %v2731_v14 = vpack.c.bf16 %v2588_v47, %v2586_v49 }
 0x773   : > { %v2750_v16 = vsel %vm1831_vm12, %v2733_v20, 0 }
 0x776   : > { %v2647_v51 = vpop.f32.mrf.mxu1 }
 0x777   : > { %v2648_v13 = vadd.f32 %v9732_v2, %v2647_v51  ;;  %v9527_v51 = vld [vmem:[%s13981_s5 + $0xe0] sm:$0xff] }
 0x77e   : > { %v2649_v53 = vpop.f32.mrf.mxu1 }
 0x77f   : > { %v2650_v56 = vadd.f32 %v9732_v2, %v2649_v53  ;;  %v2590_v53 = vpop.f32.mrf.mxu0 }
 0x781   : > { %8765 = vmatmul.msk.bf16.gmra.mxu2 %vm1394_vm1, %v10784_v8  ;;  %v2734_v63 = vpack.c.bf16 %v2650_v56, %v2648_v13 }
 0x783   : > { %v2753_v18 = vsel %vm1831_vm12, %v2734_v63, 0 }
 0x786   : > { %v2652_v59 = vpop.f32.mrf.mxu1 }
 0x787   : > { %v2653_v1 = vadd.f32 %v9732_v2, %v2652_v59  ;;  %v2592_v59 = vpop.f32.mrf.mxu0 }
 0x788   : > { %v2593_v46 = vadd.f32 %v9731_v12, %v2592_v59 }
 0x78e   : > { %v2654_v3 = vpop.f32.mrf.mxu1 }
 0x78f   : > { %v2655_v50 = vadd.f32 %v9732_v2, %v2654_v3  ;;  %v2591_v3 = vadd.f32 %v9731_v12, %v2590_v53 }
 0x791   : > { %8766 = vmatmul.msk.bf16.gmra.mxu2 %vm1394_vm1, %v10800_v21  ;;  %v2735_v10 = vpack.c.bf16 %v2655_v50, %v2653_v1 }
 0x793   : > { %v2756_v11 = vsel %vm1831_vm12, %v2735_v10, 0 }
 0x796   : > { %v2657_v17 = vpop.f32.mrf.mxu1 }
 0x797   : > { %v2658_v5 = vadd.f32 %v9732_v2, %v2657_v17  ;;  %v2732_v17 = vpack.c.bf16 %v2593_v46, %v2591_v3 }
 0x79e   : > { %v2659_v60 = vpop.f32.mrf.mxu1 }
 0x79f   : > { %v2660_v6 = vadd.f32 %v9732_v2, %v2659_v60  ;;  %v11083_v60 = vpop.f32.mrf.mxu3 }
 0x7a1   : > { %v2736_v4 = vpack.c.bf16 %v2660_v6, %v2658_v5  ;;  %8767 = vmatmul.msk.bf16.gmra.mxu2 %vm1394_vm1, %v10824_v54 }
 0x7a3   : > { %v2759_v7 = vsel %vm1831_vm12, %v2736_v4, 0 }
 0x7a4   : > { %2765 = vmatpush.bf16.xpose.msra.mxu3 %v2759_v7 }
 0x7a7   : > { %v11085_v6 = vpop.f32.mrf.mxu3 }
 0x7ac   : > { %2766 = vmatpush.bf16.xpose.msra.mxu3 %v2756_v11 }
 0x7af   : > { %v11089_v50 = vpop.f32.mrf.mxu3 }
 0x7b1   : > { %8811 = vmatmul.msk.bf16.vlgmr.msra.gmra.mxu2 %vm1394_vm1, %v10770_v58 }
 0x7b4   : > { %v11051_v19 = vpop.f32.mrf.mxu2  ;;  %2767 = vmatpush.bf16.xpose.msra.mxu3 %v2753_v18 }
 0x7b7   : > { %v11093_v1 = vpop.f32.mrf.mxu3 }
 0x7bc   : > { %v11055_v55 = vpop.f32.mrf.mxu2  ;;  %2768 = vmatpush.bf16.xpose.msra.mxu3 %v2750_v16 }
 0x7bf   : > { %v11095_v56 = vpop.f32.mrf.mxu3 }
 0x7c1   : > { %8812 = vmatmul.msk.bf16.gmra.mxu2 %vm1394_vm1, %v10784_v8 }
 0x7c3   : > { %8768 = vmatmul.msk.bf16.vlgmr.msra.gmra.mxu3 %vm1831_vm12, %v2729_v25 }
 0x7c4   : > { %v11060_v28 = vpop.f32.mrf.mxu2  ;;  %3098 = vmatpush.bf16.msrb.mxu3 %v9530_v37 }
 0x7c7   : > { %v11099_v13 = vpop.f32.mrf.mxu3 }
 0x7c8   : > { %3099 = vmatpush.bf16.msrb.mxu3 %v9529_v41 }
 0x7cc   : > { %v11062_v24 = vpop.f32.mrf.mxu2  ;;  %3100 = vmatpush.bf16.msrb.mxu3 %v9528_v43 }
 0x7cf   : > { %v11104_v22 = vpop.f32.mrf.mxu3 }
 0x7d0   : > { %3101 = vmatpush.bf16.msrb.mxu3 %v9527_v51 }
 0x7d1   : > { %8813 = vmatmul.msk.bf16.gmra.mxu2 %vm1394_vm1, %v10800_v21 }
 0x7d3   : > { %8769 = vmatmul.msk.bf16.gmra.mxu3 %vm1831_vm12, %v2730_v34 }
 0x7d4   : > { %v11068_v39 = vpop.f32.mrf.mxu2 }
 0x7d7   : > { %v11106_v33 = vpop.f32.mrf.mxu3 }
 0x7dc   : > { %v11072_v45 = vpop.f32.mrf.mxu2 }
 0x7e1   : > { %8814 = vmatmul.msk.bf16.gmra.mxu2 %vm1394_vm1, %v10824_v54 }
 0x7e3   : > { %8770 = vmatmul.msk.bf16.gmra.mxu3 %vm1831_vm12, %v2731_v14 }
 0x7e4   : > { %v11078_v42 = vpop.f32.mrf.mxu2 }
 0x7ec   : > { %v11080_v27 = vpop.f32.mrf.mxu2 }
 0x7f3   : > { %8771 = vmatmul.msk.bf16.gmra.mxu3 %vm1831_vm12, %v2732_v17 }
 0x7f4   : > { %v2709_v2 = vpop.f32.mrf.mxu2 }
 0x7f5   : > { %v2710_v30 = vadd.f32 %v9733_v62, %v2709_v2 }
 0x7fc   : > { %v2711_v5 = vpop.f32.mrf.mxu2 }
 0x7fd   : > { %v2712_v25 = vadd.f32 %v9733_v62, %v2711_v5 }
 0x7ff   : > { %v2878_v32 = vpack.c.bf16 %v2712_v25, %v2710_v30 }
 0x803   : > { %8840 = vmatmul.msk.bf16.vlgmr.msrb.gmra.mxu3 %vm1394_vm1, %v10770_v58 }
 0x804   : > { %v2714_v4 = vpop.f32.mrf.mxu2 }
 0x805   : > { %v2715_v23 = vadd.f32 %v9733_v62, %v2714_v4 }
 0x80c   : > { %v2716_v7 = vpop.f32.mrf.mxu2 }
 0x80d   : > { %v2717_v12 = vadd.f32 %v9733_v62, %v2716_v7 }
 0x80f   : > { %v2879_v26 = vpack.c.bf16 %v2717_v12, %v2715_v23 }
 0x813   : > { %8841 = vmatmul.msk.bf16.gmra.mxu3 %vm1394_vm1, %v10784_v8 }
 0x814   : > { %v2719_v9 = vpop.f32.mrf.mxu2 }
 0x815   : > { %v2720_v29 = vadd.f32 %v9733_v62, %v2719_v9 }
 0x81c   : > { %v2721_v10 = vpop.f32.mrf.mxu2 }
 0x81d   : > { %v2722_v57 = vadd.f32 %v9733_v62, %v2721_v10 }
 0x81f   : > { %v2880_v16 = vpack.c.bf16 %v2722_v57, %v2720_v29  ;;  %v9735_v57 = vld [vmem:[%s13988_s26 + $0x7] ss:$0 sm:$0xff] }
 0x823   : > { %8842 = vmatmul.msk.bf16.gmra.mxu3 %vm1394_vm1, %v10800_v21 }
 0x824   : > { %v2724_v11 = vpop.f32.mrf.mxu2 }
 0x825   : > { %v2725_v15 = vadd.f32 %v9733_v62, %v2724_v11 }
 0x82c   : > { %v2726_v63 = vpop.f32.mrf.mxu2 }
 0x82d   : > { %v2727_v18 = vadd.f32 %v9733_v62, %v2726_v63  ;;  %v9522_v63 = vld [vmem:[%s13990_s11 + $0x10] sm:$0xff] }
 0x82e   : > { %2959 = vmatpush.bf16.msra.mxu1 %v9522_v63 }
 0x82f   : > { %v2881_v20 = vpack.c.bf16 %v2727_v18, %v2725_v15 }
 0x831   : > { %2902 = vmatpush.bf16.msra.mxu0 %v2881_v20 }
 0x833   : > { %8843 = vmatmul.msk.bf16.gmra.mxu3 %vm1394_vm1, %v10824_v54 }
 0x835   : > { %2903 = vmatpush.bf16.msra.mxu0 %v2880_v16 }
 0x839   : > { %2904 = vmatpush.bf16.msra.mxu0 %v2879_v26 }
 0x83d   : > { %2905 = vmatpush.bf16.msra.mxu0 %v2878_v32 }
 0x846   : > { %v2770_v34 = vpop.f32.mrf.mxu3 }
 0x847   : > { %v2771_v37 = vadd.f32 %v2770_v34, %v10886_v31 }
 0x849   : > { %v2790_v41 = vsel %vm1394_vm1, %v2771_v37, -inf }
 0x84a   : > { %2791 = vmax.xlane.f32.xlu0 %v2790_v41 }
 0x84e   : > { %v2772_v38 = vpop.f32.mrf.mxu3 }
 0x84f   : > { %v2773_v43 = vadd.f32 %v2772_v38, %v10891_v36 }
 0x851   : > { %v2793_v47 = vsel %vm1394_vm1, %v2773_v43, -inf }
 0x852   : > { %2794 = vmax.xlane.f32.xlu1 %v2793_v47 }
 0x856   : > { %v2775_v49 = vpop.f32.mrf.mxu3 }
 0x857   : > { %v2776_v51 = vadd.f32 %v2775_v49, %v10896_v40 }
 0x859   : > { %v2796_v53 = vsel %vm1394_vm1, %v2776_v51, -inf }
 0x85a   : > { %2797 = vmax.xlane.f32.xlu2 %v2796_v53 }
 0x85e   : > { %v2777_v14 = vpop.f32.mrf.mxu3 }
 0x85f   : > { %v11115_v59 = vadd.f32 %v2777_v14, %v10904_v44 }
 0x861   : > { %v2799_v31 = vsel %vm1394_vm1, %v11115_v59, -inf }
 0x862   : > { %2800 = vmax.xlane.f32.xlu0 %v2799_v31 }
 0x866   : > { %v2780_v46 = vpop.f32.mrf.mxu3 }
 0x867   : > { %v11120_v36 = vadd.f32 %v2780_v46, %v10912_v48 }
 0x869   : > { %v2802_v3 = vsel %vm1394_vm1, %v11120_v36, -inf }
 0x86a   : > { %2803 = vmax.xlane.f32.xlu1 %v2802_v3 }
 0x86e   : > { %v2782_v40 = vpop.f32.mrf.mxu3 }
 0x86f   : > { %v11125_v17 = vadd.f32 %v2782_v40, %v10920_v52 }
 0x871   : > { %v2805_v44 = vsel %vm1394_vm1, %v11125_v17, -inf }
 0x872   : > { %2806 = vmax.xlane.f32.xlu2 %v2805_v44 }
 0x876   : > { %v2785_v2 = vpop.f32.mrf.mxu3 }
 0x877   : > { %v11130_v5 = vadd.f32 %v2785_v2, %v10928_v35 }
 0x879   : > { %v2808_v48 = vsel %vm1394_vm1, %v11130_v5, -inf }
 0x87a   : > { %2809 = vmax.xlane.f32.xlu0 %v2808_v48 }
 0x87e   : > { %v2787_v4 = vpop.f32.mrf.mxu3 }
 0x87f   : > { %v11135_v7 = vadd.f32 %v2787_v4, %v10936_v0 }
 0x881   : > { %v2811_v52 = vsel %vm1394_vm1, %v11135_v7, -inf }
 0x882   : > { %2812 = vmax.xlane.f32.xlu1 %v2811_v52 }
 0x886   : > { %v3103_v9 = vpop.f32.mrf.mxu3 }
 0x887   : > { %v3104_v52 = vadd.f32 %v9735_v57, %v3103_v9 }
 0x88e   : > { %v3105_v10 = vpop.f32.mrf.mxu3 }
 0x88f   : > { %v3106_v48 = vadd.f32 %v9735_v57, %v3105_v10 }
 0x896   : > { %v3108_v11 = vpop.f32.mrf.mxu3 }
 0x897   : > { %v3109_v31 = vadd.f32 %v9735_v57, %v3108_v11 }
 0x89e   : > { %v3110_v62 = vpop.f32.mrf.mxu3 }
 0x89f   : > { %v3111_v53 = vadd.f32 %v9735_v57, %v3110_v62 }
 0x8a1   : > { %v3195_v40 = vpack.c.bf16 %v3111_v53, %v3109_v31 }
 0x8a3   : > { %v3214_v4 = vsel %vm1831_vm12, %v3195_v40, 0 }
 0x8a6   : > { %v3113_v35 = vpop.f32.mrf.mxu3 }
 0x8a7   : > { %v3114_v32 = vadd.f32 %v9735_v57, %v3113_v35  ;;  %v3194_v35 = vpack.c.bf16 %v3106_v48, %v3104_v52 }
 0x8ae   : > { %v3115_v15 = vpop.f32.mrf.mxu3 }
 0x8af   : > { %v3116_v26 = vadd.f32 %v9735_v57, %v3115_v15 }
 0x8b1   : > { %v3196_v38 = vpack.c.bf16 %v3116_v26, %v3114_v32 }
 0x8b3   : > { %v3217_v14 = vsel %vm1831_vm12, %v3196_v38, 0 }
 0x8b6   : > { %v3118_v18 = vpop.f32.mrf.mxu3 }
 0x8b7   : > { %v3119_v16 = vadd.f32 %v9735_v57, %v3118_v18  ;;  %v3211_v18 = vsel %vm1831_vm12, %v3194_v35, 0 }
 0x8bd   : > { %v2792_v20 = vpop.xlane.xlu0 %2791 }
 0x8be   : > { %v2814_v29 = vsub.f32 %v2771_v37, %v2792_v20  ;;  %v3120_v12 = vpop.f32.mrf.mxu3 }
 0x8bf   : > { %v3121_v0 = vadd.f32 %v9735_v57, %v3120_v12 }
 0x8c0   : > { %v2822_v23 = vmul.f32 1.442695, %v2814_v29 }
 0x8c1   : > { %v3197_v25 = vpack.c.bf16 %v3121_v0, %v3119_v16 }
 0x8c2   : > { %9839 = vpow2.f32 %v2822_v23 }
 0x8c3   : > { %v3220_v30 = vsel %vm1831_vm12, %v3197_v25, 0 }
 0x8c4   : > { %3226 = vmatpush.bf16.xpose.msrb.mxu1 %v3220_v30 }
 0x8c5   : > { %v2795_v34 = vpop.xlane.xlu1 %2794 }
 0x8c6   : > { %v2815_v41 = vsub.f32 %v2773_v43, %v2795_v34 }
 0x8c8   : > { %v11142_v47 = vpop.eup %9839  ;;  %v2824_v49 = vmul.f32 1.442695, %v2815_v41 }
 0x8c9   : > { %v2838_v37 = vsel %vm1394_vm1, %v11142_v47, 0.0 }
 0x8ca   : > { %9841 = vpow2.f32 %v2824_v49  ;;  %2839 = vadd.xlane.f32.xlu2 %v2838_v37 }
 0x8cc   : > { %3227 = vmatpush.bf16.xpose.msrb.mxu1 %v3217_v14 }
 0x8cd   : > { %v2798_v46 = vpop.xlane.xlu2 %2797 }
 0x8ce   : > { %v2816_v3 = vsub.f32 %v2776_v51, %v2798_v46 }
 0x8d0   : > { %v9842_v44 = vpop.eup %9841  ;;  %v2826_v2 = vmul.f32 1.442695, %v2816_v3 }
 0x8d1   : > { %v2841_v43 = vsel %vm1394_vm1, %v9842_v44, 0.0 }
 0x8d2   : > { %9843 = vpow2.f32 %v2826_v2  ;;  %2842 = vadd.xlane.f32.xlu0 %v2841_v43 }
 0x8d4   : > { %3228 = vmatpush.bf16.xpose.msrb.mxu1 %v3214_v4 }
 0x8d5   : > { %v2801_v63 = vpop.xlane.xlu0 %2800 }
 0x8d6   : > { %v2817_v62 = vsub.f32 %v11115_v59, %v2801_v63 }
 0x8d8   : > { %v9844_v15 = vpop.eup %9843  ;;  %v2828_v11 = vmul.f32 1.442695, %v2817_v62 }
 0x8d9   : > { %v2844_v51 = vsel %vm1394_vm1, %v9844_v15, 0.0 }
 0x8da   : > { %9845 = vpow2.f32 %v2828_v11  ;;  %2845 = vadd.xlane.f32.xlu1 %v2844_v51  ;;  %v9532_v51 = vld [vmem:[%s13981_s5 + $0x168] sm:$0xff] }
 0x8dc   : > { %3229 = vmatpush.bf16.xpose.msrb.mxu1 %v3211_v18 }
 0x8dd   : > { %v2804_v20 = vpop.xlane.xlu1 %2803 }
 0x8de   : > { %v2818_v10 = vsub.f32 %v11120_v36, %v2804_v20  ;;  %v9531_v20 = vld [vmem:[%s13981_s5 + $0x160] sm:$0xff] }
 0x8e0   : > { %v9846_v29 = vpop.eup %9845  ;;  %v2830_v12 = vmul.f32 1.442695, %v2818_v10 }
 0x8e1   : > { %v2847_v9 = vsel %vm1394_vm1, %v9846_v29, 0.0 }
 0x8e2   : > { %9847 = vpow2.f32 %v2830_v12  ;;  %2848 = vadd.xlane.f32.xlu2 %v2847_v9 }
 0x8e5   : > { %v2807_v59 = vpop.xlane.xlu2 %2806 }
 0x8e6   : > { %v2819_v57 = vsub.f32 %v11125_v17, %v2807_v59 }
 0x8e8   : > { %v9848_v16 = vpop.eup %9847  ;;  %v2832_v0 = vmul.f32 1.442695, %v2819_v57 }
 0x8e9   : > { %v2850_v23 = vsel %vm1394_vm1, %v9848_v16, 0.0 }
 0x8ea   : > { %9849 = vpow2.f32 %v2832_v0  ;;  %2851 = vadd.xlane.f32.xlu0 %v2850_v23 }
 0x8ed   : > { %v2810_v25 = vpop.xlane.xlu0 %2809 }
 0x8ee   : > { %v2820_v26 = vsub.f32 %v11130_v5, %v2810_v25 }
 0x8f0   : > { %v9850_v30 = vpop.eup %9849  ;;  %v2834_v36 = vmul.f32 1.442695, %v2820_v26 }
 0x8f1   : > { %v2853_v32 = vsel %vm1394_vm1, %v9850_v30, 0.0 }
 0x8f2   : > { %9851 = vpow2.f32 %v2834_v36  ;;  %2854 = vadd.xlane.f32.xlu1 %v2853_v32 }
 0x8f5   : > { %v2813_v34 = vpop.xlane.xlu1 %2812 }
 0x8f6   : > { %v2821_v41 = vsub.f32 %v11135_v7, %v2813_v34 }
 0x8f8   : > { %v9852_v38 = vpop.eup %9851  ;;  %v2836_v17 = vmul.f32 1.442695, %v2821_v41 }
 0x8f9   : > { %v2856_v49 = vsel %vm1394_vm1, %v9852_v38, 0.0 }
 0x8fa   : > { %9853 = vpow2.f32 %v2836_v17  ;;  %2857 = vadd.xlane.f32.xlu2 %v2856_v49 }
 0x900   : > { %v9854_v37 = vpop.eup %9853 }
 0x901   : > { %v2859_v53 = vsel %vm1394_vm1, %v9854_v37, 0.0 }
 0x902   : > { %2860 = vadd.xlane.f32.xlu0 %v2859_v53 }
 0x93d   : > { %v2840_v5 = vpop.xlane.xlu2 %2839 }
 0x93e   : > { %9855 = vrcp.f32 %v2840_v5 }
 0x944   : > { %v9856_v31 = vpop.eup %9855 }
 0x945   : > { %v2843_v14 = vpop.xlane.xlu0 %2842  ;;  %v2870_v3 = vmul.f32 %v9856_v31, %v11142_v47  ;;  %v9534_v47 = vld [vmem:[%s13981_s5 + $0x178] sm:$0xff] }
 0x946   : > { %9857 = vrcp.f32 %v2843_v14  ;;  %3165 = vmatpush.bf16.msrb.mxu0 %v9534_v47  ;;  %v9734_v14 = vld [vmem:[%s13988_s26 + $0x3] ss:$0 sm:$0xff] }
 0x94c   : > { %v9858_v46 = vpop.eup %9857 }
 0x94d   : > { %v2871_v7 = vmul.f32 %v9858_v46, %v9842_v44  ;;  %v2846_v2 = vpop.xlane.xlu1 %2845  ;;  %v9533_v44 = vld [vmem:[%s13981_s5 + $0x170] sm:$0xff]  ;;  %s14003_s5 = sld [smem:[#allocation41_spill]] }
 0x94e   : > { %9859 = vrcp.f32 %v2846_v2  ;;  %3166 = vmatpush.bf16.msrb.mxu0 %v9533_v44 }
 0x94f   : > { %v2882_v40 = vpack.c.bf16 %v2871_v7, %v2870_v3 }
 0x951   : > { %8772 = vmatmul.msk.bf16.vlgmr.msra.gmra.mxu0 %vm1394_vm1, %v2882_v40 }
 0x952   : > { %3167 = vmatpush.bf16.msrb.mxu0 %v9532_v51 }
 0x954   : > { %v9860_v48 = vpop.eup %9859 }
 0x955   : > { %v2849_v43 = vpop.xlane.xlu2 %2848  ;;  %v2872_v52 = vmul.f32 %v9860_v48, %v9844_v15 }
 0x956   : > { %9861 = vrcp.f32 %v2849_v43  ;;  %3168 = vmatpush.bf16.msrb.mxu0 %v9531_v20 }
 0x95c   : > { %v9862_v4 = vpop.eup %9861 }
 0x95d   : > { %v2873_v63 = vmul.f32 %v9862_v4, %v9846_v29  ;;  %v2852_v35 = vpop.xlane.xlu0 %2851 }
 0x95e   : > { %9863 = vrcp.f32 %v2852_v35 }
 0x95f   : > { %v2883_v62 = vpack.c.bf16 %v2873_v63, %v2872_v52 }
 0x961   : > { %8773 = vmatmul.msk.bf16.gmra.mxu0 %vm1394_vm1, %v2883_v62 }
 0x964   : > { %v9864_v18 = vpop.eup %9863 }
 0x965   : > { %v2855_v11 = vpop.xlane.xlu1 %2854  ;;  %v2874_v12 = vmul.f32 %v9864_v18, %v9848_v16 }
 0x966   : > { %9865 = vrcp.f32 %v2855_v11 }
 0x96c   : > { %v9866_v10 = vpop.eup %9865 }
 0x96d   : > { %v2875_v9 = vmul.f32 %v9866_v10, %v9850_v30  ;;  %v2858_v29 = vpop.xlane.xlu2 %2857 }
 0x96e   : > { %9867 = vrcp.f32 %v2858_v29 }
 0x96f   : > { %v2884_v15 = vpack.c.bf16 %v2875_v9, %v2874_v12 }
 0x971   : > { %8774 = vmatmul.msk.bf16.gmra.mxu0 %vm1394_vm1, %v2884_v15  ;;  %v9736_v15 = vld [vmem:[%s13988_s26 + $0xb] ss:$0 sm:$0xff] }
 0x974   : > { %v9868_v57 = vpop.eup %9867 }
 0x975   : > { %v2861_v59 = vpop.xlane.xlu0 %2860  ;;  %v2876_v23 = vmul.f32 %v9868_v57, %v9852_v38 }
 0x976   : > { %9869 = vrcp.f32 %v2861_v59 }
 0x97c   : > { %v9870_v0 = vpop.eup %9869 }
 0x97d   : > { %v2877_v25 = vmul.f32 %v9870_v0, %v9854_v37 }
 0x97f   : > { %v2885_v26 = vpack.c.bf16 %v2877_v25, %v2876_v23 }
 0x981   : > { %8775 = vmatmul.msk.bf16.gmra.mxu0 %vm1394_vm1, %v2885_v26 }
 0x991   : > { %8869 = vmatmul.msk.bf16.vlgmr.msrb.gmra.mxu0 %vm1394_vm1, %v10770_v58 }
 0x9a1   : > { %8870 = vmatmul.msk.bf16.gmra.mxu0 %vm1394_vm1, %v10784_v8 }
 0x9b1   : > { %8871 = vmatmul.msk.bf16.gmra.mxu0 %vm1394_vm1, %v10800_v21  ;;  %v3036_v21 = vpop.f32.mrf.mxu2 }
 0x9b2   : > { %v3037_v46 = vadd.f32 %v9734_v14, %v3036_v21 }
 0x9b9   : > { %v3038_v49 = vpop.f32.mrf.mxu2 }
 0x9ba   : > { %v3039_v31 = vadd.f32 %v9734_v14, %v3038_v49  ;;  %v2514_v49 = vadd.f32 %v11089_v50, %v11060_v28 }
 0x9bc   : > { %v3190_v7 = vpack.c.bf16 %v3039_v31, %v3037_v46  ;;  %v2524_v31 = vadd.f32 %v11104_v22, %v11078_v42  ;;  %v10231_v22 = vld [vmem:[%s13989_s1 + $0x10] sm:$0xff] }
 0x9c1   : > { %8872 = vmatmul.msk.bf16.gmra.mxu0 %vm1394_vm1, %v10824_v54  ;;  %v3041_v53 = vpop.f32.mrf.mxu2 }
 0x9c2   : > { %v3042_v4 = vadd.f32 %v9734_v14, %v3041_v53 }
 0x9c9   : > { %v3043_v40 = vpop.f32.mrf.mxu2 }
 0x9ca   : > { %v3044_v48 = vadd.f32 %v9734_v14, %v3043_v40 }
 0x9cc   : > { %v3191_v63 = vpack.c.bf16 %v3044_v48, %v3042_v4 }
 0x9ce   : > { %v2907_v16 = vpop.f32.mrf.mxu0 }
 0x9d1   : > { %v3046_v43 = vpop.f32.mrf.mxu2 }
 0x9d2   : > { %v3047_v44 = vadd.f32 %v9734_v14, %v3046_v43 }
 0x9d6   : > { %v2909_v30 = vpop.f32.mrf.mxu0 }
 0x9d7   : > { %v2930_v36 = vpack.c.bf16 %v2909_v30, %v2907_v16 }
 0x9d9   : > { %8782 = vmatmul.msk.bf16.vlgmr.msra.gmra.mxu1 %vm1831_vm12, %v2930_v36  ;;  %v3048_v62 = vpop.f32.mrf.mxu2 }
 0x9da   : > { %v3049_v47 = vadd.f32 %v9734_v14, %v3048_v62  ;;  %v10232_v62 = vld [vmem:[%s13989_s1 + $0x18] sm:$0xff] }
 0x9dc   : > { %v3192_v18 = vpack.c.bf16 %v3049_v47, %v3047_v44 }
 0x9de   : > { %v2912_v32 = vpop.f32.mrf.mxu0 }
 0x9e1   : > { %v3051_v11 = vpop.f32.mrf.mxu2 }
 0x9e2   : > { %v3052_v9 = vadd.f32 %v9734_v14, %v3051_v11  ;;  %v10233_v11 = vld [vmem:[%s13989_s1 + $0x20] sm:$0xff] }
 0x9e6   : > { %v2914_v34 = vpop.f32.mrf.mxu0 }
 0x9e7   : > { %v2931_v41 = vpack.c.bf16 %v2914_v34, %v2912_v32 }
 0x9e9   : > { %8783 = vmatmul.msk.bf16.gmra.mxu1 %vm1831_vm12, %v2931_v41  ;;  %v3053_v10 = vpop.f32.mrf.mxu2 }
 0x9ea   : > { %v3054_v12 = vadd.f32 %v9734_v14, %v3053_v10  ;;  %v10234_v10 = vld [vmem:[%s13989_s1 + $0x28] sm:$0xff] }
 0x9ec   : > { %v3193_v59 = vpack.c.bf16 %v3054_v12, %v3052_v9 }
 0x9ee   : > { %v2917_v58 = vpop.f32.mrf.mxu0 }
 0x9f6   : > { %v2919_v38 = vpop.f32.mrf.mxu0 }
 0x9f7   : > { %v2932_v8 = vpack.c.bf16 %v2919_v38, %v2917_v58  ;;  %v2509_v58 = vadd.f32 %v11083_v60, %v11051_v19  ;;  %v2519_v19 = vadd.f32 %v11095_v56, %v11068_v39 }
 0x9f9   : > { %8784 = vmatmul.msk.bf16.gmra.mxu1 %vm1831_vm12, %v2932_v8 }
 0x9fe   : > { %v2922_v17 = vpop.f32.mrf.mxu0 }
 0xa06   : > { %v2924_v54 = vpop.f32.mrf.mxu0 }
 0xa07   : > { %v2933_v37 = vpack.c.bf16 %v2924_v54, %v2922_v17 }
 0xa09   : > { %8785 = vmatmul.msk.bf16.gmra.mxu1 %vm1831_vm12, %v2933_v37 }
 0xa0e   : > { %v3170_v5 = vpop.f32.mrf.mxu0 }
 0xa0f   : > { %v3171_v41 = vadd.f32 %v9736_v15, %v3170_v5 }
 0xa16   : > { %v3172_v3 = vpop.f32.mrf.mxu0 }
 0xa17   : > { %v3173_v32 = vadd.f32 %v9736_v15, %v3172_v3 }
 0xa19   : > { %8873 = vmatmul.msk.bf16.vlgmr.msrb.gmra.mxu1 %vm1831_vm12, %v3190_v7  ;;  %v3339_v38 = vpack.c.bf16 %v3173_v32, %v3171_v41  ;;  %v10229_v7 = vld [vmem:[%s13989_s1] sm:$0xff] }
 0xa1e   : > { %v3175_v2 = vpop.f32.mrf.mxu0 }
 0xa1f   : > { %v3176_v36 = vadd.f32 %v9736_v15, %v3175_v2  ;;  %v10230_v2 = vld [vmem:[%s13989_s1 + $0x8] sm:$0xff] }
 0xa26   : > { %v3177_v52 = vpop.f32.mrf.mxu0 }
 0xa27   : > { %v3178_v16 = vadd.f32 %v9736_v15, %v3177_v52 }
 0xa29   : > { %8874 = vmatmul.msk.bf16.gmra.mxu1 %vm1831_vm12, %v3191_v63  ;;  %v3340_v34 = vpack.c.bf16 %v3178_v16, %v3176_v36 }
 0xa2e   : > { %v3180_v35 = vpop.f32.mrf.mxu0 }
 0xa2f   : > { %v3181_v26 = vadd.f32 %v9736_v15, %v3180_v35 }
 0xa36   : > { %v3182_v51 = vpop.f32.mrf.mxu0 }
 0xa37   : > { %v3183_v23 = vadd.f32 %v9736_v15, %v3182_v51 }
 0xa39   : > { %8875 = vmatmul.msk.bf16.gmra.mxu1 %vm1831_vm12, %v3192_v18  ;;  %v3341_v30 = vpack.c.bf16 %v3183_v23, %v3181_v26  ;;  %v10236_v23 = vld [vmem:[%s13989_s1 + $0x38] sm:$0xff] }
 0xa3e   : > { %v3185_v20 = vpop.f32.mrf.mxu0 }
 0xa3f   : > { %v3186_v57 = vadd.f32 %v9736_v15, %v3185_v20 }
 0xa46   : > { %v3187_v29 = vpop.f32.mrf.mxu0 }
 0xa47   : > { %v3188_v0 = vadd.f32 %v9736_v15, %v3187_v29  ;;  %v10235_v29 = vld [vmem:[%s13989_s1 + $0x30] sm:$0xff] }
 0xa49   : > { %v3342_v25 = vpack.c.bf16 %v3188_v0, %v3186_v57  ;;  %8876 = vmatmul.msk.bf16.gmra.mxu1 %vm1831_vm12, %v3193_v59 }
 0xa4b   : > { %3363 = vmatpush.bf16.msrb.mxu2 %v3342_v25 }
 0xa4f   : > { %3364 = vmatpush.bf16.msrb.mxu2 %v3341_v30 }
 0xa53   : > { %3365 = vmatpush.bf16.msrb.mxu2 %v3340_v34 }
 0xa56   : > { %v2961_v8 = vpop.f32.mrf.mxu1 }
 0xa57   : > { %v11190_v21 = vadd.f32 %v2961_v8, %v2509_v58  ;;  %3366 = vmatpush.bf16.msrb.mxu2 %v3339_v38 }
 0xa5e   : > { %v11192_v17 = vpop.f32.mrf.mxu1 }
 0xa66   : > { %v2966_v54 = vpop.f32.mrf.mxu1 }
 0xa67   : > { %v11196_v37 = vadd.f32 %v2966_v54, %v2514_v49 }
 0xa6e   : > { %v11198_v53 = vpop.f32.mrf.mxu1 }
 0xa76   : > { %v2971_v60 = vpop.f32.mrf.mxu1 }
 0xa77   : > { %v11202_v5 = vadd.f32 %v2971_v60, %v2519_v19 }
 0xa7e   : > { %v11204_v14 = vpop.f32.mrf.mxu1 }
 0xa86   : > { %v2976_v46 = vpop.f32.mrf.mxu1 }
 0xa87   : > { %v11208_v28 = vadd.f32 %v2976_v46, %v2524_v31 }
 0xa8e   : > { %v11210_v50 = vpop.f32.mrf.mxu1 }
 0xa96   : > { %v3231_v3 = vpop.f32.mrf.mxu1 }
 0xa97   : > { %v3232_v40 = vadd.f32 %v10229_v7, %v3231_v3 }
 0xa99   : > { %v3251_v39 = vsel %vm1394_vm1, %v3232_v40, -inf }
 0xa9a   : > { %3252 = vmax.xlane.f32.xlu1 %v3251_v39 }
 0xa9e   : > { %v3233_v56 = vpop.f32.mrf.mxu1 }
 0xa9f   : > { %v3234_v43 = vadd.f32 %v10230_v2, %v3233_v56 }
 0xaa1   : > { %v3254_v48 = vsel %vm1394_vm1, %v3234_v43, -inf }
 0xaa2   : > { %3255 = vmax.xlane.f32.xlu2 %v3254_v48 }
 0xaa6   : > { %v3236_v42 = vpop.f32.mrf.mxu1 }
 0xaa7   : > { %v3237_v4 = vadd.f32 %v10231_v22, %v3236_v42 }
 0xaa9   : > { %v3257_v52 = vsel %vm1394_vm1, %v3237_v4, -inf }
 0xaaa   : > { %3258 = vmax.xlane.f32.xlu0 %v3257_v52 }
 0xaae   : > { %v3238_v63 = vpop.f32.mrf.mxu1 }
 0xaaf   : > { %v3239_v35 = vadd.f32 %v10232_v62, %v3238_v63 }
 0xab1   : > { %v3260_v47 = vsel %vm1394_vm1, %v3239_v35, -inf }
 0xab2   : > { %3261 = vmax.xlane.f32.xlu1 %v3260_v47 }
 0xab6   : > { %v3241_v44 = vpop.f32.mrf.mxu1 }
 0xab7   : > { %v3242_v51 = vadd.f32 %v10233_v11, %v3241_v44 }
 0xab9   : > { %v3263_v18 = vsel %vm1394_vm1, %v3242_v51, -inf }
 0xaba   : > { %3264 = vmax.xlane.f32.xlu2 %v3263_v18 }
 0xabe   : > { %v3243_v20 = vpop.f32.mrf.mxu1 }
 0xabf   : > { %v3244_v12 = vadd.f32 %v10234_v10, %v3243_v20 }
 0xac1   : > { %v3266_v9 = vsel %vm1394_vm1, %v3244_v12, -inf }
 0xac2   : > { %3267 = vmax.xlane.f32.xlu0 %v3266_v9 }
 0xac6   : > { %v3246_v15 = vpop.f32.mrf.mxu1 }
 0xac7   : > { %v3247_v59 = vadd.f32 %v10235_v29, %v3246_v15 }
 0xac9   : > { %v3269_v57 = vsel %vm1394_vm1, %v3247_v59, -inf }
 0xaca   : > { %3270 = vmax.xlane.f32.xlu1 %v3269_v57 }
 0xace   : > { %v3248_v0 = vpop.f32.mrf.mxu1 }
 0xacf   : > { %v3249_v25 = vadd.f32 %v10236_v23, %v3248_v0 }
 0xad1   : > { %v3272_v26 = vsel %vm1394_vm1, %v3249_v25, -inf }
 0xad2   : > { %3273 = vmax.xlane.f32.xlu2 %v3272_v26 }
 0xb0d   : > { %v3253_v16 = vpop.xlane.xlu1 %3252 }
 0xb0e   : > { %v3275_v30 = vsub.f32 %v3232_v40, %v3253_v16 }
 0xb10   : > { %v3283_v36 = vmul.f32 1.442695, %v3275_v30 }
 0xb12   : > { %9871 = vpow2.f32 %v3283_v36 }
 0xb15   : > { %v3256_v32 = vpop.xlane.xlu2 %3255 }
 0xb16   : > { %v3276_v34 = vsub.f32 %v3234_v43, %v3256_v32 }
 0xb18   : > { %v9872_v41 = vpop.eup %9871  ;;  %v3285_v58 = vmul.f32 1.442695, %v3276_v34 }
 0xb19   : > { %v3299_v38 = vsel %vm1394_vm1, %v9872_v41, 0.0 }
 0xb1a   : > { %9873 = vpow2.f32 %v3285_v58  ;;  %3300 = vadd.xlane.f32.xlu0 %v3299_v38 }
 0xb1d   : > { %v3259_v8 = vpop.xlane.xlu0 %3258 }
 0xb1e   : > { %v3277_v49 = vsub.f32 %v3237_v4, %v3259_v8 }
 0xb20   : > { %v9874_v54 = vpop.eup %9873  ;;  %v3287_v19 = vmul.f32 1.442695, %v3277_v49  ;;  %v9535_v49 = vld [vmem:[%s13990_s11 + $0x18] sm:$0xff] }
 0xb21   : > { %v3302_v60 = vsel %vm1394_vm1, %v9874_v54, 0.0  ;;  %3420 = vmatpush.bf16.msra.mxu3 %v9535_v49 }
 0xb22   : > { %9875 = vpow2.f32 %v3287_v19  ;;  %3303 = vadd.xlane.f32.xlu1 %v3302_v60 }
 0xb25   : > { %v3262_v31 = vpop.xlane.xlu1 %3261 }
 0xb26   : > { %v3278_v46 = vsub.f32 %v3239_v35, %v3262_v31 }
 0xb28   : > { %v9876_v3 = vpop.eup %9875  ;;  %v3289_v7 = vmul.f32 1.442695, %v3278_v46 }
 0xb29   : > { %v3305_v40 = vsel %vm1394_vm1, %v9876_v3, 0.0 }
 0xb2a   : > { %9877 = vpow2.f32 %v3289_v7  ;;  %3306 = vadd.xlane.f32.xlu2 %v3305_v40 }
 0xb2d   : > { %v3265_v39 = vpop.xlane.xlu2 %3264 }
 0xb2e   : > { %v3279_v56 = vsub.f32 %v3242_v51, %v3265_v39 }
 0xb30   : > { %v9878_v2 = vpop.eup %9877  ;;  %v3291_v43 = vmul.f32 1.442695, %v3279_v56 }
 0xb31   : > { %v3308_v48 = vsel %vm1394_vm1, %v9878_v2, 0.0 }
 0xb32   : > { %9879 = vpow2.f32 %v3291_v43  ;;  %3309 = vadd.xlane.f32.xlu0 %v3308_v48 }
 0xb35   : > { %v3268_v42 = vpop.xlane.xlu0 %3267 }
 0xb36   : > { %v3280_v22 = vsub.f32 %v3244_v12, %v3268_v42 }
 0xb38   : > { %v9880_v4 = vpop.eup %9879  ;;  %v3293_v52 = vmul.f32 1.442695, %v3280_v22 }
 0xb39   : > { %v3311_v63 = vsel %vm1394_vm1, %v9880_v4, 0.0 }
 0xb3a   : > { %9881 = vpow2.f32 %v3293_v52  ;;  %3312 = vadd.xlane.f32.xlu1 %v3311_v63 }
 0xb3d   : > { %v3271_v62 = vpop.xlane.xlu1 %3270 }
 0xb3e   : > { %v3281_v35 = vsub.f32 %v3247_v59, %v3271_v62  ;;  %v9539_v62 = vld [vmem:[%s13991_s16 + $0x18] sm:$0xff] }
 0xb3f   : > { %3518 = vmatpush.bf16.msra.mxu0 %v9539_v62 }
 0xb40   : > { %v9882_v47 = vpop.eup %9881  ;;  %v3295_v44 = vmul.f32 1.442695, %v3281_v35 }
 0xb41   : > { %v3314_v11 = vsel %vm1394_vm1, %v9882_v47, 0.0 }
 0xb42   : > { %9883 = vpow2.f32 %v3295_v44  ;;  %3315 = vadd.xlane.f32.xlu2 %v3314_v11 }
 0xb45   : > { %v3274_v51 = vpop.xlane.xlu2 %3273 }
 0xb46   : > { %v3282_v18 = vsub.f32 %v3249_v25, %v3274_v51 }
 0xb48   : > { %v9884_v20 = vpop.eup %9883  ;;  %v3297_v10 = vmul.f32 1.442695, %v3282_v18 }
 0xb49   : > { %v3317_v12 = vsel %vm1394_vm1, %v9884_v20, 0.0 }
 0xb4a   : > { %9885 = vpow2.f32 %v3297_v10  ;;  %3318 = vadd.xlane.f32.xlu0 %v3317_v12  ;;  %v9537_v10 = vld [vmem:[%s13991_s16 + $0x8] sm:$0xff]  ;;  %v9536_v12 = vld [vmem:[%s13991_s16] sm:$0xff] }
 0xb50   : > { %v9886_v9 = vpop.eup %9885 }
 0xb51   : > { %v3320_v15 = vsel %vm1394_vm1, %v9886_v9, 0.0 }
 0xb52   : > { %3321 = vadd.xlane.f32.xlu1 %v3320_v15  ;;  %v2511_v15 = vadd.f32 %v11085_v6, %v11055_v55 }
 0xb8d   : > { %v3301_v29 = vpop.xlane.xlu0 %3300 }
 0xb8e   : > { %9887 = vrcp.f32 %v3301_v29  ;;  %v2982_v29 = vadd.f32 %v11192_v17, %v2511_v15 }
 0xb94   : > { %v9888_v57 = vpop.eup %9887 }
 0xb95   : > { %v3304_v59 = vpop.xlane.xlu1 %3303  ;;  %v3331_v23 = vmul.f32 %v9888_v57, %v9872_v41  ;;  %v9737_v57 = vld [vmem:[%s13993_s23] ss:$0 sm:$0xff] }
 0xb96   : > { %9889 = vrcp.f32 %v3304_v59 }
 0xb9c   : > { %v9890_v0 = vpop.eup %9889 }
 0xb9d   : > { %v3332_v26 = vmul.f32 %v9890_v0, %v9874_v54  ;;  %v3307_v16 = vpop.xlane.xlu2 %3306 }
 0xb9e   : > { %9891 = vrcp.f32 %v3307_v16 }
 0xb9f   : > { %v3343_v25 = vpack.c.bf16 %v3332_v26, %v3331_v23 }
 0xba1   : > { %8877 = vmatmul.msk.bf16.vlgmr.msrb.gmra.mxu2 %vm1394_vm1, %v3343_v25 }
 0xba4   : > { %v9892_v36 = vpop.eup %9891 }
 0xba5   : > { %v3310_v30 = vpop.xlane.xlu0 %3309  ;;  %v3333_v34 = vmul.f32 %v9892_v36, %v9876_v3  ;;  %v2516_v36 = vadd.f32 %v11093_v1, %v11062_v24 }
 0xba6   : > { %9893 = vrcp.f32 %v3310_v30 }
 0xbac   : > { %v9894_v32 = vpop.eup %9893 }
 0xbad   : > { %v3334_v58 = vmul.f32 %v9894_v32, %v9878_v2  ;;  %v3313_v8 = vpop.xlane.xlu1 %3312  ;;  %v2984_v32 = vadd.f32 %v11198_v53, %v2516_v36 }
 0xbae   : > { %9895 = vrcp.f32 %v3313_v8  ;;  %v2521_v8 = vadd.f32 %v11099_v13, %v11072_v45 }
 0xbaf   : > { %v3344_v38 = vpack.c.bf16 %v3334_v58, %v3333_v34 }
 0xbb0   : > { %v2986_v49 = vadd.f32 %v11204_v14, %v2521_v8 }
 0xbb1   : > { %8878 = vmatmul.msk.bf16.gmra.mxu2 %vm1394_vm1, %v3344_v38 }
 0xbb4   : > { %v9896_v54 = vpop.eup %9895 }
 0xbb5   : > { %v3316_v41 = vpop.xlane.xlu2 %3315  ;;  %v3335_v60 = vmul.f32 %v9896_v54, %v9880_v4 }
 0xbb6   : > { %9897 = vrcp.f32 %v3316_v41 }
 0xbbc   : > { %v9898_v19 = vpop.eup %9897 }
 0xbbd   : > { %v3336_v31 = vmul.f32 %v9898_v19, %v9882_v47  ;;  %v3319_v7 = vpop.xlane.xlu0 %3318 }
 0xbbe   : > { %9899 = vrcp.f32 %v3319_v7 }
 0xbbf   : > { %v3345_v46 = vpack.c.bf16 %v3336_v31, %v3335_v60  ;;  %v2526_v60 = vadd.f32 %v11106_v33, %v11080_v27 }
 0xbc1   : > { %8879 = vmatmul.msk.bf16.gmra.mxu2 %vm1394_vm1, %v3345_v46  ;;  %v2988_v31 = vadd.f32 %v11210_v50, %v2526_v60  ;;  %v10238_v50 = vld [vmem:[#allocation2 + $0x8] sm:$0xff] }
 0xbc4   : > { %v9900_v40 = vpop.eup %9899 }
 0xbc5   : > { %v3322_v3 = vpop.xlane.xlu1 %3321  ;;  %v3337_v56 = vmul.f32 %v9900_v40, %v9884_v20  ;;  %v9538_v20 = vld [vmem:[%s13991_s16 + $0x10] sm:$0xff] }
 0xbc6   : > { %9901 = vrcp.f32 %v3322_v3  ;;  %3519 = vmatpush.bf16.msra.mxu0 %v9538_v20  ;;  %v9738_v3 = vld [vmem:[%s13994_s22] ss:$0 sm:$0xff] }
 0xbc7   : > { %v10241_v20 = vld [vmem:[#allocation2 + $0x20] sm:$0xff] }
 0xbca   : > { %3520 = vmatpush.bf16.msra.mxu0 %v9537_v10 }
 0xbcc   : > { %v9902_v39 = vpop.eup %9901 }
 0xbcd   : > { %v3338_v2 = vmul.f32 %v9902_v39, %v9886_v9 }
 0xbce   : > { %3521 = vmatpush.bf16.msra.mxu0 %v9536_v12 }
 0xbcf   : > { %v3346_v43 = vpack.c.bf16 %v3338_v2, %v3337_v56  ;;  %v10237_v56 = vld [vmem:[#allocation2] sm:$0xff] }
 0xbd1   : > { %8880 = vmatmul.msk.bf16.gmra.mxu2 %vm1394_vm1, %v3346_v43 }
 0xc24   : > { %v3368_v48 = vpop.f32.mrf.mxu2 }
 0xc2c   : > { %v3370_v42 = vpop.f32.mrf.mxu2 }
 0xc2d   : > { %v3391_v22 = vpack.c.bf16 %v3370_v42, %v3368_v48 }
 0xc2f   : > { %8887 = vmatmul.msk.bf16.vlgmr.msra.gmra.mxu3 %vm1831_vm12, %v3391_v22 }
 0xc34   : > { %v3373_v4 = vpop.f32.mrf.mxu2 }
 0xc3c   : > { %v3375_v52 = vpop.f32.mrf.mxu2 }
 0xc3d   : > { %v3392_v63 = vpack.c.bf16 %v3375_v52, %v3373_v4  ;;  %v10239_v4 = vld [vmem:[#allocation2 + $0x10] sm:$0xff] }
 0xc3f   : > { %8888 = vmatmul.msk.bf16.gmra.mxu3 %vm1831_vm12, %v3392_v63 }
 0xc44   : > { %v3378_v35 = vpop.f32.mrf.mxu2 }
 0xc4c   : > { %v3380_v47 = vpop.f32.mrf.mxu2 }
 0xc4d   : > { %v3393_v44 = vpack.c.bf16 %v3380_v47, %v3378_v35  ;;  %v10240_v47 = vld [vmem:[#allocation2 + $0x18] sm:$0xff] }
 0xc4f   : > { %8889 = vmatmul.msk.bf16.gmra.mxu3 %vm1831_vm12, %v3393_v44 }
 0xc54   : > { %v3383_v11 = vpop.f32.mrf.mxu2 }
 0xc5c   : > { %v3385_v51 = vpop.f32.mrf.mxu2 }
 0xc5d   : > { %v3394_v18 = vpack.c.bf16 %v3385_v51, %v3383_v11 }
 0xc5f   : > { %8890 = vmatmul.msk.bf16.gmra.mxu3 %vm1831_vm12, %v3394_v18 }
 0xcb2   : > { %v3422_v9 = vpop.f32.mrf.mxu3 }
 0xcb3   : > { %v3442_v59 = vadd.f32 %v3422_v9, %v11190_v21 }
 0xcb5   : > { %v3454_v26 = vadd.f32 %v9737_v57, %v3442_v59 }
 0xcba   : > { %v3424_v0 = vpop.f32.mrf.mxu3 }
 0xcbb   : > { %v3443_v23 = vadd.f32 %v3424_v0, %v2982_v29  ;;  %v10242_v29 = vld [vmem:[#allocation2 + $0x28] sm:$0xff] }
 0xcbd   : > { %v3455_v25 = vadd.f32 %v9737_v57, %v3443_v23 }
 0xcbf   : > { %v3470_v16 = vpack.c.bf16 %v3455_v25, %v3454_v26  ;;  %v10243_v26 = vld [vmem:[#allocation2 + $0x30] sm:$0xff] }
 0xcc1   : > { %8907 = vmatmul.msk.bf16.vlgmr.msra.gmra.mxu0 %vm1394_vm1, %v3470_v16 }
 0xcc2   : > { %v3427_v30 = vpop.f32.mrf.mxu3 }
 0xcc3   : > { %v3444_v55 = vadd.f32 %v3427_v30, %v11196_v37 }
 0xcc5   : > { %v3456_v21 = vadd.f32 %v9737_v57, %v3444_v55 }
 0xcca   : > { %v3429_v6 = vpop.f32.mrf.mxu3 }
 0xccb   : > { %v3445_v17 = vadd.f32 %v3429_v6, %v2984_v32 }
 0xccd   : > { %v3457_v34 = vadd.f32 %v9737_v57, %v3445_v17 }
 0xccf   : > { %v3471_v58 = vpack.c.bf16 %v3457_v34, %v3456_v21 }
 0xcd1   : > { %8908 = vmatmul.msk.bf16.gmra.mxu0 %vm1394_vm1, %v3471_v58 }
 0xcd2   : > { %v3432_v38 = vpop.f32.mrf.mxu3 }
 0xcd3   : > { %v3446_v41 = vadd.f32 %v3432_v38, %v11202_v5  ;;  %v10244_v38 = vld [vmem:[#allocation2 + $0x38] sm:$0xff] }
 0xcd5   : > { %v3458_v37 = vadd.f32 %v9737_v57, %v3446_v41 }
 0xcda   : > { %v3434_v24 = vpop.f32.mrf.mxu3 }
 0xcdb   : > { %v3447_v1 = vadd.f32 %v3434_v24, %v2986_v49 }
 0xcdd   : > { %v3459_v53 = vadd.f32 %v9737_v57, %v3447_v1 }
 0xcdf   : > { %v3472_v54 = vpack.c.bf16 %v3459_v53, %v3458_v37 }
 0xce1   : > { %8909 = vmatmul.msk.bf16.gmra.mxu0 %vm1394_vm1, %v3472_v54 }
 0xce2   : > { %v3437_v19 = vpop.f32.mrf.mxu3 }
 0xce3   : > { %v3448_v45 = vadd.f32 %v3437_v19, %v11208_v28 }
 0xce5   : > { %v3460_v5 = vadd.f32 %v9737_v57, %v3448_v45 }
 0xcea   : > { %v3439_v13 = vpop.f32.mrf.mxu3 }
 0xceb   : > { %v3449_v14 = vadd.f32 %v3439_v13, %v2988_v31 }
 0xced   : > { %v3461_v46 = vadd.f32 %v9737_v57, %v3449_v14 }
 0xcef   : > { %v3473_v7 = vpack.c.bf16 %v3461_v46, %v3460_v5 }
 0xcf1   : > { %8910 = vmatmul.msk.bf16.gmra.mxu0 %vm1394_vm1, %v3473_v7 }
 0xd3e   : > { %v3523_v40 = vpop.f32.mrf.mxu0 }
 0xd3f   : > { %v3524_v39 = vadd.f32 %v9738_v3, %v3523_v40 }
 0xd41   : > { %v11275_v2 = vadd.f32 %v10237_v56, %v3524_v39 }
 0xd43   : > { %13995 = vst [vmem:[#allocation43_spill] sm:$0xff] %v11275_v2  ;;  %v3553_v27 = vsel %vm1394_vm1, %v11275_v2, 0.0 }
 0xd44   : > { %3554 = vadd.xlane.f32.xlu2 %v3553_v27 }
 0xd46   : > { %v3525_v33 = vpop.f32.mrf.mxu0 }
 0xd47   : > { %v3526_v28 = vadd.f32 %v9738_v3, %v3525_v33 }
 0xd49   : > { %v11279_v43 = vadd.f32 %v10238_v50, %v3526_v28 }
 0xd4b   : > { %13996 = vst [vmem:[#allocation44_spill] sm:$0xff] %v11279_v43  ;;  %v3556_v48 = vsel %vm1394_vm1, %v11279_v43, 0.0 }
 0xd4c   : > { %3557 = vadd.xlane.f32.xlu0 %v3556_v48 }
 0xd4e   : > { %v3528_v42 = vpop.f32.mrf.mxu0 }
 0xd4f   : > { %v3529_v22 = vadd.f32 %v9738_v3, %v3528_v42 }
 0xd51   : > { %v11283_v52 = vadd.f32 %v10239_v4, %v3529_v22 }
 0xd53   : > { %13997 = vst [vmem:[#allocation45_spill] sm:$0xff] %v11283_v52  ;;  %v3559_v63 = vsel %vm1394_vm1, %v11283_v52, 0.0 }
 0xd54   : > { %3560 = vadd.xlane.f32.xlu1 %v3559_v63 }
 0xd56   : > { %v3530_v62 = vpop.f32.mrf.mxu0 }
 0xd57   : > { %v3531_v35 = vadd.f32 %v9738_v3, %v3530_v62 }
 0xd59   : > { %v11287_v44 = vadd.f32 %v10240_v47, %v3531_v35  ;;  %v9543_v47 = vld [vmem:[%s10591_s13 + $0x18] sm:$0xff] }
 0xd5a   : > { %3842 = vmatpush.bf16.msra.mxu1 %v9543_v47 }
 0xd5b   : > { %13998 = vst [vmem:[#allocation46_spill] sm:$0xff] %v11287_v44  ;;  %v3562_v11 = vsel %vm1394_vm1, %v11287_v44, 0.0 }
 0xd5c   : > { %3563 = vadd.xlane.f32.xlu2 %v3562_v11  ;;  %v9547_v11 = vld [vmem:[%s10591_s13 + $0x98] sm:$0xff] }
 0xd5d   : > { %3909 = vmatpush.bf16.msra.mxu2 %v9547_v11 }
 0xd5e   : > { %v3533_v51 = vpop.f32.mrf.mxu0 }
 0xd5f   : > { %v3534_v18 = vadd.f32 %v9738_v3, %v3533_v51  ;;  %v11363_v51 = vld [vmem:[%s10591_s13 + $0x118] sm:$0xff] }
 0xd60   : > { %3976 = vmatpush.bf16.msrb.mxu3 %v11363_v51 }
 0xd61   : > { %v11291_v10 = vadd.f32 %v10241_v20, %v3534_v18  ;;  %v9542_v18 = vld [vmem:[%s10591_s13 + $0x10] sm:$0xff] }
 0xd62   : > { %v9546_v20 = vld [vmem:[%s10591_s13 + $0x90] sm:$0xff]  ;;  %3843 = vmatpush.bf16.msra.mxu1 %v9542_v18 }
 0xd63   : > { %13999 = vst [vmem:[#allocation47_spill] sm:$0xff] %v11291_v10  ;;  %v3565_v12 = vsel %vm1394_vm1, %v11291_v10, 0.0  ;;  %3910 = vmatpush.bf16.msra.mxu2 %v9546_v20 }
 0xd64   : > { %3566 = vadd.xlane.f32.xlu0 %v3565_v12  ;;  %v11369_v12 = vld [vmem:[%s10591_s13 + $0x110] sm:$0xff] }
 0xd65   : > { %3977 = vmatpush.bf16.msrb.mxu3 %v11369_v12 }
 0xd66   : > { %v3535_v9 = vpop.f32.mrf.mxu0 }
 0xd67   : > { %v3536_v15 = vadd.f32 %v9738_v3, %v3535_v9  ;;  %v9541_v9 = vld [vmem:[%s10591_s13 + $0x8] sm:$0xff] }
 0xd68   : > { %3844 = vmatpush.bf16.msra.mxu1 %v9541_v9 }
 0xd69   : > { %v11295_v59 = vadd.f32 %v10242_v29, %v3536_v15  ;;  %v9545_v15 = vld [vmem:[%s10591_s13 + $0x88] sm:$0xff] }
 0xd6a   : > { %v11375_v29 = vld [vmem:[%s10591_s13 + $0x108] sm:$0xff]  ;;  %3911 = vmatpush.bf16.msra.mxu2 %v9545_v15 }
 0xd6b   : > { %14000 = vst [vmem:[#allocation48_spill] sm:$0xff] %v11295_v59  ;;  %v3568_v57 = vsel %vm1394_vm1, %v11295_v59, 0.0  ;;  %3978 = vmatpush.bf16.msrb.mxu3 %v11375_v29 }
 0xd6c   : > { %3569 = vadd.xlane.f32.xlu1 %v3568_v57 }
 0xd6e   : > { %v3538_v0 = vpop.f32.mrf.mxu0 }
 0xd6f   : > { %v3539_v23 = vadd.f32 %v9738_v3, %v3538_v0 }
 0xd71   : > { %v11299_v25 = vadd.f32 %v10243_v26, %v3539_v23  ;;  %v9540_v26 = vld [vmem:[%s10591_s13] sm:$0xff] }
 0xd72   : > { %3845 = vmatpush.bf16.msra.mxu1 %v9540_v26 }
 0xd73   : > { %14001 = vst [vmem:[#allocation49_spill] sm:$0xff] %v11299_v25  ;;  %v3571_v16 = vsel %vm1394_vm1, %v11299_v25, 0.0 }
 0xd74   : > { %3572 = vadd.xlane.f32.xlu1 %v3571_v16  ;;  %v9544_v16 = vld [vmem:[%s10591_s13 + $0x80] sm:$0xff] }
 0xd75   : > { %3912 = vmatpush.bf16.msra.mxu2 %v9544_v16 }
 0xd76   : > { %v3540_v55 = vpop.f32.mrf.mxu0  ;;  %4021 = vmatpush.bf16.msrb.mxu1 %v9547_v11  ;;  %v11400_v11 = vld [vmem:[%s10588_s8] ss:$0 sm:$0xff] }
 0xd77   : > { %v3541_v17 = vadd.f32 %v9738_v3, %v3540_v55  ;;  %v11336_v3 = vld [vmem:[#allocation2 + $0x40] sm:$0xff] }
 0xd78   : > { %v3752_v56 = vsel %vm3751_vm13, %v11336_v3, 0.0 }
 0xd79   : > { %v11311_v8 = vadd.f32 %v10244_v38, %v3541_v17  ;;  %4008 = vmatpush.bf16.msrb.mxu2 %v9543_v47 }
 0xd7a   : > { %4022 = vmatpush.bf16.msrb.mxu1 %v9546_v20 }
 0xd7b   : > { %14002 = vst [vmem:[#allocation50_spill] sm:$0xff] %v11311_v8  ;;  %v3574_v1 = vsel %vm1394_vm1, %v11311_v8, 0.0 }
 0xd7d   : > { %4009 = vmatpush.bf16.msrb.mxu2 %v9542_v18 }
 0xd7e   : > { %4023 = vmatpush.bf16.msrb.mxu1 %v9545_v15 }
 0xd81   : > { %4010 = vmatpush.bf16.msrb.mxu2 %v9541_v9 }
 0xd82   : > { %4024 = vmatpush.bf16.msrb.mxu1 %v9544_v16 }
 0xd85   : > { %4011 = vmatpush.bf16.msrb.mxu2 %v9540_v26 }
 0xdb7   : > { %v3555_v30 = vpop.xlane.xlu2 %3554 }
 0xdb8   : > { %v3577_v36 = vmul.f32 %v3555_v30, %v10666_v61  ;;  %v11382_v30 = vld [vmem:[%s10591_s13 + $0x100] sm:$0xff] }
 0xdb9   : > { %3979 = vmatpush.bf16.msrb.mxu3 %v11382_v30 }
 0xdba   : > { %v11305_v32 = vsub.f32 %v11275_v2, %v3577_v36 }
 0xdbc   : > { %v3593_v6 = vmul.f32 %v11305_v32, %v11305_v32 }
 0xdbe   : > { %v3601_v21 = vsel %vm1394_vm1, %v3593_v6, 0.0 }
 0xdbf   : > { %v3558_v34 = vpop.xlane.xlu0 %3557  ;;  %3602 = vadd.xlane.f32.xlu2 %v3601_v21 }
 0xdc0   : > { %v3578_v58 = vmul.f32 %v3558_v34, %v10666_v61 }
 0xdc2   : > { %v11314_v49 = vsub.f32 %v11279_v43, %v3578_v58 }
 0xdc4   : > { %v3594_v41 = vmul.f32 %v11314_v49, %v11314_v49 }
 0xdc6   : > { %v3604_v24 = vsel %vm1394_vm1, %v3594_v41, 0.0 }
 0xdc7   : > { %3605 = vadd.xlane.f32.xlu0 %v3604_v24  ;;  %v3561_v37 = vpop.xlane.xlu1 %3560  ;;  %3575 = vadd.xlane.f32.xlu2 %v3574_v1 }
 0xdc8   : > { %v3579_v53 = vmul.f32 %v3561_v37, %v10666_v61 }
 0xdca   : > { %v11323_v54 = vsub.f32 %v11283_v52, %v3579_v53 }
 0xdcc   : > { %v3595_v19 = vmul.f32 %v11323_v54, %v11323_v54 }
 0xdce   : > { %v3607_v60 = vsel %vm1394_vm1, %v3595_v19, 0.0 }
 0xdcf   : > { %v3564_v31 = vpop.xlane.xlu2 %3563  ;;  %3608 = vadd.xlane.f32.xlu0 %v3607_v60 }
 0xdd0   : > { %v3580_v45 = vmul.f32 %v3564_v31, %v10666_v61 }
 0xdd2   : > { %v11330_v13 = vsub.f32 %v11287_v44, %v3580_v45 }
 0xdd4   : > { %v3596_v14 = vmul.f32 %v11330_v13, %v11330_v13 }
 0xdd6   : > { %v3610_v5 = vsel %vm1394_vm1, %v3596_v14, 0.0 }
 0xdd7   : > { %v3567_v46 = vpop.xlane.xlu0 %3566  ;;  %3611 = vadd.xlane.f32.xlu1 %v3610_v5 }
 0xdd8   : > { %v3581_v7 = vmul.f32 %v3567_v46, %v10666_v61 }
 0xdda   : > { %v11339_v40 = vsub.f32 %v11291_v10, %v3581_v7 }
 0xddc   : > { %v3597_v39 = vmul.f32 %v11339_v40, %v11339_v40 }
 0xdde   : > { %v3613_v27 = vsel %vm1394_vm1, %v3597_v39, 0.0 }
 0xddf   : > { %v3570_v33 = vpop.xlane.xlu1 %3569  ;;  %3614 = vadd.xlane.f32.xlu2 %v3613_v27  ;;  %3753 = vadd.xlane.f32.xlu1 %v3752_v56 }
 0xde0   : > { %v3582_v28 = vmul.f32 %v3570_v33, %v10666_v61 }
 0xde2   : > { %v11348_v50 = vsub.f32 %v11295_v59, %v3582_v28 }
 0xde4   : > { %v3598_v48 = vmul.f32 %v11348_v50, %v11348_v50 }
 0xde6   : > { %v3616_v42 = vsel %vm1394_vm1, %v3598_v48, 0.0  ;;  %v11396_v48 = vld [vmem:[%s14003_s5] ss:$0 sm:$0xff] }
 0xde7   : > { %3617 = vadd.xlane.f32.xlu0 %v3616_v42  ;;  %v3573_v22 = vpop.xlane.xlu1 %3572 }
 0xde8   : > { %v3583_v4 = vmul.f32 %v3573_v22, %v10666_v61 }
 0xdea   : > { %v11355_v63 = vsub.f32 %v11299_v25, %v3583_v4 }
 0xdec   : > { %v3599_v62 = vmul.f32 %v11355_v63, %v11355_v63 }
 0xdee   : > { %v3619_v35 = vsel %vm1394_vm1, %v3599_v62, 0.0 }
 0xdef   : > { %3620 = vadd.xlane.f32.xlu2 %v3619_v35 }
 0xe32   : > { %v3603_v57 = vpop.xlane.xlu2 %3602 }
 0xe33   : > { %v3625_v0 = vmul.f32 %v3603_v57, %v10666_v61 }
 0xe35   : > { %v3633_v23 = vadd.f32 1e-06, %v3625_v0 }
 0xe37   : > { %9903 = vrsqrt.f32 %v3633_v23  ;;  %vm3647_vm15 = vweird.f32 %v3633_v23 }
 0xe3a   : > { %v3606_v36 = vpop.xlane.xlu0 %3605  ;;  %v3576_v55 = vpop.xlane.xlu2 %3575 }
 0xe3b   : > { %v3626_v6 = vmul.f32 %v3606_v36, %v10666_v61  ;;  %v3584_v17 = vmul.f32 %v3576_v55, %v10666_v61 }
 0xe3d   : > { %v9904_v21 = vpop.eup %9903  ;;  %v3634_v34 = vadd.f32 1e-06, %v3626_v6  ;;  %v11388_v58 = vsub.f32 %v11311_v8, %v3584_v17 }
 0xe3e   : > { %v3642_v38 = vmul.f32 %v9904_v21, %v3633_v23  ;;  %vm3648_vm14 = vweird.f32 %v9904_v21 }
 0xe3f   : > { %9905 = vrsqrt.f32 %v3634_v34  ;;  %v3600_v41 = vmul.f32 %v11388_v58, %v11388_v58  ;;  %vm3649_vm0 = vmor %vm3647_vm15, %vm3648_vm14  ;;  %vm3657_vm3 = vweird.f32 %v3634_v34 }
 0xe40   : > { %v3643_v24 = vmul.f32 %v9904_v21, %v3642_v38 }
 0xe41   : > { %v3622_v1 = vsel %vm1394_vm1, %v3600_v41, 0.0 }
 0xe42   : > { %v3644_v37 = vmul.f32 0.5, %v3643_v24  ;;  %v3609_v53 = vpop.xlane.xlu0 %3608  ;;  %3623 = vadd.xlane.f32.xlu0 %v3622_v1 }
 0xe43   : > { %v3627_v19 = vmul.f32 %v3609_v53, %v10666_v61 }
 0xe44   : > { %v3645_v60 = vsub.f32 1.5, %v3644_v37 }
 0xe45   : > { %v9906_v31 = vpop.eup %9905  ;;  %v3635_v45 = vadd.f32 1e-06, %v3627_v19 }
 0xe46   : > { %v3646_v14 = vmul.f32 %v9904_v21, %v3645_v60  ;;  %v3652_v5 = vmul.f32 %v9906_v31, %v3634_v34  ;;  %vm3658_vm2 = vweird.f32 %v9906_v31 }
 0xe47   : > { %9907 = vrsqrt.f32 %v3635_v45  ;;  %vm3659_vm4 = vmor %vm3657_vm3, %vm3658_vm2  ;;  %vm3667_vm6 = vweird.f32 %v3635_v45 }
 0xe48   : > { %v3653_v46 = vmul.f32 %v9906_v31, %v3652_v5  ;;  %v3650_v7 = vsel %vm3649_vm0, %v9904_v21, %v3646_v14 }
 0xe49   : > { %v3721_v42 = vmul.f32 %v3650_v7, %v11305_v32 }
 0xe4a   : > { %v3654_v39 = vmul.f32 0.5, %v3653_v46  ;;  %v3612_v56 = vpop.xlane.xlu1 %3611 }
 0xe4b   : > { %v3628_v27 = vmul.f32 %v3612_v56, %v10666_v61  ;;  %v3732_v18 = vmul.f32 %v11396_v48, %v3721_v42 }
 0xe4c   : > { %v3655_v33 = vsub.f32 1.5, %v3654_v39 }
 0xe4d   : > { %v9908_v28 = vpop.eup %9907  ;;  %v3636_v22 = vadd.f32 1e-06, %v3628_v27  ;;  %v3743_v36 = vadd.f32 %v11400_v11, %v3732_v18 }
 0xe4e   : > { %v3656_v4 = vmul.f32 %v9906_v31, %v3655_v33  ;;  %v3662_v62 = vmul.f32 %v9908_v28, %v3635_v45  ;;  %vm3668_vm5 = vweird.f32 %v9908_v28 }
 0xe4f   : > { %9909 = vrsqrt.f32 %v3636_v22  ;;  %vm3669_vm7 = vmor %vm3667_vm6, %vm3668_vm5  ;;  %vm3677_vm9 = vweird.f32 %v3636_v22 }
 0xe50   : > { %v3660_v35 = vsel %vm3659_vm4, %v9906_v31, %v3656_v4  ;;  %v3663_v47 = vmul.f32 %v9908_v28, %v3662_v62 }
 0xe51   : > { %v3722_v20 = vmul.f32 %v3660_v35, %v11314_v49 }
 0xe52   : > { %v3664_v9 = vmul.f32 0.5, %v3663_v47  ;;  %v3615_v15 = vpop.xlane.xlu2 %3614  ;;  %v3754_v57 = vpop.xlane.xlu1 %3753 }
 0xe53   : > { %v3733_v0 = vmul.f32 %v11396_v48, %v3722_v20  ;;  %v3629_v32 = vmul.f32 %v3615_v15, %v10666_v61  ;;  %v3755_v23 = vmul.f32 %v3754_v57, %v10666_v61 }
 0xe54   : > { %v3665_v26 = vsub.f32 1.5, %v3664_v9 }
 0xe55   : > { %v9910_v16 = vpop.eup %9909  ;;  %v3744_v55 = vadd.f32 %v11400_v11, %v3733_v0  ;;  %v3637_v6 = vadd.f32 1e-06, %v3629_v32  ;;  %v11410_v17 = vsub.f32 %v11336_v3, %v3755_v23 }
 0xe56   : > { %v3666_v49 = vmul.f32 %v9908_v28, %v3665_v26  ;;  %v3672_v21 = vmul.f32 %v9910_v16, %v3636_v22  ;;  %vm3678_vm8 = vweird.f32 %v9910_v16 }
 0xe57   : > { %v11412_v34 = vpack.c.bf16 %v3744_v55, %v3743_v36  ;;  %9911 = vrsqrt.f32 %v3637_v6  ;;  %v3757_v38 = vmul.f32 %v11410_v17, %v11410_v17  ;;  %vm3679_vm10 = vmor %vm3677_vm9, %vm3678_vm8  ;;  %vm3687_vm14 = vweird.f32 %v3637_v6 }
 0xe58   : > { %v3673_v41 = vmul.f32 %v9910_v16, %v3672_v21  ;;  %v3670_v24 = vsel %vm3669_vm7, %v9908_v28, %v3666_v49 }
 0xe59   : > { %8927 = vmatmul.msk.bf16.vlgmr.msra.gmra.mxu1 %vm1394_vm1, %v11412_v34  ;;  %8956 = vmatmul.msk.bf16.vlgmr.msra.gmra.mxu2 %vm1394_vm1, %v11412_v34  ;;  %v3758_v3 = vsel %vm3751_vm13, %v3757_v38, 0.0  ;;  %v3723_v31 = vmul.f32 %v3670_v24, %v11323_v54 }
 0xe5a   : > { %v3674_v1 = vmul.f32 0.5, %v3673_v41  ;;  %8985 = vmatmul.msk.bf16.vlgmr.msrb.gmra.mxu3 %vm1394_vm1, %v11412_v34  ;;  %v3618_v37 = vpop.xlane.xlu0 %3617  ;;  %3759 = vadd.xlane.f32.xlu1 %v3758_v3 }
 0xe5b   : > { %v3630_v53 = vmul.f32 %v3618_v37, %v10666_v61  ;;  %4034 = vmatpush.bf16.msra.mxu2 %v11363_v51  ;;  %v3734_v39 = vmul.f32 %v11396_v48, %v3723_v31 }
 0xe5c   : > { %v3675_v19 = vsub.f32 1.5, %v3674_v1 }
 0xe5d   : > { %v9912_v60 = vpop.eup %9911  ;;  %v3638_v45 = vadd.f32 1e-06, %v3630_v53  ;;  %v3745_v28 = vadd.f32 %v11400_v11, %v3734_v39 }
 0xe5e   : > { %v3676_v14 = vmul.f32 %v9910_v16, %v3675_v19  ;;  %v3682_v5 = vmul.f32 %v9912_v60, %v3637_v6  ;;  %vm3688_vm11 = vweird.f32 %v9912_v60 }
 0xe5f   : > { %9913 = vrsqrt.f32 %v3638_v45  ;;  %4035 = vmatpush.bf16.msra.mxu2 %v11369_v12  ;;  %vm3689_vm15 = vmor %vm3687_vm14, %vm3688_vm11  ;;  %vm3697_vm2 = vweird.f32 %v3638_v45 }
 0xe60   : > { %v3680_v46 = vsel %vm3679_vm10, %v9910_v16, %v3676_v14  ;;  %v3683_v7 = vmul.f32 %v9912_v60, %v3682_v5 }
 0xe61   : > { %v3724_v56 = vmul.f32 %v3680_v46, %v11330_v13 }
 0xe62   : > { %v3684_v51 = vmul.f32 0.5, %v3683_v7 }
 0xe63   : > { %v3735_v27 = vmul.f32 %v11396_v48, %v3724_v56  ;;  %4036 = vmatpush.bf16.msra.mxu2 %v11375_v29 }
 0xe64   : > { %v3685_v54 = vsub.f32 1.5, %v3684_v51 }
 0xe65   : > { %v9914_v33 = vpop.eup %9913  ;;  %v3746_v42 = vadd.f32 %v11400_v11, %v3735_v27 }
 0xe66   : > { %v3686_v22 = vmul.f32 %v9912_v60, %v3685_v54  ;;  %v3692_v12 = vmul.f32 %v9914_v33, %v3638_v45  ;;  %vm3698_vm0 = vweird.f32 %v9914_v33 }
 0xe67   : > { %v11433_v4 = vpack.c.bf16 %v3746_v42, %v3745_v28  ;;  %4037 = vmatpush.bf16.msra.mxu2 %v11382_v30  ;;  %vm3699_vm3 = vmor %vm3697_vm2, %vm3698_vm0  ;;  %v3551_v42 = vld [vmem:[%s14003_s5] sm:$0x1]  ;;  %vm4354_vm0 = vcmask 519168   ;;  %vm4391_vm2 = vcmask 125952  }
 0xe68   : > { %v3693_v13 = vmul.f32 %v9914_v33, %v3692_v12  ;;  %v3690_v29 = vsel %vm3689_vm15, %v9912_v60, %v3686_v22  ;;  %vm4350_vm15 = vcmask 122880  }
 0xe69   : > { %8928 = vmatmul.msk.bf16.gmra.mxu1 %vm1394_vm1, %v11433_v4  ;;  %8957 = vmatmul.msk.bf16.gmra.mxu2 %vm1394_vm1, %v11433_v4  ;;  %v3725_v47 = vmul.f32 %v3690_v29, %v11339_v40  ;;  %v3621_v40 = vpop.xlane.xlu2 %3620 }
 0xe6a   : > { %v3694_v62 = vmul.f32 0.5, %v3693_v13  ;;  %8986 = vmatmul.msk.bf16.gmra.mxu3 %vm1394_vm1, %v11433_v4  ;;  %v3552_v13 = vld [vmem:[%s10588_s8] sm:$0x1]  ;;  %s14004_s8 = sld [smem:[#allocation8_spill]] }
 0xe6b   : > { %v3736_v20 = vmul.f32 %v11396_v48, %v3725_v47 }
 0xe6c   : > { %v3695_v35 = vsub.f32 1.5, %v3694_v62 }
 0xe6d   : > { %v3747_v57 = vadd.f32 %v11400_v11, %v3736_v20 }
 0xe6e   : > { %v3696_v18 = vmul.f32 %v9914_v33, %v3695_v35 }
 0xe70   : > { %v3700_v30 = vsel %vm3699_vm3, %v9914_v33, %v3696_v18 }
 0xe71   : > { %v3726_v9 = vmul.f32 %v3700_v30, %v11348_v50  ;;  %v3631_v50 = vmul.f32 %v3621_v40, %v10666_v61 }
 0xe73   : > { %v3737_v15 = vmul.f32 %v11396_v48, %v3726_v9  ;;  %v3639_v23 = vadd.f32 1e-06, %v3631_v50 }
 0xe75   : > { %v3748_v0 = vadd.f32 %v11400_v11, %v3737_v15  ;;  %9915 = vrsqrt.f32 %v3639_v23  ;;  %vm3707_vm5 = vweird.f32 %v3639_v23 }
 0xe77   : > { %v11448_v32 = vpack.c.bf16 %v3748_v0, %v3747_v57 }
 0xe79   : > { %8929 = vmatmul.msk.bf16.gmra.mxu1 %vm1394_vm1, %v11448_v32  ;;  %8958 = vmatmul.msk.bf16.gmra.mxu2 %vm1394_vm1, %v11448_v32 }
 0xe7a   : > { %8987 = vmatmul.msk.bf16.gmra.mxu3 %vm1394_vm1, %v11448_v32 }
 0xe7b   : > { %v9916_v26 = vpop.eup %9915 }
 0xe7c   : > { %v3702_v16 = vmul.f32 %v9916_v26, %v3639_v23  ;;  %vm3708_vm4 = vweird.f32 %v9916_v26 }
 0xe7d   : > { %vm3709_vm6 = vmor %vm3707_vm5, %vm3708_vm4 }
 0xe7e   : > { %v3703_v36 = vmul.f32 %v9916_v26, %v3702_v16 }
 0xe80   : > { %v3704_v21 = vmul.f32 0.5, %v3703_v36 }
 0xe82   : > { %v3705_v38 = vsub.f32 1.5, %v3704_v21 }
 0xe84   : > { %v3706_v3 = vmul.f32 %v9916_v26, %v3705_v38 }
 0xe86   : > { %v3710_v37 = vsel %vm3709_vm6, %v9916_v26, %v3706_v3  ;;  %v9742_v3 = vld [vmem:[%s10594_s19 + $0x4] ss:$0 sm:$0xff] }
 0xe87   : > { %v3727_v60 = vmul.f32 %v3710_v37, %v11355_v63 }
 0xe89   : > { %v3738_v14 = vmul.f32 %v11396_v48, %v3727_v60 }
 0xe8b   : > { %v3749_v56 = vadd.f32 %v11400_v11, %v3738_v14 }
 0xeb5   : > { %v3624_v55 = vpop.xlane.xlu0 %3623 }
 0xeb6   : > { %v3632_v6 = vmul.f32 %v3624_v55, %v10666_v61 }
 0xeb8   : > { %v3640_v49 = vadd.f32 1e-06, %v3632_v6 }
 0xeba   : > { %9917 = vrsqrt.f32 %v3640_v49  ;;  %vm3717_vm8 = vweird.f32 %v3640_v49 }
 0xec0   : > { %v9918_v41 = vpop.eup %9917 }
 0xec1   : > { %v3712_v24 = vmul.f32 %v9918_v41, %v3640_v49  ;;  %vm3718_vm7 = vweird.f32 %v9918_v41 }
 0xec2   : > { %vm3719_vm9 = vmor %vm3717_vm8, %vm3718_vm7 }
 0xec3   : > { %v3713_v1 = vmul.f32 %v9918_v41, %v3712_v24  ;;  %v9743_v24 = vld [vmem:[%s10594_s19 + $0x8] ss:$0 sm:$0xff] }
 0xec5   : > { %v3714_v53 = vmul.f32 0.5, %v3713_v1 }
 0xec7   : > { %v3715_v19 = vsub.f32 1.5, %v3714_v53 }
 0xec9   : > { %v3716_v31 = vmul.f32 %v9918_v41, %v3715_v19 }
 0xecb   : > { %v3720_v45 = vsel %vm3719_vm9, %v9918_v41, %v3716_v31 }
 0xecc   : > { %v3728_v5 = vmul.f32 %v3720_v45, %v11388_v58 }
 0xecd   : > { %v3760_v46 = vpop.xlane.xlu1 %3759 }
 0xece   : > { %v3739_v7 = vmul.f32 %v11396_v48, %v3728_v5  ;;  %v3761_v39 = vmul.f32 %v3760_v46, %v10666_v61 }
 0xed0   : > { %v3750_v51 = vadd.f32 %v11400_v11, %v3739_v7  ;;  %v3762_v27 = vadd.f32 1e-06, %v3761_v39 }
 0xed2   : > { %v11465_v63 = vpack.c.bf16 %v3750_v51, %v3749_v56  ;;  %9919 = vrsqrt.f32 %v3762_v27  ;;  %vm3769_vm10 = vweird.f32 %v3762_v27  ;;  %v8939_v51 = vld [vmem:[%s10594_s19 + $0x4] sm:$0x1] }
 0xed4   : > { %8930 = vmatmul.msk.bf16.gmra.mxu1 %vm1394_vm1, %v11465_v63  ;;  %8959 = vmatmul.msk.bf16.gmra.mxu2 %vm1394_vm1, %v11465_v63 }
 0xed5   : > { %8988 = vmatmul.msk.bf16.gmra.mxu3 %vm1394_vm1, %v11465_v63 }
 0xed6   : > { %v11484_v47 = vpop.f32.mrf.mxu1 }
 0xed8   : > { %v9920_v58 = vpop.eup %9919 }
 0xed9   : > { %v3764_v48 = vmul.f32 %v9920_v58, %v3762_v27  ;;  %vm3770_vm11 = vweird.f32 %v9920_v58 }
 0xeda   : > { %vm3771_vm14 = vmor %vm3769_vm10, %vm3770_vm11 }
 0xedb   : > { %v3765_v54 = vmul.f32 %v9920_v58, %v3764_v48 }
 0xedc   : > { %v11486_v18 = vpop.f32.mrf.mxu2 }
 0xedd   : > { %v3766_v33 = vmul.f32 0.5, %v3765_v54  ;;  %v3981_v30 = vpop.f32.mrf.mxu3 }
 0xedf   : > { %v3767_v11 = vsub.f32 1.5, %v3766_v33 }
 0xee1   : > { %v3768_v28 = vmul.f32 %v9920_v58, %v3767_v11 }
 0xee3   : > { %v3772_v22 = vsel %vm3771_vm14, %v9920_v58, %v3768_v28 }
 0xee4   : > { %v3773_v12 = vmul.f32 %v3772_v22, %v11410_v17  ;;  %v11488_v17 = vpop.f32.mrf.mxu1  ;;  %v11490_v20 = vpop.f32.mrf.mxu2 }
 0xee5   : > { %v3983_v9 = vpop.f32.mrf.mxu3 }
 0xee6   : > { %v3774_v29 = vmul.f32 %v3773_v12, %v3551_v42  ;;  %v11505_v42 = vld [vmem:[%s10594_s19] ss:$0 sm:$0xff]  ;;  %v3984_v22 = vadd.f32 %v9743_v24, %v3983_v9 }
 0xee8   : > { %v3775_v62 = vadd.f32 %v3774_v29, %v3552_v13  ;;  %v3982_v13 = vadd.f32 %v9743_v24, %v3981_v30 }
 0xeea   : > { %v11476_v35 = vpack.c.bf16 %v3775_v62, %v3775_v62  ;;  %v3798_v62 = vld [vmem:[%s10594_s19] sm:$0x1] }
 0xeec   : > { %8989 = vmatmul.msk.bf16.vlgmr.msrb.gmra.mxu2 %vm1394_vm1, %v11476_v35  ;;  %8990 = vmatmul.msk.bf16.vlgmr.msrb.gmra.mxu1 %vm1394_vm1, %v11476_v35  ;;  %v11492_v15 = vpop.f32.mrf.mxu1  ;;  %v3919_v57 = vpop.f32.mrf.mxu2 }
 0xeed   : > { %v3986_v0 = vpop.f32.mrf.mxu3  ;;  %v3920_v9 = vadd.f32 %v9742_v3, %v3919_v57  ;;  %v3917_v57 = vadd.f32 %v9742_v3, %v11490_v20 }
 0xeee   : > { %v3987_v54 = vadd.f32 %v9743_v24, %v3986_v0 }
 0xef4   : > { %v11494_v40 = vpop.f32.mrf.mxu1  ;;  %v3921_v50 = vpop.f32.mrf.mxu2 }
 0xef5   : > { %v3988_v23 = vpop.f32.mrf.mxu3 }
 0xef6   : > { %v3989_v27 = vadd.f32 %v9743_v24, %v3988_v23 }
 0xef8   : > { %v4266_v12 = vpack.c.bf16 %v3989_v27, %v3987_v54  ;;  %v11558_v27 = vadd.f32 %v11505_v42, %v11494_v40  ;;  %v9556_v54 = vld [vmem:[%s10591_s13 + $0x38] sm:$0xff]  ;;  %v9553_v40 = vld [vmem:[%s10591_s13 + $0x20] sm:$0xff] }
 0xefc   : > { %8991 = vmatmul.msk.bf16.vlgmr.msra.gmra.mxu2 %vm1394_vm1, %v11476_v35  ;;  %v11496_v26 = vpop.f32.mrf.mxu1  ;;  %v3924_v16 = vpop.f32.mrf.mxu2 }
 0xefd   : > { %v3991_v36 = vpop.f32.mrf.mxu3  ;;  %v3925_v58 = vadd.f32 %v9742_v3, %v3924_v16  ;;  %v4265_v16 = vpack.c.bf16 %v3984_v22, %v3982_v13  ;;  %v9563_v13 = vld [vmem:[%s10591_s13 + $0x130] sm:$0xff] }
 0xefe   : > { %v3992_v39 = vadd.f32 %v9743_v24, %v3991_v36  ;;  %v3922_v36 = vadd.f32 %v9742_v3, %v3921_v50 }
 0xf04   : > { %v11498_v55 = vpop.f32.mrf.mxu1  ;;  %v3926_v6 = vpop.f32.mrf.mxu2 }
 0xf05   : > { %v3993_v49 = vpop.f32.mrf.mxu3  ;;  %v3927_v56 = vadd.f32 %v9742_v3, %v3926_v6 }
 0xf06   : > { %v3994_v5 = vadd.f32 %v9743_v24, %v3993_v49 }
 0xf07   : > { %v4049_v11 = vpack.c.bf16 %v3927_v56, %v3925_v58  ;;  %v11547_v56 = vld [vmem:[%s10591_s13 + $0xa8] sm:$0xff]  ;;  %v3853_v58 = vadd.f32 %v11505_v42, %v11492_v15  ;;  %v3860_v15 = vadd.f32 %v11505_v42, %v11498_v55 }
 0xf08   : > { %v4267_v48 = vpack.c.bf16 %v3994_v5, %v3992_v39  ;;  %v9562_v55 = vld [vmem:[%s10591_s13 + $0x128] sm:$0xff] }
 0xf09   : > { %v4070_v0 = vsel %vm1831_vm12, %v4049_v11, 0  ;;  %v9554_v11 = vld [vmem:[%s10591_s13 + $0x28] sm:$0xff] }
 0xf51   : > { %v3862_v21 = vpop.f32.mrf.mxu1 }
 0xf52   : > { %v11511_v6 = vadd.f32 %v11505_v42, %v3862_v21 }
 0xf57   : > { %v3929_v38 = vpop.f32.mrf.mxu2 }
 0xf58   : > { %v3996_v41 = vpop.f32.mrf.mxu3  ;;  %v3930_v37 = vadd.f32 %v9742_v3, %v3929_v38 }
 0xf59   : > { %v3997_v60 = vadd.f32 %v9743_v24, %v3996_v41  ;;  %v3864_v31 = vpop.f32.mrf.mxu1  ;;  %v4048_v41 = vpack.c.bf16 %v3922_v36, %v3920_v9 }
 0xf5a   : > { %v11514_v23 = vadd.f32 %v11505_v42, %v3864_v31 }
 0xf5f   : > { %v3931_v1 = vpop.f32.mrf.mxu2 }
 0xf60   : > { %v3932_v53 = vadd.f32 %v9742_v3, %v3931_v1  ;;  %v3998_v19 = vpop.f32.mrf.mxu3 }
 0xf61   : > { %v3999_v45 = vadd.f32 %v9743_v24, %v3998_v19  ;;  %v3915_v19 = vadd.f32 %v9742_v3, %v11486_v18  ;;  %v11543_v3 = vld [vmem:[%s10591_s13 + $0xb0] sm:$0xff] }
 0xf62   : > { %v4050_v14 = vpack.c.bf16 %v3932_v53, %v3930_v37  ;;  %v4067_v37 = vsel %vm1831_vm12, %v4048_v41, 0  ;;  %v3848_v53 = vadd.f32 %v11505_v42, %v11484_v47  ;;  %v3850_v47 = vadd.f32 %v11505_v42, %v11488_v17 }
 0xf63   : > { %v4268_v46 = vpack.c.bf16 %v3999_v45, %v3997_v60  ;;  %v4047_v45 = vpack.c.bf16 %v3917_v57, %v3915_v19 }
 0xf64   : > { %v4073_v7 = vsel %vm1831_vm12, %v4050_v14, 0  ;;  %v11533_v14 = vld [vmem:[%s10591_s13 + $0xb8] sm:$0xff] }
 0xf65   : > { %4306 = vmatpush.bf16.msrb.mxu0 %v4268_v46  ;;  %4382 = vmatpush.bf16.msrb.mxu2 %v4268_v46  ;;  %v4064_v5 = vsel %vm1831_vm12, %v4047_v45, 0 }
 0xf66   : > { %4079 = vmatpush.bf16.xpose.msra.mxu3 %v4073_v7  ;;  %4340 = vmatpush.bf16.xpose.msra.mxu1 %v4073_v7  ;;  %v4043_v7 = vpack.c.bf16 %v3850_v47, %v3848_v53 }
 0xf69   : > { %4307 = vmatpush.bf16.msrb.mxu0 %v4267_v48  ;;  %4383 = vmatpush.bf16.msrb.mxu2 %v4267_v48  ;;  %v4026_v33 = vpop.f32.mrf.mxu1  ;;  %v4044_v48 = vpack.c.bf16 %v11558_v27, %v3853_v58 }
 0xf6a   : > { %v4027_v28 = vadd.f32 %v8939_v51, %v4026_v33  ;;  %v11553_v51 = vld [vmem:[%s10591_s13 + $0xa0] sm:$0xff]  ;;  %v9555_v33 = vld [vmem:[%s10591_s13 + $0x30] sm:$0xff] }
 0xf6c   : > { %v11507_v29 = vperm.slane %v4027_v28, 0 }
 0xf6d   : > { %4308 = vmatpush.bf16.msrb.mxu0 %v4266_v12  ;;  %4384 = vmatpush.bf16.msrb.mxu2 %v4266_v12  ;;  %v9564_v12 = vld [vmem:[%s10591_s13 + $0x138] sm:$0xff] }
 0xf6e   : > { %4080 = vmatpush.bf16.xpose.msra.mxu3 %v4070_v0  ;;  %4341 = vmatpush.bf16.xpose.msra.mxu1 %v4070_v0  ;;  %v11519_v30 = vmul.f32 %v11507_v29, %v11511_v6  ;;  %v11523_v50 = vmul.f32 %v11507_v29, %v11514_v23  ;;  %v4105_v31 = vmul.f32 %v11507_v29, %v3848_v53  ;;  %v11620_v53 = vld [vmem:[%s14005_s17 + $0x10] sm:$0xff] }
 0xf6f   : > { %v4013_v49 = vpop.f32.mrf.mxu2 }
 0xf70   : > { %v4014_v21 = vadd.f32 %v4013_v49, %v3798_v62  ;;  %v4113_v20 = vsel %vm1831_vm12, %v4105_v31, 0.0  ;;  %v11596_v62 = vld [vmem:[%s14004_s8] sm:$0xf] }
 0xf71   : > { %4309 = vmatpush.bf16.msrb.mxu0 %v4265_v16  ;;  %4385 = vmatpush.bf16.msrb.mxu2 %v4265_v16  ;;  %v4028_v38 = vpop.f32.mrf.mxu1  ;;  %v4106_v16 = vmul.f32 %v11507_v29, %v3850_v47 }
 0xf72   : > { %v4349_v24 = vmul.f32 %v4027_v28, %v4014_v21  ;;  %v4331_v46 = vperm.slane %v4014_v21, 0  ;;  %v11574_v28 = vadd.f32 %v11505_v42, %v11496_v26  ;;  %v9561_v26 = vld [vmem:[%s10591_s13 + $0x120] sm:$0xff]  ;;  %v4046_v42 = vpack.c.bf16 %v11514_v23, %v11511_v6  ;;  %v11608_v21 = vld [vmem:[%s14005_s17 + $0x8] sm:$0xff] }
 0xf73   : > { %v4116_v49 = vsel %vm1831_vm12, %v4106_v16, 0.0 }
 0xf74   : > { %v4351_v1 = vsel %vm4350_vm15, %v4349_v24, 0.0  ;;  %v4332_v39 = vpack.c.bf16 %v4331_v46, %v4331_v46  ;;  %v4045_v22 = vpack.c.bf16 %v3860_v15, %v11574_v28  ;;  %v4107_v24 = vmul.f32 %v11507_v29, %v3853_v58  ;;  %v11638_v58 = vld [vmem:[%s14005_s17 + $0x20] sm:$0xff] }
 0xf75   : > { %4352 = vadd.xlane.f32.xlu2 %v4351_v1  ;;  %4456 = vmatpush.bf16.msra.mxu2 %v9556_v54 }
 0xf76   : > { %4081 = vmatpush.bf16.xpose.msra.mxu3 %v4067_v37  ;;  %4342 = vmatpush.bf16.xpose.msra.mxu1 %v4067_v37  ;;  %v4119_v37 = vsel %vm1831_vm12, %v4107_v24, 0.0 }
 0xf77   : > { %v4015_v60 = vpop.f32.mrf.mxu2  ;;  %4590 = vmatpush.bf16.msra.mxu0 %v9564_v12 }
 0xf79   : > { %4457 = vmatpush.bf16.msra.mxu2 %v9555_v33 }
 0xf7b   : > { %4591 = vmatpush.bf16.msra.mxu0 %v9563_v13 }
 0xf7d   : > { %4114 = vadd.xlane.f32.xlu2 %v4113_v20  ;;  %4458 = vmatpush.bf16.msra.mxu2 %v9554_v11  ;;  %v11628_v20 = vld [vmem:[%s14005_s17 + $0x18] sm:$0xff] }
 0xf7e   : > { %4082 = vmatpush.bf16.xpose.msra.mxu3 %v4064_v5  ;;  %4343 = vmatpush.bf16.xpose.msra.mxu1 %v4064_v5  ;;  %v4110_v5 = vmul.f32 %v11507_v29, %v3860_v15 }
 0xf7f   : > { %v11539_v18 = vpop.f32.mrf.mxu2  ;;  %4592 = vmatpush.bf16.msra.mxu0 %v9562_v55 }
 0xf81   : > { %4459 = vmatpush.bf16.msra.mxu2 %v9553_v40 }
 0xf83   : > { %4593 = vmatpush.bf16.msra.mxu0 %v9561_v26 }
 0xf85   : > { %8992 = vmatmul.msk.bf16.vlgmr.msra.gmra.mxu3 %vm1831_vm12, %v4043_v7  ;;  %9000 = vmatmul.msk.bf16.vlgmr.msra.gmra.mxu1 %vm1831_vm12, %v4332_v39  ;;  %v4128_v39 = vsel %vm1831_vm12, %v4110_v5, 0.0 }
 0xf86   : > { %4523 = vmatpush.bf16.msrb.mxu1 %v11533_v14  ;;  %4619 = vmatpush.bf16.msrb.mxu3 %v9556_v54 }
 0xf87   : > { %v4041_v17 = vpop.f32.mrf.mxu2 }
 0xf8a   : > { %4524 = vmatpush.bf16.msrb.mxu1 %v11543_v3  ;;  %4620 = vmatpush.bf16.msrb.mxu3 %v9555_v33 }
 0xf8e   : > { %4525 = vmatpush.bf16.msrb.mxu1 %v11547_v56  ;;  %4621 = vmatpush.bf16.msrb.mxu3 %v9554_v11  ;;  %v4131_v11 = vsel %vm1831_vm12, %v11519_v30, 0.0 }
 0xf92   : > { %4526 = vmatpush.bf16.msrb.mxu1 %v11553_v51  ;;  %4622 = vmatpush.bf16.msrb.mxu3 %v9553_v40 }
 0xf95   : > { %8993 = vmatmul.msk.bf16.gmra.mxu3 %vm1831_vm12, %v4044_v48  ;;  %9056 = vmatmul.msk.bf16.vlgmr.msrb.gmra.mxu1 %vm1394_vm1, %v11412_v34 }
 0xf96   : > { %4645 = vmatpush.bf16.msra.mxu3 %v9564_v12  ;;  %v4134_v12 = vsel %vm1831_vm12, %v11523_v50, 0.0 }
 0xf9a   : > { %4646 = vmatpush.bf16.msra.mxu3 %v9563_v13 }
 0xf9e   : > { %4647 = vmatpush.bf16.msra.mxu3 %v9562_v55 }
 0xfa2   : > { %4648 = vmatpush.bf16.msra.mxu3 %v9561_v26  ;;  %v11654_v26 = vld [vmem:[%s14005_s17 + $0x38] sm:$0xff] }
 0xfa5   : > { %8994 = vmatmul.msk.bf16.gmra.mxu3 %vm1831_vm12, %v4045_v22  ;;  %9057 = vmatmul.msk.bf16.gmra.mxu1 %vm1394_vm1, %v11433_v4 }
 0xfb5   : > { %8995 = vmatmul.msk.bf16.gmra.mxu3 %vm1831_vm12, %v4046_v42  ;;  %9058 = vmatmul.msk.bf16.gmra.mxu1 %vm1394_vm1, %v11448_v32 }
 0xfc5   : > { %9059 = vmatmul.msk.bf16.gmra.mxu1 %vm1394_vm1, %v11465_v63  ;;  %9089 = vmatmul.msk.bf16.vlgmr.msrb.gmra.mxu3 %vm1394_vm1, %v11476_v35 }
 0xfd5   : > { %9091 = vmatmul.msk.bf16.vlgmr.msra.gmra.mxu3 %vm1394_vm1, %v11476_v35 }
0x1002   : > { %v4345_v36 = vpop.f32.mrf.mxu1 }
0x1003   : > { %v11599_v6 = vadd.f32 %v4345_v36, %v11596_v62 }
0x1005   : > { %v4355_v23 = vsel %vm4354_vm0, %v11599_v6, -inf }
0x1006   : > { %4356 = vmax.xlane.f32.xlu0 %v4355_v23 }
0x1008   : > { %v11603_v0 = vpop.f32.mrf.mxu3 }
0x100a   : > { %v4347_v9 = vpop.f32.mrf.mxu1 }
0x100b   : > { %v9744_v9 = vld [vmem:[%s10594_s19 + $0x5] ss:$0 sm:$0xff] }
0x100e   : > { %4117 = vadd.xlane.f32.xlu0 %v4116_v49 }
0x1010   : > { %v4086_v38 = vpop.f32.mrf.mxu3 }
0x1011   : > { %v11611_v41 = vadd.f32 %v4086_v38, %v11608_v21 }
0x1012   : > { %v11614_v1 = vpop.f32.mrf.mxu1 }
0x1013   : > { %v4140_v57 = vsel %vm1394_vm1, %v11611_v41, -inf }
0x1014   : > { %4141 = vmax.xlane.f32.xlu2 %v4140_v57 }
0x1016   : > { %4120 = vadd.xlane.f32.xlu0 %v4119_v37 }
0x1018   : > { %v4089_v19 = vpop.f32.mrf.mxu3 }
0x1019   : > { %v11623_v60 = vadd.f32 %v4089_v19, %v11620_v53 }
0x101a   : > { %v4530_v31 = vpop.f32.mrf.mxu1 }
0x101b   : > { %v4143_v45 = vsel %vm1394_vm1, %v11623_v60, -inf }
0x101c   : > { %4144 = vmax.xlane.f32.xlu2 %v4143_v45 }
0x1020   : > { %v4091_v47 = vpop.f32.mrf.mxu3 }
0x1021   : > { %v11632_v46 = vadd.f32 %v4091_v47, %v11628_v20 }
0x1022   : > { %v4533_v7 = vpop.f32.mrf.mxu1 }
0x1023   : > { %v4146_v17 = vsel %vm1394_vm1, %v11632_v46, -inf }
0x1024   : > { %4129 = vadd.xlane.f32.xlu2 %v4128_v39  ;;  %4147 = vmax.xlane.f32.xlu0 %v4146_v17 }
0x1028   : > { %v4094_v48 = vpop.f32.mrf.mxu3 }
0x1029   : > { %v11641_v54 = vadd.f32 %v4094_v48, %v11638_v58  ;;  %v4534_v48 = vadd.f32 %v9744_v9, %v4533_v7 }
0x102a   : > { %v4535_v33 = vpop.f32.mrf.mxu1 }
0x102b   : > { %v4149_v40 = vsel %vm1394_vm1, %v11641_v54, -inf  ;;  %v4536_v47 = vadd.f32 %v9744_v9, %v4535_v33 }
0x102c   : > { %4132 = vadd.xlane.f32.xlu2 %v4131_v11  ;;  %4150 = vmax.xlane.f32.xlu0 %v4149_v40  ;;  %v4531_v40 = vadd.f32 %v9744_v9, %v4530_v31  ;;  %v4353_v31 = vpop.xlane.xlu2 %4352 }
0x102d   : > { %v4659_v11 = vpack.c.bf16 %v4536_v47, %v4534_v48  ;;  %v11681_v47 = vld [vmem:[%s14005_s17] sm:$0xff] }
0x102e   : > { %v4085_v48 = vadd.f32 %v11603_v0, %v11681_v47  ;;  %v4109_v0 = vmul.f32 %v11507_v29, %v11574_v28  ;;  %v11714_v28 = vld [vmem:[%s14005_s17 + $0x30] sm:$0xff] }
0x1030   : > { %v11647_v15 = vpop.f32.mrf.mxu3 }
0x1032   : > { %v4538_v22 = vpop.f32.mrf.mxu1 }
0x1033   : > { %v4539_v45 = vadd.f32 %v9744_v9, %v4538_v22 }
0x1034   : > { %4135 = vadd.xlane.f32.xlu0 %v4134_v12  ;;  %v4678_v12 = vsel %vm1831_vm12, %v4659_v11, 0 }
0x1038   : > { %v11651_v13 = vpop.f32.mrf.mxu3 }
0x103a   : > { %v4540_v55 = vpop.f32.mrf.mxu1 }
0x103b   : > { %v4541_v57 = vadd.f32 %v9744_v9, %v4540_v55 }
0x103d   : > { %v4660_v5 = vpack.c.bf16 %v4541_v57, %v4539_v45 }
0x103f   : > { %v4681_v39 = vsel %vm1831_vm12, %v4660_v5, 0 }
0x1040   : > { %v4101_v42 = vpop.f32.mrf.mxu3 }
0x1041   : > { %v11657_v30 = vadd.f32 %v4101_v42, %v11654_v26  ;;  %v4529_v42 = vadd.f32 %v9744_v9, %v11614_v1 }
0x1042   : > { %v4543_v36 = vpop.f32.mrf.mxu1 }
0x1043   : > { %v4158_v23 = vsel %vm1394_vm1, %v11657_v30, -inf  ;;  %v4544_v38 = vadd.f32 %v9744_v9, %v4543_v36  ;;  %v9010_v36 = vld [vmem:[%s10594_s19 + $0x1] sm:$0x1]  ;;  %v4658_v22 = vpack.c.bf16 %v4531_v40, %v4529_v42 }
0x1044   : > { %4159 = vmax.xlane.f32.xlu2 %v4158_v23 }
0x1045   : > { %v4675_v33 = vsel %vm1831_vm12, %v4658_v22, 0  ;;  %v4108_v22 = vmul.f32 %v11507_v29, %v11558_v27 }
0x1048   : > { %v4624_v16 = vpop.f32.mrf.mxu3 }
0x1049   : > { %v11669_v23 = vadd.f32 %v9010_v36, %v4624_v16  ;;  %v11675_v16 = vpop.xlane.xlu2 %4114 }
0x104a   : > { %v4545_v49 = vpop.f32.mrf.mxu1 }
0x104b   : > { %v4546_v50 = vadd.f32 %v9744_v9, %v4545_v49  ;;  %v4942_v49 = vperm.slane %v11669_v23, 0 }
0x104d   : > { %v4661_v24 = vpack.c.bf16 %v4546_v50, %v4544_v38  ;;  %v4943_v7 = vpack.c.bf16 %v4942_v49, %v4942_v49  ;;  %v4358_v38 = vperm.slane %v4353_v31, 0  ;;  %v4122_v49 = vsel %vm1831_vm12, %v4108_v22, 0.0 }
0x104f   : > { %v4684_v37 = vsel %vm1831_vm12, %v4661_v24, 0 }
0x1050   : > { %v4626_v19 = vpop.f32.mrf.mxu3  ;;  %4690 = vmatpush.bf16.xpose.msra.mxu1 %v4684_v37  ;;  %4951 = vmatpush.bf16.xpose.msrb.mxu3 %v4684_v37 }
0x1058   : > { %v11664_v17 = vpop.f32.mrf.mxu3  ;;  %4691 = vmatpush.bf16.xpose.msra.mxu1 %v4681_v39  ;;  %4952 = vmatpush.bf16.xpose.msrb.mxu3 %v4681_v39 }
0x1060   : > { %v4652_v55 = vpop.f32.mrf.mxu3  ;;  %4692 = vmatpush.bf16.xpose.msra.mxu1 %v4678_v12  ;;  %4953 = vmatpush.bf16.xpose.msrb.mxu3 %v4678_v12  ;;  %v4137_v12 = vsel %vm1394_vm1, %v4085_v48, -inf }
0x1068   : > { %4693 = vmatpush.bf16.xpose.msra.mxu1 %v4675_v33  ;;  %4954 = vmatpush.bf16.xpose.msrb.mxu3 %v4675_v33 }
0x106f   : > { %9100 = vmatmul.msk.bf16.vlgmr.msrb.gmra.mxu3 %vm1831_vm12, %v4943_v7 }
0x1079   : > { %v4357_v50 = vpop.xlane.xlu0 %4356 }
0x107a   : > { %v4359_v24 = vmax.f32 %v4357_v50, %v4358_v38 }
0x107c   : > { %v4360_v1 = vsub.f32 %v11599_v6, %v4359_v24  ;;  %v4363_v9 = vsub.f32 %v4358_v38, %v4359_v24  ;;  %v11703_v38 = vld [vmem:[%s14005_s17 + $0x28] sm:$0xff] }
0x107d   : > { %v11707_v27 = vadd.f32 %v11647_v15, %v11703_v38 }
0x107e   : > { %v4361_v57 = vmul.f32 1.442695, %v4360_v1  ;;  %v11718_v1 = vadd.f32 %v11651_v13, %v11714_v28 }
0x107f   : > { %v4152_v29 = vsel %vm1394_vm1, %v11707_v27, -inf }
0x1080   : > { %9921 = vpow2.f32 %v4361_v57  ;;  %v4155_v15 = vsel %vm1394_vm1, %v11718_v1, -inf }
0x1081   : > { %v11677_v37 = vpop.xlane.xlu0 %4117 }
0x1086   : > { %v9922_v19 = vpop.eup %9921 }
0x1087   : > { %v4142_v45 = vpop.xlane.xlu2 %4141  ;;  %v4366_v5 = vsel %vm4354_vm0, %v9922_v19, 0.0 }
0x1088   : > { %v11684_v39 = vmax.f32 %v4142_v45, %v11677_v37  ;;  %4367 = vadd.xlane.f32.xlu1 %v4366_v5  ;;  %v4364_v45 = vmul.f32 1.442695, %v4363_v9 }
0x1089   : > { %v4121_v11 = vpop.xlane.xlu0 %4120 }
0x108a   : > { %v4194_v6 = vsub.f32 %v11677_v37, %v11684_v39  ;;  %v4170_v50 = vsub.f32 %v11611_v41, %v11684_v39 }
0x108c   : > { %v4179_v24 = vmul.f32 1.442695, %v4170_v50 }
0x108f   : > { %v4145_v40 = vpop.xlane.xlu2 %4144 }
0x1090   : > { %v4163_v55 = vmax.f32 %v4145_v40, %v4121_v11  ;;  %4138 = vmax.xlane.f32.xlu1 %v4137_v12 }
0x1092   : > { %v4171_v42 = vsub.f32 %v11623_v60, %v4163_v55  ;;  %v4195_v36 = vsub.f32 %v4121_v11, %v4163_v55  ;;  %v4125_v60 = vsel %vm1831_vm12, %v4109_v0, 0.0 }
0x1094   : > { %v4181_v33 = vmul.f32 1.442695, %v4171_v42  ;;  %v8968_v42 = vld [vmem:[%s10594_s19 + $0x8] sm:$0x1] }
0x1096   : > { %9923 = vpow2.f32 %v4181_v33  ;;  %v4040_v33 = vadd.f32 %v8968_v42, %v11539_v18 }
0x1097   : > { %9925 = vpow2.f32 %v4179_v24  ;;  %v11728_v11 = vpop.xlane.xlu2 %4129  ;;  %v4148_v22 = vpop.xlane.xlu0 %4147 }
0x1098   : > { %4123 = vadd.xlane.f32.xlu1 %v4122_v49  ;;  %9927 = vpow2.f32 %v4364_v45 }
0x109c   : > { %v11697_v7 = vpop.eup %9923 }
0x109d   : > { %v4223_v31 = vsel %vm1394_vm1, %v11697_v7, 0.0  ;;  %v11722_v57 = vpop.eup %9925 }
0x109e   : > { %4224 = vadd.xlane.f32.xlu2 %v4223_v31  ;;  %v4220_v41 = vsel %vm1394_vm1, %v11722_v57, 0.0  ;;  %v9928_v13 = vpop.eup %9927 }
0x109f   : > { %v11732_v49 = vpop.xlane.xlu2 %4132  ;;  %v4151_v18 = vpop.xlane.xlu0 %4150 }
0x10a0   : > { %4126 = vadd.xlane.f32.xlu1 %v4125_v60  ;;  %v11737_v60 = vperm.slane %v4040_v33, 0 }
0x10a8   : > { %4153 = vmax.xlane.f32.xlu1 %v4152_v29 }
0x10b0   : > { %4156 = vmax.xlane.f32.xlu1 %v4155_v15  ;;  %v4205_v15 = vmul.f32 1.442695, %v4195_v36 }
0x10b8   : > { %4221 = vadd.xlane.f32.xlu1 %v4220_v41 }
0x10f2   : > { %v11726_v5 = vpop.f32.mrf.mxu3 }
0x10fa   : > { %v4958_v40 = vpop.f32.mrf.mxu3 }
0x10fb   : > { %v4368_v12 = vpop.xlane.xlu1 %4367 }
0x10fc   : > { %v4369_v55 = vadd.f32 %v9928_v13, %v4368_v12  ;;  %v4160_v12 = vpop.xlane.xlu2 %4159 }
0x10fe   : > { %9929 = vrcp.f32 %v4369_v55 }
0x1103   : > { %v4139_v0 = vpop.xlane.xlu1 %4138 }
0x1104   : > { %v9930_v31 = vpop.eup %9929  ;;  %v11735_v9 = vmax.f32 %v4139_v0, %v11675_v16 }
0x1105   : > { %v4371_v50 = vmul.f32 %v9930_v31, %v9922_v19  ;;  %v4373_v29 = vmul.f32 %v9930_v31, %v9928_v13 }
0x1106   : > { %v4169_v24 = vsub.f32 %v4085_v48, %v11735_v9 }
0x1107   : > { %v4372_v41 = vpack.c.bf16 %v4371_v50, %v4371_v50  ;;  %v11741_v45 = vmul.f32 %v4373_v29, %v11737_v60 }
0x1108   : > { %v4177_v40 = vmul.f32 1.442695, %v4169_v24 }
0x1109   : > { %9001 = vmatmul.msk.bf16.vlgmr.msrb.gmra.mxu2 %vm1394_vm1, %v4372_v41 }
0x110a   : > { %9931 = vpow2.f32 %v4177_v40  ;;  %4632 = vmatpush.bf16.msrb.mxu2 %v11533_v14 }
0x110b   : > { %9933 = vpow2.f32 %v4205_v15  ;;  %v11745_v55 = vpop.xlane.xlu1 %4123 }
0x110c   : > { %v11748_v19 = vmax.f32 %v4148_v22, %v11745_v55  ;;  %v11760_v22 = vpop.xlane.xlu0 %4135 }
0x110d   : > { %v11765_v50 = vmax.f32 %v4160_v12, %v11760_v22 }
0x110e   : > { %v4172_v48 = vsub.f32 %v11632_v46, %v11748_v19  ;;  %v4196_v36 = vsub.f32 %v11745_v55, %v11748_v19  ;;  %4633 = vmatpush.bf16.msrb.mxu2 %v11543_v3 }
0x1110   : > { %v11755_v13 = vpop.eup %9931  ;;  %v4183_v42 = vmul.f32 1.442695, %v4172_v48 }
0x1111   : > { %v9934_v33 = vpop.eup %9933  ;;  %v4225_v0 = vpop.xlane.xlu2 %4224  ;;  %v4217_v14 = vsel %vm1394_vm1, %v11755_v13, 0.0 }
0x1112   : > { %9935 = vpow2.f32 %v4183_v42  ;;  %v4243_v31 = vadd.f32 %v9934_v33, %v4225_v0  ;;  %4218 = vadd.xlane.f32.xlu0 %v4217_v14  ;;  %4634 = vmatpush.bf16.msrb.mxu2 %v11547_v56  ;;  %v4176_v56 = vsub.f32 %v11657_v30, %v11765_v50 }
0x1113   : > { %v11762_v46 = vpop.xlane.xlu1 %4126 }
0x1114   : > { %9937 = vrcp.f32 %v4243_v31  ;;  %v4165_v3 = vmax.f32 %v4151_v18, %v11762_v46  ;;  %v4203_v31 = vmul.f32 1.442695, %v4194_v6 }
0x1116   : > { %v4173_v29 = vsub.f32 %v11641_v54, %v4165_v3  ;;  %v4197_v24 = vsub.f32 %v11762_v46, %v4165_v3  ;;  %4635 = vmatpush.bf16.msrb.mxu2 %v11553_v51  ;;  %v4191_v51 = vmul.f32 1.442695, %v4176_v56 }
0x1118   : > { %v11771_v15 = vpop.eup %9935  ;;  %v4185_v41 = vmul.f32 1.442695, %v4173_v29 }
0x1119   : > { %9027 = vmatmul.msk.bf16.vlgmr.msra.gmra.mxu2 %vm1394_vm1, %v11412_v34  ;;  %v4226_v40 = vsel %vm1394_vm1, %v11771_v15, 0.0 }
0x111a   : > { %v11779_v12 = vpop.eup %9937  ;;  %9939 = vpow2.f32 %v4185_v41  ;;  %4227 = vadd.xlane.f32.xlu0 %v4226_v40 }
0x111b   : > { %v4154_v54 = vpop.xlane.xlu1 %4153  ;;  %v4275_v18 = vmul.f32 %v11779_v12, %v9934_v33  ;;  %9941 = vpow2.f32 %v4191_v51 }
0x111c   : > { %v4166_v48 = vmax.f32 %v4154_v54, %v11728_v11 }
0x111d   : > { %v11784_v42 = vmul.f32 %v11737_v60, %v4275_v18 }
0x111e   : > { %v4174_v30 = vsub.f32 %v11707_v27, %v4166_v48  ;;  %v4198_v55 = vsub.f32 %v11728_v11, %v4166_v48 }
0x1120   : > { %v11787_v0 = vpop.eup %9939  ;;  %v4187_v14 = vmul.f32 1.442695, %v4174_v30 }
0x1121   : > { %v4229_v46 = vsel %vm1394_vm1, %v11787_v0, 0.0  ;;  %v11797_v29 = vpop.eup %9941 }
0x1122   : > { %9943 = vpow2.f32 %v4187_v14  ;;  %4230 = vadd.xlane.f32.xlu1 %v4229_v46  ;;  %v4238_v39 = vsel %vm1394_vm1, %v11797_v29, 0.0 }
0x1123   : > { %v4157_v33 = vpop.xlane.xlu1 %4156  ;;  %9945 = vpow2.f32 %v4203_v31  ;;  %v4193_v31 = vsub.f32 %v11675_v16, %v11735_v9  ;;  %v4200_v16 = vsub.f32 %v11760_v22, %v11765_v50 }
0x1124   : > { %v11795_v3 = vmax.f32 %v4157_v33, %v11732_v49  ;;  %v4207_v33 = vmul.f32 1.442695, %v4196_v36 }
0x1125   : > { %v4201_v46 = vmul.f32 1.442695, %v4193_v31 }
0x1126   : > { %v4175_v27 = vsub.f32 %v11718_v1, %v11795_v3 }
0x1128   : > { %v11801_v56 = vpop.eup %9943  ;;  %v4189_v41 = vmul.f32 1.442695, %v4175_v27 }
0x1129   : > { %9028 = vmatmul.msk.bf16.gmra.mxu2 %vm1394_vm1, %v11433_v4  ;;  %v4232_v37 = vsel %vm1394_vm1, %v11801_v56, 0.0  ;;  %v9946_v6 = vpop.eup %9945 }
0x112a   : > { %9947 = vpow2.f32 %v4189_v41  ;;  %4233 = vadd.xlane.f32.xlu2 %v4232_v37  ;;  %4239 = vadd.xlane.f32.xlu1 %v4238_v39  ;;  %v4209_v39 = vmul.f32 1.442695, %v4197_v24 }
0x112b   : > { %v4222_v40 = vpop.xlane.xlu1 %4221 }
0x112c   : > { %v4242_v54 = vadd.f32 %v9946_v6, %v4222_v40 }
0x112e   : > { %9949 = vrcp.f32 %v4242_v54 }
0x112f   : > { %9951 = vpow2.f32 %v4201_v46 }
0x1130   : > { %v11809_v1 = vpop.eup %9947  ;;  %9953 = vpow2.f32 %v4207_v33  ;;  %v4211_v33 = vmul.f32 1.442695, %v4198_v55 }
0x1131   : > { %v4235_v18 = vsel %vm1394_vm1, %v11809_v1, 0.0 }
0x1132   : > { %4236 = vadd.xlane.f32.xlu0 %v4235_v18 }
0x1134   : > { %v9950_v51 = vpop.eup %9949 }
0x1135   : > { %v4274_v30 = vmul.f32 %v9950_v51, %v9946_v6  ;;  %v9952_v27 = vpop.eup %9951  ;;  %v4258_v19 = vmul.f32 %v9950_v51, %v11722_v57  ;;  %v4259_v57 = vmul.f32 %v11779_v12, %v11697_v7 }
0x1136   : > { %v9954_v40 = vpop.eup %9953 }
0x1137   : > { %v11814_v14 = vmul.f32 %v11737_v60, %v4274_v30 }
0x1139   : > { %9029 = vmatmul.msk.bf16.gmra.mxu2 %vm1394_vm1, %v11448_v32 }
0x1149   : > { %9030 = vmatmul.msk.bf16.gmra.mxu2 %vm1394_vm1, %v11465_v63 }
0x1159   : > { %9090 = vmatmul.msk.bf16.vlgmr.msrb.gmra.mxu2 %vm1394_vm1, %v11476_v35 }
0x1185   : > { %v4219_v41 = vpop.xlane.xlu0 %4218 }
0x1186   : > { %v4241_v37 = vadd.f32 %v9952_v27, %v4219_v41 }
0x1188   : > { %9955 = vrcp.f32 %v4241_v37 }
0x1189   : > { %9957 = vpow2.f32 %v4209_v39 }
0x118c   : > { %v4387_v6 = vpop.f32.mrf.mxu2 }
0x118d   : > { %v11828_v54 = vadd.f32 %v4387_v6, %v11741_v45  ;;  %v4228_v18 = vpop.xlane.xlu0 %4227  ;;  %v4215_v45 = vmul.f32 1.442695, %v4200_v16 }
0x118e   : > { %v9956_v30 = vpop.eup %9955  ;;  %v4244_v9 = vadd.f32 %v9954_v40, %v4228_v18 }
0x118f   : > { %v4257_v36 = vmul.f32 %v9956_v30, %v11755_v13  ;;  %v4273_v31 = vmul.f32 %v9956_v30, %v9952_v27  ;;  %v9958_v41 = vpop.eup %9957  ;;  %v4199_v13 = vsub.f32 %v11732_v49, %v11795_v3 }
0x1190   : > { %9959 = vrcp.f32 %v4244_v9 }
0x1191   : > { %v4269_v24 = vpack.c.bf16 %v4258_v19, %v4257_v36  ;;  %v11836_v46 = vmul.f32 %v11737_v60, %v4273_v31  ;;  %9961 = vpow2.f32 %v4215_v45  ;;  %v4213_v6 = vmul.f32 1.442695, %v4199_v13 }
0x1192   : > { %9963 = vpow2.f32 %v4211_v33 }
0x1193   : > { %8996 = vmatmul.msk.bf16.vlgmr.msrb.gmra.mxu0 %vm1394_vm1, %v4269_v24 }
0x1194   : > { %v4389_v22 = vpop.f32.mrf.mxu2 }
0x1195   : > { %v4231_v50 = vpop.xlane.xlu1 %4230 }
0x1196   : > { %v9960_v37 = vpop.eup %9959  ;;  %v4245_v11 = vadd.f32 %v9958_v41, %v4231_v50 }
0x1197   : > { %v4260_v48 = vmul.f32 %v9960_v37, %v11771_v15  ;;  %v4276_v51 = vmul.f32 %v9960_v37, %v9954_v40  ;;  %v9962_v18 = vpop.eup %9961  ;;  %v9745_v15 = vld [vmem:[%s10594_s19 + $0x1] ss:$0 sm:$0xff] }
0x1198   : > { %9965 = vrcp.f32 %v4245_v11  ;;  %v9964_v16 = vpop.eup %9963 }
0x1199   : > { %v4270_v27 = vpack.c.bf16 %v4260_v48, %v4259_v57  ;;  %v11845_v39 = vmul.f32 %v11737_v60, %v4276_v51  ;;  %9967 = vpow2.f32 %v4213_v6 }
0x119c   : > { %v4461_v30 = vpop.f32.mrf.mxu2 }
0x119d   : > { %v4234_v9 = vpop.xlane.xlu2 %4233  ;;  %v4240_v7 = vpop.xlane.xlu1 %4239  ;;  %v4462_v31 = vadd.f32 %v9745_v15, %v4461_v30 }
0x119e   : > { %v9966_v12 = vpop.eup %9965  ;;  %v4246_v55 = vadd.f32 %v9964_v16, %v4234_v9  ;;  %v4248_v19 = vadd.f32 %v9962_v18, %v4240_v7 }
0x119f   : > { %v4277_v49 = vmul.f32 %v9966_v12, %v9958_v41  ;;  %v9968_v36 = vpop.eup %9967  ;;  %v4261_v37 = vmul.f32 %v9966_v12, %v11787_v0 }
0x11a0   : > { %9969 = vrcp.f32 %v4246_v55 }
0x11a1   : > { %9971 = vrcp.f32 %v4248_v19  ;;  %v11849_v3 = vmul.f32 %v11737_v60, %v4277_v49 }
0x11a3   : > { %8997 = vmatmul.msk.bf16.gmra.mxu0 %vm1394_vm1, %v4270_v27 }
0x11a4   : > { %v4463_v40 = vpop.f32.mrf.mxu2 }
0x11a5   : > { %v4464_v24 = vadd.f32 %v9745_v15, %v4463_v40  ;;  %v4237_v45 = vpop.xlane.xlu0 %4236 }
0x11a6   : > { %v9970_v33 = vpop.eup %9969  ;;  %v4247_v22 = vadd.f32 %v9968_v36, %v4237_v45 }
0x11a7   : > { %v9972_v50 = vpop.eup %9971  ;;  %v4262_v41 = vmul.f32 %v9970_v33, %v11801_v56  ;;  %v4654_v57 = vpack.c.bf16 %v4464_v24, %v4462_v31  ;;  %v4278_v11 = vmul.f32 %v9970_v33, %v9964_v16 }
0x11a8   : > { %9973 = vrcp.f32 %v4247_v22  ;;  %v4280_v13 = vmul.f32 %v9972_v50, %v9962_v18  ;;  %v4264_v9 = vmul.f32 %v9972_v50, %v11797_v29 }
0x11a9   : > { %9092 = vmatmul.msk.bf16.vlgmr.msra.gmra.mxu1 %vm1831_vm12, %v4654_v57  ;;  %v4271_v48 = vpack.c.bf16 %v4262_v41, %v4261_v37  ;;  %v11856_v51 = vmul.f32 %v11737_v60, %v4278_v11  ;;  %v9039_v37 = vld [vmem:[%s10594_s19 + $0x5] sm:$0x1] }
0x11aa   : > { %v11859_v27 = vmul.f32 %v11737_v60, %v4280_v13 }
0x11ac   : > { %v4466_v6 = vpop.f32.mrf.mxu2 }
0x11ad   : > { %v4467_v12 = vadd.f32 %v9745_v15, %v4466_v6 }
0x11ae   : > { %v9974_v30 = vpop.eup %9973 }
0x11af   : > { %v4263_v0 = vmul.f32 %v9974_v30, %v11809_v1  ;;  %v4279_v56 = vmul.f32 %v9974_v30, %v9968_v36 }
0x11b1   : > { %v4272_v7 = vpack.c.bf16 %v4264_v9, %v4263_v0  ;;  %v11864_v16 = vmul.f32 %v11737_v60, %v4279_v56 }
0x11b3   : > { %8998 = vmatmul.msk.bf16.gmra.mxu0 %vm1394_vm1, %v4271_v48 }
0x11b4   : > { %v4468_v18 = vpop.f32.mrf.mxu2 }
0x11b5   : > { %v4469_v55 = vadd.f32 %v9745_v15, %v4468_v18 }
0x11b7   : > { %v4655_v19 = vpack.c.bf16 %v4469_v55, %v4467_v12 }
0x11b9   : > { %9093 = vmatmul.msk.bf16.gmra.mxu1 %vm1831_vm12, %v4655_v19 }
0x11bc   : > { %v4471_v49 = vpop.f32.mrf.mxu2 }
0x11bd   : > { %v4472_v40 = vadd.f32 %v9745_v15, %v4471_v49 }
0x11c3   : > { %8999 = vmatmul.msk.bf16.gmra.mxu0 %vm1394_vm1, %v4272_v7 }
0x11c4   : > { %v4473_v29 = vpop.f32.mrf.mxu2 }
0x11c5   : > { %v4474_v1 = vadd.f32 %v9745_v15, %v4473_v29 }
0x11c7   : > { %v4656_v36 = vpack.c.bf16 %v4474_v1, %v4472_v40 }
0x11c9   : > { %9094 = vmatmul.msk.bf16.gmra.mxu1 %vm1831_vm12, %v4656_v36 }
0x11cc   : > { %v4476_v60 = vpop.f32.mrf.mxu2 }
0x11cd   : > { %v4477_v33 = vadd.f32 %v9745_v15, %v4476_v60 }
0x11d3   : > { %9085 = vmatmul.msk.bf16.vlgmr.msra.gmra.mxu0 %vm1394_vm1, %v11412_v34 }
0x11d4   : > { %v4478_v45 = vpop.f32.mrf.mxu2 }
0x11d5   : > { %v4479_v22 = vadd.f32 %v9745_v15, %v4478_v45 }
0x11d7   : > { %v4657_v50 = vpack.c.bf16 %v4479_v22, %v4477_v33 }
0x11d9   : > { %9095 = vmatmul.msk.bf16.gmra.mxu1 %vm1831_vm12, %v4657_v50 }
0x11dc   : > { %v4637_v41 = vpop.f32.mrf.mxu2 }
0x11dd   : > { %v4638_v57 = vadd.f32 %v9039_v37, %v4637_v41 }
0x11df   : > { %v4715_v11 = vperm.slane %v4638_v57, 0 }
0x11e1   : > { %v4716_v13 = vmul.f32 %v4715_v11, %v4462_v31  ;;  %v4717_v48 = vmul.f32 %v4715_v11, %v4464_v24  ;;  %v4719_v6 = vmul.f32 %v4715_v11, %v4469_v55  ;;  %v4720_v30 = vmul.f32 %v4715_v11, %v4472_v40 }
0x11e2   : > { %v4721_v9 = vmul.f32 %v4715_v11, %v4474_v1  ;;  %v11874_v0 = vmul.f32 %v4715_v11, %v4479_v22  ;;  %v11880_v18 = vmul.f32 %v4715_v11, %v4477_v33  ;;  %v4718_v19 = vmul.f32 %v4715_v11, %v4467_v12 }
0x11e3   : > { %9086 = vmatmul.msk.bf16.gmra.mxu0 %vm1394_vm1, %v11433_v4  ;;  %v4724_v56 = vsel %vm1831_vm12, %v4716_v13, 0.0  ;;  %v4727_v15 = vsel %vm1831_vm12, %v4717_v48, 0.0 }
0x11e4   : > { %v4639_v7 = vpop.f32.mrf.mxu2  ;;  %4725 = vadd.xlane.f32.xlu2 %v4724_v56  ;;  %4728 = vadd.xlane.f32.xlu0 %v4727_v15  ;;  %v4730_v31 = vsel %vm1831_vm12, %v4718_v19, 0.0 }
0x11ec   : > { %4731 = vadd.xlane.f32.xlu0 %v4730_v31 }
0x11f3   : > { %9087 = vmatmul.msk.bf16.gmra.mxu0 %vm1394_vm1, %v11448_v32 }
0x1203   : > { %9088 = vmatmul.msk.bf16.gmra.mxu0 %vm1394_vm1, %v11465_v63 }
0x1210   : > { %v4311_v24 = vpop.f32.mrf.mxu0 }
0x1211   : > { %v11888_v55 = vadd.f32 %v4311_v24, %v11836_v46 }
0x1218   : > { %v4313_v49 = vpop.f32.mrf.mxu0 }
0x1219   : > { %v11891_v29 = vadd.f32 %v4313_v49, %v11814_v14 }
0x1220   : > { %v4316_v40 = vpop.f32.mrf.mxu0 }
0x1221   : > { %v11896_v1 = vadd.f32 %v4316_v40, %v11784_v42 }
0x1226   : > { %v4695_v36 = vpop.f32.mrf.mxu1 }
0x1227   : > { %v11899_v60 = vadd.f32 %v4695_v36, %v11681_v47  ;;  %v4745_v36 = vsel %vm1831_vm12, %v11874_v0, 0.0  ;;  %v4742_v0 = vsel %vm1831_vm12, %v11880_v18, 0.0 }
0x1228   : > { %v4318_v45 = vpop.f32.mrf.mxu0 }
0x1229   : > { %v11902_v33 = vadd.f32 %v4318_v45, %v11845_v39  ;;  %v4748_v46 = vsel %vm1394_vm1, %v11899_v60, -inf  ;;  %v4733_v39 = vsel %vm1831_vm12, %v4719_v6, 0.0 }
0x122a   : > { %4749 = vmax.xlane.f32.xlu1 %v4748_v46 }
0x122e   : > { %v4697_v22 = vpop.f32.mrf.mxu1 }
0x122f   : > { %v11909_v50 = vadd.f32 %v4697_v22, %v11608_v21 }
0x1230   : > { %v4321_v42 = vpop.f32.mrf.mxu0 }
0x1231   : > { %v11912_v37 = vadd.f32 %v4321_v42, %v11849_v3  ;;  %v4751_v47 = vsel %vm1394_vm1, %v11909_v50, -inf  ;;  %v4736_v3 = vsel %vm1831_vm12, %v4720_v30, 0.0  ;;  %v4960_v30 = vmul.f32 %v4638_v57, %v11669_v23 }
0x1232   : > { %4752 = vmax.xlane.f32.xlu2 %v4751_v47  ;;  %4734 = vadd.xlane.f32.xlu1 %v4733_v39  ;;  %v11951_v23 = vadd.f32 %v11726_v5, %v11596_v62 }
0x1234   : > { %v4964_v45 = vsel %vm4354_vm0, %v11951_v23, -inf }
0x1236   : > { %v4700_v41 = vpop.f32.mrf.mxu1 }
0x1237   : > { %v11918_v11 = vadd.f32 %v4700_v41, %v11620_v53 }
0x1238   : > { %v4323_v13 = vpop.f32.mrf.mxu0 }
0x1239   : > { %v11921_v48 = vadd.f32 %v4323_v13, %v11856_v51  ;;  %v4754_v21 = vsel %vm1394_vm1, %v11918_v11, -inf  ;;  %v4739_v51 = vsel %vm1831_vm12, %v4721_v9, 0.0 }
0x123a   : > { %4755 = vmax.xlane.f32.xlu2 %v4754_v21  ;;  %4737 = vadd.xlane.f32.xlu1 %v4736_v3 }
0x123e   : > { %v4702_v56 = vpop.f32.mrf.mxu1 }
0x123f   : > { %v11929_v15 = vadd.f32 %v4702_v56, %v11628_v20  ;;  %v9746_v56 = vld [vmem:[%s10594_s19 + $0x9] ss:$0 sm:$0xff] }
0x1240   : > { %v4326_v53 = vpop.f32.mrf.mxu0 }
0x1241   : > { %v11932_v7 = vadd.f32 %v4326_v53, %v11864_v16  ;;  %v4757_v19 = vsel %vm1394_vm1, %v11929_v15, -inf  ;;  %v4961_v16 = vsel %vm4350_vm15, %v4960_v30, 0.0 }
0x1242   : > { %4740 = vadd.xlane.f32.xlu2 %v4739_v51  ;;  %4758 = vmax.xlane.f32.xlu0 %v4757_v19 }
0x1246   : > { %v4705_v31 = vpop.f32.mrf.mxu1 }
0x1247   : > { %v11939_v24 = vadd.f32 %v4705_v31, %v11638_v58 }
0x1248   : > { %v4328_v49 = vpop.f32.mrf.mxu0 }
0x1249   : > { %v11942_v20 = vadd.f32 %v4328_v49, %v11859_v27  ;;  %v4760_v9 = vsel %vm1394_vm1, %v11939_v24, -inf }
0x124a   : > { %4962 = vadd.xlane.f32.xlu2 %v4961_v16  ;;  %4761 = vmax.xlane.f32.xlu0 %v4760_v9 }
0x124e   : > { %v4707_v58 = vpop.f32.mrf.mxu1 }
0x124f   : > { %v11954_v57 = vadd.f32 %v4707_v58, %v11703_v38 }
0x1250   : > { %v4595_v27 = vpop.f32.mrf.mxu0 }
0x1251   : > { %v4763_v46 = vsel %vm1394_vm1, %v11954_v57, -inf }
0x1252   : > { %4746 = vadd.xlane.f32.xlu2 %v4745_v36  ;;  %4965 = vmax.xlane.f32.xlu0 %v4964_v45  ;;  %v4596_v36 = vadd.f32 %v9746_v56, %v4595_v27 }
0x1253   : > { %4764 = vmax.xlane.f32.xlu1 %v4763_v46 }
0x1256   : > { %v4710_v22 = vpop.f32.mrf.mxu1 }
0x1257   : > { %v11963_v62 = vadd.f32 %v4710_v22, %v11714_v28  ;;  %v11975_v46 = vpop.xlane.xlu2 %4725 }
0x1258   : > { %v4597_v38 = vpop.f32.mrf.mxu0 }
0x1259   : > { %v4766_v5 = vsel %vm1394_vm1, %v11963_v62, -inf  ;;  %v4598_v9 = vadd.f32 %v9746_v56, %v4597_v38 }
0x125a   : > { %4767 = vmax.xlane.f32.xlu0 %v4766_v5 }
0x125b   : > { %4743 = vadd.xlane.f32.xlu1 %v4742_v0  ;;  %v4876_v45 = vpack.c.bf16 %v4598_v9, %v4596_v36 }
0x125e   : > { %v4712_v42 = vpop.f32.mrf.mxu1 }
0x125f   : > { %v11970_v47 = vadd.f32 %v4712_v42, %v11654_v26 }
0x1260   : > { %v4600_v39 = vpop.f32.mrf.mxu0 }
0x1261   : > { %v4769_v41 = vsel %vm1394_vm1, %v11970_v47, -inf  ;;  %v4601_v16 = vadd.f32 %v9746_v56, %v4600_v39  ;;  %v11984_v39 = vpop.xlane.xlu0 %4728 }
0x1263   : > { %4770 = vmax.xlane.f32.xlu1 %v4769_v41 }
0x1268   : > { %v4602_v28 = vpop.f32.mrf.mxu0 }
0x1269   : > { %v4603_v26 = vadd.f32 %v9746_v56, %v4602_v28 }
0x126b   : > { %v4877_v58 = vpack.c.bf16 %v4603_v26, %v4601_v16 }
0x1270   : > { %v4605_v13 = vpop.f32.mrf.mxu0 }
0x1271   : > { %v4606_v31 = vadd.f32 %v9746_v56, %v4605_v13 }
0x1278   : > { %v4607_v21 = vpop.f32.mrf.mxu0 }
0x1279   : > { %v4608_v30 = vadd.f32 %v9746_v56, %v4607_v21 }
0x127b   : > { %v4878_v49 = vpack.c.bf16 %v4608_v30, %v4606_v31 }
0x1280   : > { %v4610_v3 = vpop.f32.mrf.mxu0 }
0x1281   : > { %v4611_v51 = vadd.f32 %v9746_v56, %v4610_v3  ;;  %v11995_v3 = vpop.xlane.xlu0 %4731 }
0x1288   : > { %v4612_v53 = vpop.f32.mrf.mxu0 }
0x1289   : > { %v4613_v19 = vadd.f32 %v9746_v56, %v4612_v53 }
0x128b   : > { %v4879_v18 = vpack.c.bf16 %v4613_v19, %v4611_v51 }
0x128d   : > { %4917 = vmatpush.bf16.msra.mxu2 %v4879_v18  ;;  %4991 = vmatpush.bf16.msrb.mxu0 %v4879_v18 }
0x1291   : > { %4918 = vmatpush.bf16.msra.mxu2 %v4878_v49  ;;  %4992 = vmatpush.bf16.msrb.mxu0 %v4878_v49 }
0x1295   : > { %4919 = vmatpush.bf16.msra.mxu2 %v4877_v58  ;;  %4993 = vmatpush.bf16.msrb.mxu0 %v4877_v58 }
0x1299   : > { %4920 = vmatpush.bf16.msra.mxu2 %v4876_v45  ;;  %4994 = vmatpush.bf16.msrb.mxu0 %v4876_v45 }
0x129d   : > { %v4750_v22 = vpop.xlane.xlu1 %4749 }
0x129e   : > { %v11978_v5 = vmax.f32 %v4750_v22, %v11975_v46 }
0x12a0   : > { %v4780_v0 = vsub.f32 %v11899_v60, %v11978_v5  ;;  %v4804_v42 = vsub.f32 %v11975_v46, %v11978_v5 }
0x12a2   : > { %v4788_v38 = vmul.f32 1.442695, %v4780_v0 }
0x12a4   : > { %9975 = vpow2.f32 %v4788_v38 }
0x12a5   : > { %v4753_v27 = vpop.xlane.xlu2 %4752  ;;  %v12006_v18 = vpop.xlane.xlu1 %4734 }
0x12a6   : > { %v11987_v41 = vmax.f32 %v4753_v27, %v11984_v39 }
0x12a8   : > { %v4781_v28 = vsub.f32 %v11909_v50, %v11987_v41 }
0x12aa   : > { %v11991_v13 = vpop.eup %9975  ;;  %v4790_v21 = vmul.f32 1.442695, %v4781_v28 }
0x12ab   : > { %v4828_v60 = vsel %vm1394_vm1, %v11991_v13, 0.0 }
0x12ac   : > { %9977 = vpow2.f32 %v4790_v21  ;;  %4829 = vadd.xlane.f32.xlu2 %v4828_v60 }
0x12ad   : > { %v4756_v56 = vpop.xlane.xlu2 %4755  ;;  %v12023_v22 = vpop.xlane.xlu1 %4737 }
0x12ae   : > { %v11998_v53 = vmax.f32 %v4756_v56, %v11995_v3 }
0x12b0   : > { %v4782_v51 = vsub.f32 %v11918_v11, %v11998_v53  ;;  %v4806_v50 = vsub.f32 %v11995_v3, %v11998_v53 }
0x12b2   : > { %v12004_v19 = vpop.eup %9977  ;;  %v4792_v30 = vmul.f32 1.442695, %v4782_v51 }
0x12b3   : > { %v4831_v31 = vsel %vm1394_vm1, %v12004_v19, 0.0 }
0x12b4   : > { %9979 = vpow2.f32 %v4792_v30  ;;  %4832 = vadd.xlane.f32.xlu0 %v4831_v31 }
0x12b5   : > { %v4759_v26 = vpop.xlane.xlu0 %4758  ;;  %v12013_v16 = vpop.xlane.xlu2 %4740 }
0x12b6   : > { %v12011_v49 = vmax.f32 %v4759_v26, %v12006_v18 }
0x12b8   : > { %v4783_v11 = vsub.f32 %v11929_v15, %v12011_v49  ;;  %v4807_v9 = vsub.f32 %v12006_v18, %v12011_v49 }
0x12ba   : > { %v12019_v58 = vpop.eup %9979  ;;  %v4794_v36 = vmul.f32 1.442695, %v4783_v11 }
0x12bb   : > { %v4834_v45 = vsel %vm1394_vm1, %v12019_v58, 0.0 }
0x12bc   : > { %9981 = vpow2.f32 %v4794_v36  ;;  %4835 = vadd.xlane.f32.xlu1 %v4834_v45 }
0x12bd   : > { %v4762_v0 = vpop.xlane.xlu0 %4761  ;;  %v4963_v28 = vpop.xlane.xlu2 %4962 }
0x12be   : > { %v12026_v38 = vmax.f32 %v4762_v0, %v12023_v22  ;;  %v4967_v51 = vperm.slane %v4963_v28, 0 }
0x12c0   : > { %v4784_v15 = vsub.f32 %v11939_v24, %v12026_v38  ;;  %v4808_v27 = vsub.f32 %v12023_v22, %v12026_v38 }
0x12c2   : > { %v12032_v21 = vpop.eup %9981  ;;  %v4796_v60 = vmul.f32 1.442695, %v4784_v15  ;;  %v4820_v18 = vmul.f32 1.442695, %v4808_v27 }
0x12c3   : > { %v4837_v56 = vsel %vm1394_vm1, %v12032_v21, 0.0 }
0x12c4   : > { %9983 = vpow2.f32 %v4796_v60  ;;  %4838 = vadd.xlane.f32.xlu2 %v4837_v56 }
0x12c5   : > { %v4966_v30 = vpop.xlane.xlu0 %4965 }
0x12c6   : > { %v4765_v31 = vpop.xlane.xlu1 %4764  ;;  %v4968_v26 = vmax.f32 %v4966_v30, %v4967_v51 }
0x12c7   : > { %v12037_v11 = vmax.f32 %v4765_v31, %v12013_v16 }
0x12c8   : > { %v4969_v24 = vsub.f32 %v11951_v23, %v4968_v26  ;;  %v12040_v36 = vsub.f32 %v4967_v51, %v4968_v26 }
0x12c9   : > { %v4785_v45 = vsub.f32 %v11954_v57, %v12037_v11 }
0x12ca   : > { %v12046_v15 = vpop.eup %9983  ;;  %v4970_v28 = vmul.f32 1.442695, %v4969_v24  ;;  %v4973_v22 = vmul.f32 1.442695, %v12040_v36 }
0x12cb   : > { %v4798_v60 = vmul.f32 1.442695, %v4785_v45  ;;  %v4840_v56 = vsel %vm1394_vm1, %v12046_v15, 0.0 }
0x12cc   : > { %9985 = vpow2.f32 %v4970_v28  ;;  %4841 = vadd.xlane.f32.xlu0 %v4840_v56  ;;  %v12067_v56 = vpop.xlane.xlu2 %4746 }
0x12cd   : > { %9987 = vpow2.f32 %v4798_v60  ;;  %v4768_v30 = vpop.xlane.xlu0 %4767 }
0x12ce   : > { %v12050_v23 = vpop.xlane.xlu1 %4743 }
0x12cf   : > { %v12053_v51 = vmax.f32 %v4768_v30, %v12050_v23 }
0x12d1   : > { %v4786_v57 = vsub.f32 %v11963_v62, %v12053_v51 }
0x12d2   : > { %v12059_v26 = vpop.eup %9985 }
0x12d3   : > { %v12061_v24 = vpop.eup %9987  ;;  %v4800_v45 = vmul.f32 1.442695, %v4786_v57  ;;  %v4975_v28 = vsel %vm4354_vm0, %v12059_v26, 0.0 }
0x12d4   : > { %v4843_v60 = vsel %vm1394_vm1, %v12061_v24, 0.0  ;;  %4976 = vadd.xlane.f32.xlu2 %v4975_v28 }
0x12d5   : > { %9989 = vpow2.f32 %v4800_v45  ;;  %4844 = vadd.xlane.f32.xlu1 %v4843_v60  ;;  %v4812_v60 = vmul.f32 1.442695, %v4804_v42 }
0x12d6   : > { %v4771_v62 = vpop.xlane.xlu1 %4770 }
0x12d7   : > { %v12070_v30 = vmax.f32 %v4771_v62, %v12067_v56 }
0x12d9   : > { %v4787_v40 = vsub.f32 %v11970_v47, %v12070_v30  ;;  %v4805_v47 = vsub.f32 %v11984_v39, %v11987_v41 }
0x12db   : > { %v12074_v6 = vpop.eup %9989  ;;  %v4802_v57 = vmul.f32 1.442695, %v4787_v40  ;;  %v4814_v40 = vmul.f32 1.442695, %v4805_v47 }
0x12dc   : > { %v4846_v14 = vsel %vm1394_vm1, %v12074_v6, 0.0 }
0x12dd   : > { %9991 = vpow2.f32 %v4802_v57  ;;  %4847 = vadd.xlane.f32.xlu0 %v4846_v14  ;;  %v9068_v14 = vld [vmem:[%s10594_s19 + $0x9] sm:$0x1] }
0x12de   : > { %9993 = vpow2.f32 %v4812_v60  ;;  %v4651_v57 = vadd.f32 %v9068_v14, %v11664_v17  ;;  %v4818_v17 = vmul.f32 1.442695, %v4807_v9 }
0x12df   : > { %9995 = vpow2.f32 %v4814_v40 }
0x12e0   : > { %v12092_v60 = vperm.slane %v4651_v57, 0 }
0x12e3   : > { %v12078_v45 = vpop.eup %9991 }
0x12e4   : > { %v4849_v28 = vsel %vm1394_vm1, %v12078_v45, 0.0  ;;  %v9994_v62 = vpop.eup %9993 }
0x12e5   : > { %4850 = vadd.xlane.f32.xlu1 %v4849_v28  ;;  %v4816_v28 = vmul.f32 1.442695, %v4806_v50  ;;  %v9996_v0 = vpop.eup %9995 }
0x131f   : > { %v4830_v12 = vpop.xlane.xlu2 %4829 }
0x1320   : > { %v4852_v31 = vadd.f32 %v9994_v62, %v4830_v12 }
0x1322   : > { %9997 = vrcp.f32 %v4852_v31 }
0x1323   : > { %9999 = vpow2.f32 %v4816_v28 }
0x1327   : > { %v4833_v46 = vpop.xlane.xlu0 %4832 }
0x1328   : > { %v9998_v5 = vpop.eup %9997  ;;  %v4853_v42 = vadd.f32 %v9996_v0, %v4833_v46  ;;  %v14006_v46 = vsub.f32 %v12013_v16, %v12037_v11  ;;  %v14007_v11 = vsub.f32 %v12050_v23, %v12053_v51 }
0x1329   : > { %v4884_v39 = vmul.f32 %v9998_v5, %v9994_v62  ;;  %v10000_v41 = vpop.eup %9999  ;;  %v4868_v50 = vmul.f32 %v9998_v5, %v11991_v13 }
0x132a   : > { %10001 = vrcp.f32 %v4853_v42  ;;  %v4822_v5 = vmul.f32 1.442695, %v14006_v46  ;;  %v4824_v36 = vmul.f32 1.442695, %v14007_v11 }
0x132b   : > { %v12095_v12 = vmul.f32 %v12092_v60, %v4884_v39  ;;  %10003 = vpow2.f32 %v4818_v17 }
0x132f   : > { %v4836_v31 = vpop.xlane.xlu1 %4835 }
0x1330   : > { %v10002_v3 = vpop.eup %10001  ;;  %v4854_v53 = vadd.f32 %v10000_v41, %v4836_v31 }
0x1331   : > { %v4869_v47 = vmul.f32 %v10002_v3, %v12004_v19  ;;  %v4885_v40 = vmul.f32 %v10002_v3, %v9996_v0  ;;  %v10004_v49 = vpop.eup %10003  ;;  %v9552_v19 = vld [vmem:[%s10597_s25] sm:$0xff] }
0x1332   : > { %10005 = vrcp.f32 %v4854_v53  ;;  %5136 = vmatpush.bf16.msrb.mxu2 %v9552_v19  ;;  %5087 = vmatpush.bf16.msra.mxu0 %v9552_v19 }
0x1333   : > { %v4880_v62 = vpack.c.bf16 %v4869_v47, %v4868_v50  ;;  %v12103_v14 = vmul.f32 %v12092_v60, %v4885_v40  ;;  %10007 = vpow2.f32 %v4820_v18 }
0x1335   : > { %9096 = vmatmul.msk.bf16.vlgmr.msra.gmra.mxu2 %vm1394_vm1, %v4880_v62 }
0x1337   : > { %v4839_v9 = vpop.xlane.xlu2 %4838 }
0x1338   : > { %v10006_v57 = vpop.eup %10005  ;;  %v4855_v28 = vadd.f32 %v10004_v49, %v4839_v9 }
0x1339   : > { %v4886_v13 = vmul.f32 %v10006_v57, %v10000_v41  ;;  %v10008_v38 = vpop.eup %10007  ;;  %v4870_v17 = vmul.f32 %v10006_v57, %v12019_v58 }
0x133a   : > { %10009 = vrcp.f32 %v4855_v28 }
0x133b   : > { %v12111_v0 = vmul.f32 %v12092_v60, %v4886_v13  ;;  %10011 = vpow2.f32 %v4822_v5 }
0x133c   : > { %10013 = vpow2.f32 %v4973_v22 }
0x133f   : > { %v4842_v27 = vpop.xlane.xlu0 %4841 }
0x1340   : > { %v10010_v42 = vpop.eup %10009  ;;  %v4856_v39 = vadd.f32 %v10008_v38, %v4842_v27 }
0x1341   : > { %v4871_v41 = vmul.f32 %v10010_v42, %v12032_v21  ;;  %v4887_v31 = vmul.f32 %v10010_v42, %v10004_v49  ;;  %v10012_v53 = vpop.eup %10011  ;;  %v4811_v49 = vsub.f32 %v12067_v56, %v12070_v30  ;;  %v10355_v42 = vmov 4.0  }
0x1342   : > { %10015 = vrcp.f32 %v4856_v39  ;;  %v10014_v50 = vpop.eup %10013 }
0x1343   : > { %v4881_v3 = vpack.c.bf16 %v4871_v41, %v4870_v17  ;;  %v12120_v16 = vmul.f32 %v12092_v60, %v4887_v31  ;;  %10017 = vpow2.f32 %v4824_v36  ;;  %v4826_v23 = vmul.f32 1.442695, %v4811_v49 }
0x1344   : > { %v4392_v17 = vsel %vm4391_vm2, %v11828_v54, 0.0  ;;  %v9571_v54 = vld [vmem:[%s10591_s13 + $0xc8] sm:$0xff] }
0x1345   : > { %9097 = vmatmul.msk.bf16.gmra.mxu2 %vm1394_vm1, %v4881_v3  ;;  %v4393_v41 = vrot.slane %v4392_v17, 4  ;;  %v9572_v3 = vld [vmem:[%s10591_s13 + $0xd0] sm:$0xff] }
0x1347   : > { %v4977_v47 = vpop.xlane.xlu2 %4976 }
0x1348   : > { %v10016_v40 = vpop.eup %10015  ;;  %v4845_v62 = vpop.xlane.xlu1 %4844  ;;  %v4978_v58 = vadd.f32 %v10014_v50, %v4977_v47  ;;  %v4394_v47 = vadd.f32 %v4393_v41, %v4392_v17  ;;  %v14010_v17 = vpack.c.bf16 %v11921_v48, %v11912_v37  ;;  %v9565_v37 = vld [vmem:[%s10597_s25 + $0x8] sm:$0xff]  ;;  %v9576_v48 = vld [vmem:[%s10591_s13 + $0x150] sm:$0xff] }
0x1349   : > { %v4857_v21 = vadd.f32 %v10012_v53, %v4845_v62  ;;  %v4888_v18 = vmul.f32 %v10016_v40, %v10008_v38  ;;  %v10018_v51 = vpop.eup %10017  ;;  %v4872_v22 = vmul.f32 %v10016_v40, %v12046_v15  ;;  %v9573_v15 = vld [vmem:[%s10591_s13 + $0xd8] sm:$0xff]  ;;  %5040 = vmatpush.bf16.msra.mxu3 %v9565_v37  ;;  %5120 = vmatpush.bf16.msrb.mxu1 %v9565_v37 }
0x134a   : > { %10019 = vrcp.f32 %v4978_v58  ;;  %5251 = vmatpush.bf16.msra.mxu2 %v9573_v15  ;;  %v4395_v58 = vrot.slane %v4394_v47, 2 }
0x134b   : > { %10021 = vrcp.f32 %v4857_v21  ;;  %v12129_v9 = vmul.f32 %v12092_v60, %v4888_v18  ;;  %v9570_v21 = vld [vmem:[%s10591_s13 + $0xc0] sm:$0xff] }
0x134c   : > { %10023 = vpow2.f32 %v4826_v23 }
0x134e   : > { %5252 = vmatpush.bf16.msra.mxu2 %v9572_v3 }
0x1350   : > { %v10020_v57 = vpop.eup %10019  ;;  %v4848_v28 = vpop.xlane.xlu0 %4847 }
0x1351   : > { %v10022_v13 = vpop.eup %10021  ;;  %v4980_v19 = vmul.f32 %v10020_v57, %v12059_v26  ;;  %v4858_v46 = vadd.f32 %v10018_v51, %v4848_v28  ;;  %v4982_v5 = vmul.f32 %v10020_v57, %v10014_v50 }
0x1352   : > { %v4873_v56 = vmul.f32 %v10022_v13, %v12061_v24  ;;  %v4889_v30 = vmul.f32 %v10022_v13, %v10012_v53  ;;  %v10024_v24 = vpop.eup %10023  ;;  %5253 = vmatpush.bf16.msra.mxu2 %v9571_v54  ;;  %v4396_v13 = vadd.f32 %v4395_v58, %v4394_v47 }
0x1353   : > { %v4981_v38 = vpack.c.bf16 %v4980_v19, %v4980_v19  ;;  %10025 = vrcp.f32 %v4858_v46  ;;  %v12135_v27 = vmul.f32 %v4982_v5, %v12092_v60  ;;  %v14008_v5 = vpack.c.bf16 %v11891_v29, %v11888_v55  ;;  %v9569_v55 = vld [vmem:[%s10591_s13 + $0x58] sm:$0xff]  ;;  %v9568_v29 = vld [vmem:[%s10591_s13 + $0x50] sm:$0xff] }
0x1354   : > { %10027 = vrcp.f32 %v10355_v42  ;;  %v4882_v39 = vpack.c.bf16 %v4873_v56, %v4872_v22  ;;  %v12138_v26 = vmul.f32 %v12092_v60, %v4889_v30  ;;  %v9567_v42 = vld [vmem:[%s10591_s13 + $0x48] sm:$0xff]  ;;  %5184 = vmatpush.bf16.msra.mxu1 %v9569_v55 }
0x1355   : > { %9101 = vmatmul.msk.bf16.vlgmr.msrb.gmra.mxu0 %vm1394_vm1, %v4981_v38  ;;  %v14009_v38 = vpack.c.bf16 %v11902_v33, %v11896_v1  ;;  %v14011_v1 = vpack.c.bf16 %v11942_v20, %v11932_v7  ;;  %v9577_v33 = vld [vmem:[%s10591_s13 + $0x158] sm:$0xff]  ;;  %v9575_v7 = vld [vmem:[%s10591_s13 + $0x148] sm:$0xff]  ;;  %v9574_v20 = vld [vmem:[%s10591_s13 + $0x140] sm:$0xff] }
0x1356   : > { %9098 = vmatmul.msk.bf16.gmra.mxu2 %vm1394_vm1, %v4882_v39  ;;  %5347 = vmatpush.bf16.msrb.mxu0 %v9569_v55  ;;  %v9566_v39 = vld [vmem:[%s10591_s13 + $0x40] sm:$0xff] }
0x1357   : > { %5254 = vmatpush.bf16.msra.mxu2 %v9570_v21  ;;  %5318 = vmatpush.bf16.msrb.mxu3 %v9577_v33 }
0x1358   : > { %v4851_v31 = vpop.xlane.xlu1 %4850  ;;  %5185 = vmatpush.bf16.msra.mxu1 %v9568_v29 }
0x1359   : > { %v10026_v11 = vpop.eup %10025  ;;  %v4859_v36 = vadd.f32 %v10024_v24, %v4851_v31 }
0x135a   : > { %v10028_v53 = vpop.eup %10027  ;;  %v4890_v50 = vmul.f32 %v10026_v11, %v10018_v51  ;;  %v4874_v23 = vmul.f32 %v10026_v11, %v12074_v6  ;;  %v4397_v6 = vrot.slane %v4396_v13, 1  ;;  %5348 = vmatpush.bf16.msrb.mxu0 %v9568_v29 }
0x135b   : > { %10029 = vrcp.f32 %v4859_v36  ;;  %v4400_v62 = vmul.f32 4.0, %v10028_v53  ;;  %vm4404_vm3 = vweird.f32 %v10028_v53  ;;  %5319 = vmatpush.bf16.msrb.mxu3 %v9576_v48 }
0x135c   : > { %v12148_v40 = vmul.f32 %v12092_v60, %v4890_v50  ;;  %v4398_v22 = vadd.f32 %v4397_v6, %v4396_v13  ;;  %5186 = vmatpush.bf16.msra.mxu1 %v9567_v42 }
0x135d   : > { %v4401_v49 = vsub.f32 1.0, %v4400_v62 }
0x135e   : > { %5349 = vmatpush.bf16.msrb.mxu0 %v9567_v42 }
0x135f   : > { %v4402_v46 = vmul.f32 %v10028_v53, %v4401_v49  ;;  %5320 = vmatpush.bf16.msrb.mxu3 %v9575_v7 }
0x1360   : > { %5187 = vmatpush.bf16.msra.mxu1 %v9566_v39 }
0x1361   : > { %v10030_v18 = vpop.eup %10029 }
0x1362   : > { %v4875_v57 = vmul.f32 %v10030_v18, %v12078_v45  ;;  %v4891_v28 = vmul.f32 %v10030_v18, %v10024_v24  ;;  %v4403_v45 = vadd.f32 %v10028_v53, %v4402_v46  ;;  %5350 = vmatpush.bf16.msrb.mxu0 %v9566_v39 }
0x1363   : > { %5321 = vmatpush.bf16.msrb.mxu3 %v9574_v20 }
0x1364   : > { %v4883_v51 = vpack.c.bf16 %v4875_v57, %v4874_v23  ;;  %v12154_v19 = vmul.f32 %v12092_v60, %v4891_v28  ;;  %v12161_v56 = vsel %vm4404_vm3, %v10028_v53, %v4403_v45 }
0x1365   : > { %9116 = vmatmul.msk.bf16.vlgmr.msra.gmra.mxu0 %vm1831_vm12, %v14008_v5  ;;  %v4406_v30 = vmul.f32 %v12161_v56, %v4398_v22 }
0x1366   : > { %9099 = vmatmul.msk.bf16.gmra.mxu2 %vm1394_vm1, %v4883_v51  ;;  %5360 = vmatpush.bf16.msra.mxu0 %v9573_v15 }
0x1367   : > { %v4413_v60 = vpack.c.bf16 %v4406_v30, %v4406_v30 }
0x136a   : > { %5361 = vmatpush.bf16.msra.mxu0 %v9572_v3 }
0x136e   : > { %5362 = vmatpush.bf16.msra.mxu0 %v9571_v54 }
0x1372   : > { %5363 = vmatpush.bf16.msra.mxu0 %v9570_v21 }
0x1375   : > { %9117 = vmatmul.msk.bf16.gmra.mxu0 %vm1831_vm12, %v14009_v38 }
0x1376   : > { %9121 = vmatmul.msk.bf16.vlgmr.msrb.gmra.mxu2 %vm1831_vm12, %v4413_v60 }
0x1385   : > { %9118 = vmatmul.msk.bf16.gmra.mxu0 %vm1831_vm12, %v14010_v17 }
0x1386   : > { %9176 = vmatmul.msk.bf16.vlgmr.msra.gmra.mxu2 %vm1394_vm1, %v11412_v34 }
0x1395   : > { %9119 = vmatmul.msk.bf16.gmra.mxu0 %vm1831_vm12, %v14011_v1 }
0x1396   : > { %9177 = vmatmul.msk.bf16.gmra.mxu2 %vm1394_vm1, %v11433_v4 }
0x13a5   : > { %9209 = vmatmul.msk.bf16.vlgmr.msrb.gmra.mxu0 %vm1394_vm1, %v11476_v35 }
0x13a6   : > { %9178 = vmatmul.msk.bf16.gmra.mxu2 %vm1394_vm1, %v11448_v32  ;;  %5373 = vmatpush.bf16.msrb.mxu0 %v9577_v33 }
0x13aa   : > { %5374 = vmatpush.bf16.msrb.mxu0 %v9576_v48 }
0x13ae   : > { %5375 = vmatpush.bf16.msrb.mxu0 %v9575_v7 }
0x13b2   : > { %5376 = vmatpush.bf16.msrb.mxu0 %v9574_v20 }
0x13b5   : > { %9210 = vmatmul.msk.bf16.vlgmr.msra.gmra.mxu0 %vm1394_vm1, %v11476_v35 }
0x13b6   : > { %9179 = vmatmul.msk.bf16.gmra.mxu2 %vm1394_vm1, %v11465_v63 }
0x13b8   : > { %v4922_v15 = vpop.f32.mrf.mxu2 }
0x13b9   : > { %v4923_v41 = vadd.f32 %v4922_v15, %v12095_v12  ;;  %v9159_v15 = vld [vmem:[%s10594_s19 + $0x6] sm:$0x1] }
0x13c0   : > { %v4924_v24 = vpop.f32.mrf.mxu2 }
0x13c1   : > { %v4925_v31 = vadd.f32 %v4924_v24, %v12103_v14  ;;  %v9130_v24 = vld [vmem:[%s10594_s19 + $0x2] sm:$0x1] }
0x13c3   : > { %v5011_v3 = vpack.c.bf16 %v4925_v31, %v4923_v41 }
0x13c5   : > { %9108 = vmatmul.msk.bf16.vlgmr.msra.gmra.mxu3 %vm1831_vm12, %v5011_v3  ;;  %9211 = vmatmul.msk.bf16.vlgmr.msrb.gmra.mxu0 %vm1394_vm1, %v11476_v35 }
0x13c8   : > { %v4927_v11 = vpop.f32.mrf.mxu2 }
0x13c9   : > { %v4928_v53 = vadd.f32 %v4927_v11, %v12111_v0 }
0x13d0   : > { %v4929_v36 = vpop.f32.mrf.mxu2 }
0x13d1   : > { %v4930_v50 = vadd.f32 %v4929_v36, %v12120_v16 }
0x13d2   : > { %v4996_v47 = vpop.f32.mrf.mxu0 }
0x13d3   : > { %v5012_v54 = vpack.c.bf16 %v4930_v50, %v4928_v53  ;;  %v4997_v62 = vadd.f32 %v4996_v47, %v12135_v27 }
0x13d5   : > { %v5000_v12 = vsel %vm4391_vm2, %v4997_v62, 0.0  ;;  %9109 = vmatmul.msk.bf16.gmra.mxu3 %vm1831_vm12, %v5012_v54  ;;  %v9747_v54 = vld [vmem:[%s10594_s19 + $0x6] ss:$0 sm:$0xff] }
0x13d6   : > { %v5001_v14 = vrot.slane %v5000_v12, 4 }
0x13d8   : > { %v5002_v58 = vadd.f32 %v5001_v14, %v5000_v12 }
0x13d9   : > { %v4932_v21 = vpop.f32.mrf.mxu2 }
0x13da   : > { %v5003_v18 = vrot.slane %v5002_v58, 2  ;;  %v4998_v49 = vpop.f32.mrf.mxu0  ;;  %v4933_v16 = vadd.f32 %v4932_v21, %v12129_v9 }
0x13dc   : > { %v5004_v23 = vadd.f32 %v5003_v18, %v5002_v58 }
0x13de   : > { %v5005_v57 = vrot.slane %v5004_v23, 1 }
0x13e0   : > { %v5006_v28 = vadd.f32 %v5005_v57, %v5004_v23 }
0x13e1   : > { %v4934_v13 = vpop.f32.mrf.mxu2 }
0x13e2   : > { %v5007_v0 = vmul.f32 %v5006_v28, %v12161_v56  ;;  %v4935_v51 = vadd.f32 %v4934_v13, %v12138_v26  ;;  %v12211_v27 = vpop.f32.mrf.mxu0 }
0x13e4   : > { %v5109_v46 = vpack.c.bf16 %v5007_v0, %v5007_v0  ;;  %v5013_v5 = vpack.c.bf16 %v4935_v51, %v4933_v16 }
0x13e6   : > { %9110 = vmatmul.msk.bf16.gmra.mxu3 %vm1831_vm12, %v5013_v5  ;;  %9120 = vmatmul.msk.bf16.vlgmr.msrb.gmra.mxu1 %vm1831_vm12, %v5109_v46 }
0x13e9   : > { %v4937_v6 = vpop.f32.mrf.mxu2 }
0x13ea   : > { %v12215_v45 = vpop.f32.mrf.mxu0  ;;  %v4938_v30 = vadd.f32 %v4937_v6, %v12148_v40 }
0x13eb   : > { %14012 = vst [vmem:[#allocation51_spill] sm:$0xff] %v12215_v45 }
0x13f1   : > { %v4939_v22 = vpop.f32.mrf.mxu2 }
0x13f2   : > { %v4940_v60 = vadd.f32 %v4939_v22, %v12154_v19  ;;  %v12219_v38 = vpop.f32.mrf.mxu0 }
0x13f4   : > { %v5014_v9 = vpack.c.bf16 %v4940_v60, %v4938_v30 }
0x13f6   : > { %9111 = vmatmul.msk.bf16.gmra.mxu3 %vm1831_vm12, %v5014_v9  ;;  %9147 = vmatmul.msk.bf16.vlgmr.msra.gmra.mxu1 %vm1394_vm1, %v11412_v34 }
0x13f9   : > { %v12224_v26 = vpop.f32.mrf.mxu2 }
0x13fa   : > { %v12226_v55 = vpop.f32.mrf.mxu0 }
0x13fb   : > { %14013 = vst [vmem:[#allocation52_spill] sm:$0xff] %v12226_v55 }
0x1401   : > { %v5140_v29 = vpop.f32.mrf.mxu2 }
0x1402   : > { %v12228_v42 = vpop.f32.mrf.mxu0 }
0x1406   : > { %9205 = vmatmul.msk.bf16.vlgmr.msrb.gmra.mxu3 %vm1394_vm1, %v11412_v34  ;;  %9148 = vmatmul.msk.bf16.gmra.mxu1 %vm1394_vm1, %v11433_v4 }
0x1409   : > { %v5256_v40 = vpop.f32.mrf.mxu2 }
0x140a   : > { %v12234_v19 = vpop.f32.mrf.mxu0  ;;  %v5257_v30 = vadd.f32 %v9747_v54, %v5256_v40 }
0x140b   : > { %14014 = vst [vmem:[#allocation53_spill] sm:$0xff] %v12234_v19 }
0x1411   : > { %v5258_v39 = vpop.f32.mrf.mxu2 }
0x1412   : > { %v12236_v17 = vpop.f32.mrf.mxu0  ;;  %v5259_v6 = vadd.f32 %v9747_v54, %v5258_v39 }
0x1414   : > { %v5386_v9 = vpack.c.bf16 %v5259_v6, %v5257_v30  ;;  %v12292_v30 = vld [vmem:[%s10591_s13 + $0xf0] sm:$0xff] }
0x1416   : > { %9206 = vmatmul.msk.bf16.gmra.mxu3 %vm1394_vm1, %v11433_v4  ;;  %9149 = vmatmul.msk.bf16.gmra.mxu1 %vm1394_vm1, %v11448_v32  ;;  %v5403_v29 = vsel %vm1831_vm12, %v5386_v9, 0 }
0x1419   : > { %v5261_v1 = vpop.f32.mrf.mxu2 }
0x141a   : > { %v12242_v33 = vpop.f32.mrf.mxu0  ;;  %v5262_v51 = vadd.f32 %v9747_v54, %v5261_v1 }
0x141b   : > { %14015 = vst [vmem:[#allocation54_spill] sm:$0xff] %v12242_v33 }
0x1421   : > { %v5263_v37 = vpop.f32.mrf.mxu2 }
0x1422   : > { %v5352_v48 = vpop.f32.mrf.mxu0  ;;  %v5264_v0 = vadd.f32 %v9747_v54, %v5263_v37 }
0x1423   : > { %v5353_v3 = vadd.f32 %v9130_v24, %v5352_v48 }
0x1424   : > { %v5387_v5 = vpack.c.bf16 %v5264_v0, %v5262_v51 }
0x1425   : > { %v5670_v37 = vperm.slane %v5353_v3, 0 }
0x1426   : > { %9207 = vmatmul.msk.bf16.gmra.mxu3 %vm1394_vm1, %v11448_v32  ;;  %9150 = vmatmul.msk.bf16.gmra.mxu1 %vm1394_vm1, %v11465_v63  ;;  %v5406_v22 = vsel %vm1831_vm12, %v5387_v5, 0  ;;  %v12288_v5 = vld [vmem:[%s10591_s13 + $0xf8] sm:$0xff] }
0x1429   : > { %v5266_v7 = vpop.f32.mrf.mxu2 }
0x142a   : > { %v5354_v20 = vpop.f32.mrf.mxu0  ;;  %v5267_v23 = vadd.f32 %v9747_v54, %v5266_v7  ;;  %v5671_v7 = vpack.c.bf16 %v5670_v37, %v5670_v37  ;;  %v12298_v37 = vld [vmem:[%s10591_s13 + $0xe8] sm:$0xff] }
0x1431   : > { %v5268_v41 = vpop.f32.mrf.mxu2 }
0x1432   : > { %v5365_v31 = vpop.f32.mrf.mxu0  ;;  %v5269_v18 = vadd.f32 %v9747_v54, %v5268_v41 }
0x1433   : > { %v5366_v11 = vadd.f32 %v9159_v15, %v5365_v31  ;;  %v9748_v15 = vld [vmem:[%s10594_s19 + $0x2] ss:$0 sm:$0xff] }
0x1434   : > { %v5388_v13 = vpack.c.bf16 %v5269_v18, %v5267_v23 }
0x1435   : > { %v5688_v36 = vmul.f32 %v5366_v11, %v5353_v3  ;;  %v5443_v41 = vperm.slane %v5366_v11, 0 }
0x1436   : > { %9208 = vmatmul.msk.bf16.gmra.mxu3 %vm1394_vm1, %v11465_v63  ;;  %v5409_v16 = vsel %vm1831_vm12, %v5388_v13, 0 }
0x1437   : > { %v5689_v53 = vsel %vm4350_vm15, %v5688_v36, 0.0 }
0x1438   : > { %5690 = vadd.xlane.f32.xlu2 %v5689_v53 }
0x1439   : > { %v5271_v50 = vpop.f32.mrf.mxu2 }
0x143a   : > { %v5367_v47 = vpop.f32.mrf.mxu0  ;;  %v5272_v12 = vadd.f32 %v9747_v54, %v5271_v50 }
0x1441   : > { %v5273_v62 = vpop.f32.mrf.mxu2 }
0x1442   : > { %v5274_v14 = vadd.f32 %v9747_v54, %v5273_v62  ;;  %v12254_v58 = vpop.f32.mrf.mxu0 }
0x1444   : > { %v5389_v21 = vpack.c.bf16 %v5274_v14, %v5272_v12 }
0x1446   : > { %v5412_v49 = vsel %vm1831_vm12, %v5389_v21, 0 }
0x1447   : > { %5418 = vmatpush.bf16.xpose.msrb.mxu1 %v5412_v49  ;;  %5679 = vmatpush.bf16.xpose.msra.mxu3 %v5412_v49 }
0x1448   : > { %v12257_v57 = vpop.f32.mrf.mxu3 }
0x144a   : > { %v5380_v28 = vpop.f32.mrf.mxu0 }
0x144f   : > { %5419 = vmatpush.bf16.xpose.msrb.mxu1 %v5409_v16  ;;  %5680 = vmatpush.bf16.xpose.msra.mxu3 %v5409_v16 }
0x1450   : > { %v12260_v46 = vpop.f32.mrf.mxu3 }
0x1451   : > { %14016 = vst [vmem:[#allocation55_spill] sm:$0xff] %v12260_v46 }
0x1457   : > { %5420 = vmatpush.bf16.xpose.msrb.mxu1 %v5406_v22  ;;  %5681 = vmatpush.bf16.xpose.msra.mxu3 %v5406_v22 }
0x1458   : > { %v12263_v60 = vpop.f32.mrf.mxu3 }
0x145f   : > { %5421 = vmatpush.bf16.xpose.msrb.mxu1 %v5403_v29  ;;  %5682 = vmatpush.bf16.xpose.msra.mxu3 %v5403_v29 }
0x1460   : > { %v12266_v48 = vpop.f32.mrf.mxu3 }
0x1461   : > { %14017 = vst [vmem:[#allocation56_spill] sm:$0xff] %v12266_v48 }
0x1463   : > { %v12268_v1 = vpop.f32.mrf.mxu1 }
0x1466   : > { %9220 = vmatmul.msk.bf16.vlgmr.msra.gmra.mxu3 %vm1831_vm12, %v5671_v7 }
0x1467   : > { %5925 = vmatpush.bf16.msra.mxu1 %v12288_v5 }
0x1469   : > { %v12271_v39 = vpop.f32.mrf.mxu3 }
0x146b   : > { %v5124_v20 = vpop.f32.mrf.mxu1  ;;  %5926 = vmatpush.bf16.msra.mxu1 %v12292_v30 }
0x146f   : > { %5927 = vmatpush.bf16.msra.mxu1 %v12298_v37 }
0x1471   : > { %v12274_v40 = vpop.f32.mrf.mxu3 }
0x1472   : > { %14018 = vst [vmem:[#allocation57_spill] sm:$0xff] %v12274_v40  ;;  %v12397_v40 = vld [vmem:[%s14005_s17 + $0x20] sm:$0xff] }
0x1473   : > { %v5189_v24 = vpop.f32.mrf.mxu1  ;;  %14026 = vst [vmem:[#allocation65_spill] sm:$0xff] %v12397_v40 }
0x1474   : > { %v5190_v31 = vadd.f32 %v9748_v15, %v5189_v24  ;;  %v12302_v24 = vld [vmem:[%s10591_s13 + $0xe0] sm:$0xff] }
0x1475   : > { %5928 = vmatpush.bf16.msra.mxu1 %v12302_v24 }
0x1476   : > { %v5444_v36 = vmul.f32 %v5443_v41, %v5190_v31 }
0x1478   : > { %v5452_v53 = vsel %vm1831_vm12, %v5444_v36, 0.0 }
0x1479   : > { %v12277_v3 = vpop.f32.mrf.mxu3  ;;  %5453 = vadd.xlane.f32.xlu1 %v5452_v53 }
0x147b   : > { %v5191_v50 = vpop.f32.mrf.mxu1 }
0x147c   : > { %v5192_v47 = vadd.f32 %v9748_v15, %v5191_v50 }
0x147e   : > { %v5382_v54 = vpack.c.bf16 %v5192_v47, %v5190_v31  ;;  %v5445_v62 = vmul.f32 %v5443_v41, %v5192_v47 }
0x1480   : > { %9212 = vmatmul.msk.bf16.vlgmr.msrb.gmra.mxu1 %vm1831_vm12, %v5382_v54  ;;  %v5455_v12 = vsel %vm1831_vm12, %v5445_v62, 0.0 }
0x1481   : > { %v12281_v14 = vpop.f32.mrf.mxu3  ;;  %5456 = vadd.xlane.f32.xlu2 %v5455_v12 }
0x1482   : > { %14019 = vst [vmem:[#allocation58_spill] sm:$0xff] %v12281_v14 }
0x1483   : > { %v5194_v11 = vpop.f32.mrf.mxu1 }
0x1484   : > { %v5195_v21 = vadd.f32 %v9748_v15, %v5194_v11 }
0x1486   : > { %v5446_v18 = vmul.f32 %v5443_v41, %v5195_v21 }
0x1488   : > { %v5458_v49 = vsel %vm1831_vm12, %v5446_v18, 0.0 }
0x1489   : > { %v5323_v23 = vpop.f32.mrf.mxu3  ;;  %5459 = vadd.xlane.f32.xlu2 %v5458_v49 }
0x148b   : > { %v5196_v28 = vpop.f32.mrf.mxu1 }
0x148c   : > { %v5197_v13 = vadd.f32 %v9748_v15, %v5196_v28 }
0x148e   : > { %v5383_v0 = vpack.c.bf16 %v5197_v13, %v5195_v21  ;;  %v12284_v16 = vmul.f32 %v5443_v41, %v5197_v13  ;;  %v9749_v13 = vld [vmem:[%s10594_s19 + $0xa] ss:$0 sm:$0xff] }
0x1490   : > { %9213 = vmatmul.msk.bf16.gmra.mxu1 %vm1831_vm12, %v5383_v0 }
0x1491   : > { %v5325_v51 = vpop.f32.mrf.mxu3 }
0x1493   : > { %v5199_v6 = vpop.f32.mrf.mxu1 }
0x1494   : > { %v5200_v22 = vadd.f32 %v9748_v15, %v5199_v6 }
0x1496   : > { %v12294_v9 = vmul.f32 %v5443_v41, %v5200_v22 }
0x1499   : > { %v5328_v29 = vpop.f32.mrf.mxu3 }
0x149b   : > { %v5201_v7 = vpop.f32.mrf.mxu1 }
0x149c   : > { %v5202_v20 = vadd.f32 %v9748_v15, %v5201_v7 }
0x149e   : > { %v5384_v31 = vpack.c.bf16 %v5202_v20, %v5200_v22  ;;  %v12304_v36 = vmul.f32 %v5443_v41, %v5202_v20 }
0x14a0   : > { %9214 = vmatmul.msk.bf16.gmra.mxu1 %vm1831_vm12, %v5384_v31 }
0x14a1   : > { %v5330_v53 = vpop.f32.mrf.mxu3 }
0x14a3   : > { %v5204_v50 = vpop.f32.mrf.mxu1 }
0x14a4   : > { %v5205_v47 = vadd.f32 %v9748_v15, %v5204_v50  ;;  %v5329_v50 = vadd.f32 %v9749_v13, %v5328_v29  ;;  %v10245_v29 = vld [vmem:[%s14004_s8] sm:$0xf] }
0x14a6   : > { %v12308_v54 = vmul.f32 %v5443_v41, %v5205_v47 }
0x14a9   : > { %v5333_v62 = vpop.f32.mrf.mxu3 }
0x14aa   : > { %v5334_v31 = vadd.f32 %v9749_v13, %v5333_v62 }
0x14ab   : > { %v5206_v12 = vpop.f32.mrf.mxu1 }
0x14ac   : > { %v5207_v11 = vadd.f32 %v9748_v15, %v5206_v12  ;;  %v5331_v15 = vadd.f32 %v9749_v13, %v5330_v53 }
0x14ae   : > { %v5385_v21 = vpack.c.bf16 %v5207_v11, %v5205_v47  ;;  %v12310_v18 = vmul.f32 %v5443_v41, %v5207_v11  ;;  %v5326_v47 = vadd.f32 %v9749_v13, %v5325_v51  ;;  %v5605_v12 = vpack.c.bf16 %v5331_v15, %v5329_v50 }
0x14af   : > { %v5324_v11 = vadd.f32 %v9749_v13, %v5323_v23 }
0x14b0   : > { %9215 = vmatmul.msk.bf16.gmra.mxu1 %vm1831_vm12, %v5385_v21 }
0x14b1   : > { %v5335_v49 = vpop.f32.mrf.mxu3  ;;  %v5604_v21 = vpack.c.bf16 %v5326_v47, %v5324_v11  ;;  %v12351_v11 = vld [vmem:[%s14005_s17 + $0x18] sm:$0xff] }
0x14b2   : > { %v5336_v7 = vadd.f32 %v9749_v13, %v5335_v49  ;;  %14022 = vst [vmem:[#allocation61_spill] sm:$0xff] %v12351_v11 }
0x14b4   : > { %v5606_v41 = vpack.c.bf16 %v5336_v7, %v5334_v31  ;;  %v5461_v31 = vsel %vm1831_vm12, %v12284_v16, 0.0 }
0x14b9   : > { %v5338_v28 = vpop.f32.mrf.mxu3 }
0x14ba   : > { %v5339_v6 = vadd.f32 %v9749_v13, %v5338_v28  ;;  %v12325_v28 = vld [vmem:[%s14005_s17] sm:$0xff] }
0x14c0   : > { %9287 = vmatmul.msk.bf16.vlgmr.msra.gmra.mxu1 %vm1394_vm1, %v11412_v34 }
0x14c1   : > { %v5340_v0 = vpop.f32.mrf.mxu3 }
0x14c2   : > { %v5341_v22 = vadd.f32 %v9749_v13, %v5340_v0 }
0x14c4   : > { %v5607_v20 = vpack.c.bf16 %v5341_v22, %v5339_v6  ;;  %v12333_v22 = vld [vmem:[%s14005_s17 + $0x8] sm:$0xff] }
0x14c5   : > { %14020 = vst [vmem:[#allocation59_spill] sm:$0xff] %v12333_v22 }
0x14c6   : > { %5645 = vmatpush.bf16.msrb.mxu2 %v5607_v20  ;;  %5719 = vmatpush.bf16.msra.mxu0 %v5607_v20 }
0x14ca   : > { %5646 = vmatpush.bf16.msrb.mxu2 %v5606_v41  ;;  %5720 = vmatpush.bf16.msra.mxu0 %v5606_v41  ;;  %v12343_v41 = vld [vmem:[%s14005_s17 + $0x10] sm:$0xff] }
0x14cb   : > { %14021 = vst [vmem:[#allocation60_spill] sm:$0xff] %v12343_v41 }
0x14ce   : > { %5647 = vmatpush.bf16.msrb.mxu2 %v5605_v12  ;;  %5721 = vmatpush.bf16.msra.mxu0 %v5605_v12 }
0x14d0   : > { %9288 = vmatmul.msk.bf16.gmra.mxu1 %vm1394_vm1, %v11433_v4 }
0x14d2   : > { %5648 = vmatpush.bf16.msrb.mxu2 %v5604_v21  ;;  %5722 = vmatpush.bf16.msra.mxu0 %v5604_v21 }
0x14e0   : > { %9289 = vmatmul.msk.bf16.gmra.mxu1 %vm1394_vm1, %v11448_v32 }
0x14e9   : > { %v5684_v53 = vpop.f32.mrf.mxu3 }
0x14ea   : > { %v5685_v62 = vadd.f32 %v10245_v29, %v5684_v53  ;;  %v5464_v53 = vsel %vm1831_vm12, %v12294_v9, 0.0 }
0x14ec   : > { %v5692_v51 = vsel %vm4354_vm0, %v5685_v62, -inf }
0x14ed   : > { %5693 = vmax.xlane.f32.xlu0 %v5692_v51  ;;  %v5467_v51 = vsel %vm1831_vm12, %v12304_v36, 0.0 }
0x14f0   : > { %9290 = vmatmul.msk.bf16.gmra.mxu1 %vm1394_vm1, %v11465_v63 }
0x14f1   : > { %v5686_v23 = vpop.f32.mrf.mxu3 }
0x14fd   : > { %v5423_v49 = vpop.f32.mrf.mxu1 }
0x14fe   : > { %v12328_v13 = vadd.f32 %v12325_v28, %v5423_v49  ;;  %v12363_v49 = vld [vmem:[%s14005_s17 + $0x28] sm:$0xff] }
0x14ff   : > { %14023 = vst [vmem:[#allocation62_spill] sm:$0xff] %v12363_v49 }
0x1500   : > { %v5476_v0 = vsel %vm1394_vm1, %v12328_v13, -inf }
0x1501   : > { %5477 = vmax.xlane.f32.xlu0 %v5476_v0 }
0x1505   : > { %v5425_v6 = vpop.f32.mrf.mxu1 }
0x1506   : > { %v12336_v7 = vadd.f32 %v12333_v22, %v5425_v6  ;;  %v5470_v6 = vsel %vm1831_vm12, %v12308_v54, 0.0 }
0x1508   : > { %v5479_v20 = vsel %vm1394_vm1, %v12336_v7, -inf }
0x1509   : > { %5480 = vmax.xlane.f32.xlu1 %v5479_v20  ;;  %5462 = vadd.xlane.f32.xlu0 %v5461_v31  ;;  %v12373_v31 = vld [vmem:[%s14005_s17 + $0x30] sm:$0xff] }
0x150a   : > { %14024 = vst [vmem:[#allocation63_spill] sm:$0xff] %v12373_v31 }
0x150d   : > { %v5428_v15 = vpop.f32.mrf.mxu1 }
0x150e   : > { %v12346_v50 = vadd.f32 %v12343_v41, %v5428_v15 }
0x1510   : > { %v5482_v47 = vsel %vm1394_vm1, %v12346_v50, -inf }
0x1511   : > { %5483 = vmax.xlane.f32.xlu1 %v5482_v47 }
0x1515   : > { %v5430_v12 = vpop.f32.mrf.mxu1 }
0x1516   : > { %v12354_v21 = vadd.f32 %v12351_v11, %v5430_v12  ;;  %v12381_v12 = vld [vmem:[%s14005_s17 + $0x38] sm:$0xff] }
0x1517   : > { %14025 = vst [vmem:[#allocation64_spill] sm:$0xff] %v12381_v12 }
0x1518   : > { %v5485_v16 = vsel %vm1394_vm1, %v12354_v21, -inf }
0x1519   : > { %5486 = vmax.xlane.f32.xlu2 %v5485_v16  ;;  %5465 = vadd.xlane.f32.xlu1 %v5464_v53 }
0x151d   : > { %v5433_v29 = vpop.f32.mrf.mxu1 }
0x151e   : > { %v12400_v10 = vadd.f32 %v12397_v40, %v5433_v29 }
0x1520   : > { %v5488_v44 = vsel %vm1394_vm1, %v12400_v10, -inf }
0x1521   : > { %5468 = vadd.xlane.f32.xlu2 %v5467_v51 }
0x1525   : > { %v5435_v23 = vpop.f32.mrf.mxu1 }
0x1526   : > { %v12366_v0 = vadd.f32 %v12363_v49, %v5435_v23 }
0x1528   : > { %v5491_v9 = vsel %vm1394_vm1, %v12366_v0, -inf }
0x1529   : > { %5471 = vadd.xlane.f32.xlu2 %v5470_v6  ;;  %5492 = vmax.xlane.f32.xlu1 %v5491_v9  ;;  %v5691_v9 = vpop.xlane.xlu2 %5690 }
0x152d   : > { %v5438_v20 = vpop.f32.mrf.mxu1 }
0x152e   : > { %v12376_v36 = vadd.f32 %v12373_v31, %v5438_v20  ;;  %v12518_v31 = vld [vmem:[%s10591_s13 + $0x160] sm:$0xff] }
0x1530   : > { %v5494_v15 = vsel %vm1394_vm1, %v12376_v36, -inf }
0x1531   : > { %5495 = vmax.xlane.f32.xlu1 %v5494_v15  ;;  %v5695_v15 = vperm.slane %v5691_v9, 0  ;;  %v12402_v9 = vpop.xlane.xlu1 %5453  ;;  %v12414_v52 = vpop.xlane.xlu2 %5456 }
0x1535   : > { %v5440_v47 = vpop.f32.mrf.mxu1 }
0x1536   : > { %v12384_v54 = vadd.f32 %v12381_v12, %v5440_v47  ;;  %v12506_v12 = vld [vmem:[%s10591_s13 + $0x170] sm:$0xff] }
0x1538   : > { %v5497_v16 = vsel %vm1394_vm1, %v12384_v54, -inf }
0x1539   : > { %5498 = vmax.xlane.f32.xlu2 %v5497_v16 }
0x153d   : > { %v12388_v53 = vpop.f32.mrf.mxu1 }
0x1545   : > { %v5932_v51 = vpop.f32.mrf.mxu1 }
0x154d   : > { %v5935_v23 = vpop.f32.mrf.mxu1 }
0x1555   : > { %v5937_v6 = vpop.f32.mrf.mxu1 }
0x155d   : > { %v5940_v20 = vpop.f32.mrf.mxu1 }
0x1560   : > { %v5694_v61 = vpop.xlane.xlu0 %5693 }
0x1561   : > { %v5696_v8 = vmax.f32 %v5694_v61, %v5695_v15  ;;  %v9750_v61 = vld [vmem:[%s10594_s19 + $0x7] ss:$0 sm:$0xff] }
0x1563   : > { %v5697_v33 = vsub.f32 %v5685_v62, %v5696_v8  ;;  %v12390_v14 = vsub.f32 %v5695_v15, %v5696_v8 }
0x1565   : > { %v5698_v47 = vmul.f32 1.442695, %v5697_v33  ;;  %v5942_v25 = vpop.f32.mrf.mxu1 }
0x1566   : > { %v5943_v43 = vadd.f32 %v9750_v61, %v5942_v25 }
0x1567   : > { %10031 = vpow2.f32 %v5698_v47 }
0x156d   : > { %v12392_v59 = vpop.eup %10031  ;;  %v5945_v16 = vpop.f32.mrf.mxu1 }
0x156e   : > { %v5703_v19 = vsel %vm4354_vm0, %v12392_v59, 0.0  ;;  %v5946_v15 = vadd.f32 %v9750_v61, %v5945_v16  ;;  %v5941_v16 = vadd.f32 %v9750_v61, %v5940_v20 }
0x156f   : > { %5704 = vadd.xlane.f32.xlu0 %v5703_v19 }
0x1574   : > { %v5478_v8 = vpop.xlane.xlu0 %5477 }
0x1575   : > { %v12406_v33 = vmax.f32 %v5478_v8, %v12402_v9  ;;  %v5947_v62 = vpop.f32.mrf.mxu1 }
0x1576   : > { %v5948_v47 = vadd.f32 %v9750_v61, %v5947_v62 }
0x1577   : > { %v5508_v19 = vsub.f32 %v12328_v13, %v12406_v33  ;;  %5489 = vmax.xlane.f32.xlu0 %v5488_v44  ;;  %v6062_v13 = vpack.c.bf16 %v5943_v43, %v5941_v16  ;;  %v5473_v44 = vsel %vm1831_vm12, %v12310_v18, 0.0  ;;  %v5936_v43 = vadd.f32 %v9750_v61, %v5935_v23 }
0x1578   : > { %v6063_v55 = vpack.c.bf16 %v5948_v47, %v5946_v15  ;;  %v5938_v47 = vadd.f32 %v9750_v61, %v5937_v6  ;;  %v14027_v49 = vsub.f32 %v12402_v9, %v12406_v33 }
0x1579   : > { %v5516_v48 = vmul.f32 1.442695, %v5508_v19 }
0x157a   : > { %v12417_v8 = vsel %vm1831_vm12, %v6063_v55, 0  ;;  %v12428_v55 = vsel %vm1831_vm12, %v6062_v13, 0  ;;  %v6061_v16 = vpack.c.bf16 %v5938_v47, %v5936_v43  ;;  %v5540_v11 = vmul.f32 1.442695, %v14027_v49 }
0x157b   : > { %6092 = vmatpush.bf16.xpose.msrb.mxu1 %v12417_v8  ;;  %10033 = vpow2.f32 %v5516_v48  ;;  %v12433_v48 = vpop.xlane.xlu2 %5459 }
0x157c   : > { %v5481_v62 = vpop.xlane.xlu1 %5480  ;;  %v12447_v23 = vsel %vm1831_vm12, %v6061_v16, 0  ;;  %v12453_v47 = vpop.xlane.xlu0 %5462 }
0x157d   : > { %v12421_v45 = vmax.f32 %v5481_v62, %v12414_v52 }
0x157f   : > { %v5509_v15 = vsub.f32 %v12336_v7, %v12421_v45  ;;  %5474 = vadd.xlane.f32.xlu0 %v5473_v44 }
0x1581   : > { %v5518_v25 = vmul.f32 1.442695, %v5509_v15  ;;  %v12430_v19 = vpop.eup %10033  ;;  %v5933_v15 = vadd.f32 %v9750_v61, %v5932_v51 }
0x1582   : > { %v5556_v7 = vsel %vm1394_vm1, %v12430_v19, 0.0 }
0x1583   : > { %10035 = vpow2.f32 %v5518_v25  ;;  %6093 = vmatpush.bf16.xpose.msrb.mxu1 %v12428_v55 }
0x1584   : > { %v5484_v20 = vpop.xlane.xlu1 %5483 }
0x1585   : > { %v12436_v18 = vmax.f32 %v5484_v20, %v12433_v48 }
0x1587   : > { %v5510_v6 = vsub.f32 %v12346_v50, %v12436_v18  ;;  %5557 = vadd.xlane.f32.xlu0 %v5556_v7  ;;  %v5931_v50 = vadd.f32 %v9750_v61, %v12388_v53 }
0x1589   : > { %v12444_v13 = vpop.eup %10035  ;;  %v5520_v44 = vmul.f32 1.442695, %v5510_v6  ;;  %v6060_v7 = vpack.c.bf16 %v5933_v15, %v5931_v50 }
0x158a   : > { %v5559_v25 = vsel %vm1394_vm1, %v12444_v13, 0.0 }
0x158b   : > { %10037 = vpow2.f32 %v5520_v44  ;;  %6094 = vmatpush.bf16.xpose.msrb.mxu1 %v12447_v23  ;;  %5560 = vadd.xlane.f32.xlu1 %v5559_v25  ;;  %v12463_v44 = vsel %vm1831_vm12, %v6060_v7, 0 }
0x158c   : > { %v5487_v43 = vpop.xlane.xlu2 %5486  ;;  %v12468_v53 = vpop.xlane.xlu1 %5465 }
0x158d   : > { %v12456_v20 = vmax.f32 %v5487_v43, %v12453_v47 }
0x158f   : > { %v5511_v51 = vsub.f32 %v12354_v21, %v12456_v20 }
0x1591   : > { %v12460_v16 = vpop.eup %10037  ;;  %v5522_v6 = vmul.f32 1.442695, %v5511_v51 }
0x1592   : > { %v5562_v25 = vsel %vm1394_vm1, %v12460_v16, 0.0 }
0x1593   : > { %10039 = vpow2.f32 %v5522_v6  ;;  %6095 = vmatpush.bf16.xpose.msrb.mxu1 %v12463_v44  ;;  %5563 = vadd.xlane.f32.xlu2 %v5562_v25 }
0x1594   : > { %v12472_v15 = vpop.xlane.xlu2 %5468 }
0x1599   : > { %v12470_v61 = vpop.eup %10039 }
0x159a   : > { %v5565_v21 = vsel %vm1394_vm1, %v12470_v61, 0.0 }
0x159b   : > { %5566 = vadd.xlane.f32.xlu0 %v5565_v21 }
0x159c   : > { %v5493_v50 = vpop.xlane.xlu1 %5492  ;;  %v12483_v25 = vpop.xlane.xlu2 %5471 }
0x159d   : > { %v12477_v43 = vmax.f32 %v5493_v50, %v12472_v15  ;;  %v12502_v50 = vld [vmem:[%s10591_s13 + $0x178] sm:$0xff] }
0x159e   : > { %5992 = vmatpush.bf16.msra.mxu2 %v12502_v50 }
0x159f   : > { %v5513_v7 = vsub.f32 %v12366_v0, %v12477_v43 }
0x15a1   : > { %v5526_v6 = vmul.f32 1.442695, %v5513_v7 }
0x15a2   : > { %5993 = vmatpush.bf16.msra.mxu2 %v12506_v12 }
0x15a3   : > { %10041 = vpow2.f32 %v5526_v6 }
0x15a4   : > { %v5496_v62 = vpop.xlane.xlu1 %5495 }
0x15a5   : > { %v12486_v29 = vmax.f32 %v5496_v62, %v12483_v25 }
0x15a7   : > { %v5514_v21 = vsub.f32 %v12376_v36, %v12486_v29  ;;  %v5701_v36 = vmul.f32 1.442695, %v12390_v14 }
0x15a9   : > { %v12492_v0 = vpop.eup %10041  ;;  %v5528_v46 = vmul.f32 1.442695, %v5514_v21 }
0x15aa   : > { %v5571_v7 = vsel %vm1394_vm1, %v12492_v0, 0.0 }
0x15ab   : > { %10043 = vpow2.f32 %v5528_v46  ;;  %5572 = vadd.xlane.f32.xlu2 %v5571_v7  ;;  %v12510_v46 = vld [vmem:[%s10591_s13 + $0x168] sm:$0xff] }
0x15ac   : > { %10045 = vpow2.f32 %v5701_v36  ;;  %5994 = vmatpush.bf16.msra.mxu2 %v12510_v46 }
0x15b0   : > { %5995 = vmatpush.bf16.msra.mxu2 %v12518_v31 }
0x15b1   : > { %v12496_v6 = vpop.eup %10043 }
0x15b2   : > { %v5574_v62 = vsel %vm1394_vm1, %v12496_v6, 0.0  ;;  %v10046_v51 = vpop.eup %10045 }
0x15b3   : > { %5575 = vadd.xlane.f32.xlu0 %v5574_v62 }
0x15e2   : > { %v5705_v21 = vpop.xlane.xlu0 %5704 }
0x15e3   : > { %v5706_v2 = vadd.f32 %v10046_v51, %v5705_v21 }
0x15e5   : > { %10047 = vrcp.f32 %v5706_v2 }
0x15ea   : > { %v5490_v7 = vpop.xlane.xlu0 %5489 }
0x15eb   : > { %v10048_v14 = vpop.eup %10047  ;;  %v12514_v62 = vmax.f32 %v5490_v7, %v12468_v53  ;;  %v5533_v7 = vsub.f32 %v12414_v52, %v12421_v45 }
0x15ec   : > { %v5708_v36 = vmul.f32 %v10048_v14, %v12392_v59  ;;  %v12520_v40 = vmul.f32 %v10048_v14, %v10046_v51  ;;  %v5499_v59 = vpop.xlane.xlu2 %5498 }
0x15ed   : > { %v5512_v2 = vsub.f32 %v12400_v10, %v12514_v62  ;;  %v5542_v10 = vmul.f32 1.442695, %v5533_v7 }
0x15ee   : > { %v5709_v21 = vpack.c.bf16 %v5708_v36, %v5708_v36 }
0x15ef   : > { %v5524_v41 = vmul.f32 1.442695, %v5512_v2 }
0x15f0   : > { %9221 = vmatmul.msk.bf16.vlgmr.msra.gmra.mxu0 %vm1394_vm1, %v5709_v21 }
0x15f1   : > { %10049 = vpow2.f32 %v5524_v41 }
0x15f2   : > { %v12531_v51 = vpop.xlane.xlu0 %5474  ;;  %10051 = vpow2.f32 %v5540_v11  ;;  %v14028_v11 = vsub.f32 %v12433_v48, %v12436_v18 }
0x15f3   : > { %v12534_v14 = vmax.f32 %v5499_v59, %v12531_v51  ;;  %10053 = vpow2.f32 %v5542_v10  ;;  %v5535_v10 = vsub.f32 %v12453_v47, %v12456_v20 }
0x15f4   : > { %v5544_v21 = vmul.f32 1.442695, %v14028_v11 }
0x15f5   : > { %v5515_v36 = vsub.f32 %v12384_v54, %v12534_v14 }
0x15f7   : > { %v12540_v9 = vpop.eup %10049  ;;  %v5530_v52 = vmul.f32 1.442695, %v5515_v36 }
0x15f8   : > { %v5568_v45 = vsel %vm1394_vm1, %v12540_v9, 0.0  ;;  %v10052_v41 = vpop.eup %10051 }
0x15f9   : > { %10055 = vpow2.f32 %v5530_v52  ;;  %5569 = vadd.xlane.f32.xlu1 %v5568_v45  ;;  %v10054_v54 = vpop.eup %10053  ;;  %v5546_v45 = vmul.f32 1.442695, %v5535_v10 }
0x15fa   : > { %v5558_v33 = vpop.xlane.xlu0 %5557 }
0x15fb   : > { %v5580_v2 = vadd.f32 %v10052_v41, %v5558_v33 }
0x15fd   : > { %10057 = vrcp.f32 %v5580_v2 }
0x15fe   : > { %v5561_v7 = vpop.xlane.xlu1 %5560  ;;  %10059 = vpow2.f32 %v5544_v21 }
0x15ff   : > { %v12547_v59 = vpop.eup %10055  ;;  %v5581_v49 = vadd.f32 %v10054_v54, %v5561_v7 }
0x1600   : > { %v5577_v36 = vsel %vm1394_vm1, %v12547_v59, 0.0 }
0x1601   : > { %10061 = vrcp.f32 %v5581_v49  ;;  %5578 = vadd.xlane.f32.xlu1 %v5577_v36 }
0x1602   : > { %10063 = vpow2.f32 %v5546_v45 }
0x1603   : > { %v10058_v52 = vpop.eup %10057 }
0x1604   : > { %v12553_v33 = vmul.f32 %v10058_v52, %v10052_v41  ;;  %v10060_v48 = vpop.eup %10059  ;;  %v5596_v7 = vmul.f32 %v10058_v52, %v12430_v19  ;;  %v14029_v19 = vsub.f32 %v12472_v15, %v12477_v43 }
0x1606   : > { %v5564_v18 = vpop.xlane.xlu2 %5563  ;;  %v5550_v52 = vmul.f32 1.442695, %v14029_v19 }
0x1607   : > { %v10062_v2 = vpop.eup %10061  ;;  %v5582_v11 = vadd.f32 %v10060_v48, %v5564_v18 }
0x1608   : > { %v5597_v21 = vmul.f32 %v10062_v2, %v12444_v13  ;;  %v12557_v22 = vmul.f32 %v10062_v2, %v10054_v54  ;;  %v10064_v20 = vpop.eup %10063 }
0x1609   : > { %10065 = vrcp.f32 %v5582_v11 }
0x160a   : > { %v5608_v47 = vpack.c.bf16 %v5597_v21, %v5596_v7  ;;  %v5536_v21 = vsub.f32 %v12468_v53, %v12514_v62  ;;  %v14031_v53 = vsub.f32 %v12531_v51, %v12534_v14 }
0x160c   : > { %9216 = vmatmul.msk.bf16.vlgmr.msrb.gmra.mxu2 %vm1394_vm1, %v5608_v47  ;;  %v9578_v47 = vld [vmem:[%s10597_s25 + $0x10] sm:$0xff]  ;;  %v5554_v62 = vmul.f32 1.442695, %v14031_v53 }
0x160d   : > { %6353 = vmatpush.bf16.xpose.msrb.mxu2 %v12417_v8  ;;  %5809 = vmatpush.bf16.msrb.mxu3 %v9578_v47 }
0x160e   : > { %v5567_v49 = vpop.xlane.xlu0 %5566  ;;  %5768 = vmatpush.bf16.msrb.mxu0 %v9578_v47 }
0x160f   : > { %v10066_v41 = vpop.eup %10065  ;;  %v5583_v10 = vadd.f32 %v10064_v20, %v5567_v49  ;;  %v9188_v49 = vld [vmem:[%s10594_s19 + $0xa] sm:$0x1] }
0x1610   : > { %v12561_v36 = vmul.f32 %v10066_v41, %v10060_v48  ;;  %v5598_v54 = vmul.f32 %v10066_v41, %v12460_v16  ;;  %v14030_v48 = vsub.f32 %v12483_v25, %v12486_v29  ;;  %v9581_v41 = vld [vmem:[%s10591_s13 + $0x70] sm:$0xff] }
0x1611   : > { %10067 = vrcp.f32 %v5583_v10  ;;  %v5379_v10 = vadd.f32 %v9188_v49, %v12254_v58 }
0x1612   : > { %10069 = vpow2.f32 %v5550_v52  ;;  %v5552_v2 = vmul.f32 1.442695, %v14030_v48  ;;  %v9580_v52 = vld [vmem:[%s10591_s13 + $0x68] sm:$0xff] }
0x1613   : > { %v12588_v19 = vperm.slane %v5379_v10, 0 }
0x1614   : > { %10071 = vpow2.f32 %v5552_v2 }
0x1615   : > { %6354 = vmatpush.bf16.xpose.msrb.mxu2 %v12428_v55 }
0x1617   : > { %v10068_v13 = vpop.eup %10067 }
0x1618   : > { %v5599_v45 = vmul.f32 %v10068_v13, %v12470_v61  ;;  %v12569_v8 = vmul.f32 %v10068_v13, %v10064_v20  ;;  %v10070_v15 = vpop.eup %10069  ;;  %v9582_v20 = vld [vmem:[%s10591_s13 + $0x78] sm:$0xff] }
0x1619   : > { %5858 = vmatpush.bf16.msra.mxu3 %v9582_v20  ;;  %6021 = vmatpush.bf16.msra.mxu0 %v9582_v20 }
0x161a   : > { %v5609_v18 = vpack.c.bf16 %v5599_v45, %v5598_v54  ;;  %v10072_v16 = vpop.eup %10071  ;;  %v5711_v45 = vmul.f32 %v12520_v40, %v12588_v19 }
0x161c   : > { %9217 = vmatmul.msk.bf16.gmra.mxu2 %vm1394_vm1, %v5609_v18  ;;  %v9579_v18 = vld [vmem:[%s10591_s13 + $0x60] sm:$0xff] }
0x161d   : > { %6355 = vmatpush.bf16.xpose.msrb.mxu2 %v12447_v23  ;;  %5859 = vmatpush.bf16.msra.mxu3 %v9581_v41 }
0x161e   : > { %v5573_v55 = vpop.xlane.xlu2 %5572  ;;  %6022 = vmatpush.bf16.msra.mxu0 %v9581_v41 }
0x161f   : > { %v5585_v43 = vadd.f32 %v10070_v15, %v5573_v55 }
0x1621   : > { %10073 = vrcp.f32 %v5585_v43  ;;  %5860 = vmatpush.bf16.msra.mxu3 %v9580_v52 }
0x1622   : > { %6023 = vmatpush.bf16.msra.mxu0 %v9580_v52 }
0x1625   : > { %6356 = vmatpush.bf16.xpose.msrb.mxu2 %v12463_v44  ;;  %v5548_v44 = vmul.f32 1.442695, %v5536_v21  ;;  %5861 = vmatpush.bf16.msra.mxu3 %v9579_v18 }
0x1626   : > { %v5576_v61 = vpop.xlane.xlu0 %5575  ;;  %6024 = vmatpush.bf16.msra.mxu0 %v9579_v18 }
0x1627   : > { %v10074_v11 = vpop.eup %10073  ;;  %v5586_v29 = vadd.f32 %v10072_v16, %v5576_v61 }
0x1628   : > { %v12577_v25 = vmul.f32 %v10074_v11, %v10070_v15  ;;  %v5601_v21 = vmul.f32 %v10074_v11, %v12492_v0 }
0x1629   : > { %10075 = vrcp.f32 %v5586_v29 }
0x162a   : > { %10077 = vpow2.f32 %v5548_v44 }
0x162b   : > { %10079 = vpow2.f32 %v5554_v62 }
0x162f   : > { %v10076_v7 = vpop.eup %10075 }
0x1630   : > { %v12579_v23 = vmul.f32 %v10076_v7, %v10072_v16  ;;  %v10078_v13 = vpop.eup %10077  ;;  %v5602_v52 = vmul.f32 %v10076_v7, %v12496_v6  ;;  %v5621_v6 = vmul.f32 %v12588_v19, %v12553_v33 }
0x1631   : > { %v10080_v55 = vpop.eup %10079 }
0x166c   : > { %v5570_v54 = vpop.xlane.xlu1 %5569 }
0x166d   : > { %v5584_v48 = vadd.f32 %v10078_v13, %v5570_v54  ;;  %v5724_v58 = vpop.f32.mrf.mxu0 }
0x166e   : > { %v5725_v2 = vadd.f32 %v5724_v58, %v5711_v45 }
0x166f   : > { %10081 = vrcp.f32 %v5584_v48 }
0x1670   : > { %v5728_v15 = vsel %vm4391_vm2, %v5725_v2, 0.0 }
0x1671   : > { %v5729_v51 = vrot.slane %v5728_v15, 4 }
0x1673   : > { %v5730_v14 = vadd.f32 %v5729_v51, %v5728_v15 }
0x1674   : > { %v5579_v43 = vpop.xlane.xlu1 %5578 }
0x1675   : > { %v10082_v16 = vpop.eup %10081  ;;  %v5731_v61 = vrot.slane %v5730_v14, 2  ;;  %v5587_v29 = vadd.f32 %v10080_v55, %v5579_v43  ;;  %v5726_v40 = vpop.f32.mrf.mxu0  ;;  %v5090_v43 = vadd.f32 %v12211_v27, %v12257_v57 }
0x1676   : > { %v5600_v47 = vmul.f32 %v10082_v16, %v12540_v9  ;;  %v5616_v20 = vmul.f32 %v10082_v16, %v10078_v13 }
0x1677   : > { %v5732_v44 = vadd.f32 %v5731_v61, %v5730_v14  ;;  %10083 = vrcp.f32 %v5587_v29  ;;  %v9751_v61 = vld [vmem:[%s10594_s19 + $0x3] ss:$0 sm:$0xff] }
0x1678   : > { %v5610_v49 = vpack.c.bf16 %v5601_v21, %v5600_v47 }
0x1679   : > { %v5733_v41 = vrot.slane %v5732_v44, 1 }
0x167a   : > { %9218 = vmatmul.msk.bf16.gmra.mxu2 %vm1394_vm1, %v5610_v49  ;;  %v5095_v49 = vadd.f32 %v12219_v38, %v12263_v60 }
0x167b   : > { %v5734_v10 = vadd.f32 %v5733_v41, %v5732_v44 }
0x167d   : > { %v10084_v53 = vpop.eup %10083  ;;  %v5735_v62 = vmul.f32 %v5734_v10, %v12161_v56 }
0x167e   : > { %v5603_v54 = vmul.f32 %v10084_v53, %v12547_v59  ;;  %v5619_v45 = vmul.f32 %v10084_v53, %v10080_v55  ;;  %v5622_v59 = vmul.f32 %v12588_v19, %v12557_v22  ;;  %v5623_v22 = vmul.f32 %v12588_v19, %v12561_v36 }
0x167f   : > { %v5798_v18 = vpack.c.bf16 %v5735_v62, %v5735_v62  ;;  %v5626_v36 = vmul.f32 %v12588_v19, %v12577_v25 }
0x1680   : > { %v5611_v0 = vpack.c.bf16 %v5603_v54, %v5602_v52  ;;  %v5628_v51 = vmul.f32 %v12588_v19, %v5619_v45 }
0x1681   : > { %9232 = vmatmul.msk.bf16.vlgmr.msrb.gmra.mxu3 %vm1831_vm12, %v5798_v18 }
0x1682   : > { %6047 = vmatpush.bf16.msrb.mxu3 %v12502_v50 }
0x1686   : > { %6048 = vmatpush.bf16.msrb.mxu3 %v12506_v12 }
0x168a   : > { %9219 = vmatmul.msk.bf16.gmra.mxu2 %vm1394_vm1, %v5611_v0  ;;  %6049 = vmatpush.bf16.msrb.mxu3 %v12510_v46  ;;  %v5624_v46 = vmul.f32 %v12588_v19, %v12569_v8 }
0x168e   : > { %6050 = vmatpush.bf16.msrb.mxu3 %v12518_v31 }
0x168f   : > { %v5650_v9 = vpop.f32.mrf.mxu2 }
0x1690   : > { %v5651_v50 = vadd.f32 %v5650_v9, %v5621_v6 }
0x1691   : > { %9258 = vmatmul.msk.bf16.vlgmr.msra.gmra.mxu3 %vm1394_vm1, %v11412_v34 }
0x1697   : > { %v5652_v11 = vpop.f32.mrf.mxu2 }
0x1698   : > { %v5653_v7 = vadd.f32 %v5652_v11, %v5622_v59 }
0x169a   : > { %v5739_v12 = vpack.c.bf16 %v5653_v7, %v5651_v50  ;;  %9316 = vmatmul.msk.bf16.vlgmr.msra.gmra.mxu2 %vm1394_vm1, %v11412_v34 }
0x169c   : > { %9228 = vmatmul.msk.bf16.vlgmr.msrb.gmra.mxu0 %vm1831_vm12, %v5739_v12 }
0x169d   : > { %6034 = vmatpush.bf16.msrb.mxu0 %v12288_v5 }
0x169f   : > { %v5655_v31 = vpop.f32.mrf.mxu2 }
0x16a0   : > { %v5656_v34 = vadd.f32 %v5655_v31, %v5623_v22 }
0x16a1   : > { %9259 = vmatmul.msk.bf16.gmra.mxu3 %vm1394_vm1, %v11433_v4  ;;  %6035 = vmatpush.bf16.msrb.mxu0 %v12292_v30 }
0x16a5   : > { %6036 = vmatpush.bf16.msrb.mxu0 %v12298_v37  ;;  %v5625_v37 = vmul.f32 %v12588_v19, %v5616_v20 }
0x16a7   : > { %v5657_v33 = vpop.f32.mrf.mxu2 }
0x16a8   : > { %v5658_v13 = vadd.f32 %v5657_v33, %v5624_v46  ;;  %v9752_v46 = vld [vmem:[%s10594_s19 + $0xb] ss:$0 sm:$0xff] }
0x16a9   : > { %6037 = vmatpush.bf16.msrb.mxu0 %v12302_v24 }
0x16aa   : > { %v5740_v5 = vpack.c.bf16 %v5658_v13, %v5656_v34  ;;  %9317 = vmatmul.msk.bf16.gmra.mxu2 %vm1394_vm1, %v11433_v4  ;;  %v5139_v4 = vadd.f32 %v12224_v26, %v12268_v1  ;;  %v5627_v26 = vmul.f32 %v12588_v19, %v12579_v23 }
0x16ac   : > { %9229 = vmatmul.msk.bf16.gmra.mxu0 %vm1831_vm12, %v5740_v5 }
0x16b1   : > { %9260 = vmatmul.msk.bf16.gmra.mxu3 %vm1394_vm1, %v11448_v32 }
0x16ba   : > { %9318 = vmatmul.msk.bf16.gmra.mxu2 %vm1394_vm1, %v11448_v32 }
0x16c1   : > { %9261 = vmatmul.msk.bf16.gmra.mxu3 %vm1394_vm1, %v11465_v63 }
0x16ca   : > { %9319 = vmatmul.msk.bf16.gmra.mxu2 %vm1394_vm1, %v11465_v63 }
0x16d1   : > { %9322 = vmatmul.msk.bf16.vlgmr.msrb.gmra.mxu3 %vm1394_vm1, %v11476_v35 }
0x16fd   : > { %v5660_v30 = vpop.f32.mrf.mxu2 }
0x16fe   : > { %v5661_v48 = vadd.f32 %v5660_v30, %v5625_v37 }
0x1704   : > { %v5811_v24 = vpop.f32.mrf.mxu3 }
0x1705   : > { %v12647_v32 = vadd.f32 %v5811_v24, %v5139_v4  ;;  %v5662_v8 = vpop.f32.mrf.mxu2 }
0x1706   : > { %v5663_v58 = vadd.f32 %v5662_v8, %v5626_v36 }
0x1708   : > { %v5741_v63 = vpack.c.bf16 %v5663_v58, %v5661_v48 }
0x170a   : > { %9230 = vmatmul.msk.bf16.gmra.mxu0 %vm1831_vm12, %v5741_v63 }
0x170c   : > { %v5813_v2 = vpop.f32.mrf.mxu3 }
0x170d   : > { %v5665_v15 = vpop.f32.mrf.mxu2 }
0x170e   : > { %v5666_v55 = vadd.f32 %v5665_v15, %v5627_v26 }
0x1714   : > { %v5863_v1 = vpop.f32.mrf.mxu3 }
0x1715   : > { %v5667_v14 = vpop.f32.mrf.mxu2  ;;  %v12659_v47 = vadd.f32 %v9751_v61, %v5863_v1  ;;  %v5100_v1 = vadd.f32 %v12228_v42, %v12271_v39  ;;  %v9241_v39 = vld [vmem:[%s10594_s19 + $0x3] sm:$0x1] }
0x1716   : > { %v5668_v25 = vadd.f32 %v5667_v14, %v5628_v51 }
0x1718   : > { %v5742_v16 = vpack.c.bf16 %v5668_v25, %v5666_v55  ;;  %v5105_v25 = vadd.f32 %v12236_v17, %v12277_v3 }
0x1719   : > { %v5770_v29 = vpop.f32.mrf.mxu0 }
0x171a   : > { %v12656_v40 = vadd.f32 %v5770_v29, %v5090_v43  ;;  %9231 = vmatmul.msk.bf16.gmra.mxu0 %vm1831_vm12, %v5742_v16 }
0x171c   : > { %v5865_v21 = vpop.f32.mrf.mxu3 }
0x171d   : > { %v12661_v23 = vadd.f32 %v9751_v61, %v5865_v21  ;;  %v5997_v20 = vpop.f32.mrf.mxu2 }
0x171e   : > { %v5998_v2 = vadd.f32 %v9752_v46, %v5997_v20 }
0x171f   : > { %v6056_v19 = vpack.c.bf16 %v12661_v23, %v12659_v47 }
0x1721   : > { %9323 = vmatmul.msk.bf16.vlgmr.msrb.gmra.mxu1 %vm1831_vm12, %v6056_v19  ;;  %v12666_v44 = vpop.f32.mrf.mxu0 }
0x1724   : > { %v5868_v27 = vpop.f32.mrf.mxu3 }
0x1725   : > { %v5999_v57 = vpop.f32.mrf.mxu2  ;;  %v12674_v62 = vadd.f32 %v9751_v61, %v5868_v27 }
0x1726   : > { %v6000_v58 = vadd.f32 %v9752_v46, %v5999_v57 }
0x1728   : > { %v6278_v15 = vpack.c.bf16 %v6000_v58, %v5998_v2  ;;  %v14036_v58 = vld [vmem:[#allocation65_spill] sm:$0xff]  ;;  %v14037_v2 = vld [vmem:[#allocation63_spill] sm:$0xff] }
0x1729   : > { %v5775_v41 = vpop.f32.mrf.mxu0 }
0x172a   : > { %v12670_v10 = vadd.f32 %v5775_v41, %v5095_v49  ;;  %9320 = vmatmul.msk.bf16.vlgmr.msra.gmra.mxu0 %vm1394_vm1, %v11476_v35  ;;  %v9270_v41 = vld [vmem:[%s10594_s19 + $0x7] sm:$0x1] }
0x172c   : > { %v5870_v53 = vpop.f32.mrf.mxu3 }
0x172d   : > { %v12676_v52 = vadd.f32 %v9751_v61, %v5870_v53  ;;  %v6002_v54 = vpop.f32.mrf.mxu2 }
0x172e   : > { %v6003_v48 = vadd.f32 %v9752_v46, %v6002_v54 }
0x172f   : > { %v6057_v45 = vpack.c.bf16 %v12676_v52, %v12674_v62 }
0x1731   : > { %9324 = vmatmul.msk.bf16.gmra.mxu1 %vm1831_vm12, %v6057_v45  ;;  %v12700_v26 = vpop.f32.mrf.mxu0 }
0x1734   : > { %v5873_v18 = vpop.f32.mrf.mxu3 }
0x1735   : > { %v6004_v0 = vpop.f32.mrf.mxu2  ;;  %v12683_v60 = vadd.f32 %v9751_v61, %v5873_v18 }
0x1736   : > { %v6005_v24 = vadd.f32 %v9752_v46, %v6004_v0 }
0x1738   : > { %v6279_v63 = vpack.c.bf16 %v6005_v24, %v6003_v48 }
0x173a   : > { %9321 = vmatmul.msk.bf16.vlgmr.msrb.gmra.mxu0 %vm1394_vm1, %v11476_v35 }
0x173c   : > { %v5875_v38 = vpop.f32.mrf.mxu3 }
0x173d   : > { %v12685_v9 = vadd.f32 %v9751_v61, %v5875_v38  ;;  %v6007_v6 = vpop.f32.mrf.mxu2 }
0x173e   : > { %v6008_v37 = vadd.f32 %v9752_v46, %v6007_v6 }
0x173f   : > { %v6058_v59 = vpack.c.bf16 %v12685_v9, %v12683_v60 }
0x1741   : > { %9325 = vmatmul.msk.bf16.gmra.mxu1 %vm1831_vm12, %v6058_v59 }
0x1744   : > { %v5878_v11 = vpop.f32.mrf.mxu3 }
0x1745   : > { %v6009_v50 = vpop.f32.mrf.mxu2  ;;  %v12690_v12 = vadd.f32 %v9751_v61, %v5878_v11 }
0x1746   : > { %v6010_v30 = vadd.f32 %v9752_v46, %v6009_v50 }
0x1748   : > { %v6280_v36 = vpack.c.bf16 %v6010_v30, %v6008_v37 }
0x174c   : > { %v5880_v7 = vpop.f32.mrf.mxu3 }
0x174d   : > { %v12692_v31 = vadd.f32 %v9751_v61, %v5880_v7  ;;  %v6012_v22 = vpop.f32.mrf.mxu2 }
0x174e   : > { %v6013_v13 = vadd.f32 %v9752_v46, %v6012_v22 }
0x174f   : > { %v6059_v35 = vpack.c.bf16 %v12692_v31, %v12690_v12 }
0x1751   : > { %9326 = vmatmul.msk.bf16.gmra.mxu1 %vm1831_vm12, %v6059_v35 }
0x1754   : > { %v12698_v33 = vpop.f32.mrf.mxu3 }
0x1755   : > { %v6014_v34 = vpop.f32.mrf.mxu2 }
0x1756   : > { %v6015_v5 = vadd.f32 %v9752_v46, %v6014_v34 }
0x1758   : > { %v6281_v4 = vpack.c.bf16 %v6015_v5, %v6013_v13  ;;  %v14033_v5 = vld [vmem:[#allocation61_spill] sm:$0xff] }
0x175a   : > { %6319 = vmatpush.bf16.msra.mxu0 %v6281_v4  ;;  %6393 = vmatpush.bf16.msra.mxu3 %v6281_v4  ;;  %v14034_v4 = vld [vmem:[#allocation62_spill] sm:$0xff] }
0x175c   : > { %v6054_v8 = vpop.f32.mrf.mxu3 }
0x175e   : > { %6320 = vmatpush.bf16.msra.mxu0 %v6280_v36  ;;  %6394 = vmatpush.bf16.msra.mxu3 %v6280_v36 }
0x1762   : > { %6321 = vmatpush.bf16.msra.mxu0 %v6279_v63  ;;  %6395 = vmatpush.bf16.msra.mxu3 %v6279_v63 }
0x1766   : > { %6322 = vmatpush.bf16.msra.mxu0 %v6278_v15  ;;  %6396 = vmatpush.bf16.msra.mxu3 %v6278_v15 }
0x1787   : > { %v5780_v51 = vpop.f32.mrf.mxu0 }
0x1788   : > { %v12704_v14 = vadd.f32 %v5780_v51, %v5100_v1 }
0x178f   : > { %v12706_v55 = vpop.f32.mrf.mxu0 }
0x1797   : > { %v5785_v43 = vpop.f32.mrf.mxu0 }
0x1798   : > { %v12710_v16 = vadd.f32 %v5785_v43, %v5105_v25 }
0x179e   : > { %v6097_v61 = vpop.f32.mrf.mxu1 }
0x179f   : > { %v12713_v29 = vadd.f32 %v12325_v28, %v6097_v61  ;;  %v12715_v21 = vpop.f32.mrf.mxu0 }
0x17a1   : > { %v6150_v42 = vsel %vm1394_vm1, %v12713_v29, -inf }
0x17a2   : > { %6151 = vmax.xlane.f32.xlu1 %v6150_v42 }
0x17a6   : > { %v6099_v20 = vpop.f32.mrf.mxu1 }
0x17a7   : > { %v6026_v19 = vpop.f32.mrf.mxu0 }
0x17a8   : > { %v6027_v27 = vadd.f32 %v9241_v39, %v6026_v19  ;;  %v14038_v19 = vld [vmem:[#allocation64_spill] sm:$0xff] }
0x17aa   : > { %v6344_v57 = vperm.slane %v6027_v27, 0 }
0x17ac   : > { %v6345_v17 = vpack.c.bf16 %v6344_v57, %v6344_v57 }
0x17ae   : > { %v6102_v3 = vpop.f32.mrf.mxu1  ;;  %9331 = vmatmul.msk.bf16.vlgmr.msrb.gmra.mxu2 %vm1831_vm12, %v6345_v17 }
0x17af   : > { %v6028_v49 = vpop.f32.mrf.mxu0 }
0x17b6   : > { %v6104_v53 = vpop.f32.mrf.mxu1 }
0x17b7   : > { %v6039_v28 = vpop.f32.mrf.mxu0  ;;  %v12735_v30 = vadd.f32 %v14033_v5, %v6104_v53 }
0x17b8   : > { %v6040_v54 = vadd.f32 %v9270_v41, %v6039_v28 }
0x17b9   : > { %v6159_v36 = vsel %vm1394_vm1, %v12735_v30, -inf }
0x17ba   : > { %v6117_v45 = vperm.slane %v6040_v54, 0 }
0x17bc   : > { %v6121_v18 = vmul.f32 %v6117_v45, %v12676_v52  ;;  %v6119_v0 = vmul.f32 %v6117_v45, %v12661_v23  ;;  %v6118_v38 = vmul.f32 %v6117_v45, %v12659_v47  ;;  %v6122_v22 = vmul.f32 %v6117_v45, %v12683_v60  ;;  %v14032_v52 = vld [vmem:[#allocation59_spill] sm:$0xff]  ;;  %v14035_v60 = vld [vmem:[#allocation60_spill] sm:$0xff] }
0x17bd   : > { %v6120_v35 = vmul.f32 %v6117_v45, %v12674_v62  ;;  %v6100_v46 = vadd.f32 %v14032_v52, %v6099_v20  ;;  %v12741_v62 = vadd.f32 %v14035_v60, %v6102_v3  ;;  %v6123_v1 = vmul.f32 %v6117_v45, %v12685_v9 }
0x17be   : > { %v6107_v6 = vpop.f32.mrf.mxu1  ;;  %v6135_v59 = vsel %vm1831_vm12, %v6121_v18, 0.0  ;;  %v6129_v11 = vsel %vm1831_vm12, %v6119_v0, 0.0  ;;  %v6126_v50 = vsel %vm1831_vm12, %v6118_v38, 0.0  ;;  %v6138_v47 = vsel %vm1831_vm12, %v6122_v22, 0.0 }
0x17bf   : > { %v6041_v7 = vpop.f32.mrf.mxu0  ;;  %6136 = vadd.xlane.f32.xlu1 %v6135_v59  ;;  %6130 = vadd.xlane.f32.xlu0 %v6129_v11  ;;  %v6132_v34 = vsel %vm1831_vm12, %v6120_v35, 0.0  ;;  %v6153_v13 = vsel %vm1394_vm1, %v6100_v46, -inf  ;;  %v6156_v48 = vsel %vm1394_vm1, %v12741_v62, -inf  ;;  %v12750_v63 = vadd.f32 %v14036_v58, %v6107_v6 }
0x17c0   : > { %6127 = vadd.xlane.f32.xlu2 %v6126_v50  ;;  %v6141_v43 = vsel %vm1831_vm12, %v6123_v1, 0.0  ;;  %v6125_v61 = vmul.f32 %v6117_v45, %v12692_v31  ;;  %v6124_v42 = vmul.f32 %v6117_v45, %v12690_v12  ;;  %v6362_v3 = vmul.f32 %v6040_v54, %v6027_v27 }
0x17c1   : > { %v6162_v25 = vsel %vm1394_vm1, %v12750_v63, -inf }
0x17c2   : > { %v6147_v39 = vsel %vm1831_vm12, %v6125_v61, 0.0  ;;  %v6144_v9 = vsel %vm1831_vm12, %v6124_v42, 0.0  ;;  %v6363_v49 = vsel %vm4350_vm15, %v6362_v3, 0.0 }
0x17c6   : > { %v6109_v23 = vpop.f32.mrf.mxu1 }
0x17c7   : > { %6139 = vadd.xlane.f32.xlu1 %v6138_v47  ;;  %6133 = vadd.xlane.f32.xlu0 %v6132_v34  ;;  %v12738_v37 = vadd.f32 %v14034_v4, %v6109_v23  ;;  %v10254_v34 = vld [vmem:[%s14004_s8] sm:$0xf] }
0x17c8   : > { %6154 = vmax.xlane.f32.xlu2 %v6153_v13 }
0x17c9   : > { %v6165_v24 = vsel %vm1394_vm1, %v12738_v37, -inf }
0x17ce   : > { %v6112_v8 = vpop.f32.mrf.mxu1 }
0x17cf   : > { %6166 = vmax.xlane.f32.xlu1 %v6165_v24  ;;  %6160 = vmax.xlane.f32.xlu0 %v6159_v36  ;;  %v12753_v15 = vadd.f32 %v14037_v2, %v6112_v8 }
0x17d0   : > { %6157 = vmax.xlane.f32.xlu2 %v6156_v48 }
0x17d1   : > { %v6168_v51 = vsel %vm1394_vm1, %v12753_v15, -inf }
0x17d6   : > { %v6114_v20 = vpop.f32.mrf.mxu1 }
0x17d7   : > { %6169 = vmax.xlane.f32.xlu1 %v6168_v51  ;;  %6163 = vmax.xlane.f32.xlu0 %v6162_v25  ;;  %v12766_v57 = vadd.f32 %v14038_v19, %v6114_v20 }
0x17d8   : > { %6142 = vadd.xlane.f32.xlu2 %v6141_v43 }
0x17d9   : > { %v6171_v17 = vsel %vm1394_vm1, %v12766_v57, -inf }
0x17df   : > { %6148 = vadd.xlane.f32.xlu0 %v6147_v39 }
0x17e0   : > { %6145 = vadd.xlane.f32.xlu2 %v6144_v9 }
0x17e8   : > { %6172 = vmax.xlane.f32.xlu2 %v6171_v17 }
0x17f0   : > { %6364 = vadd.xlane.f32.xlu2 %v6363_v49 }
0x1815   : > { %v6152_v31 = vpop.xlane.xlu1 %6151 }
0x1831   : > { %v6358_v12 = vpop.f32.mrf.mxu2 }
0x1832   : > { %v12771_v41 = vpop.xlane.xlu0 %6130  ;;  %v12778_v45 = vpop.xlane.xlu1 %6136  ;;  %v12805_v13 = vadd.f32 %v10254_v34, %v6358_v12 }
0x1833   : > { %v12773_v53 = vpop.xlane.xlu2 %6127 }
0x1834   : > { %v12776_v28 = vmax.f32 %v6152_v31, %v12773_v53 }
0x1836   : > { %v6182_v18 = vsub.f32 %v12713_v29, %v12776_v28  ;;  %v6206_v27 = vsub.f32 %v12773_v53, %v12776_v28 }
0x1838   : > { %v6190_v54 = vmul.f32 1.442695, %v6182_v18 }
0x1839   : > { %v6360_v0 = vpop.f32.mrf.mxu2 }
0x183a   : > { %10085 = vpow2.f32 %v6190_v54  ;;  %v12784_v38 = vpop.xlane.xlu0 %6133  ;;  %v12792_v7 = vpop.xlane.xlu1 %6139 }
0x183b   : > { %v6155_v6 = vpop.xlane.xlu2 %6154 }
0x183c   : > { %v12787_v59 = vmax.f32 %v6155_v6, %v12771_v41 }
0x183e   : > { %v6183_v11 = vsub.f32 %v6100_v46, %v12787_v59  ;;  %v6207_v50 = vsub.f32 %v12771_v41, %v12787_v59 }
0x1840   : > { %v12794_v29 = vpop.eup %10085  ;;  %v6192_v22 = vmul.f32 1.442695, %v6183_v11 }
0x1841   : > { %v6230_v35 = vsel %vm1394_vm1, %v12794_v29, 0.0 }
0x1842   : > { %10087 = vpow2.f32 %v6192_v22  ;;  %6231 = vadd.xlane.f32.xlu0 %v6230_v35  ;;  %v6161_v52 = vpop.xlane.xlu0 %6160  ;;  %v6167_v58 = vpop.xlane.xlu1 %6166 }
0x1843   : > { %v12799_v23 = vmax.f32 %v6161_v52, %v12778_v45  ;;  %v6158_v47 = vpop.xlane.xlu2 %6157 }
0x1844   : > { %v12802_v46 = vmax.f32 %v6158_v47, %v12784_v38 }
0x1845   : > { %v6185_v5 = vsub.f32 %v12735_v30, %v12799_v23  ;;  %v6209_v4 = vsub.f32 %v12778_v45, %v12799_v23  ;;  %v6366_v30 = vsel %vm4354_vm0, %v12805_v13, -inf }
0x1846   : > { %v6184_v60 = vsub.f32 %v12741_v62, %v12802_v46  ;;  %v6208_v24 = vsub.f32 %v12784_v38, %v12802_v46 }
0x1847   : > { %v6196_v36 = vmul.f32 1.442695, %v6185_v5 }
0x1848   : > { %v12815_v8 = vpop.eup %10087  ;;  %v6194_v48 = vmul.f32 1.442695, %v6184_v60  ;;  %v6218_v53 = vmul.f32 1.442695, %v6208_v24 }
0x1849   : > { %10089 = vpow2.f32 %v6196_v36  ;;  %v6233_v2 = vsel %vm1394_vm1, %v12815_v8, 0.0 }
0x184a   : > { %6234 = vadd.xlane.f32.xlu1 %v6233_v2  ;;  %6367 = vmax.xlane.f32.xlu0 %v6366_v30  ;;  %v6164_v1 = vpop.xlane.xlu0 %6163  ;;  %10091 = vpow2.f32 %v6194_v48  ;;  %v6170_v49 = vpop.xlane.xlu1 %6169  ;;  %v6214_v48 = vmul.f32 1.442695, %v6206_v27 }
0x184b   : > { %v12822_v62 = vmax.f32 %v6164_v1, %v12792_v7  ;;  %v12824_v51 = vpop.xlane.xlu2 %6142 }
0x184c   : > { %v12827_v25 = vmax.f32 %v6167_v58, %v12824_v51 }
0x184d   : > { %v6186_v43 = vsub.f32 %v12750_v63, %v12822_v62  ;;  %v6210_v61 = vsub.f32 %v12792_v7, %v12822_v62  ;;  %v6220_v62 = vmul.f32 1.442695, %v6209_v4 }
0x184e   : > { %v6187_v42 = vsub.f32 %v12738_v37, %v12827_v25  ;;  %v6211_v39 = vsub.f32 %v12824_v51, %v12827_v25 }
0x184f   : > { %v12837_v9 = vpop.eup %10089  ;;  %v6198_v20 = vmul.f32 1.442695, %v6186_v43  ;;  %v6222_v23 = vmul.f32 1.442695, %v6210_v61 }
0x1850   : > { %v6200_v19 = vmul.f32 1.442695, %v6187_v42  ;;  %v6239_v17 = vsel %vm1394_vm1, %v12837_v9, 0.0  ;;  %v12841_v3 = vpop.eup %10091  ;;  %v6224_v46 = vmul.f32 1.442695, %v6211_v39 }
0x1851   : > { %10093 = vpow2.f32 %v6198_v20  ;;  %6240 = vadd.xlane.f32.xlu2 %v6239_v17  ;;  %v6236_v63 = vsel %vm1394_vm1, %v12841_v3, 0.0 }
0x1852   : > { %10095 = vpow2.f32 %v6200_v19  ;;  %6237 = vadd.xlane.f32.xlu1 %v6236_v63  ;;  %v12862_v22 = vpop.xlane.xlu0 %6148 }
0x1853   : > { %v12845_v37 = vpop.xlane.xlu2 %6145 }
0x1854   : > { %v12848_v31 = vmax.f32 %v6170_v49, %v12845_v37 }
0x1856   : > { %v6188_v12 = vsub.f32 %v12753_v15, %v12848_v31  ;;  %v6212_v18 = vsub.f32 %v12845_v37, %v12848_v31 }
0x1857   : > { %v12854_v54 = vpop.eup %10093 }
0x1858   : > { %v6202_v0 = vmul.f32 1.442695, %v6188_v12  ;;  %v6242_v6 = vsel %vm1394_vm1, %v12854_v54, 0.0  ;;  %v12858_v11 = vpop.eup %10095  ;;  %v6226_v39 = vmul.f32 1.442695, %v6212_v18 }
0x1859   : > { %6243 = vadd.xlane.f32.xlu0 %v6242_v6  ;;  %v6245_v7 = vsel %vm1394_vm1, %v12858_v11, 0.0 }
0x185a   : > { %10097 = vpow2.f32 %v6202_v0  ;;  %6246 = vadd.xlane.f32.xlu1 %v6245_v7 }
0x185b   : > { %v6173_v15 = vpop.xlane.xlu2 %6172 }
0x185c   : > { %v12865_v35 = vmax.f32 %v6173_v15, %v12862_v22 }
0x185e   : > { %v6189_v52 = vsub.f32 %v12766_v57, %v12865_v35  ;;  %v6216_v57 = vmul.f32 1.442695, %v6207_v50  ;;  %v6213_v37 = vsub.f32 %v12862_v22, %v12865_v35 }
0x1860   : > { %v12869_v47 = vpop.eup %10097  ;;  %v6204_v34 = vmul.f32 1.442695, %v6189_v52 }
0x1861   : > { %v6248_v5 = vsel %vm1394_vm1, %v12869_v47, 0.0 }
0x1862   : > { %10099 = vpow2.f32 %v6204_v34  ;;  %6249 = vadd.xlane.f32.xlu2 %v6248_v5 }
0x1863   : > { %10101 = vpow2.f32 %v6214_v48  ;;  %v6365_v1 = vpop.xlane.xlu2 %6364 }
0x1864   : > { %10103 = vpow2.f32 %v6216_v57  ;;  %v6369_v28 = vperm.slane %v6365_v1, 0 }
0x1868   : > { %v12873_v60 = vpop.eup %10099 }
0x1869   : > { %v6251_v36 = vsel %vm1394_vm1, %v12873_v60, 0.0  ;;  %v10102_v58 = vpop.eup %10101 }
0x186a   : > { %6252 = vadd.xlane.f32.xlu0 %v6251_v36  ;;  %v10104_v27 = vpop.eup %10103 }
0x18b5   : > { %v6232_v2 = vpop.xlane.xlu0 %6231 }
0x18b6   : > { %v6254_v30 = vadd.f32 %v10102_v58, %v6232_v2 }
0x18b8   : > { %10105 = vrcp.f32 %v6254_v30  ;;  %v6228_v30 = vmul.f32 1.442695, %v6213_v37 }
0x18b9   : > { %10107 = vpow2.f32 %v6220_v62 }
0x18ba   : > { %10109 = vpow2.f32 %v6218_v53 }
0x18bd   : > { %v6235_v51 = vpop.xlane.xlu1 %6234  ;;  %v6368_v25 = vpop.xlane.xlu0 %6367 }
0x18be   : > { %v10106_v41 = vpop.eup %10105  ;;  %v6255_v59 = vadd.f32 %v10104_v27, %v6235_v51  ;;  %v6370_v50 = vmax.f32 %v6368_v25, %v6369_v28 }
0x18bf   : > { %v12889_v43 = vmul.f32 %v10106_v41, %v10102_v58  ;;  %v10108_v38 = vpop.eup %10107  ;;  %v6270_v63 = vmul.f32 %v10106_v41, %v12794_v29 }
0x18c0   : > { %10111 = vrcp.f32 %v6255_v59  ;;  %v6371_v42 = vsub.f32 %v12805_v13, %v6370_v50  ;;  %v12892_v45 = vsub.f32 %v6369_v28, %v6370_v50  ;;  %v10110_v20 = vpop.eup %10109 }
0x18c2   : > { %v6372_v4 = vmul.f32 1.442695, %v6371_v42 }
0x18c4   : > { %10113 = vpow2.f32 %v6372_v4  ;;  %v6241_v24 = vpop.xlane.xlu2 %6240 }
0x18c5   : > { %v6257_v19 = vadd.f32 %v10108_v38, %v6241_v24  ;;  %10115 = vpow2.f32 %v6222_v23  ;;  %v6238_v49 = vpop.xlane.xlu1 %6237  ;;  %v6375_v24 = vmul.f32 1.442695, %v12892_v45 }
0x18c6   : > { %v10112_v17 = vpop.eup %10111  ;;  %v6256_v0 = vadd.f32 %v10110_v20, %v6238_v49 }
0x18c7   : > { %v6271_v12 = vmul.f32 %v10112_v17, %v12815_v8  ;;  %10117 = vrcp.f32 %v6257_v19  ;;  %v12896_v13 = vmul.f32 %v10112_v17, %v10104_v27 }
0x18c8   : > { %10119 = vpow2.f32 %v6224_v46  ;;  %v9591_v46 = vld [vmem:[%s10597_s25 + $0x18] sm:$0xff] }
0x18c9   : > { %v6282_v61 = vpack.c.bf16 %v6271_v12, %v6270_v63  ;;  %10121 = vrcp.f32 %v6256_v0  ;;  %6442 = vmatpush.bf16.msra.mxu2 %v9591_v46  ;;  %6483 = vmatpush.bf16.msrb.mxu3 %v9591_v46  ;;  %v9299_v63 = vld [vmem:[%s10594_s19 + $0xb] sm:$0x1] }
0x18ca   : > { %v10114_v6 = vpop.eup %10113  ;;  %10123 = vpow2.f32 %v6226_v39 }
0x18cb   : > { %9327 = vmatmul.msk.bf16.vlgmr.msra.gmra.mxu0 %vm1394_vm1, %v6282_v61  ;;  %v6377_v7 = vsel %vm4354_vm0, %v10114_v6, 0.0  ;;  %v10116_v29 = vpop.eup %10115 }
0x18cc   : > { %6378 = vadd.xlane.f32.xlu1 %v6377_v7  ;;  %v6244_v15 = vpop.xlane.xlu0 %6243 }
0x18cd   : > { %v10118_v8 = vpop.eup %10117  ;;  %v6258_v52 = vadd.f32 %v10116_v29, %v6244_v15  ;;  %v6247_v36 = vpop.xlane.xlu1 %6246 }
0x18ce   : > { %v10120_v34 = vpop.eup %10119  ;;  %v6273_v5 = vmul.f32 %v10118_v8, %v12837_v9  ;;  %v12904_v48 = vmul.f32 %v10118_v8, %v10108_v38 }
0x18cf   : > { %v10122_v57 = vpop.eup %10121  ;;  %v6259_v31 = vadd.f32 %v10120_v34, %v6247_v36  ;;  %10125 = vrcp.f32 %v6258_v52 }
0x18d0   : > { %v6272_v18 = vmul.f32 %v10122_v57, %v12841_v3  ;;  %v6288_v58 = vmul.f32 %v10122_v57, %v10110_v20  ;;  %v10124_v1 = vpop.eup %10123 }
0x18d1   : > { %10127 = vrcp.f32 %v6259_v31 }
0x18d2   : > { %v6283_v2 = vpack.c.bf16 %v6273_v5, %v6272_v18  ;;  %10129 = vpow2.f32 %v6228_v30 }
0x18d5   : > { %v10126_v62 = vpop.eup %10125  ;;  %v6250_v53 = vpop.xlane.xlu2 %6249 }
0x18d6   : > { %v6274_v9 = vmul.f32 %v10126_v62, %v12854_v54  ;;  %v6260_v28 = vadd.f32 %v10124_v1, %v6250_v53  ;;  %v6290_v27 = vmul.f32 %v10126_v62, %v10116_v29 }
0x18d7   : > { %v10128_v51 = vpop.eup %10127 }
0x18d8   : > { %v6275_v25 = vmul.f32 %v10128_v51, %v12858_v11  ;;  %10131 = vrcp.f32 %v6260_v28  ;;  %v6291_v22 = vmul.f32 %v10128_v51, %v10120_v34  ;;  %v10130_v3 = vpop.eup %10129 }
0x18da   : > { %v6284_v35 = vpack.c.bf16 %v6275_v25, %v6274_v9 }
0x18db   : > { %9328 = vmatmul.msk.bf16.gmra.mxu0 %vm1394_vm1, %v6283_v2 }
0x18dd   : > { %v6253_v41 = vpop.xlane.xlu0 %6252 }
0x18de   : > { %v10132_v59 = vpop.eup %10131  ;;  %v6261_v50 = vadd.f32 %v10130_v3, %v6253_v41 }
0x18df   : > { %v6292_v42 = vmul.f32 %v10132_v59, %v10124_v1  ;;  %v6276_v54 = vmul.f32 %v10132_v59, %v12869_v47 }
0x18e0   : > { %10133 = vrcp.f32 %v6261_v50 }
0x18e1   : > { %10135 = vpow2.f32 %v6375_v24  ;;  %v14040_v24 = vld [vmem:[#allocation55_spill] sm:$0xff] }
0x18e6   : > { %v10134_v23 = vpop.eup %10133 }
0x18e7   : > { %v6277_v4 = vmul.f32 %v10134_v23, %v12873_v60  ;;  %v6293_v38 = vmul.f32 %v10134_v23, %v10130_v3  ;;  %v10136_v20 = vpop.eup %10135  ;;  %v6053_v60 = vadd.f32 %v9299_v63, %v12698_v33 }
0x18e9   : > { %v6285_v11 = vpack.c.bf16 %v6277_v4, %v6276_v54  ;;  %v6294_v39 = vperm.slane %v6053_v60, 0  ;;  %v12931_v54 = vld [vmem:[%s10601_s14] ss:$0 sm:$0xff] }
0x18eb   : > { %9329 = vmatmul.msk.bf16.gmra.mxu0 %vm1394_vm1, %v6284_v35  ;;  %v6295_v45 = vmul.f32 %v6294_v39, %v12889_v43  ;;  %v6296_v7 = vmul.f32 %v6294_v39, %v12896_v13  ;;  %v6297_v5 = vmul.f32 %v6294_v39, %v6288_v58  ;;  %v6298_v33 = vmul.f32 %v6294_v39, %v12904_v48 }
0x18ec   : > { %v6299_v43 = vmul.f32 %v6294_v39, %v6290_v27  ;;  %v6300_v18 = vmul.f32 %v6294_v39, %v6291_v22  ;;  %v6301_v53 = vmul.f32 %v6294_v39, %v6292_v42  ;;  %v6302_v58 = vmul.f32 %v6294_v39, %v6293_v38  ;;  %v14039_v38 = vld [vmem:[#allocation43_spill] sm:$0xff] }
0x18fb   : > { %9330 = vmatmul.msk.bf16.gmra.mxu0 %vm1394_vm1, %v6285_v11 }
0x193f   : > { %v6379_v19 = vpop.xlane.xlu1 %6378 }
0x1940   : > { %v6380_v17 = vadd.f32 %v10136_v20, %v6379_v19 }
0x1942   : > { %10137 = vrcp.f32 %v6380_v17 }
0x1948   : > { %v10138_v47 = vpop.eup %10137  ;;  %v6324_v49 = vpop.f32.mrf.mxu0 }
0x1949   : > { %v6382_v12 = vmul.f32 %v10138_v47, %v10114_v6  ;;  %v6384_v0 = vmul.f32 %v10138_v47, %v10136_v20  ;;  %v6325_v15 = vadd.f32 %v6324_v49, %v6295_v45  ;;  %v14041_v20 = vld [vmem:[#allocation51_spill] sm:$0xff] }
0x194a   : > { %v5092_v19 = vadd.f32 %v14041_v20, %v14040_v24 }
0x194b   : > { %v6383_v61 = vpack.c.bf16 %v6382_v12, %v6382_v12  ;;  %v6385_v25 = vmul.f32 %v6384_v0, %v6294_v39  ;;  %v14042_v0 = vld [vmem:[#allocation44_spill] sm:$0xff] }
0x194c   : > { %v5791_v47 = vadd.f32 %v12666_v44, %v5092_v19 }
0x194d   : > { %9332 = vmatmul.msk.bf16.vlgmr.msra.gmra.mxu3 %vm1394_vm1, %v6383_v61 }
0x1950   : > { %v6326_v29 = vpop.f32.mrf.mxu0 }
0x1951   : > { %v6327_v8 = vadd.f32 %v6326_v29, %v6296_v7 }
0x1953   : > { %v6413_v52 = vpack.c.bf16 %v6327_v8, %v6325_v15  ;;  %v14043_v15 = vld [vmem:[#allocation45_spill] sm:$0xff]  ;;  %v14044_v8 = vld [vmem:[#allocation56_spill] sm:$0xff] }
0x1955   : > { %9339 = vmatmul.msk.bf16.vlgmr.msra.gmra.mxu2 %vm1831_vm12, %v6413_v52  ;;  %v14045_v52 = vld [vmem:[#allocation52_spill] sm:$0xff] }
0x1958   : > { %v6329_v34 = vpop.f32.mrf.mxu0 }
0x1959   : > { %v6330_v36 = vadd.f32 %v6329_v34, %v6297_v5  ;;  %v5097_v34 = vadd.f32 %v14045_v52, %v14044_v8  ;;  %v6498_v8 = vld [vmem:[%s10601_s14] sm:$0x1]  ;;  %s14059_s14 = sld [smem:[#allocation30_spill]] }
0x195a   : > { %v10255_v52 = vld [vmem:[#allocation2 + $0x40] sm:$0xff] }
0x195f   : > { %p9450_p8 = scmp.ne.s32.totalorder %s14059_s14, 3 }
0x1960   : > { %v6331_v6 = vpop.f32.mrf.mxu0  ;;  %s14061_s19 = sld [smem:[#allocation28_spill]] (!%p9450_p8) }
0x1961   : > { %v6332_v57 = vadd.f32 %v6331_v6, %v6298_v33  ;;  %v5793_v6 = vadd.f32 %v12700_v26, %v5097_v34 }
0x1963   : > { %v6414_v37 = vpack.c.bf16 %v6332_v57, %v6330_v36 }
0x1965   : > { %9340 = vmatmul.msk.bf16.gmra.mxu2 %vm1831_vm12, %v6414_v37 }
0x1968   : > { %v6334_v31 = vpop.f32.mrf.mxu0 }
0x1969   : > { %v6335_v2 = vadd.f32 %v6334_v31, %v6299_v43  ;;  %v14046_v31 = vld [vmem:[#allocation46_spill] sm:$0xff] }
0x1970   : > { %v6336_v13 = vpop.f32.mrf.mxu0 }
0x1971   : > { %v6337_v30 = vadd.f32 %v6336_v13, %v6300_v18 }
0x1973   : > { %v6415_v1 = vpack.c.bf16 %v6337_v30, %v6335_v2  ;;  %v14047_v30 = vld [vmem:[#allocation47_spill] sm:$0xff] }
0x1975   : > { %9341 = vmatmul.msk.bf16.gmra.mxu2 %vm1831_vm12, %v6415_v1 }
0x1978   : > { %v6339_v62 = vpop.f32.mrf.mxu0 }
0x1979   : > { %v6340_v9 = vadd.f32 %v6339_v62, %v6301_v53  ;;  %v14048_v62 = vld [vmem:[#allocation57_spill] sm:$0xff] }
0x197a   : > { %v14049_v53 = vld [vmem:[#allocation53_spill] sm:$0xff] }
0x1980   : > { %v6341_v48 = vpop.f32.mrf.mxu0 }
0x1981   : > { %v6342_v28 = vadd.f32 %v6341_v48, %v6302_v58  ;;  %v5102_v58 = vadd.f32 %v14049_v53, %v14048_v62 }
0x1983   : > { %v6416_v51 = vpack.c.bf16 %v6342_v28, %v6340_v9  ;;  %v5795_v28 = vadd.f32 %v12706_v55, %v5102_v58 }
0x1985   : > { %9342 = vmatmul.msk.bf16.gmra.mxu2 %vm1831_vm12, %v6416_v51 }
0x19d0   : > { %v6398_v35 = vpop.f32.mrf.mxu3 }
0x19d1   : > { %v6399_v27 = vadd.f32 %v6398_v35, %v6385_v25 }
0x19d3   : > { %v6402_v22 = vsel %vm4391_vm2, %v6399_v27, 0.0 }
0x19d4   : > { %v6403_v3 = vrot.slane %v6402_v22, 4 }
0x19d6   : > { %v6404_v41 = vadd.f32 %v6403_v3, %v6402_v22 }
0x19d8   : > { %v6405_v59 = vrot.slane %v6404_v41, 2  ;;  %v6400_v50 = vpop.f32.mrf.mxu3  ;;  %v6444_v23 = vpop.f32.mrf.mxu2 }
0x19d9   : > { %v6464_v42 = vadd.f32 %v6444_v23, %v12656_v40  ;;  %v14051_v50 = vld [vmem:[#allocation49_spill] sm:$0xff] }
0x19da   : > { %v6406_v4 = vadd.f32 %v6405_v59, %v6404_v41 }
0x19db   : > { %v6490_v11 = vadd.f32 %v6464_v42, %v14039_v38  ;;  %v14052_v42 = vld [vmem:[#allocation58_spill] sm:$0xff] }
0x19dc   : > { %v6407_v46 = vrot.slane %v6406_v4, 1 }
0x19dd   : > { %v6502_v17 = vadd.f32 %v12931_v54, %v6490_v11 }
0x19de   : > { %v6408_v63 = vadd.f32 %v6407_v46, %v6406_v4  ;;  %v14053_v4 = vld [vmem:[#allocation54_spill] sm:$0xff] }
0x19df   : > { %6512 = vst.msk [vmem:[#allocation2] sm:$0xff] %vm1394_vm1, %v6502_v17  ;;  %v5107_v38 = vadd.f32 %v14053_v4, %v14052_v42  ;;  %v9372_v4 = vld [vmem:[%s10610_s3 + $0x38] sm:$0xf0] }
0x19e0   : > { %v6409_v49 = vmul.f32 %v6408_v63, %v12161_v56  ;;  %v6446_v60 = vpop.f32.mrf.mxu2  ;;  %v14054_v63 = vld [vmem:[#allocation50_spill] sm:$0xff] }
0x19e1   : > { %v6465_v40 = vadd.f32 %v6446_v60, %v5791_v47  ;;  %v5797_v24 = vadd.f32 %v12715_v21, %v5107_v38  ;;  %v14055_v21 = vld [vmem:[#allocation42_spill] sm:$0xff] }
0x19e2   : > { %v6472_v12 = vpack.c.bf16 %v6409_v49, %v6409_v49 }
0x19e3   : > { %v6491_v61 = vadd.f32 %v6465_v40, %v14042_v0 }
0x19e4   : > { %9343 = vmatmul.msk.bf16.vlgmr.msrb.gmra.mxu3 %vm1831_vm12, %v6472_v12 }
0x19e5   : > { %v6503_v39 = vadd.f32 %v12931_v54, %v6491_v61 }
0x19e6   : > { %v6521_v45 = vld [vmem:[#allocation2] sm:$0xff] }
0x19e7   : > { %6513 = vst.msk [vmem:[#allocation2 + $0x8] sm:$0xff] %vm1394_vm1, %v6503_v39  ;;  %v6532_v7 = vsel %vm1394_vm1, %v6521_v45, 0.0 }
0x19e8   : > { %6533 = vadd.xlane.f32.xlu2 %v6532_v7  ;;  %v6449_v44 = vpop.f32.mrf.mxu2 }
0x19e9   : > { %v6466_v29 = vadd.f32 %v6449_v44, %v12670_v10 }
0x19eb   : > { %v6492_v56 = vadd.f32 %v6466_v29, %v14043_v15 }
0x19ed   : > { %v6504_v5 = vadd.f32 %v12931_v54, %v6492_v56 }
0x19ee   : > { %v6522_v33 = vld [vmem:[#allocation2 + $0x8] sm:$0xff] }
0x19ef   : > { %6514 = vst.msk [vmem:[#allocation2 + $0x10] sm:$0xff] %vm1394_vm1, %v6504_v5  ;;  %v6535_v36 = vsel %vm1394_vm1, %v6522_v33, 0.0 }
0x19f0   : > { %v6451_v57 = vpop.f32.mrf.mxu2  ;;  %6536 = vadd.xlane.f32.xlu0 %v6535_v36 }
0x19f1   : > { %v6467_v37 = vadd.f32 %v6451_v57, %v5793_v6 }
0x19f3   : > { %v6493_v43 = vadd.f32 %v6467_v37, %v14046_v31 }
0x19f5   : > { %v6505_v10 = vadd.f32 %v12931_v54, %v6493_v43 }
0x19f6   : > { %v12955_v18 = vld [vmem:[#allocation2 + $0x10] sm:$0xff] }
0x19f7   : > { %6515 = vst.msk [vmem:[#allocation2 + $0x18] sm:$0xff] %vm1394_vm1, %v6505_v10  ;;  %v6538_v13 = vsel %vm1394_vm1, %v12955_v18, 0.0 }
0x19f8   : > { %6539 = vadd.xlane.f32.xlu1 %v6538_v13  ;;  %v6454_v26 = vpop.f32.mrf.mxu2 }
0x19f9   : > { %v6468_v2 = vadd.f32 %v6454_v26, %v12704_v14  ;;  %v14050_v14 = vld [vmem:[#allocation48_spill] sm:$0xff] }
0x19fb   : > { %v6494_v1 = vadd.f32 %v6468_v2, %v14047_v30 }
0x19fd   : > { %v6506_v48 = vadd.f32 %v12931_v54, %v6494_v1 }
0x19fe   : > { %v12965_v9 = vld [vmem:[#allocation2 + $0x18] sm:$0xff] }
0x19ff   : > { %6516 = vst.msk [vmem:[#allocation2 + $0x20] sm:$0xff] %vm1394_vm1, %v6506_v48  ;;  %v6541_v51 = vsel %vm1394_vm1, %v12965_v9, 0.0 }
0x1a00   : > { %6542 = vadd.xlane.f32.xlu2 %v6541_v51  ;;  %v6456_v25 = vpop.f32.mrf.mxu2 }
0x1a01   : > { %v6469_v35 = vadd.f32 %v6456_v25, %v5795_v28 }
0x1a03   : > { %v6495_v27 = vadd.f32 %v6469_v35, %v14050_v14 }
0x1a05   : > { %v6507_v22 = vadd.f32 %v12931_v54, %v6495_v27 }
0x1a06   : > { %v6525_v3 = vld [vmem:[#allocation2 + $0x20] sm:$0xff] }
0x1a07   : > { %6517 = vst.msk [vmem:[#allocation2 + $0x28] sm:$0xff] %vm1394_vm1, %v6507_v22  ;;  %v6544_v41 = vsel %vm1394_vm1, %v6525_v3, 0.0 }
0x1a08   : > { %6545 = vadd.xlane.f32.xlu0 %v6544_v41  ;;  %v6459_v59 = vpop.f32.mrf.mxu2 }
0x1a09   : > { %v6470_v55 = vadd.f32 %v6459_v59, %v12710_v16 }
0x1a0b   : > { %v6496_v23 = vadd.f32 %v6470_v55, %v14051_v50  ;;  %v9370_v55 = vld [vmem:[%s10610_s3 + $0x30] sm:$0xf]  ;;  %v9599_v50 = vld [vmem:[%s10610_s3 + $0x34] sm:$0xf0] }
0x1a0c   : > { %v9371_v42 = vor.u32 %v9599_v50, %v9370_v55 }
0x1a0d   : > { %v6508_v11 = vadd.f32 %v12931_v54, %v6496_v23  ;;  %v9598_v23 = vld [vmem:[%s10610_s3 + $0x34] sm:$0xf] }
0x1a0e   : > { %v6526_v46 = vld [vmem:[#allocation2 + $0x28] sm:$0xff]  ;;  %v9375_v38 = vor.u32 %v9598_v23, %v9372_v4  ;;  %6832 = vmatpush.bf16.msra.mxu3 %v9371_v42  ;;  %v13078_v23 = vld [vmem:[%s1248_s7] ss:$0 sm:$0xff] }
0x1a0f   : > { %6518 = vst.msk [vmem:[#allocation2 + $0x30] sm:$0xff] %vm1394_vm1, %v6508_v11  ;;  %v6547_v20 = vsel %vm1394_vm1, %v6526_v46, 0.0  ;;  %v9362_v11 = vld [vmem:[%s10610_s3 + $0x20] sm:$0xf] }
0x1a10   : > { %6548 = vadd.xlane.f32.xlu1 %v6547_v20  ;;  %v6461_v19 = vpop.f32.mrf.mxu2  ;;  %6865 = vmatpush.bf16.msrb.mxu0 %v9375_v38 }
0x1a11   : > { %v6471_v17 = vadd.f32 %v6461_v19, %v5797_v24  ;;  %v9596_v24 = vld [vmem:[%s10610_s3 + $0x24] sm:$0xf]  ;;  %v9364_v19 = vld [vmem:[%s10610_s3 + $0x28] sm:$0xf0] }
0x1a13   : > { %v6497_v47 = vadd.f32 %v6471_v17, %v14054_v63  ;;  %v9367_v17 = vor.u32 %v9596_v24, %v9364_v19 }
0x1a15   : > { %v6509_v16 = vadd.f32 %v12931_v54, %v6497_v47  ;;  %6866 = vmatpush.bf16.msrb.mxu0 %v9367_v17  ;;  %v9354_v47 = vld [vmem:[%s10610_s3 + $0x10] sm:$0xf] }
0x1a16   : > { %v6527_v49 = vld [vmem:[#allocation2 + $0x30] sm:$0xff] }
0x1a17   : > { %6519 = vst.msk [vmem:[#allocation2 + $0x38] sm:$0xff] %vm1394_vm1, %v6509_v16  ;;  %v6550_v60 = vsel %vm1394_vm1, %v6527_v49, 0.0  ;;  %v9595_v16 = vld [vmem:[%s10610_s3 + $0x14] sm:$0xf0] }
0x1a18   : > { %6551 = vadd.xlane.f32.xlu1 %v6550_v60 }
0x1a1e   : > { %v12996_v15 = vld [vmem:[#allocation2 + $0x38] sm:$0xff] }
0x1a1f   : > { %v6553_v6 = vsel %vm1394_vm1, %v12996_v15, 0.0 }
0x1a5b   : > { %v6534_v40 = vpop.xlane.xlu2 %6533 }
0x1a5c   : > { %v6559_v12 = vmul.f32 %v6534_v40, %v14055_v21  ;;  %v9355_v40 = vor.u32 %v9595_v16, %v9354_v47 }
0x1a5e   : > { %v12988_v0 = vsub.f32 %v6521_v45, %v6559_v12  ;;  %v9356_v12 = vld [vmem:[%s10610_s3 + $0x18] sm:$0xf0] }
0x1a60   : > { %v6577_v61 = vmul.f32 %v12988_v0, %v12988_v0 }
0x1a62   : > { %v6586_v39 = vsel %vm1394_vm1, %v6577_v61, 0.0 }
0x1a63   : > { %6587 = vadd.xlane.f32.xlu2 %v6586_v39  ;;  %v6537_v7 = vpop.xlane.xlu0 %6536 }
0x1a64   : > { %v6560_v54 = vmul.f32 %v6537_v7, %v14055_v21  ;;  %v9346_v7 = vld [vmem:[%s10610_s3] sm:$0xf] }
0x1a66   : > { %v12994_v44 = vsub.f32 %v6522_v33, %v6560_v54  ;;  %v9593_v54 = vld [vmem:[%s10610_s3 + $0x4] sm:$0xf0] }
0x1a67   : > { %v6485_v29 = vpop.f32.mrf.mxu3 }
0x1a68   : > { %v6489_v56 = vadd.f32 %v6485_v29, %v12647_v32  ;;  %v6578_v45 = vmul.f32 %v12994_v44, %v12994_v44  ;;  %v9592_v29 = vld [vmem:[%s10610_s3 + $0x4] sm:$0xf] }
0x1a6a   : > { %v6510_v34 = vadd.f32 %v10255_v52, %v6489_v56  ;;  %v6589_v5 = vsel %vm1394_vm1, %v6578_v45, 0.0  ;;  %v9347_v56 = vor.u32 %v9593_v54, %v9346_v7  ;;  %v9348_v45 = vld [vmem:[%s10610_s3 + $0x8] sm:$0xf0] }
0x1a6b   : > { %v6540_v36 = vpop.xlane.xlu1 %6539  ;;  %6590 = vadd.xlane.f32.xlu0 %v6589_v5  ;;  %6554 = vadd.xlane.f32.xlu2 %v6553_v6 }
0x1a6c   : > { %v6511_v33 = vadd.f32 %v6510_v34, %v6498_v8  ;;  %v6561_v57 = vmul.f32 %v6540_v36, %v14055_v21  ;;  %v9351_v8 = vor.u32 %v9592_v29, %v9348_v45 }
0x1a6e   : > { %6520 = vst.msk [vmem:[#allocation2 + $0x40] sm:$0x1] %vm3751_vm13, %v6511_v33  ;;  %v13008_v32 = vsub.f32 %v12955_v18, %v6561_v57 }
0x1a6f   : > { %v6487_v37 = vpop.f32.mrf.mxu3 }
0x1a70   : > { %v6579_v31 = vmul.f32 %v13008_v32, %v13008_v32 }
0x1a72   : > { %v6592_v43 = vsel %vm1394_vm1, %v6579_v31, 0.0 }
0x1a73   : > { %v6543_v10 = vpop.xlane.xlu2 %6542  ;;  %6593 = vadd.xlane.f32.xlu0 %v6592_v43 }
0x1a74   : > { %v6562_v13 = vmul.f32 %v6543_v10, %v14055_v21 }
0x1a75   : > { %v13014_v26 = vld [vmem:[#allocation2 + $0x40] sm:$0xff] }
0x1a76   : > { %v13017_v2 = vsub.f32 %v12965_v9, %v6562_v13  ;;  %v6556_v30 = vsel %vm1394_vm1, %v13014_v26, 0.0 }
0x1a77   : > { %6557 = vadd.xlane.f32.xlu2 %v6556_v30 }
0x1a78   : > { %v6580_v18 = vmul.f32 %v13017_v2, %v13017_v2 }
0x1a7a   : > { %v6595_v1 = vsel %vm1394_vm1, %v6580_v18, 0.0 }
0x1a7b   : > { %6596 = vadd.xlane.f32.xlu1 %v6595_v1  ;;  %v6546_v62 = vpop.xlane.xlu0 %6545 }
0x1a7c   : > { %v6563_v53 = vmul.f32 %v6546_v62, %v14055_v21 }
0x1a7e   : > { %v13025_v58 = vsub.f32 %v6525_v3, %v6563_v53 }
0x1a80   : > { %v6581_v48 = vmul.f32 %v13025_v58, %v13025_v58 }
0x1a82   : > { %v6598_v9 = vsel %vm1394_vm1, %v6581_v48, 0.0 }
0x1a83   : > { %v6549_v28 = vpop.xlane.xlu1 %6548  ;;  %6599 = vadd.xlane.f32.xlu0 %v6598_v9 }
0x1a84   : > { %v6564_v51 = vmul.f32 %v6549_v28, %v14055_v21 }
0x1a86   : > { %v13031_v25 = vsub.f32 %v6526_v46, %v6564_v51  ;;  %v9597_v46 = vld [vmem:[%s10610_s3 + $0x24] sm:$0xf0] }
0x1a87   : > { %v9363_v20 = vor.u32 %v9597_v46, %v9362_v11 }
0x1a88   : > { %v6582_v35 = vmul.f32 %v13031_v25, %v13031_v25 }
0x1a89   : > { %6833 = vmatpush.bf16.msra.mxu3 %v9363_v20  ;;  %v13085_v20 = vld [vmem:[%s1251_s24] ss:$0 sm:$0xff]  ;;  %s14066_s24 = sld [smem:[#allocation26_spill]] (!%p9450_p8) }
0x1a8a   : > { %v6601_v14 = vsel %vm1394_vm1, %v6582_v35, 0.0 }
0x1a8b   : > { %6602 = vadd.xlane.f32.xlu1 %v6601_v14  ;;  %v6552_v27 = vpop.xlane.xlu1 %6551 }
0x1a8c   : > { %v6565_v22 = vmul.f32 %v6552_v27, %v14055_v21 }
0x1a8d   : > { %6834 = vmatpush.bf16.msra.mxu3 %v9355_v40 }
0x1a8e   : > { %v13037_v3 = vsub.f32 %v6527_v49, %v6565_v22  ;;  %v9594_v49 = vld [vmem:[%s10610_s3 + $0x14] sm:$0xf] }
0x1a8f   : > { %v9359_v61 = vor.u32 %v9594_v49, %v9356_v12 }
0x1a90   : > { %v6583_v41 = vmul.f32 %v13037_v3, %v13037_v3 }
0x1a91   : > { %6867 = vmatpush.bf16.msrb.mxu0 %v9359_v61  ;;  %6835 = vmatpush.bf16.msra.mxu3 %v9347_v56 }
0x1a92   : > { %v6604_v59 = vsel %vm1394_vm1, %v6583_v41, 0.0 }
0x1a93   : > { %6605 = vadd.xlane.f32.xlu2 %v6604_v59 }
0x1a95   : > { %6868 = vmatpush.bf16.msrb.mxu0 %v9351_v8 }
0x1ad6   : > { %v6588_v63 = vpop.xlane.xlu2 %6587 }
0x1ad7   : > { %v6613_v60 = vmul.f32 %v6588_v63, %v14055_v21 }
0x1ad9   : > { %v6622_v39 = vadd.f32 1e-06, %v6613_v60 }
0x1adb   : > { %10139 = vrsqrt.f32 %v6622_v39  ;;  %vm6637_vm13 = vweird.f32 %v6622_v39 }
0x1ade   : > { %v6591_v52 = vpop.xlane.xlu0 %6590  ;;  %v6555_v34 = vpop.xlane.xlu2 %6554 }
0x1adf   : > { %v6614_v5 = vmul.f32 %v6591_v52, %v14055_v21  ;;  %v6566_v6 = vmul.f32 %v6555_v34, %v14055_v21 }
0x1ae1   : > { %v10140_v36 = vpop.eup %10139  ;;  %v6623_v33 = vadd.f32 1e-06, %v6614_v5  ;;  %v13062_v57 = vsub.f32 %v12996_v15, %v6566_v6 }
0x1ae2   : > { %v6632_v37 = vmul.f32 %v10140_v36, %v6622_v39  ;;  %vm6638_vm12 = vweird.f32 %v10140_v36 }
0x1ae3   : > { %10141 = vrsqrt.f32 %v6623_v33  ;;  %v6584_v31 = vmul.f32 %v13062_v57, %v13062_v57  ;;  %vm6639_vm4 = vmor %vm6637_vm13, %vm6638_vm12  ;;  %vm6647_vm6 = vweird.f32 %v6623_v33 }
0x1ae4   : > { %v6633_v43 = vmul.f32 %v10140_v36, %v6632_v37 }
0x1ae5   : > { %v6607_v10 = vsel %vm1394_vm1, %v6584_v31, 0.0 }
0x1ae6   : > { %v6634_v13 = vmul.f32 0.5, %v6633_v43  ;;  %v6594_v30 = vpop.xlane.xlu0 %6593  ;;  %6608 = vadd.xlane.f32.xlu0 %v6607_v10 }
0x1ae7   : > { %v6615_v18 = vmul.f32 %v6594_v30, %v14055_v21 }
0x1ae8   : > { %v6635_v1 = vsub.f32 1.5, %v6634_v13 }
0x1ae9   : > { %v10142_v62 = vpop.eup %10141  ;;  %v6624_v53 = vadd.f32 1e-06, %v6615_v18 }
0x1aea   : > { %v6636_v48 = vmul.f32 %v10140_v36, %v6635_v1  ;;  %v6642_v15 = vmul.f32 %v10142_v62, %v6623_v33  ;;  %v6558_v9 = vpop.xlane.xlu2 %6557  ;;  %vm6648_vm5 = vweird.f32 %v10142_v62 }
0x1aeb   : > { %10143 = vrsqrt.f32 %v6624_v53  ;;  %v6567_v28 = vmul.f32 %v6558_v9, %v14055_v21  ;;  %vm6649_vm7 = vmor %vm6647_vm6, %vm6648_vm5  ;;  %vm6657_vm9 = vweird.f32 %v6624_v53 }
0x1aec   : > { %v6643_v51 = vmul.f32 %v10142_v62, %v6642_v15  ;;  %v6640_v14 = vsel %vm6639_vm4, %v10140_v36, %v6636_v48 }
0x1aed   : > { %v13070_v35 = vsub.f32 %v13014_v26, %v6567_v28  ;;  %v6721_v42 = vmul.f32 %v6640_v14, %v12988_v0 }
0x1aee   : > { %v6644_v27 = vmul.f32 0.5, %v6643_v51  ;;  %v6597_v22 = vpop.xlane.xlu1 %6596 }
0x1aef   : > { %v6616_v41 = vmul.f32 %v6597_v22, %v14055_v21  ;;  %v6585_v59 = vmul.f32 %v13070_v35, %v13070_v35  ;;  %v6733_v19 = vmul.f32 %v13078_v23, %v6721_v42 }
0x1af0   : > { %v6645_v55 = vsub.f32 1.5, %v6644_v27 }
0x1af1   : > { %v10144_v50 = vpop.eup %10143  ;;  %v6625_v26 = vadd.f32 1e-06, %v6616_v41  ;;  %v6610_v4 = vsel %vm1394_vm1, %v6585_v59, 0.0  ;;  %v6745_v40 = vadd.f32 %v13085_v20, %v6733_v19 }
0x1af2   : > { %v6646_v38 = vmul.f32 %v10142_v62, %v6645_v55  ;;  %v6652_v11 = vmul.f32 %v10144_v50, %v6624_v53  ;;  %6611 = vadd.xlane.f32.xlu1 %v6610_v4  ;;  %vm6658_vm8 = vweird.f32 %v10144_v50 }
0x1af3   : > { %10145 = vrsqrt.f32 %v6625_v26  ;;  %vm6659_vm10 = vmor %vm6657_vm9, %vm6658_vm8  ;;  %vm6667_vm14 = vweird.f32 %v6625_v26 }
0x1af4   : > { %v6650_v46 = vsel %vm6649_vm7, %v10142_v62, %v6646_v38  ;;  %v6653_v24 = vmul.f32 %v10144_v50, %v6652_v11 }
0x1af5   : > { %v6722_v17 = vmul.f32 %v6650_v46, %v12994_v44 }
0x1af6   : > { %v6654_v63 = vmul.f32 0.5, %v6653_v24  ;;  %v6600_v0 = vpop.xlane.xlu0 %6599 }
0x1af7   : > { %v6734_v47 = vmul.f32 %v13078_v23, %v6722_v17  ;;  %v6617_v16 = vmul.f32 %v6600_v0, %v14055_v21 }
0x1af8   : > { %v6655_v49 = vsub.f32 1.5, %v6654_v63 }
0x1af9   : > { %v10146_v60 = vpop.eup %10145  ;;  %v6746_v12 = vadd.f32 %v13085_v20, %v6734_v47  ;;  %v6626_v61 = vadd.f32 1e-06, %v6617_v16 }
0x1afa   : > { %v6656_v39 = vmul.f32 %v10144_v50, %v6655_v49  ;;  %v6662_v7 = vmul.f32 %v10146_v60, %v6625_v26  ;;  %vm6668_vm11 = vweird.f32 %v10146_v60 }
0x1afb   : > { %v6762_v54 = vpack.c.bf16 %v6746_v12, %v6745_v40  ;;  %10147 = vrsqrt.f32 %v6626_v61  ;;  %vm6669_vm15 = vmor %vm6667_vm14, %vm6668_vm11  ;;  %vm6677_vm2 = vweird.f32 %v6626_v61 }
0x1afc   : > { %v6663_v44 = vmul.f32 %v10146_v60, %v6662_v7  ;;  %v6660_v29 = vsel %vm6659_vm10, %v10144_v50, %v6656_v39 }
0x1afd   : > { %9376 = vmatmul.msk.bf16.vlgmr.msra.gmra.mxu3 %vm1394_vm1, %v6762_v54  ;;  %9381 = vmatmul.msk.bf16.vlgmr.msrb.gmra.mxu0 %vm1394_vm1, %v6762_v54  ;;  %v6723_v5 = vmul.f32 %v6660_v29, %v13008_v32 }
0x1afe   : > { %v6664_v56 = vmul.f32 0.5, %v6663_v44  ;;  %v6603_v45 = vpop.xlane.xlu1 %6602 }
0x1aff   : > { %v6618_v8 = vmul.f32 %v6603_v45, %v14055_v21  ;;  %v6735_v10 = vmul.f32 %v13078_v23, %v6723_v5 }
0x1b00   : > { %v6665_v52 = vsub.f32 1.5, %v6664_v56 }
0x1b01   : > { %v10148_v34 = vpop.eup %10147  ;;  %v6627_v6 = vadd.f32 1e-06, %v6618_v8  ;;  %v6747_v62 = vadd.f32 %v13085_v20, %v6735_v10 }
0x1b02   : > { %v6666_v36 = vmul.f32 %v10146_v60, %v6665_v52  ;;  %v6672_v33 = vmul.f32 %v10148_v34, %v6626_v61  ;;  %vm6678_vm0 = vweird.f32 %v10148_v34 }
0x1b03   : > { %10149 = vrsqrt.f32 %v6627_v6  ;;  %vm6679_vm3 = vmor %vm6677_vm2, %vm6678_vm0  ;;  %vm6687_vm13 = vweird.f32 %v6627_v6 }
0x1b04   : > { %v6670_v37 = vsel %vm6669_vm15, %v10146_v60, %v6666_v36  ;;  %v6673_v31 = vmul.f32 %v10148_v34, %v6672_v33  ;;  %v6767_v33 = vld [vmem:[%s10613_s2] sm:$0x3] }
0x1b05   : > { %v6724_v43 = vmul.f32 %v6670_v37, %v13017_v2 }
0x1b06   : > { %v6674_v13 = vmul.f32 0.5, %v6673_v31 }
0x1b07   : > { %v6736_v30 = vmul.f32 %v13078_v23, %v6724_v43  ;;  %v13122_v43 = vperm.slane %v6767_v33, 1 }
0x1b08   : > { %v6675_v18 = vsub.f32 1.5, %v6674_v13 }
0x1b09   : > { %v10150_v1 = vpop.eup %10149  ;;  %v6748_v32 = vadd.f32 %v13085_v20, %v6736_v30 }
0x1b0a   : > { %v6676_v53 = vmul.f32 %v10148_v34, %v6675_v18  ;;  %v6682_v48 = vmul.f32 %v10150_v1, %v6627_v6  ;;  %vm6688_vm12 = vweird.f32 %v10150_v1 }
0x1b0b   : > { %v6763_v15 = vpack.c.bf16 %v6748_v32, %v6747_v62  ;;  %vm6689_vm4 = vmor %vm6687_vm13, %vm6688_vm12  ;;  %v13130_v62 = vperm.slane %v6767_v33, 0 }
0x1b0c   : > { %v6683_v9 = vmul.f32 %v10150_v1, %v6682_v48  ;;  %v6680_v2 = vsel %vm6679_vm3, %v10148_v34, %v6676_v53 }
0x1b0d   : > { %9377 = vmatmul.msk.bf16.gmra.mxu3 %vm1394_vm1, %v6763_v15  ;;  %9382 = vmatmul.msk.bf16.gmra.mxu0 %vm1394_vm1, %v6763_v15  ;;  %v6725_v14 = vmul.f32 %v6680_v2, %v13025_v58  ;;  %v6606_v58 = vpop.xlane.xlu2 %6605 }
0x1b0e   : > { %v6684_v28 = vmul.f32 0.5, %v6683_v9  ;;  %v6619_v4 = vmul.f32 %v6606_v58, %v14055_v21 }
0x1b0f   : > { %v6737_v59 = vmul.f32 %v13078_v23, %v6725_v14 }
0x1b10   : > { %v6685_v51 = vsub.f32 1.5, %v6684_v28  ;;  %v6628_v38 = vadd.f32 1e-06, %v6619_v4 }
0x1b11   : > { %v6749_v50 = vadd.f32 %v13085_v20, %v6737_v59 }
0x1b12   : > { %v6686_v27 = vmul.f32 %v10150_v1, %v6685_v51  ;;  %10151 = vrsqrt.f32 %v6628_v38  ;;  %vm6697_vm6 = vweird.f32 %v6628_v38 }
0x1b14   : > { %v6690_v22 = vsel %vm6689_vm4, %v10150_v1, %v6686_v27 }
0x1b15   : > { %v6726_v41 = vmul.f32 %v6690_v22, %v13031_v25 }
0x1b17   : > { %v6738_v55 = vmul.f32 %v13078_v23, %v6726_v41 }
0x1b18   : > { %v10152_v11 = vpop.eup %10151 }
0x1b19   : > { %v6750_v42 = vadd.f32 %v13085_v20, %v6738_v55  ;;  %v6692_v25 = vmul.f32 %v10152_v11, %v6628_v38  ;;  %vm6698_vm5 = vweird.f32 %v10152_v11 }
0x1b1a   : > { %vm6699_vm7 = vmor %vm6697_vm6, %vm6698_vm5 }
0x1b1b   : > { %v6764_v26 = vpack.c.bf16 %v6750_v42, %v6749_v50  ;;  %v6693_v46 = vmul.f32 %v10152_v11, %v6692_v25 }
0x1b1d   : > { %9378 = vmatmul.msk.bf16.gmra.mxu3 %vm1394_vm1, %v6764_v26  ;;  %9383 = vmatmul.msk.bf16.gmra.mxu0 %vm1394_vm1, %v6764_v26  ;;  %v6694_v63 = vmul.f32 0.5, %v6693_v46 }
0x1b1f   : > { %v6695_v0 = vsub.f32 1.5, %v6694_v63 }
0x1b21   : > { %v6696_v16 = vmul.f32 %v10152_v11, %v6695_v0 }
0x1b23   : > { %v6700_v39 = vsel %vm6699_vm7, %v10152_v11, %v6696_v16 }
0x1b24   : > { %v6727_v44 = vmul.f32 %v6700_v39, %v13037_v3 }
0x1b59   : > { %v6609_v24 = vpop.xlane.xlu0 %6608 }
0x1b5a   : > { %v6620_v19 = vmul.f32 %v6609_v24, %v14055_v21 }
0x1b5c   : > { %v6629_v17 = vadd.f32 1e-06, %v6620_v19 }
0x1b5e   : > { %10153 = vrsqrt.f32 %v6629_v17  ;;  %vm6707_vm9 = vweird.f32 %v6629_v17 }
0x1b64   : > { %v10154_v47 = vpop.eup %10153 }
0x1b65   : > { %v6702_v49 = vmul.f32 %v10154_v47, %v6629_v17  ;;  %v6612_v60 = vpop.xlane.xlu1 %6611  ;;  %vm6708_vm8 = vweird.f32 %v10154_v47 }
0x1b66   : > { %v6621_v40 = vmul.f32 %v6612_v60, %v14055_v21  ;;  %vm6709_vm10 = vmor %vm6707_vm9, %vm6708_vm8  ;;  %v6739_v21 = vmul.f32 %v13078_v23, %v6727_v44 }
0x1b67   : > { %v6703_v12 = vmul.f32 %v10154_v47, %v6702_v49 }
0x1b68   : > { %v6630_v61 = vadd.f32 1e-06, %v6621_v40  ;;  %v6751_v6 = vadd.f32 %v13085_v20, %v6739_v21 }
0x1b69   : > { %v6704_v7 = vmul.f32 0.5, %v6703_v12 }
0x1b6a   : > { %10155 = vrsqrt.f32 %v6630_v61  ;;  %vm6717_vm14 = vweird.f32 %v6630_v61 }
0x1b6b   : > { %v6705_v54 = vsub.f32 1.5, %v6704_v7 }
0x1b6d   : > { %v6706_v29 = vmul.f32 %v10154_v47, %v6705_v54 }
0x1b6f   : > { %v6710_v56 = vsel %vm6709_vm10, %v10154_v47, %v6706_v29 }
0x1b70   : > { %v10156_v45 = vpop.eup %10155  ;;  %v6728_v8 = vmul.f32 %v6710_v56, %v13062_v57 }
0x1b71   : > { %v6712_v52 = vmul.f32 %v10156_v45, %v6630_v61  ;;  %vm6718_vm11 = vweird.f32 %v10156_v45 }
0x1b72   : > { %v6740_v34 = vmul.f32 %v13078_v23, %v6728_v8  ;;  %vm6719_vm15 = vmor %vm6717_vm14, %vm6718_vm11 }
0x1b73   : > { %v6713_v5 = vmul.f32 %v10156_v45, %v6712_v52 }
0x1b74   : > { %v6752_v36 = vadd.f32 %v13085_v20, %v6740_v34 }
0x1b75   : > { %v6714_v37 = vmul.f32 0.5, %v6713_v5 }
0x1b76   : > { %v6765_v3 = vpack.c.bf16 %v6752_v36, %v6751_v6 }
0x1b77   : > { %v6715_v31 = vsub.f32 1.5, %v6714_v37 }
0x1b78   : > { %9379 = vmatmul.msk.bf16.gmra.mxu3 %vm1394_vm1, %v6765_v3  ;;  %9384 = vmatmul.msk.bf16.gmra.mxu0 %vm1394_vm1, %v6765_v3 }
0x1b79   : > { %v6716_v57 = vmul.f32 %v10156_v45, %v6715_v31 }
0x1b7a   : > { %v6870_v10 = vpop.f32.mrf.mxu0 }
0x1b7b   : > { %v6720_v13 = vsel %vm6719_vm15, %v10156_v45, %v6716_v57  ;;  %v6871_v30 = vadd.f32 %v6870_v10, %v13122_v43 }
0x1b7c   : > { %v6729_v18 = vmul.f32 %v6720_v13, %v13070_v35 }
0x1b7d   : > { %v13128_v1 = vmul.f32 0.70710677, %v6871_v30  ;;  %v13182_v45 = vmul.f32 0.5, %v6871_v30 }
0x1b7e   : > { %v6741_v32 = vmul.f32 %v13078_v23, %v6729_v18 }
0x1b7f   : > { %v13134_v53 = vand.u32 2147483647, %v13128_v1  ;;  %vm6931_vm4 = vcmp.lt.f32.partialorder %v13128_v1, 0.0 }
0x1b80   : > { %v6837_v48 = vpop.f32.mrf.mxu3  ;;  %v6753_v28 = vadd.f32 %v13085_v20, %v6741_v32 }
0x1b81   : > { %v6985_v15 = vmul.f32 0.3275911, %v13134_v53  ;;  %v13138_v9 = vadd.f32 %v6837_v48, %v13130_v62  ;;  %v7453_v34 = vsub.f32 0.0, %v13134_v53 }
0x1b82   : > { %v6872_v2 = vpop.f32.mrf.mxu0  ;;  %v6766_v27 = vpack.c.bf16 %v6753_v28, %v6753_v28 }
0x1b83   : > { %v7003_v51 = vadd.f32 1.0, %v6985_v15  ;;  %v13142_v35 = vmul.f32 0.70710677, %v13138_v9  ;;  %v13145_v14 = vadd.f32 %v6872_v2, %v13122_v43 }
0x1b85   : > { %10157 = vrcp.f32 %v7003_v51  ;;  %v13148_v23 = vand.u32 2147483647, %v13142_v35  ;;  %v13151_v22 = vmul.f32 0.70710677, %v13145_v14  ;;  %v7046_v46 = vand.u32 2147483648, %v7003_v51 }
0x1b86   : > { %v7044_v17 = vand.u32 2147483647, %v7003_v51  ;;  %vm7040_vm2 = vweird.f32 %v7003_v51 }
0x1b87   : > { %v6984_v41 = vmul.f32 0.3275911, %v13148_v23  ;;  %v13157_v20 = vand.u32 2147483647, %v13151_v22  ;;  %v7047_v49 = vor.u32 1.1754944e-38, %v7046_v46 }
0x1b88   : > { %v6839_v59 = vpop.f32.mrf.mxu3  ;;  %9380 = vmatmul.msk.bf16.gmra.mxu3 %vm1394_vm1, %v6766_v27  ;;  %9385 = vmatmul.msk.bf16.gmra.mxu0 %vm1394_vm1, %v6766_v27  ;;  %vm7045_vm12 = vcmp.eq.f32.partialorder %v7044_v17, 8.507059e+37  ;;  %v7471_v17 = vmul.f32 %v7453_v34, %v13134_v53 }
0x1b89   : > { %v13160_v55 = vadd.f32 %v6839_v59, %v13130_v62  ;;  %v7002_v50 = vadd.f32 1.0, %v6984_v41  ;;  %v6987_v26 = vmul.f32 0.3275911, %v13157_v20  ;;  %v7455_v53 = vsub.f32 0.0, %v13157_v20 }
0x1b8a   : > { %v6875_v24 = vpop.f32.mrf.mxu0 }
0x1b8b   : > { %v10158_v42 = vpop.eup %10157  ;;  %v13164_v58 = vmul.f32 0.70710677, %v13160_v55  ;;  %10159 = vrcp.f32 %v7002_v50  ;;  %v7005_v38 = vadd.f32 1.0, %v6987_v26  ;;  %v13171_v16 = vadd.f32 %v6875_v24, %v13122_v43 }
0x1b8c   : > { %v7036_v4 = vmul.f32 %v10158_v42, %v7003_v51  ;;  %vm7041_vm0 = vweird.f32 %v10158_v42  ;;  %v7029_v29 = vand.u32 2147483647, %v7002_v50  ;;  %v7031_v56 = vand.u32 2147483648, %v7002_v50 }
0x1b8d   : > { %v13167_v25 = vand.u32 2147483647, %v13164_v58  ;;  %10161 = vrcp.f32 %v7005_v38  ;;  %vm7042_vm3 = vmor %vm7040_vm2, %vm7041_vm0  ;;  %v13179_v7 = vmul.f32 0.70710677, %v13171_v16  ;;  %vm7025_vm5 = vweird.f32 %v7002_v50 }
0x1b8e   : > { %v7037_v11 = vsub.f32 1.0, %v7036_v4  ;;  %v7074_v36 = vand.u32 2147483647, %v7005_v38  ;;  %vm7030_vm7 = vcmp.eq.f32.partialorder %v7029_v29, 8.507059e+37  ;;  %v7032_v3 = vor.u32 1.1754944e-38, %v7031_v56 }
0x1b8f   : > { %v6986_v63 = vmul.f32 0.3275911, %v13167_v25  ;;  %v13187_v33 = vand.u32 2147483647, %v13179_v7  ;;  %v7076_v31 = vand.u32 2147483648, %v7005_v38  ;;  %vm7070_vm9 = vweird.f32 %v7005_v38 }
0x1b90   : > { %v7038_v19 = vmul.f32 %v10158_v42, %v7037_v11  ;;  %v6842_v37 = vpop.f32.mrf.mxu3  ;;  %vm7075_vm10 = vcmp.eq.f32.partialorder %v7074_v36, 8.507059e+37  ;;  %v10356_v24 = vmov 1.0   ;;  %v7454_v36 = vsub.f32 0.0, %v13167_v25 }
0x1b91   : > { %v10160_v0 = vpop.eup %10159  ;;  %v13173_v40 = vadd.f32 1.0, %v6986_v63  ;;  %v6989_v18 = vmul.f32 0.3275911, %v13187_v33  ;;  %v13195_v15 = vadd.f32 %v6842_v37, %v13130_v62  ;;  %v7077_v27 = vor.u32 1.1754944e-38, %v7076_v31 }
0x1b92   : > { %v7039_v47 = vadd.f32 %v10158_v42, %v7038_v19  ;;  %v7021_v60 = vmul.f32 %v10160_v0, %v7002_v50  ;;  %vm7026_vm13 = vweird.f32 %v10160_v0  ;;  %v13212_v19 = vsel %vm6931_vm4, -1.0, %v10356_v24  ;;  %v6877_v34 = vpop.f32.mrf.mxu0 }
0x1b93   : > { %10163 = vrcp.f32 %v13173_v40  ;;  %v10162_v54 = vpop.eup %10161  ;;  %vm7027_vm6 = vmor %vm7025_vm5, %vm7026_vm13  ;;  %v13198_v51 = vadd.f32 1.0, %v6989_v18  ;;  %v7059_v59 = vand.u32 2147483647, %v13173_v40  ;;  %v7061_v50 = vand.u32 2147483648, %v13173_v40 }
0x1b94   : > { %v7043_v12 = vsel %vm7042_vm3, %v10158_v42, %v7039_v47  ;;  %v7022_v39 = vsub.f32 1.0, %v7021_v60  ;;  %v7066_v21 = vmul.f32 %v10162_v54, %v7005_v38  ;;  %vm7071_vm8 = vweird.f32 %v10162_v54 }
0x1b95   : > { %v13175_v61 = vsel %vm7045_vm12, %v7047_v49, %v7043_v12  ;;  %vm7072_vm11 = vmor %vm7070_vm9, %vm7071_vm8  ;;  %10165 = vrcp.f32 %v13198_v51  ;;  %v13207_v46 = vmul.f32 0.70710677, %v13195_v15  ;;  %v13218_v47 = vmul.f32 0.5, %v13138_v9 }
0x1b96   : > { %v7291_v44 = vmul.f32 1.0614054, %v13175_v61  ;;  %v7023_v8 = vmul.f32 %v10160_v0, %v7022_v39  ;;  %v7067_v6 = vsub.f32 1.0, %v7066_v21  ;;  %v7452_v49 = vsub.f32 0.0, %v13148_v23 }
0x1b97   : > { %vm7055_vm15 = vweird.f32 %v13173_v40  ;;  %vm7060_vm2 = vcmp.eq.f32.partialorder %v7059_v59, 8.507059e+37  ;;  %v13226_v56 = vand.u32 2147483647, %v13207_v46  ;;  %v13229_v21 = vmul.f32 0.5, %v13145_v14 }
0x1b98   : > { %v7309_v52 = vadd.f32 -1.4531521, %v7291_v44  ;;  %v7024_v5 = vadd.f32 %v10160_v0, %v7023_v8  ;;  %v7068_v30 = vmul.f32 %v10162_v54, %v7067_v6  ;;  %v9615_v44 = vld [vmem:[%s10619_s20 + $0x78] sm:$0xff]  ;;  %v7490_v8 = vmul.f32 1.442695, %v7471_v17 }
0x1b99   : > { %v10164_v57 = vpop.eup %10163  ;;  %7789 = vmatpush.bf16.msrb.mxu2 %v9615_v44  ;;  %vm6930_vm3 = vcmp.lt.f32.partialorder %v13142_v35, 0.0  ;;  %v7470_v14 = vmul.f32 %v7452_v49, %v13148_v23  ;;  %v13243_v18 = vadd.f32 %v6877_v34, %v13122_v43  ;;  %vm7100_vm13 = vweird.f32 %v13198_v51 }
0x1b9a   : > { %v7327_v10 = vmul.f32 %v7309_v52, %v13175_v61  ;;  %v7028_v13 = vsel %vm7027_vm6, %v10160_v0, %v7024_v5  ;;  %v7051_v48 = vmul.f32 %v10164_v57, %v13173_v40  ;;  %v7069_v28 = vadd.f32 %v10162_v54, %v7068_v30 }
0x1b9b   : > { %v13191_v32 = vsel %vm7030_vm7, %v7032_v3, %v7028_v13  ;;  %vm7056_vm14 = vweird.f32 %v10164_v57  ;;  %v10166_v9 = vpop.eup %10165  ;;  %vm6933_vm6 = vcmp.lt.f32.partialorder %v13151_v22, 0.0  ;;  %vm6932_vm9 = vcmp.lt.f32.partialorder %v13164_v58, 0.0 }
0x1b9c   : > { %v7290_v2 = vmul.f32 1.0614054, %v13191_v32  ;;  %v7052_v41 = vsub.f32 1.0, %v7051_v48  ;;  %v7345_v42 = vadd.f32 1.4214138, %v7327_v10  ;;  %v7073_v4 = vsel %vm7072_vm11, %v10162_v54, %v7069_v28  ;;  %vm7057_vm0 = vmor %vm7055_vm15, %vm7056_vm14 }
0x1b9d   : > { %v13204_v38 = vsel %vm7075_vm10, %v7077_v27, %v7073_v4  ;;  %v7062_v54 = vor.u32 1.1754944e-38, %v7061_v50  ;;  %v7096_v37 = vmul.f32 %v10166_v9, %v13198_v51  ;;  %v7473_v10 = vmul.f32 %v7455_v53, %v13157_v20 }
0x1b9e   : > { %v7308_v26 = vadd.f32 -1.4531521, %v7290_v2  ;;  %v7053_v11 = vmul.f32 %v10164_v57, %v7052_v41  ;;  %v7293_v0 = vmul.f32 1.0614054, %v13204_v38  ;;  %v7363_v12 = vmul.f32 %v7345_v42, %v13175_v61 }
0x1b9f   : > { %v7097_v30 = vsub.f32 1.0, %v7096_v37  ;;  %v7104_v2 = vand.u32 2147483647, %v13198_v51  ;;  %v7106_v28 = vand.u32 2147483648, %v13198_v51  ;;  %vm7101_vm12 = vweird.f32 %v10166_v9 }
0x1ba0   : > { %v7326_v63 = vmul.f32 %v7308_v26, %v13191_v32  ;;  %v7054_v60 = vadd.f32 %v10164_v57, %v7053_v11  ;;  %v7311_v1 = vadd.f32 -1.4531521, %v7293_v0  ;;  %v7381_v3 = vadd.f32 -0.28449672, %v7363_v12  ;;  %v9614_v26 = vld [vmem:[%s10619_s20 + $0x70] sm:$0xff]  ;;  %vm7102_vm4 = vmor %vm7100_vm13, %vm7101_vm12 }
0x1ba1   : > { %v7098_v59 = vmul.f32 %v10166_v9, %v7097_v30  ;;  %v7472_v42 = vmul.f32 %v7454_v36, %v13167_v25  ;;  %v7488_v4 = vmul.f32 1.442695, %v7470_v14  ;;  %v7494_v0 = vmul.f32 1.442695, %v7473_v10  ;;  %7790 = vmatpush.bf16.msrb.mxu2 %v9614_v26 }
0x1ba2   : > { %v7344_v39 = vadd.f32 1.4214138, %v7326_v63  ;;  %v7058_v29 = vsel %vm7057_vm0, %v10164_v57, %v7054_v60  ;;  %v7329_v40 = vmul.f32 %v7311_v1, %v13204_v38  ;;  %v6988_v57 = vmul.f32 0.3275911, %v13226_v56 }
0x1ba3   : > { %v13232_v52 = vsel %vm7060_vm2, %v7062_v54, %v7058_v29  ;;  %v7399_v20 = vmul.f32 %v7381_v3, %v13175_v61  ;;  %v7099_v17 = vadd.f32 %v10166_v9, %v7098_v59  ;;  %v7107_v49 = vor.u32 1.1754944e-38, %v7106_v28 }
0x1ba4   : > { %v7362_v5 = vmul.f32 %v7344_v39, %v13191_v32  ;;  %v7292_v6 = vmul.f32 1.0614054, %v13232_v52  ;;  %v7347_v31 = vadd.f32 1.4214138, %v7329_v40  ;;  %v13248_v27 = vadd.f32 1.0, %v6988_v57  ;;  %v6844_v40 = vpop.f32.mrf.mxu3 }
0x1ba5   : > { %v13258_v60 = vmul.f32 0.70710677, %v13243_v18  ;;  %v7103_v39 = vsel %vm7102_vm4, %v10166_v9, %v7099_v17  ;;  %vm7105_vm5 = vcmp.eq.f32.partialorder %v7104_v2, 8.507059e+37  ;;  %v7417_v1 = vadd.f32 0.2548296, %v7399_v20 }
0x1ba6   : > { %v7310_v13 = vadd.f32 -1.4531521, %v7292_v6  ;;  %v7365_v48 = vmul.f32 %v7347_v31, %v13204_v38  ;;  %v7380_v23 = vadd.f32 -0.28449672, %v7362_v5  ;;  %10167 = vrcp.f32 %v13248_v27 }
0x1ba7   : > { %10169 = vpow2.f32 %v7490_v8  ;;  %v7492_v54 = vmul.f32 1.442695, %v7472_v42  ;;  %v13262_v44 = vsel %vm7105_vm5, %v7107_v49, %v7103_v39  ;;  %v13268_v5 = vsel %vm6930_vm3, -1.0, %v10356_v24 }
0x1ba8   : > { %v7328_v41 = vmul.f32 %v7310_v13, %v13232_v52  ;;  %v7383_v50 = vadd.f32 -0.28449672, %v7365_v48  ;;  %v7398_v12 = vmul.f32 %v7380_v23, %v13191_v32  ;;  %10171 = vpow2.f32 %v7488_v4  ;;  %v9607_v23 = vld [vmem:[%s10619_s20 + $0x38] sm:$0xff] }
0x1ba9   : > { %v7295_v29 = vmul.f32 1.0614054, %v13262_v44  ;;  %10173 = vpow2.f32 %v7494_v0  ;;  %v13272_v9 = vand.u32 2147483647, %v13258_v60  ;;  %v7435_v3 = vmul.f32 %v7417_v1, %v13175_v61  ;;  %7756 = vmatpush.bf16.msra.mxu1 %v9607_v23  ;;  %v6880_v0 = vpop.f32.mrf.mxu0 }
0x1baa   : > { %v7346_v11 = vadd.f32 1.4214138, %v7328_v41  ;;  %v7401_v63 = vmul.f32 %v7383_v50, %v13204_v38  ;;  %v7416_v8 = vadd.f32 0.2548296, %v7398_v12  ;;  %10175 = vpow2.f32 %v7492_v54 }
0x1bab   : > { %v7313_v36 = vadd.f32 -1.4531521, %v7295_v29  ;;  %v6991_v35 = vmul.f32 0.3275911, %v13272_v9  ;;  %v13279_v14 = vadd.f32 %v6844_v40, %v13130_v62  ;;  %v7457_v48 = vsub.f32 0.0, %v13187_v33 }
0x1bac   : > { %v7364_v25 = vmul.f32 %v7346_v11, %v13232_v52  ;;  %v7419_v51 = vadd.f32 0.2548296, %v7401_v63  ;;  %v10168_v34 = vpop.eup %10167  ;;  %v7089_v2 = vand.u32 2147483647, %v13248_v27  ;;  %v7091_v61 = vand.u32 2147483648, %v13248_v27  ;;  %v9613_v11 = vld [vmem:[%s10619_s20 + $0x68] sm:$0xff] }
0x1bad   : > { %v7081_v37 = vmul.f32 %v10168_v34, %v13248_v27  ;;  %v7331_v10 = vmul.f32 %v7313_v36, %v13262_v44  ;;  %v10170_v30 = vpop.eup %10169  ;;  %v13286_v28 = vadd.f32 1.0, %v6991_v35  ;;  %v7434_v59 = vmul.f32 %v7416_v8, %v13191_v32  ;;  %7791 = vmatpush.bf16.msrb.mxu2 %v9613_v11 }
0x1bae   : > { %v7382_v53 = vadd.f32 -0.28449672, %v7364_v25  ;;  %v7437_v31 = vmul.f32 %v7419_v51, %v13204_v38  ;;  %v10172_v41 = vpop.eup %10171  ;;  %vm7086_vm7 = vweird.f32 %v10168_v34  ;;  %v6951_v42 = vsel %vm6933_vm6, -1.0, %v10356_v24 }
0x1baf   : > { %v7082_v13 = vsub.f32 1.0, %v7081_v37  ;;  %v7349_v20 = vadd.f32 1.4214138, %v7331_v10  ;;  %v10174_v50 = vpop.eup %10173  ;;  %v13294_v26 = vmul.f32 0.5, %v13160_v55  ;;  %10177 = vrcp.f32 %v13286_v28  ;;  %v9612_v37 = vld [vmem:[%s10619_s20 + $0x60] sm:$0xff] }
0x1bb0   : > { %v7400_v6 = vmul.f32 %v7382_v53, %v13232_v52  ;;  %v7525_v17 = vmul.f32 %v10170_v30, %v7435_v3  ;;  %v7527_v32 = vmul.f32 %v10174_v50, %v7437_v31  ;;  %vm7085_vm8 = vweird.f32 %v13248_v27  ;;  %v10176_v49 = vpop.eup %10175  ;;  %v9606_v27 = vld [vmem:[%s10619_s20 + $0x30] sm:$0xff]  ;;  %v9611_v50 = vld [vmem:[%s10619_s20 + $0x58] sm:$0xff] }
0x1bb1   : > { %v7083_v38 = vmul.f32 %v10168_v34, %v7082_v13  ;;  %v7475_v22 = vmul.f32 %v7457_v48, %v13187_v33  ;;  %vm7087_vm10 = vmor %vm7085_vm8, %vm7086_vm7  ;;  %v7092_v55 = vor.u32 1.1754944e-38, %v7091_v61  ;;  %v7524_v12 = vmul.f32 %v10172_v41, %v7434_v59  ;;  %7757 = vmatpush.bf16.msra.mxu1 %v9606_v27  ;;  %7792 = vmatpush.bf16.msrb.mxu2 %v9612_v37  ;;  %v9605_v48 = vld [vmem:[%s10619_s20 + $0x28] sm:$0xff] }
0x1bb2   : > { %v7418_v57 = vadd.f32 0.2548296, %v7400_v6  ;;  %v7367_v25 = vmul.f32 %v7349_v20, %v13262_v44  ;;  %vm7090_vm11 = vcmp.eq.f32.partialorder %v7089_v2, 8.507059e+37  ;;  %v7456_v51 = vsub.f32 0.0, %v13226_v56 }
0x1bb3   : > { %v7084_v63 = vadd.f32 %v10168_v34, %v7083_v38  ;;  %v13312_v33 = vadd.f32 %v6880_v0, %v13122_v43  ;;  %v7543_v53 = vsub.f32 1.0, %v7525_v17  ;;  %v7545_v29 = vsub.f32 1.0, %v7527_v32 }
0x1bb4   : > { %v7436_v4 = vmul.f32 %v7418_v57, %v13232_v52  ;;  %v13304_v52 = vmul.f32 0.70710677, %v13279_v14  ;;  %v6950_v40 = vsel %vm6932_vm9, -1.0, %v10356_v24  ;;  %vm6935_vm14 = vcmp.lt.f32.partialorder %v13179_v7, 0.0 }
0x1bb5   : > { %v7088_v39 = vsel %vm7087_vm10, %v10168_v34, %v7084_v63  ;;  %v10178_v34 = vpop.eup %10177  ;;  %v7498_v6 = vmul.f32 1.442695, %v7475_v22  ;;  %v7542_v3 = vsub.f32 1.0, %v7524_v12  ;;  %v7385_v35 = vadd.f32 -0.28449672, %v7367_v25  ;;  %7758 = vmatpush.bf16.msra.mxu1 %v9605_v48  ;;  %7793 = vmatpush.bf16.msrb.mxu2 %v9611_v50  ;;  %v9604_v63 = vld [vmem:[%s10619_s20 + $0x20] sm:$0xff] }
0x1bb6   : > { %v7526_v1 = vmul.f32 %v10176_v49, %v7436_v4  ;;  %v13308_v54 = vsel %vm7090_vm11, %v7092_v55, %v7088_v39  ;;  %v13320_v36 = vand.u32 2147483647, %v13304_v52  ;;  %v7126_v57 = vmul.f32 %v10178_v34, %v13286_v28  ;;  %v9610_v25 = vld [vmem:[%s10619_s20 + $0x50] sm:$0xff] }
0x1bb7   : > { %v7294_v8 = vmul.f32 1.0614054, %v13308_v54  ;;  %v7474_v10 = vmul.f32 %v7456_v51, %v13226_v56  ;;  %v13327_v30 = vmul.f32 0.70710677, %v13312_v33  ;;  %v7561_v2 = vmul.f32 %v7543_v53, %v13212_v19  ;;  %v6847_v51 = vpop.f32.mrf.mxu3 }
0x1bb8   : > { %v7544_v58 = vsub.f32 1.0, %v7526_v1  ;;  %v6990_v13 = vmul.f32 0.3275911, %v13320_v36  ;;  %v7563_v61 = vmul.f32 %v7545_v29, %v6951_v42  ;;  %v7127_v23 = vsub.f32 1.0, %v7126_v57 }
0x1bb9   : > { %v7312_v31 = vadd.f32 -1.4531521, %v7294_v8  ;;  %v7459_v41 = vsub.f32 0.0, %v13272_v9  ;;  %v7136_v20 = vand.u32 2147483648, %v13286_v28  ;;  %v13337_v56 = vand.u32 2147483647, %v13327_v30  ;;  %7759 = vmatpush.bf16.msra.mxu1 %v9604_v63  ;;  %7794 = vmatpush.bf16.msrb.mxu2 %v9610_v25 }
0x1bba   : > { %v13334_v38 = vadd.f32 1.0, %v6990_v13  ;;  %v7560_v4 = vmul.f32 %v7542_v3, %v13268_v5  ;;  %v7128_v11 = vmul.f32 %v10178_v34, %v7127_v23  ;;  %vm7131_vm15 = vweird.f32 %v10178_v34 }
0x1bbb   : > { %v7330_v59 = vmul.f32 %v7312_v31, %v13308_v54  ;;  %v7134_v19 = vand.u32 2147483647, %v13286_v28  ;;  %v7562_v42 = vmul.f32 %v7544_v58, %v6950_v40  ;;  %v7403_v17 = vmul.f32 %v7385_v35, %v13262_v44  ;;  %v9609_v58 = vld [vmem:[%s10619_s20 + $0x48] sm:$0xff] }
0x1bbc   : > { %v7496_v32 = vmul.f32 1.442695, %v7474_v10  ;;  %10179 = vrcp.f32 %v13334_v38  ;;  %v7581_v0 = vadd.f32 1.0, %v7563_v61  ;;  %v7129_v49 = vadd.f32 %v10178_v34, %v7128_v11  ;;  %v9602_v61 = vld [vmem:[%s10619_s20 + $0x10] sm:$0xff] }
0x1bbd   : > { %vm7130_vm0 = vweird.f32 %v13286_v28  ;;  %v7477_v22 = vmul.f32 %v7459_v41, %v13272_v9  ;;  %v7348_v5 = vadd.f32 1.4214138, %v7330_v59  ;;  %v7137_v55 = vor.u32 1.1754944e-38, %v7136_v20  ;;  %v9603_v9 = vld [vmem:[%s10619_s20 + $0x18] sm:$0xff]  ;;  %7795 = vmatpush.bf16.msrb.mxu2 %v9609_v58  ;;  %v6882_v59 = vpop.f32.mrf.mxu0  ;;  %v9600_v58 = vld [vmem:[%s10619_s20] sm:$0xff] }
0x1bbe   : > { %vm7132_vm2 = vmor %vm7130_vm0, %vm7131_vm15  ;;  %v6993_v12 = vmul.f32 0.3275911, %v13337_v56  ;;  %v7579_v39 = vadd.f32 1.0, %v7561_v2  ;;  %v7578_v27 = vadd.f32 1.0, %v7560_v4  ;;  %vm7135_vm3 = vcmp.eq.f32.partialorder %v7134_v19, 8.507059e+37  ;;  %7760 = vmatpush.bf16.msra.mxu1 %v9603_v9 }
0x1bbf   : > { %v7133_v1 = vsel %vm7132_vm2, %v10178_v34, %v7129_v49  ;;  %v7580_v53 = vadd.f32 1.0, %v7562_v42  ;;  %v7421_v29 = vadd.f32 0.2548296, %v7403_v17  ;;  %v13357_v8 = vsel %vm6935_vm14, -1.0, %v10356_v24 }
0x1bc0   : > { %v13349_v40 = vsel %vm7135_vm3, %v7137_v55, %v7133_v1  ;;  %v13351_v28 = vadd.f32 1.0, %v6993_v12  ;;  %10181 = vpow2.f32 %v7498_v6  ;;  %v7502_v34 = vmul.f32 1.442695, %v7477_v22  ;;  %v9601_v22 = vld [vmem:[%s10619_s20 + $0x8] sm:$0xff] }
0x1bc1   : > { %v7297_v37 = vmul.f32 1.0614054, %v13349_v40  ;;  %v7599_v35 = vmul.f32 %v7581_v0, %v13229_v21  ;;  %v7366_v31 = vmul.f32 %v7348_v5, %v13308_v54  ;;  %v13364_v57 = vadd.f32 %v6847_v51, %v13130_v62 }
0x1bc2   : > { %v10180_v3 = vpop.eup %10179  ;;  %10183 = vrcp.f32 %v13351_v28  ;;  %v7597_v7 = vmul.f32 %v7579_v39, %v13182_v45  ;;  %v7458_v13 = vsub.f32 0.0, %v13320_v36  ;;  %v13371_v48 = vmul.f32 %v7578_v27, %v13218_v47  ;;  %7761 = vmatpush.bf16.msra.mxu1 %v9602_v61 }
0x1bc3   : > { %v7315_v10 = vadd.f32 -1.4531521, %v7297_v37  ;;  %v7111_v6 = vmul.f32 %v10180_v3, %v13334_v38  ;;  %v13374_v21 = vmul.f32 %v7580_v53, %v13294_v26  ;;  %v7439_v2 = vmul.f32 %v7421_v29, %v13262_v44  ;;  %v9608_v44 = vld [vmem:[%s10619_s20 + $0x40] sm:$0xff]  ;;  %s14069_s20 = sld [smem:[#allocation27_spill]] (!%p9450_p8) }
0x1bc4   : > { %10185 = vpow2.f32 %v7496_v32  ;;  %v7119_v41 = vand.u32 2147483647, %v13334_v38  ;;  %v7647_v20 = vpack.c.bf16 %v7599_v35, %v7597_v7  ;;  %v7384_v50 = vadd.f32 -0.28449672, %v7366_v31  ;;  %7796 = vmatpush.bf16.msrb.mxu2 %v9608_v44 }
0x1bc5   : > { %v7333_v23 = vmul.f32 %v7315_v10, %v13349_v40  ;;  %10187 = vpow2.f32 %v7502_v34  ;;  %v7112_v45 = vsub.f32 1.0, %v7111_v6  ;;  %v7121_v47 = vand.u32 2147483648, %v13334_v38 }
0x1bc6   : > { %v13382_v26 = vmul.f32 0.70710677, %v13364_v57  ;;  %v10182_v4 = vpop.eup %10181  ;;  %vm7116_vm12 = vweird.f32 %v10180_v3  ;;  %v7476_v42 = vmul.f32 %v7458_v13, %v13320_v36  ;;  %v7646_v32 = vpack.c.bf16 %v13374_v21, %v13371_v48  ;;  %7762 = vmatpush.bf16.msra.mxu1 %v9601_v22 }
0x1bc7   : > { %v7351_v11 = vadd.f32 1.4214138, %v7333_v23  ;;  %v7113_v19 = vmul.f32 %v10180_v3, %v7112_v45  ;;  %v7529_v63 = vmul.f32 %v10182_v4, %v7439_v2  ;;  %v13392_v49 = vadd.f32 %v6882_v59, %v13122_v43  ;;  %7797 = vmatmul.bf16.vlgmr.msrb.gmra.mxu2 %v7647_v20 }
0x1bc8   : > { %v10184_v17 = vpop.eup %10183  ;;  %v13389_v0 = vand.u32 2147483647, %v13382_v26  ;;  %vm7115_vm13 = vweird.f32 %v13334_v38  ;;  %v7402_v25 = vmul.f32 %v7384_v50, %v13308_v54  ;;  %vm7120_vm5 = vcmp.eq.f32.partialorder %v7119_v41, 8.507059e+37  ;;  %v6849_v38 = vpop.f32.mrf.mxu3 }
0x1bc9   : > { %v7369_v5 = vmul.f32 %v7351_v11, %v13349_v40  ;;  %v7114_v55 = vadd.f32 %v10180_v3, %v7113_v19  ;;  %v7156_v36 = vmul.f32 %v10184_v17, %v13351_v28  ;;  %vm7117_vm4 = vmor %vm7115_vm13, %vm7116_vm12  ;;  %v7122_v39 = vor.u32 1.1754944e-38, %v7121_v47 }
0x1bca   : > { %v10186_v12 = vpop.eup %10185  ;;  %v6992_v27 = vmul.f32 0.3275911, %v13389_v0  ;;  %v7164_v9 = vand.u32 2147483647, %v13351_v28  ;;  %v7166_v34 = vand.u32 2147483648, %v13351_v28  ;;  %vm7161_vm6 = vweird.f32 %v10184_v17  ;;  %7763 = vmatpush.bf16.msra.mxu1 %v9600_v58 }
0x1bcb   : > { %v10188_v1 = vpop.eup %10187  ;;  %v7387_v51 = vadd.f32 -0.28449672, %v7369_v5  ;;  %v7118_v53 = vsel %vm7117_vm4, %v10180_v3, %v7114_v55  ;;  %v7157_v29 = vsub.f32 1.0, %v7156_v36  ;;  %v13408_v31 = vmul.f32 0.70710677, %v13392_v49 }
0x1bcc   : > { %v13402_v37 = vsel %vm7120_vm5, %v7122_v39, %v7118_v53  ;;  %v13405_v35 = vadd.f32 1.0, %v6992_v27  ;;  %v7547_v6 = vsub.f32 1.0, %v7529_v63  ;;  %v7420_v13 = vadd.f32 0.2548296, %v7402_v25 }
0x1bcd   : > { %v7405_v7 = vmul.f32 %v7387_v51, %v13349_v40  ;;  %v7296_v10 = vmul.f32 1.0614054, %v13402_v37  ;;  %v7158_v3 = vmul.f32 %v10184_v17, %v7157_v29  ;;  %v13415_v48 = vadd.f32 %v6849_v38, %v13130_v62  ;;  %7764 = vmatmul.bf16.vlgmr.msra.gmra.mxu1 %v7646_v32 }
0x1bce   : > { %10189 = vrcp.f32 %v13405_v35  ;;  %vm7160_vm7 = vweird.f32 %v13351_v28  ;;  %vm6937_vm8 = vcmp.lt.f32.partialorder %v13258_v60, 0.0  ;;  %v7500_v23 = vmul.f32 1.442695, %v7476_v42 }
0x1bcf   : > { %v7423_v21 = vadd.f32 0.2548296, %v7405_v7  ;;  %v7314_v2 = vadd.f32 -1.4531521, %v7296_v10  ;;  %v7159_v61 = vadd.f32 %v10184_v17, %v7158_v3  ;;  %vm7162_vm9 = vmor %vm7160_vm7, %vm7161_vm6  ;;  %vm7165_vm10 = vcmp.eq.f32.partialorder %v7164_v9, 8.507059e+37 }
0x1bd0   : > { %v7167_v45 = vor.u32 1.1754944e-38, %v7166_v34  ;;  %v13422_v50 = vand.u32 2147483647, %v13408_v31  ;;  %v7565_v47 = vmul.f32 %v7547_v6, %v13357_v8  ;;  %v7438_v44 = vmul.f32 %v7420_v13, %v13308_v54 }
0x1bd1   : > { %v7441_v41 = vmul.f32 %v7423_v21, %v13349_v40  ;;  %v7332_v59 = vmul.f32 %v7314_v2, %v13402_v37  ;;  %v7163_v20 = vsel %vm7162_vm9, %v10184_v17, %v7159_v61  ;;  %v13429_v4 = vmul.f32 0.70710677, %v13415_v48 }
0x1bd2   : > { %v13426_v28 = vsel %vm7165_vm10, %v7167_v45, %v7163_v20  ;;  %v6995_v42 = vmul.f32 0.3275911, %v13422_v50  ;;  %v6899_v63 = vmul.f32 0.5, %v13171_v16  ;;  %vm6934_vm11 = vcmp.lt.f32.partialorder %v13207_v46, 0.0 }
0x1bd3   : > { %v7531_v11 = vmul.f32 %v10188_v1, %v7441_v41  ;;  %v7350_v19 = vadd.f32 1.4214138, %v7332_v59  ;;  %v7299_v40 = vmul.f32 1.0614054, %v13426_v28  ;;  %v6955_v54 = vsel %vm6937_vm8, -1.0, %v10356_v24 }
0x1bd4   : > { %v10190_v17 = vpop.eup %10189  ;;  %10191 = vpow2.f32 %v7500_v23  ;;  %v7583_v55 = vadd.f32 1.0, %v7565_v47  ;;  %v7528_v36 = vmul.f32 %v10186_v12, %v7438_v44  ;;  %v13440_v25 = vadd.f32 1.0, %v6995_v42 }
0x1bd5   : > { %v7549_v8 = vsub.f32 1.0, %v7531_v11  ;;  %v7368_v32 = vmul.f32 %v7350_v19, %v13402_v37  ;;  %v7317_v22 = vadd.f32 -1.4531521, %v7299_v40  ;;  %v7141_v5 = vmul.f32 %v10190_v17, %v13405_v35 }
0x1bd6   : > { %v13443_v39 = vand.u32 2147483647, %v13429_v4  ;;  %v6901_v51 = vmul.f32 0.5, %v13243_v18  ;;  %v7149_v53 = vand.u32 2147483647, %v13405_v35  ;;  %v7151_v29 = vand.u32 2147483648, %v13405_v35 }
0x1bd7   : > { %v7567_v16 = vmul.f32 %v7549_v8, %v6955_v54  ;;  %v7386_v27 = vadd.f32 -0.28449672, %v7368_v32  ;;  %v7335_v1 = vmul.f32 %v7317_v22, %v13426_v28  ;;  %v7142_v60 = vsub.f32 1.0, %v7141_v5 }
0x1bd8   : > { %10193 = vrcp.f32 %v13440_v25  ;;  %vm7146_vm14 = vweird.f32 %v10190_v17  ;;  %v7601_v58 = vmul.f32 %v7583_v55, %v6899_v63  ;;  %v7546_v7 = vsub.f32 1.0, %v7528_v36 }
0x1bd9   : > { %v7585_v9 = vadd.f32 1.0, %v7567_v16  ;;  %v7404_v12 = vmul.f32 %v7386_v27, %v13402_v37  ;;  %v7143_v38 = vmul.f32 %v10190_v17, %v7142_v60  ;;  %v7353_v10 = vadd.f32 1.4214138, %v7335_v1 }
0x1bda   : > { %v10192_v34 = vpop.eup %10191  ;;  %v6994_v3 = vmul.f32 0.3275911, %v13443_v39  ;;  %vm7145_vm15 = vweird.f32 %v13405_v35  ;;  %v6952_v21 = vsel %vm6934_vm11, -1.0, %v10356_v24  ;;  %vm6936_vm0 = vcmp.lt.f32.partialorder %v13304_v52, 0.0 }
0x1bdb   : > { %v7603_v6 = vmul.f32 %v7585_v9, %v6901_v51  ;;  %v7422_v13 = vadd.f32 0.2548296, %v7404_v12  ;;  %v7144_v18 = vadd.f32 %v10190_v17, %v7143_v38  ;;  %vm7147_vm2 = vmor %vm7145_vm15, %vm7146_vm14  ;;  %v7152_v2 = vor.u32 1.1754944e-38, %v7151_v29 }
0x1bdc   : > { %v13457_v61 = vadd.f32 1.0, %v6994_v3  ;;  %vm7150_vm3 = vcmp.eq.f32.partialorder %v7149_v53, 8.507059e+37  ;;  %v7564_v20 = vmul.f32 %v7546_v7, %v6952_v21  ;;  %v7371_v47 = vmul.f32 %v7353_v10, %v13426_v28 }
0x1bdd   : > { %v7440_v23 = vmul.f32 %v7422_v13, %v13402_v37  ;;  %v7148_v45 = vsel %vm7147_vm2, %v10190_v17, %v7144_v18  ;;  %v7649_v41 = vpack.c.bf16 %v7603_v6, %v7601_v58  ;;  %v7461_v19 = vsub.f32 0.0, %v13337_v56 }
0x1bde   : > { %v10194_v59 = vpop.eup %10193  ;;  %v13461_v35 = vsel %vm7150_vm3, %v7152_v2, %v7148_v45  ;;  %10195 = vrcp.f32 %v13457_v61  ;;  %v6954_v37 = vsel %vm6936_vm0, -1.0, %v10356_v24  ;;  %v7582_v63 = vadd.f32 1.0, %v7564_v20 }
0x1bdf   : > { %v7530_v46 = vmul.f32 %v10192_v34, %v7440_v23  ;;  %v7298_v44 = vmul.f32 1.0614054, %v13461_v35  ;;  %v7186_v11 = vmul.f32 %v10194_v59, %v13440_v25  ;;  %7802 = vmatmul.bf16.gmra.mxu2 %v7649_v41  ;;  %v7389_v54 = vadd.f32 -0.28449672, %v7371_v47 }
0x1be0   : > { %v7194_v8 = vand.u32 2147483647, %v13440_v25  ;;  %v7196_v32 = vand.u32 2147483648, %v13440_v25  ;;  %vm7191_vm12 = vweird.f32 %v10194_v59  ;;  %v6898_v16 = vmul.f32 0.5, %v13195_v15 }
0x1be1   : > { %v7548_v40 = vsub.f32 1.0, %v7530_v46  ;;  %v7316_v42 = vadd.f32 -1.4531521, %v7298_v44  ;;  %v7187_v17 = vsub.f32 1.0, %v7186_v11  ;;  %v6900_v52 = vmul.f32 0.5, %v13279_v14 }
0x1be2   : > { %v7479_v27 = vmul.f32 %v7461_v19, %v13337_v56  ;;  %v7460_v1 = vsub.f32 0.0, %v13389_v0  ;;  %vm7190_vm13 = vweird.f32 %v13440_v25  ;;  %v7600_v29 = vmul.f32 %v7582_v63, %v6898_v16 }
0x1be3   : > { %v7566_v22 = vmul.f32 %v7548_v40, %v6954_v37  ;;  %v7334_v5 = vmul.f32 %v7316_v42, %v13461_v35  ;;  %v7188_v55 = vmul.f32 %v10194_v59, %v7187_v17  ;;  %vm7192_vm4 = vmor %vm7190_vm13, %vm7191_vm12  ;;  %vm7195_vm5 = vcmp.eq.f32.partialorder %v7194_v8, 8.507059e+37 }
0x1be4   : > { %v10196_v36 = vpop.eup %10195  ;;  %v7197_v9 = vor.u32 1.1754944e-38, %v7196_v32  ;;  %v7407_v15 = vmul.f32 %v7389_v54, %v13426_v28  ;;  %v7506_v56 = vmul.f32 1.442695, %v7479_v27  ;;  %v7463_v7 = vsub.f32 0.0, %v13422_v50 }
0x1be5   : > { %v7584_v60 = vadd.f32 1.0, %v7566_v22  ;;  %v7352_v51 = vadd.f32 1.4214138, %v7334_v5  ;;  %v7189_v53 = vadd.f32 %v10194_v59, %v7188_v55  ;;  %v7171_v12 = vmul.f32 %v10196_v36, %v13457_v61 }
0x1be6   : > { %v7478_v3 = vmul.f32 %v7460_v1, %v13389_v0  ;;  %v7181_v6 = vand.u32 2147483648, %v13457_v61  ;;  %vm7176_vm6 = vweird.f32 %v10196_v36  ;;  %v7179_v2 = vand.u32 2147483647, %v13457_v61 }
0x1be7   : > { %v7602_v38 = vmul.f32 %v7584_v60, %v6900_v52  ;;  %v7370_v14 = vmul.f32 %v7352_v51, %v13461_v35  ;;  %v7193_v34 = vsel %vm7192_vm4, %v10194_v59, %v7189_v53  ;;  %v7172_v10 = vsub.f32 1.0, %v7171_v12 }
0x1be8   : > { %v7198_v58 = vsel %vm7195_vm5, %v7197_v9, %v7193_v34  ;;  %v7425_v23 = vadd.f32 0.2548296, %v7407_v15  ;;  %10197 = vpow2.f32 %v7506_v56  ;;  %v7481_v41 = vmul.f32 %v7463_v7, %v13422_v50 }
0x1be9   : > { %v7301_v25 = vmul.f32 1.0614054, %v7198_v58  ;;  %v7648_v13 = vpack.c.bf16 %v7602_v38, %v7600_v29  ;;  %v7388_v18 = vadd.f32 -0.28449672, %v7370_v14  ;;  %v7173_v21 = vmul.f32 %v10196_v36, %v7172_v10 }
0x1bea   : > { %vm7175_vm7 = vweird.f32 %v13457_v61  ;;  %v7504_v20 = vmul.f32 1.442695, %v7478_v3  ;;  %v7182_v47 = vor.u32 1.1754944e-38, %v7181_v6  ;;  %vm7180_vm9 = vcmp.eq.f32.partialorder %v7179_v2, 8.507059e+37 }
0x1beb   : > { %v7319_v45 = vadd.f32 -1.4531521, %v7301_v25  ;;  %7769 = vmatmul.bf16.gmra.mxu1 %v7648_v13  ;;  %v7174_v59 = vadd.f32 %v10196_v36, %v7173_v21  ;;  %vm7177_vm8 = vmor %vm7175_vm7, %vm7176_vm6  ;;  %v7406_v46 = vmul.f32 %v7388_v18, %v13461_v35  ;;  %v7462_v11 = vsub.f32 0.0, %v13443_v39 }
0x1bec   : > { %v7443_v37 = vmul.f32 %v7425_v23, %v13426_v28  ;;  %v7510_v17 = vmul.f32 1.442695, %v7481_v41  ;;  %10199 = vpow2.f32 %v7504_v20  ;;  %vm6939_vm10 = vcmp.lt.f32.partialorder %v13327_v30, 0.0 }
0x1bed   : > { %v7337_v0 = vmul.f32 %v7319_v45, %v7198_v58  ;;  %v7178_v44 = vsel %vm7177_vm8, %v10196_v36, %v7174_v59  ;;  %v7424_v32 = vadd.f32 0.2548296, %v7406_v46  ;;  %v7480_v36 = vmul.f32 %v7462_v11, %v13443_v39 }
0x1bee   : > { %v7183_v42 = vsel %vm7180_vm9, %v7182_v47, %v7178_v44  ;;  %v10198_v8 = vpop.eup %10197  ;;  %10201 = vpow2.f32 %v7510_v17  ;;  %v6957_v14 = vsel %vm6939_vm10, -1.0, %v10356_v24  ;;  %vm6941_vm11 = vcmp.lt.f32.partialorder %v13408_v31, 0.0 }
0x1bef   : > { %v7355_v40 = vadd.f32 1.4214138, %v7337_v0  ;;  %v7300_v61 = vmul.f32 1.0614054, %v7183_v42  ;;  %v7533_v5 = vmul.f32 %v10198_v8, %v7443_v37  ;;  %v7442_v1 = vmul.f32 %v7424_v32, %v13461_v35 }
0x1bf0   : > { %v7508_v29 = vmul.f32 1.442695, %v7480_v36  ;;  %vm6938_vm14 = vcmp.lt.f32.partialorder %v13382_v26, 0.0  ;;  %v6959_v25 = vsel %vm6941_vm11, -1.0, %v10356_v24  ;;  %v6903_v45 = vmul.f32 0.5, %v13312_v33 }
0x1bf1   : > { %v7373_v63 = vmul.f32 %v7355_v40, %v7198_v58  ;;  %v7318_v22 = vadd.f32 -1.4531521, %v7300_v61  ;;  %v7551_v51 = vsub.f32 1.0, %v7533_v5  ;;  %v6956_v31 = vsel %vm6938_vm14, -1.0, %v10356_v24 }
0x1bf2   : > { %v10200_v12 = vpop.eup %10199  ;;  %v6905_v41 = vmul.f32 0.5, %v13392_v49  ;;  %vm6940_vm15 = vcmp.lt.f32.partialorder %v13429_v4, 0.0  ;;  %v6902_v8 = vmul.f32 0.5, %v13364_v57  ;;  %v6904_v32 = vmul.f32 0.5, %v13415_v48 }
0x1bf3   : > { %v7391_v55 = vadd.f32 -0.28449672, %v7373_v63  ;;  %v7336_v16 = vmul.f32 %v7318_v22, %v7183_v42  ;;  %v7532_v34 = vmul.f32 %v10200_v12, %v7442_v1  ;;  %v7569_v7 = vmul.f32 %v7551_v51, %v6957_v14 }
0x1bf4   : > { %v10202_v15 = vpop.eup %10201  ;;  %v6958_v37 = vsel %vm6940_vm15, -1.0, %v10356_v24 }
0x1bf5   : > { %v6885_v19 = vpop.f32.mrf.mxu0  ;;  %v7409_v52 = vmul.f32 %v7391_v55, %v7198_v58  ;;  %v7354_v60 = vadd.f32 1.4214138, %v7336_v16  ;;  %v7550_v3 = vsub.f32 1.0, %v7532_v34  ;;  %v7587_v13 = vadd.f32 1.0, %v7569_v7 }
0x1bf6   : > { %v13491_v50 = vadd.f32 %v6885_v19, %v13122_v43 }
0x1bf7   : > { %v7427_v53 = vadd.f32 0.2548296, %v7409_v52  ;;  %v7372_v38 = vmul.f32 %v7354_v60, %v7183_v42  ;;  %v7568_v20 = vmul.f32 %v7550_v3, %v6956_v31  ;;  %v7605_v47 = vmul.f32 %v7587_v13, %v6903_v45 }
0x1bf8   : > { %v13494_v54 = vmul.f32 0.70710677, %v13491_v50 }
0x1bf9   : > { %v7445_v39 = vmul.f32 %v7427_v53, %v7198_v58  ;;  %v7390_v56 = vadd.f32 -0.28449672, %v7372_v38 }
0x1bfa   : > { %v13498_v28 = vand.u32 2147483647, %v13494_v54 }
0x1bfb   : > { %v7535_v30 = vmul.f32 %v10202_v15, %v7445_v39  ;;  %v7408_v35 = vmul.f32 %v7390_v56, %v7183_v42  ;;  %v6852_v19 = vpop.f32.mrf.mxu3 }
0x1bfc   : > { %v6997_v27 = vmul.f32 0.3275911, %v13498_v28  ;;  %v13513_v33 = vadd.f32 %v6852_v19, %v13130_v62 }
0x1bfd   : > { %v7553_v10 = vsub.f32 1.0, %v7535_v30  ;;  %v7426_v6 = vadd.f32 0.2548296, %v7408_v35  ;;  %v6887_v51 = vpop.f32.mrf.mxu0 }
0x1bfe   : > { %v7015_v9 = vadd.f32 1.0, %v6997_v27  ;;  %v13516_v63 = vmul.f32 0.70710677, %v13513_v33 }
0x1bff   : > { %v7571_v18 = vmul.f32 %v7553_v10, %v6959_v25  ;;  %v7444_v21 = vmul.f32 %v7426_v6, %v7183_v42  ;;  %v7586_v42 = vadd.f32 1.0, %v7568_v20 }
0x1c00   : > { %10203 = vrcp.f32 %v7015_v9  ;;  %v7226_v61 = vand.u32 2147483648, %v7015_v9  ;;  %vm7220_vm2 = vweird.f32 %v7015_v9  ;;  %v7224_v4 = vand.u32 2147483647, %v7015_v9 }
0x1c01   : > { %10205 = vpow2.f32 %v7508_v29  ;;  %v7589_v59 = vadd.f32 1.0, %v7571_v18  ;;  %v6978_v55 = vand.u32 2147483647, %v13516_v63  ;;  %v7604_v36 = vmul.f32 %v7586_v42, %v6902_v8 }
0x1c02   : > { %v7227_v52 = vor.u32 1.1754944e-38, %v7226_v61  ;;  %vm7225_vm12 = vcmp.eq.f32.partialorder %v7224_v4, 8.507059e+37  ;;  %v13524_v29 = vadd.f32 %v6887_v51, %v13122_v43 }
0x1c03   : > { %v7607_v46 = vmul.f32 %v7589_v59, %v6905_v41  ;;  %v6996_v27 = vmul.f32 0.3275911, %v6978_v55  ;;  %v6854_v12 = vpop.f32.mrf.mxu3  ;;  %v7464_v20 = vsub.f32 0.0, %v6978_v55 }
0x1c04   : > { %v13528_v48 = vmul.f32 0.70710677, %v13524_v29  ;;  %v13534_v39 = vadd.f32 %v6854_v12, %v13130_v62 }
0x1c05   : > { %v7651_v40 = vpack.c.bf16 %v7607_v46, %v7605_v47  ;;  %v7014_v53 = vadd.f32 1.0, %v6996_v27  ;;  %v6890_v14 = vpop.f32.mrf.mxu0  ;;  %v7482_v42 = vmul.f32 %v7464_v20, %v6978_v55 }
0x1c06   : > { %v10204_v58 = vpop.eup %10203  ;;  %v13538_v56 = vmul.f32 0.70710677, %v13534_v39  ;;  %v13545_v3 = vadd.f32 %v6890_v14, %v13122_v43  ;;  %v7465_v43 = vsub.f32 0.0, %v13498_v28 }
0x1c07   : > { %v7216_v2 = vmul.f32 %v10204_v58, %v7015_v9  ;;  %v10206_v23 = vpop.eup %10205  ;;  %vm7221_vm0 = vweird.f32 %v10204_v58  ;;  %7807 = vmatmul.bf16.gmra.mxu2 %v7651_v40  ;;  %10207 = vrcp.f32 %v7014_v53  ;;  %v13531_v9 = vand.u32 2147483647, %v13528_v48 }
0x1c08   : > { %v7534_v26 = vmul.f32 %v10206_v23, %v7444_v21  ;;  %vm7222_vm3 = vmor %vm7220_vm2, %vm7221_vm0  ;;  %v13542_v10 = vand.u32 2147483647, %v13538_v56  ;;  %v7211_v6 = vand.u32 2147483648, %v7014_v53  ;;  %v7209_v13 = vand.u32 2147483647, %v7014_v53 }
0x1c09   : > { %v7217_v0 = vsub.f32 1.0, %v7216_v2  ;;  %v6999_v15 = vmul.f32 0.3275911, %v13531_v9  ;;  %v13549_v23 = vmul.f32 0.70710677, %v13545_v3  ;;  %vm7205_vm4 = vweird.f32 %v7014_v53 }
0x1c0a   : > { %v7552_v44 = vsub.f32 1.0, %v7534_v26  ;;  %v6998_v18 = vmul.f32 0.3275911, %v13542_v10  ;;  %v7212_v59 = vor.u32 1.1754944e-38, %v7211_v6  ;;  %vm7210_vm6 = vcmp.eq.f32.partialorder %v7209_v13, 8.507059e+37 }
0x1c0b   : > { %v7218_v11 = vmul.f32 %v10204_v58, %v7217_v0  ;;  %v7017_v35 = vadd.f32 1.0, %v6999_v15  ;;  %v6857_v21 = vpop.f32.mrf.mxu3  ;;  %v13556_v0 = vand.u32 2147483647, %v13549_v23  ;;  %v7483_v40 = vmul.f32 %v7465_v43, %v13498_v28 }
0x1c0c   : > { %v7570_v49 = vmul.f32 %v7552_v44, %v6958_v37  ;;  %v13551_v31 = vadd.f32 1.0, %v6998_v18  ;;  %v13563_v37 = vadd.f32 %v6857_v21, %v13130_v62  ;;  %v7512_v55 = vmul.f32 1.442695, %v7482_v42 }
0x1c0d   : > { %v7219_v17 = vadd.f32 %v10204_v58, %v7218_v11  ;;  %v10208_v34 = vpop.eup %10207  ;;  %10209 = vrcp.f32 %v7017_v35  ;;  %v6892_v41 = vpop.f32.mrf.mxu0  ;;  %v7001_v61 = vmul.f32 0.3275911, %v13556_v0  ;;  %v7514_v28 = vmul.f32 1.442695, %v7483_v40 }
0x1c0e   : > { %v7588_v22 = vadd.f32 1.0, %v7570_v49  ;;  %v7201_v7 = vmul.f32 %v10208_v34, %v7014_v53  ;;  %vm7206_vm13 = vweird.f32 %v10208_v34  ;;  %10211 = vrcp.f32 %v13551_v31 }
0x1c0f   : > { %v7223_v5 = vsel %vm7222_vm3, %v10204_v58, %v7219_v17  ;;  %vm7207_vm5 = vmor %vm7205_vm4, %vm7206_vm13  ;;  %v13571_v62 = vmul.f32 0.70710677, %v13563_v37  ;;  %v7467_v27 = vsub.f32 0.0, %v13531_v9  ;;  %vm7250_vm8 = vweird.f32 %v7017_v35 }
0x1c10   : > { %v7606_v16 = vmul.f32 %v7588_v22, %v6904_v32  ;;  %v13521_v60 = vsel %vm7225_vm12, %v7227_v52, %v7223_v5  ;;  %v7202_v25 = vsub.f32 1.0, %v7201_v7  ;;  %v7254_v32 = vand.u32 2147483647, %v7017_v35 }
0x1c11   : > { %v7303_v57 = vmul.f32 1.0614054, %v13521_v60  ;;  %v7256_v22 = vand.u32 2147483648, %v7017_v35  ;;  %v13568_v52 = vadd.f32 1.0, %v7001_v61  ;;  %v13581_v7 = vand.u32 2147483647, %v13571_v62 }
0x1c12   : > { %v7650_v1 = vpack.c.bf16 %v7606_v16, %v7604_v36  ;;  %v7203_v58 = vmul.f32 %v10208_v34, %v7202_v25  ;;  %vm7255_vm10 = vcmp.eq.f32.partialorder %v7254_v32, 8.507059e+37  ;;  %v7239_v25 = vand.u32 2147483647, %v13551_v31 }
0x1c13   : > { %v7321_v38 = vadd.f32 -1.4531521, %v7303_v57  ;;  %v10210_v47 = vpop.eup %10209  ;;  %v6859_v4 = vpop.f32.mrf.mxu3  ;;  %10213 = vrcp.f32 %v13568_v52  ;;  %v7257_v12 = vor.u32 1.1754944e-38, %v7256_v22  ;;  %v7000_v13 = vmul.f32 0.3275911, %v13581_v7 }
0x1c14   : > { %7774 = vmatmul.bf16.gmra.mxu1 %v7650_v1  ;;  %v7204_v45 = vadd.f32 %v10208_v34, %v7203_v58  ;;  %v7246_v19 = vmul.f32 %v10210_v47, %v7017_v35  ;;  %vm7251_vm7 = vweird.f32 %v10210_v47  ;;  %v10212_v5 = vpop.eup %10211  ;;  %10215 = vpow2.f32 %v7514_v28 }
0x1c15   : > { %v7339_v30 = vmul.f32 %v7321_v38, %v13521_v60  ;;  %v7231_v1 = vmul.f32 %v10212_v5, %v13551_v31  ;;  %vm7252_vm9 = vmor %vm7250_vm8, %vm7251_vm7  ;;  %vm7236_vm11 = vweird.f32 %v10212_v5  ;;  %v7485_v21 = vmul.f32 %v7467_v27, %v13531_v9 }
0x1c16   : > { %v7208_v26 = vsel %vm7207_vm5, %v10208_v34, %v7204_v45  ;;  %v7247_v17 = vsub.f32 1.0, %v7246_v19  ;;  %v7241_v34 = vand.u32 2147483648, %v13551_v31  ;;  %vm7235_vm14 = vweird.f32 %v13551_v31 }
0x1c17   : > { %v7357_v2 = vadd.f32 1.4214138, %v7339_v30  ;;  %v13559_v44 = vsel %vm7210_vm6, %v7212_v59, %v7208_v26  ;;  %v7232_v38 = vsub.f32 1.0, %v7231_v1  ;;  %vm7237_vm15 = vmor %vm7235_vm14, %vm7236_vm11  ;;  %v13591_v20 = vadd.f32 1.0, %v7000_v13 }
0x1c18   : > { %v7302_v11 = vmul.f32 1.0614054, %v13559_v44  ;;  %v7248_v16 = vmul.f32 %v10210_v47, %v7247_v17  ;;  %v7242_v59 = vor.u32 1.1754944e-38, %v7241_v34  ;;  %vm6943_vm0 = vcmp.lt.f32.partialorder %v13494_v54, 0.0 }
0x1c19   : > { %v7375_v46 = vmul.f32 %v7357_v2, %v13521_v60  ;;  %v7233_v35 = vmul.f32 %v10212_v5, %v7232_v38  ;;  %v10214_v45 = vpop.eup %10213  ;;  %vm7240_vm2 = vcmp.eq.f32.partialorder %v7239_v25, 8.507059e+37  ;;  %v7466_v31 = vsub.f32 0.0, %v13542_v10 }
0x1c1a   : > { %v7320_v49 = vadd.f32 -1.4531521, %v7302_v11  ;;  %v7249_v53 = vadd.f32 %v10210_v47, %v7248_v16  ;;  %10217 = vrcp.f32 %v13591_v20  ;;  %v7518_v19 = vmul.f32 1.442695, %v7485_v21 }
0x1c1b   : > { %v7393_v8 = vadd.f32 -0.28449672, %v7375_v46  ;;  %v7234_v2 = vadd.f32 %v10212_v5, %v7233_v35  ;;  %10219 = vpow2.f32 %v7512_v55  ;;  %v7286_v4 = vand.u32 2147483648, %v13568_v52 }
0x1c1c   : > { %v7338_v36 = vmul.f32 %v7320_v49, %v13559_v44  ;;  %v7253_v14 = vsel %vm7252_vm9, %v10210_v47, %v7249_v53  ;;  %v7276_v47 = vmul.f32 %v10214_v45, %v13568_v52  ;;  %v10216_v49 = vpop.eup %10215  ;;  %vm7281_vm3 = vweird.f32 %v10214_v45 }
0x1c1d   : > { %v7411_v57 = vmul.f32 %v7393_v8, %v13521_v60  ;;  %v13583_v30 = vsel %vm7255_vm10, %v7257_v12, %v7253_v14  ;;  %v7238_v26 = vsel %vm7237_vm15, %v10212_v5, %v7234_v2  ;;  %v7284_v22 = vand.u32 2147483647, %v13568_v52 }
0x1c1e   : > { %v7356_v51 = vadd.f32 1.4214138, %v7338_v36  ;;  %v7305_v58 = vmul.f32 1.0614054, %v13583_v30  ;;  %v13596_v9 = vsel %vm7240_vm2, %v7242_v59, %v7238_v26  ;;  %v7277_v42 = vsub.f32 1.0, %v7276_v47 }
0x1c1f   : > { %v7429_v18 = vadd.f32 0.2548296, %v7411_v57  ;;  %v7304_v40 = vmul.f32 1.0614054, %v13596_v9  ;;  %v13605_v5 = vmul.f32 0.5, %v13491_v50  ;;  %v7484_v16 = vmul.f32 %v7466_v31, %v13542_v10 }
0x1c20   : > { %v7374_v15 = vmul.f32 %v7356_v51, %v13559_v44  ;;  %v7323_v43 = vadd.f32 -1.4531521, %v7305_v58  ;;  %v7278_v32 = vmul.f32 %v10214_v45, %v7277_v42  ;;  %vm7280_vm12 = vweird.f32 %v13568_v52  ;;  %v10218_v1 = vpop.eup %10217 }
0x1c21   : > { %v7447_v11 = vmul.f32 %v7429_v18, %v13521_v60  ;;  %v7322_v8 = vadd.f32 -1.4531521, %v7304_v40  ;;  %v6961_v60 = vsel %vm6943_vm0, -1.0, %v10356_v24  ;;  %10221 = vpow2.f32 %v7518_v19  ;;  %vm7282_vm13 = vmor %vm7280_vm12, %vm7281_vm3  ;;  %v10220_v12 = vpop.eup %10219 }
0x1c22   : > { %v7392_v6 = vadd.f32 -0.28449672, %v7374_v15  ;;  %v7341_v46 = vmul.f32 %v7323_v43, %v13583_v30  ;;  %v7279_v27 = vadd.f32 %v10214_v45, %v7278_v32  ;;  %v7287_v50 = vor.u32 1.1754944e-38, %v7286_v4 }
0x1c23   : > { %v7537_v28 = vmul.f32 %v10216_v49, %v7447_v11  ;;  %v7340_v55 = vmul.f32 %v7322_v8, %v13596_v9  ;;  %vm6942_vm4 = vcmp.lt.f32.partialorder %v13516_v63, 0.0  ;;  %vm7285_vm5 = vcmp.eq.f32.partialorder %v7284_v22, 8.507059e+37 }
0x1c24   : > { %v7410_v41 = vmul.f32 %v7392_v6, %v13559_v44  ;;  %v7359_v61 = vadd.f32 1.4214138, %v7341_v46  ;;  %v7283_v57 = vsel %vm7282_vm13, %v10214_v45, %v7279_v27  ;;  %v7261_v10 = vmul.f32 %v10218_v1, %v13591_v20 }
0x1c25   : > { %v7358_v54 = vadd.f32 1.4214138, %v7340_v55  ;;  %v7516_v15 = vmul.f32 1.442695, %v7484_v16  ;;  %v13618_v14 = vsel %vm7285_vm5, %v7287_v50, %v7283_v57  ;;  %v7469_v52 = vsub.f32 0.0, %v13556_v0 }
0x1c26   : > { %v7428_v17 = vadd.f32 0.2548296, %v7410_v41  ;;  %v7377_v36 = vmul.f32 %v7359_v61, %v13583_v30  ;;  %v7307_v35 = vmul.f32 1.0614054, %v13618_v14  ;;  %v7262_v25 = vsub.f32 1.0, %v7261_v10 }
0x1c27   : > { %v7376_v34 = vmul.f32 %v7358_v54, %v13596_v9  ;;  %v7269_v13 = vand.u32 2147483647, %v13591_v20  ;;  %v7271_v18 = vand.u32 2147483648, %v13591_v20  ;;  %vm7266_vm6 = vweird.f32 %v10218_v1  ;;  %v10222_v41 = vpop.eup %10221 }
0x1c28   : > { %v7446_v51 = vmul.f32 %v7428_v17, %v13559_v44  ;;  %v7395_v53 = vadd.f32 -0.28449672, %v7377_v36  ;;  %v7555_v44 = vsub.f32 1.0, %v7537_v28  ;;  %v7325_v2 = vadd.f32 -1.4531521, %v7307_v35 }
0x1c29   : > { %v7394_v21 = vadd.f32 -0.28449672, %v7376_v34  ;;  %v7263_v45 = vmul.f32 %v10218_v1, %v7262_v25  ;;  %vm6945_vm7 = vcmp.lt.f32.partialorder %v13528_v48, 0.0  ;;  %10223 = vpow2.f32 %v7516_v15 }
0x1c2a   : > { %v7413_v38 = vmul.f32 %v7395_v53, %v13583_v30  ;;  %v7536_v6 = vmul.f32 %v10220_v12, %v7446_v51  ;;  %v7487_v59 = vmul.f32 %v7469_v52, %v13556_v0  ;;  %v7343_v47 = vmul.f32 %v7325_v2, %v13618_v14 }
0x1c2b   : > { %v7412_v26 = vmul.f32 %v7394_v21, %v13596_v9  ;;  %v7264_v46 = vadd.f32 %v10218_v1, %v7263_v45  ;;  %vm7265_vm8 = vweird.f32 %v13591_v20  ;;  %v7573_v31 = vmul.f32 %v7555_v44, %v6961_v60 }
0x1c2c   : > { %v7431_v58 = vadd.f32 0.2548296, %v7413_v38  ;;  %vm7267_vm9 = vmor %vm7265_vm8, %vm7266_vm6  ;;  %vm7270_vm10 = vcmp.eq.f32.partialorder %v7269_v13, 8.507059e+37  ;;  %v7272_v19 = vor.u32 1.1754944e-38, %v7271_v18  ;;  %v7554_v40 = vsub.f32 1.0, %v7536_v6 }
0x1c2d   : > { %v7430_v42 = vadd.f32 0.2548296, %v7412_v26  ;;  %v7361_v49 = vadd.f32 1.4214138, %v7343_v47  ;;  %v7268_v17 = vsel %vm7267_vm9, %v10218_v1, %v7264_v46  ;;  %v7522_v61 = vmul.f32 1.442695, %v7487_v59 }
0x1c2e   : > { %v7449_v43 = vmul.f32 %v7431_v58, %v13583_v30  ;;  %v7273_v4 = vsel %vm7270_vm10, %v7272_v19, %v7268_v17  ;;  %v7468_v0 = vsub.f32 0.0, %v13581_v7  ;;  %v6963_v8 = vsel %vm6945_vm7, -1.0, %v10356_v24  ;;  %v10256_v17 = vld [vmem:[#allocation2] sm:$0xff] }
0x1c2f   : > { %v7448_v20 = vmul.f32 %v7430_v42, %v13596_v9  ;;  %v7379_v32 = vmul.f32 %v7361_v49, %v13618_v14  ;;  %v7306_v22 = vmul.f32 1.0614054, %v7273_v4  ;;  %v10224_v60 = vpop.eup %10223  ;;  %v7591_v36 = vadd.f32 1.0, %v7573_v31 }
0x1c30   : > { %v7539_v11 = vmul.f32 %v10222_v41, %v7449_v43  ;;  %v6960_v16 = vsel %vm6942_vm4, -1.0, %v10356_v24  ;;  %vm6944_vm11 = vcmp.lt.f32.partialorder %v13538_v56, 0.0  ;;  %v6909_v48 = vmul.f32 0.5, %v13524_v29  ;;  %v13653_v41 = vld [vmem:[%s1268_s15] ss:$0 sm:$0xff]  ;;  %s14070_s15 = sld [smem:[#allocation29_spill]] (!%p9450_p8) }
0x1c31   : > { %v7572_v55 = vmul.f32 %v7554_v40, %v6960_v16  ;;  %v7538_v27 = vmul.f32 %v10224_v60, %v7448_v20  ;;  %v7397_v1 = vadd.f32 -0.28449672, %v7379_v32  ;;  %v7324_v51 = vadd.f32 -1.4531521, %v7306_v22 }
0x1c32   : > { %v7557_v30 = vsub.f32 1.0, %v7539_v11  ;;  %10225 = vpow2.f32 %v7522_v61  ;;  %v7486_v9 = vmul.f32 %v7468_v0, %v13581_v7  ;;  %v7609_v63 = vmul.f32 %v7591_v36, %v13605_v5  ;;  %v10257_v36 = vld [vmem:[#allocation2 + $0x8] sm:$0xff] }
0x1c33   : > { %v7556_v50 = vsub.f32 1.0, %v7538_v27  ;;  %v7415_v54 = vmul.f32 %v7397_v1, %v13618_v14  ;;  %v7342_v57 = vmul.f32 %v7324_v51, %v7273_v4  ;;  %v6962_v12 = vsel %vm6944_vm11, -1.0, %v10356_v24  ;;  %v10258_v1 = vld [vmem:[#allocation2 + $0x10] sm:$0xff] }
0x1c34   : > { %v7575_v28 = vmul.f32 %v7557_v30, %v6963_v8  ;;  %v7590_v56 = vadd.f32 1.0, %v7572_v55  ;;  %v6906_v44 = vmul.f32 0.5, %v13513_v33  ;;  %v7520_v29 = vmul.f32 1.442695, %v7486_v9 }
0x1c35   : > { %v7574_v38 = vmul.f32 %v7556_v50, %v6962_v12  ;;  %v7433_v15 = vadd.f32 0.2548296, %v7415_v54  ;;  %v7360_v52 = vadd.f32 1.4214138, %v7342_v57  ;;  %v6908_v7 = vmul.f32 0.5, %v13534_v39  ;;  %v10259_v54 = vld [vmem:[#allocation2 + $0x18] sm:$0xff] }
0x1c36   : > { %v7593_v53 = vadd.f32 1.0, %v7575_v28  ;;  %vm6947_vm14 = vcmp.lt.f32.partialorder %v13549_v23, 0.0  ;;  %v7608_v58 = vmul.f32 %v7590_v56, %v6906_v44  ;;  %10227 = vpow2.f32 %v7520_v29 }
0x1c37   : > { %v7592_v35 = vadd.f32 1.0, %v7574_v38  ;;  %v7451_v25 = vmul.f32 %v7433_v15, %v13618_v14  ;;  %v7378_v6 = vmul.f32 %v7360_v52, %v7273_v4  ;;  %v6965_v39 = vsel %vm6947_vm14, -1.0, %v10356_v24  ;;  %v10260_v38 = vld [vmem:[#allocation2 + $0x20] sm:$0xff] }
0x1c38   : > { %v7611_v10 = vmul.f32 %v7593_v53, %v6909_v48  ;;  %v10226_v5 = vpop.eup %10225  ;;  %v6911_v11 = vmul.f32 0.5, %v13545_v3  ;;  %vm6946_vm15 = vcmp.lt.f32.partialorder %v13571_v62, 0.0  ;;  %v6910_v20 = vmul.f32 0.5, %v13563_v37 }
0x1c39   : > { %v7610_v13 = vmul.f32 %v7592_v35, %v6908_v7  ;;  %v7541_v18 = vmul.f32 %v10226_v5, %v7451_v25  ;;  %v7396_v21 = vadd.f32 -0.28449672, %v7378_v6  ;;  %v6964_v61 = vsel %vm6946_vm15, -1.0, %v10356_v24  ;;  %v10261_v7 = vld [vmem:[#allocation2 + $0x28] sm:$0xff] }
0x1c3a   : > { %v7653_v34 = vpack.c.bf16 %v7611_v10, %v7609_v63 }
0x1c3b   : > { %v7559_v33 = vsub.f32 1.0, %v7541_v18  ;;  %v7414_v2 = vmul.f32 %v7396_v21, %v7273_v4  ;;  %v7652_v45 = vpack.c.bf16 %v7610_v13, %v7608_v58  ;;  %v10262_v13 = vld [vmem:[#allocation2 + $0x30] sm:$0xff] }
0x1c3c   : > { %7812 = vmatmul.bf16.gmra.mxu2 %v7653_v34  ;;  %v10228_v31 = vpop.eup %10227 }
0x1c3d   : > { %v7577_v43 = vmul.f32 %v7559_v33, %v6965_v39  ;;  %v7432_v14 = vadd.f32 0.2548296, %v7414_v2  ;;  %7779 = vmatmul.bf16.gmra.mxu1 %v7652_v45  ;;  %v10263_v39 = vld [vmem:[#allocation2 + $0x38] sm:$0xff] }
0x1c3f   : > { %v7450_v23 = vmul.f32 %v7432_v14, %v7273_v4  ;;  %v7595_v46 = vadd.f32 1.0, %v7577_v43 }
0x1c41   : > { %v7540_v19 = vmul.f32 %v10228_v31, %v7450_v23  ;;  %v7613_v42 = vmul.f32 %v7595_v46, %v6911_v11 }
0x1c43   : > { %v7558_v49 = vsub.f32 1.0, %v7540_v19  ;;  %v7655_v8 = vpack.c.bf16 %v7613_v42, %v7613_v42 }
0x1c45   : > { %v7576_v0 = vmul.f32 %v7558_v49, %v6964_v61 }
0x1c47   : > { %v7594_v62 = vadd.f32 1.0, %v7576_v0 }
0x1c49   : > { %v7612_v60 = vmul.f32 %v7594_v62, %v6910_v20 }
0x1c4a   : > { %v7765_v59 = vpop.f32.mrf.mxu1  ;;  %v7798_v26 = vpop.f32.mrf.mxu2 }
0x1c4b   : > { %v7766_v47 = vadd.f32 %v13653_v41, %v7765_v59  ;;  %v7654_v28 = vpack.c.bf16 %v7612_v60, %v7612_v60 }
0x1c4c   : > { %7817 = vmatmul.bf16.gmra.mxu2 %v7655_v8 }
0x1c4d   : > { %v7799_v40 = vadd.f32 %v7798_v26, %v7766_v47  ;;  %7784 = vmatmul.bf16.gmra.mxu1 %v7654_v28  ;;  %v10264_v47 = vld [vmem:[#allocation2 + $0x40] sm:$0xff] }
0x1c4f   : > { %v13659_v30 = vadd.f32 %v10256_v17, %v7799_v40 }
0x1c51   : > { %7831 = vst.msk [vmem:[#allocation2] sm:$0xff] %vm1394_vm1, %v13659_v30 }
0x1c52   : > { %v7767_v4 = vpop.f32.mrf.mxu1  ;;  %v7800_v32 = vpop.f32.mrf.mxu2 }
0x1c53   : > { %v7768_v3 = vadd.f32 %v13653_v41, %v7767_v4 }
0x1c55   : > { %v7801_v22 = vadd.f32 %v7800_v32, %v7768_v3 }
0x1c57   : > { %v13666_v16 = vadd.f32 %v10257_v36, %v7801_v22 }
0x1c59   : > { %7832 = vst.msk [vmem:[#allocation2 + $0x8] sm:$0xff] %vm1394_vm1, %v13666_v16 }
0x1c62   : > { %v7803_v55 = vpop.f32.mrf.mxu2 }
0x1c68   : > { %v7770_v24 = vpop.f32.mrf.mxu1 }
0x1c69   : > { %v7771_v27 = vadd.f32 %v13653_v41, %v7770_v24 }
0x1c6a   : > { %v7805_v9 = vpop.f32.mrf.mxu2 }
0x1c6b   : > { %v7804_v37 = vadd.f32 %v7803_v55, %v7771_v27 }
0x1c6d   : > { %v13671_v51 = vadd.f32 %v10258_v1, %v7804_v37 }
0x1c6f   : > { %7833 = vst.msk [vmem:[#allocation2 + $0x10] sm:$0xff] %vm1394_vm1, %v13671_v51 }
0x1c70   : > { %v7772_v48 = vpop.f32.mrf.mxu1 }
0x1c71   : > { %v7773_v53 = vadd.f32 %v13653_v41, %v7772_v48 }
0x1c73   : > { %v7806_v50 = vadd.f32 %v7805_v9, %v7773_v53 }
0x1c75   : > { %v13676_v57 = vadd.f32 %v10259_v54, %v7806_v50 }
0x1c77   : > { %7834 = vst.msk [vmem:[#allocation2 + $0x18] sm:$0xff] %vm1394_vm1, %v13676_v57 }
0x1c8a   : > { %v7808_v10 = vpop.f32.mrf.mxu2 }
0x1c91   : > { %v7775_v63 = vpop.f32.mrf.mxu1 }
0x1c92   : > { %v7776_v12 = vadd.f32 %v13653_v41, %v7775_v63  ;;  %v7810_v29 = vpop.f32.mrf.mxu2 }
0x1c94   : > { %v7809_v56 = vadd.f32 %v7808_v10, %v7776_v12 }
0x1c96   : > { %v7826_v15 = vadd.f32 %v10260_v38, %v7809_v56 }
0x1c98   : > { %7835 = vst.msk [vmem:[#allocation2 + $0x20] sm:$0xff] %vm1394_vm1, %v7826_v15 }
0x1c99   : > { %v7777_v52 = vpop.f32.mrf.mxu1 }
0x1c9a   : > { %v7778_v44 = vadd.f32 %v13653_v41, %v7777_v52 }
0x1c9c   : > { %v7811_v34 = vadd.f32 %v7810_v29, %v7778_v44 }
0x1c9e   : > { %v13683_v35 = vadd.f32 %v10261_v7, %v7811_v34 }
0x1ca0   : > { %7836 = vst.msk [vmem:[#allocation2 + $0x28] sm:$0xff] %vm1394_vm1, %v13683_v35 }
0x1cba   : > { %v7780_v25 = vpop.f32.mrf.mxu1 }
0x1cbb   : > { %v7781_v6 = vadd.f32 %v13653_v41, %v7780_v25 }
0x1cbf   : > { %v7813_v5 = vpop.f32.mrf.mxu2 }
0x1cc0   : > { %v7814_v58 = vadd.f32 %v7813_v5, %v7781_v6 }
0x1cc2   : > { %v7828_v18 = vadd.f32 %v10262_v13, %v7814_v58  ;;  %v7782_v21 = vpop.f32.mrf.mxu1 }
0x1cc3   : > { %v7783_v33 = vadd.f32 %v13653_v41, %v7782_v21 }
0x1cc4   : > { %7837 = vst.msk [vmem:[#allocation2 + $0x30] sm:$0xff] %vm1394_vm1, %v7828_v18 }
0x1cc7   : > { %v7815_v2 = vpop.f32.mrf.mxu2 }
0x1cc8   : > { %v7816_v45 = vadd.f32 %v7815_v2, %v7783_v33 }
0x1cca   : > { %v7829_v43 = vadd.f32 %v10263_v39, %v7816_v45  ;;  %v7785_v14 = vpop.f32.mrf.mxu1 }
0x1ccb   : > { %v7786_v59 = vadd.f32 %v13653_v41, %v7785_v14 }
0x1ccc   : > { %7838 = vst.msk [vmem:[#allocation2 + $0x38] sm:$0xff] %vm1394_vm1, %v7829_v43 }
0x1ccf   : > { %v7818_v26 = vpop.f32.mrf.mxu2 }
0x1cd0   : > { %v7819_v23 = vadd.f32 %v7818_v26, %v7786_v59 }
0x1cd2   : > { %v7830_v46 = vadd.f32 %v10264_v47, %v7819_v23  ;;  %v7787_v31 = vpop.f32.mrf.mxu1 }
0x1cd3   : > { %7843 = sbr.rel (%p9450_p8) target bundleno = 7816 (0x1e88), region = 148 }
0x1cd4   : > { %7839 = vst.msk [vmem:[#allocation2 + $0x40] sm:$0xff] %vm1394_vm1, %v7830_v46 }
0x1cd7   : > { %v7820_v11 = vpop.f32.mrf.mxu2 }
0x1cd8   : > { %v7864_v19 = vsel %vm1394_vm1, %v7828_v18, 0.0  ;;  %v7858_v40 = vsel %vm1394_vm1, %v7826_v15, 0.0  ;;  %v7846_v42 = vsel %vm1394_vm1, %v13659_v30, 0.0  ;;  %v7867_v41 = vsel %vm1394_vm1, %v7829_v43, 0.0  ;;  %v14060_v20 = vld [vmem:[#allocation42_spill] sm:$0xff]  ;;  %v9616_v26 = vld [vmem:[%s14061_s19] sm:$0xff] }
0x1cd9   : > { %7865 = vadd.xlane.f32.xlu1 %v7864_v19  ;;  %7859 = vadd.xlane.f32.xlu0 %v7858_v40  ;;  %v7861_v49 = vsel %vm1394_vm1, %v13683_v35, 0.0  ;;  %v7849_v17 = vsel %vm1394_vm1, %v13666_v16, 0.0  ;;  %v7852_v61 = vsel %vm1394_vm1, %v13671_v51, 0.0  ;;  %v7855_v0 = vsel %vm1394_vm1, %v13676_v57, 0.0  ;;  %v9617_v45 = vld [vmem:[%s14061_s19 + $0x8] sm:$0xff] }
0x1cda   : > { %7847 = vadd.xlane.f32.xlu2 %v7846_v42 }
0x1ce1   : > { %7868 = vadd.xlane.f32.xlu1 %v7867_v41  ;;  %7862 = vadd.xlane.f32.xlu0 %v7861_v49 }
0x1ce2   : > { %7850 = vadd.xlane.f32.xlu2 %v7849_v17 }
0x1ce9   : > { %7853 = vadd.xlane.f32.xlu0 %v7852_v61  ;;  %7856 = vadd.xlane.f32.xlu1 %v7855_v0 }
0x1d4c   : > { %v7866_v4 = vpop.xlane.xlu1 %7865  ;;  %v7860_v8 = vpop.xlane.xlu0 %7859 }
0x1d4d   : > { %v7876_v3 = vmul.f32 %v7866_v4, %v14060_v20  ;;  %v7874_v62 = vmul.f32 %v7860_v8, %v14060_v20  ;;  %v7848_v32 = vpop.xlane.xlu2 %7847 }
0x1d4e   : > { %v7870_v1 = vmul.f32 %v7848_v32, %v14060_v20 }
0x1d4f   : > { %v13709_v22 = vsub.f32 %v7828_v18, %v7876_v3  ;;  %v13711_v60 = vsub.f32 %v7826_v15, %v7874_v62 }
0x1d50   : > { %v13732_v12 = vsub.f32 %v13659_v30, %v7870_v1 }
0x1d51   : > { %v7892_v36 = vmul.f32 %v13709_v22, %v13709_v22  ;;  %v7890_v28 = vmul.f32 %v13711_v60, %v13711_v60 }
0x1d53   : > { %v7912_v24 = vsel %vm1394_vm1, %v7892_v36, 0.0  ;;  %v7906_v55 = vsel %vm1394_vm1, %v7890_v28, 0.0 }
0x1d54   : > { %v7869_v27 = vpop.xlane.xlu1 %7868  ;;  %v7863_v37 = vpop.xlane.xlu0 %7862  ;;  %7913 = vadd.xlane.f32.xlu1 %v7912_v24  ;;  %7907 = vadd.xlane.f32.xlu2 %v7906_v55 }
0x1d55   : > { %v7877_v48 = vmul.f32 %v7869_v27, %v14060_v20  ;;  %v7875_v53 = vmul.f32 %v7863_v37, %v14060_v20  ;;  %v7851_v9 = vpop.xlane.xlu2 %7850 }
0x1d56   : > { %v7871_v50 = vmul.f32 %v7851_v9, %v14060_v20 }
0x1d57   : > { %v13723_v54 = vsub.f32 %v7829_v43, %v7877_v48  ;;  %v13726_v63 = vsub.f32 %v13683_v35, %v7875_v53  ;;  %v7886_v35 = vmul.f32 %v13732_v12, %v13732_v12 }
0x1d58   : > { %v13729_v10 = vsub.f32 %v13666_v16, %v7871_v50 }
0x1d59   : > { %v7891_v56 = vmul.f32 %v13726_v63, %v13726_v63  ;;  %v7893_v38 = vmul.f32 %v13723_v54, %v13723_v54  ;;  %v7894_v58 = vsel %vm1394_vm1, %v7886_v35, 0.0 }
0x1d5a   : > { %v7887_v15 = vmul.f32 %v13729_v10, %v13729_v10 }
0x1d5b   : > { %v7909_v52 = vsel %vm1394_vm1, %v7891_v56, 0.0  ;;  %v7915_v44 = vsel %vm1394_vm1, %v7893_v38, 0.0 }
0x1d5c   : > { %7910 = vadd.xlane.f32.xlu0 %v7909_v52  ;;  %v7854_v29 = vpop.xlane.xlu0 %7853  ;;  %7916 = vadd.xlane.f32.xlu2 %v7915_v44  ;;  %v7897_v16 = vsel %vm1394_vm1, %v7887_v15, 0.0  ;;  %v7857_v30 = vpop.xlane.xlu1 %7856 }
0x1d5d   : > { %v7872_v34 = vmul.f32 %v7854_v29, %v14060_v20  ;;  %7898 = vadd.xlane.f32.xlu1 %v7897_v16  ;;  %v7873_v7 = vmul.f32 %v7857_v30, %v14060_v20 }
0x1d5f   : > { %v13748_v25 = vsub.f32 %v13671_v51, %v7872_v34  ;;  %v13751_v6 = vsub.f32 %v13676_v57, %v7873_v7  ;;  %v9619_v51 = vld [vmem:[%s14061_s19 + $0x18] sm:$0xff]  ;;  %v9618_v57 = vld [vmem:[%s14061_s19 + $0x10] sm:$0xff] }
0x1d60   : > { %9637 = vmatpush.bf16.msra.mxu2 %v9619_v51  ;;  %9638 = vmatpush.bf16.msra.mxu3 %v9619_v51 }
0x1d61   : > { %v7888_v5 = vmul.f32 %v13748_v25, %v13748_v25  ;;  %v7889_v18 = vmul.f32 %v13751_v6, %v13751_v6  ;;  %8100 = vmatpush.bf16.msra.mxu0 %v9619_v51  ;;  %9636 = vmatpush.bf16.msra.mxu1 %v9619_v51 }
0x1d63   : > { %v7900_v13 = vsel %vm1394_vm1, %v7888_v5, 0.0  ;;  %v7903_v21 = vsel %vm1394_vm1, %v7889_v18, 0.0 }
0x1d64   : > { %7901 = vadd.xlane.f32.xlu2 %v7900_v13  ;;  %7895 = vadd.xlane.f32.xlu0 %v7894_v58 }
0x1d65   : > { %9640 = vmatpush.bf16.msra.mxu2 %v9618_v57  ;;  %9641 = vmatpush.bf16.msra.mxu3 %v9618_v57 }
0x1d66   : > { %8101 = vmatpush.bf16.msra.mxu0 %v9618_v57  ;;  %9639 = vmatpush.bf16.msra.mxu1 %v9618_v57 }
0x1d69   : > { %9643 = vmatpush.bf16.msra.mxu2 %v9617_v45  ;;  %9644 = vmatpush.bf16.msra.mxu3 %v9617_v45 }
0x1d6a   : > { %8102 = vmatpush.bf16.msra.mxu0 %v9617_v45  ;;  %9642 = vmatpush.bf16.msra.mxu1 %v9617_v45 }
0x1d6c   : > { %7904 = vadd.xlane.f32.xlu0 %v7903_v21 }
0x1d6d   : > { %9646 = vmatpush.bf16.msra.mxu2 %v9616_v26  ;;  %9647 = vmatpush.bf16.msra.mxu3 %v9616_v26 }
0x1d6e   : > { %8103 = vmatpush.bf16.msra.mxu0 %v9616_v26  ;;  %9645 = vmatpush.bf16.msra.mxu1 %v9616_v26 }
0x1dc7   : > { %v7914_v33 = vpop.xlane.xlu1 %7913  ;;  %v7908_v2 = vpop.xlane.xlu2 %7907 }
0x1dc8   : > { %v7924_v39 = vmul.f32 %v7914_v33, %v14060_v20  ;;  %v7922_v43 = vmul.f32 %v7908_v2, %v14060_v20 }
0x1dca   : > { %v7932_v14 = vadd.f32 1e-06, %v7924_v39  ;;  %v7930_v59 = vadd.f32 1e-06, %v7922_v43 }
0x1dcc   : > { %10268 = vrsqrt.f32 %v7932_v14  ;;  %vm8000_vm0 = vweird.f32 %v7932_v14  ;;  %vm7980_vm13 = vweird.f32 %v7930_v59 }
0x1dcd   : > { %10270 = vrsqrt.f32 %v7930_v59 }
0x1dcf   : > { %v7911_v23 = vpop.xlane.xlu0 %7910  ;;  %v7917_v47 = vpop.xlane.xlu2 %7916 }
0x1dd0   : > { %v7923_v46 = vmul.f32 %v7911_v23, %v14060_v20  ;;  %v7899_v31 = vpop.xlane.xlu1 %7898  ;;  %v7925_v11 = vmul.f32 %v7917_v47, %v14060_v20  ;;  %v10265_v23 = vld [vmem:[%s14066_s24] ss:$0 sm:$0xff] }
0x1dd1   : > { %v7919_v19 = vmul.f32 %v7899_v31, %v14060_v20 }
0x1dd2   : > { %v13769_v40 = vpop.eup %10268  ;;  %v13771_v42 = vadd.f32 1e-06, %v7923_v46  ;;  %v13773_v41 = vadd.f32 1e-06, %v7925_v11 }
0x1dd3   : > { %v13775_v49 = vpop.eup %10270  ;;  %v7995_v17 = vmul.f32 %v13769_v40, %v7932_v14  ;;  %v7927_v61 = vadd.f32 1e-06, %v7919_v19  ;;  %vm8001_vm2 = vweird.f32 %v13769_v40 }
0x1dd4   : > { %v7975_v0 = vmul.f32 %v13775_v49, %v7930_v59  ;;  %10272 = vrsqrt.f32 %v13771_v42  ;;  %vm7981_vm3 = vweird.f32 %v13775_v49  ;;  %vm13801_vm12 = vmor %vm8000_vm0, %vm8001_vm2  ;;  %vm7990_vm4 = vweird.f32 %v13771_v42 }
0x1dd5   : > { %v7996_v4 = vmul.f32 %v13769_v40, %v7995_v17  ;;  %10274 = vrsqrt.f32 %v7927_v61  ;;  %vm13808_vm5 = vmor %vm7980_vm13, %vm7981_vm3  ;;  %vm7950_vm6 = vweird.f32 %v7927_v61  ;;  %vm8010_vm9 = vweird.f32 %v13773_v41 }
0x1dd6   : > { %v7976_v8 = vmul.f32 %v13775_v49, %v7975_v0  ;;  %10276 = vrsqrt.f32 %v13773_v41 }
0x1dd7   : > { %v7997_v3 = vmul.f32 0.5, %v7996_v4  ;;  %v7896_v62 = vpop.xlane.xlu0 %7895  ;;  %v7902_v32 = vpop.xlane.xlu2 %7901 }
0x1dd8   : > { %v7977_v36 = vmul.f32 0.5, %v7976_v8  ;;  %v7918_v28 = vmul.f32 %v7896_v62, %v14060_v20  ;;  %v7920_v24 = vmul.f32 %v7902_v32, %v14060_v20 }
0x1dd9   : > { %v7998_v55 = vsub.f32 1.5, %v7997_v3 }
0x1dda   : > { %v10273_v27 = vpop.eup %10272  ;;  %v7978_v37 = vsub.f32 1.5, %v7977_v36  ;;  %v13785_v1 = vadd.f32 1e-06, %v7918_v28  ;;  %v13787_v48 = vadd.f32 1e-06, %v7920_v24 }
0x1ddb   : > { %v13789_v53 = vpop.eup %10274  ;;  %v7985_v9 = vmul.f32 %v10273_v27, %v13771_v42  ;;  %v7999_v38 = vmul.f32 %v13769_v40, %v7998_v55  ;;  %vm7991_vm8 = vweird.f32 %v10273_v27  ;;  %v10266_v42 = vld [vmem:[%s14069_s20] ss:$0 sm:$0xff] }
0x1ddc   : > { %v10277_v50 = vpop.eup %10276  ;;  %v7945_v56 = vmul.f32 %v13789_v53, %v7927_v61  ;;  %10278 = vrsqrt.f32 %v13785_v1  ;;  %v7979_v15 = vmul.f32 %v13775_v49, %v7978_v37  ;;  %vm7951_vm7 = vweird.f32 %v13789_v53  ;;  %vm7992_vm14 = vmor %vm7990_vm4, %vm7991_vm8 }
0x1ddd   : > { %v7986_v52 = vmul.f32 %v10273_v27, %v7985_v9  ;;  %v8005_v44 = vmul.f32 %v10277_v50, %v13773_v41  ;;  %10280 = vrsqrt.f32 %v13787_v48  ;;  %v8003_v51 = vsel %vm13801_vm12, %v13769_v40, %v7999_v38  ;;  %vm13823_vm10 = vmor %vm7950_vm6, %vm7951_vm7 }
0x1dde   : > { %v7946_v29 = vmul.f32 %v13789_v53, %v7945_v56  ;;  %v7983_v21 = vsel %vm13808_vm5, %v13775_v49, %v7979_v15  ;;  %vm8011_vm11 = vweird.f32 %v10277_v50  ;;  %v8020_v47 = vmul.f32 %v8003_v51, %v13709_v22 }
0x1ddf   : > { %v7987_v30 = vmul.f32 0.5, %v7986_v52  ;;  %v8006_v34 = vmul.f32 %v10277_v50, %v8005_v44  ;;  %v7905_v7 = vpop.xlane.xlu0 %7904  ;;  %v8018_v26 = vmul.f32 %v7983_v21, %v13711_v60  ;;  %vm8012_vm15 = vmor %vm8010_vm9, %vm8011_vm11  ;;  %vm7940_vm2 = vweird.f32 %v13785_v1 }
0x1de0   : > { %v7947_v5 = vmul.f32 0.5, %v7946_v29  ;;  %v7921_v58 = vmul.f32 %v7905_v7, %v14060_v20  ;;  %v8031_v4 = vmul.f32 %v10265_v23, %v8020_v47  ;;  %vm7960_vm3 = vweird.f32 %v13787_v48 }
0x1de1   : > { %v7988_v13 = vsub.f32 1.5, %v7987_v30  ;;  %v8007_v18 = vmul.f32 0.5, %v8006_v34  ;;  %v8029_v61 = vmul.f32 %v10265_v23, %v8018_v26 }
0x1de2   : > { %v10279_v57 = vpop.eup %10278  ;;  %v7948_v33 = vsub.f32 1.5, %v7947_v5  ;;  %v13821_v2 = vadd.f32 1e-06, %v7921_v58 }
0x1de3   : > { %v7989_v45 = vmul.f32 %v10273_v27, %v7988_v13  ;;  %v8008_v39 = vsub.f32 1.5, %v8007_v18  ;;  %v7935_v43 = vmul.f32 %v10279_v57, %v13785_v1  ;;  %v10281_v14 = vpop.eup %10280  ;;  %vm7941_vm0 = vweird.f32 %v10279_v57 }
0x1de4   : > { %v7949_v59 = vmul.f32 %v13789_v53, %v7948_v33  ;;  %10282 = vrsqrt.f32 %v13821_v2  ;;  %v7955_v11 = vmul.f32 %v10281_v14, %v13787_v48  ;;  %vm7961_vm12 = vweird.f32 %v10281_v14  ;;  %vm7942_vm13 = vmor %vm7940_vm2, %vm7941_vm0 }
0x1de5   : > { %v8009_v46 = vmul.f32 %v10277_v50, %v8008_v39  ;;  %v7936_v31 = vmul.f32 %v10279_v57, %v7935_v43  ;;  %v7993_v40 = vsel %vm7992_vm14, %v10273_v27, %v7989_v45  ;;  %v8042_v27 = vadd.f32 %v10266_v42, %v8031_v4  ;;  %vm7962_vm4 = vmor %vm7960_vm3, %vm7961_vm12 }
0x1de6   : > { %v7953_v19 = vsel %vm13823_vm10, %v13789_v53, %v7949_v59  ;;  %v7956_v49 = vmul.f32 %v10281_v14, %v7955_v11  ;;  %v8019_v22 = vmul.f32 %v7993_v40, %v13726_v63  ;;  %vm7970_vm6 = vweird.f32 %v13821_v2 }
0x1de7   : > { %v7937_v60 = vmul.f32 0.5, %v7936_v31  ;;  %v8013_v17 = vsel %vm8012_vm15, %v10277_v50, %v8009_v46  ;;  %v8015_v36 = vmul.f32 %v7953_v19, %v13729_v10 }
0x1de8   : > { %v8021_v0 = vmul.f32 %v8013_v17, %v13723_v54  ;;  %v7957_v3 = vmul.f32 0.5, %v7956_v49  ;;  %v8030_v62 = vmul.f32 %v10265_v23, %v8019_v22  ;;  %v8040_v54 = vadd.f32 %v10266_v42, %v8029_v61 }
0x1de9   : > { %v7938_v8 = vsub.f32 1.5, %v7937_v60  ;;  %v8026_v38 = vmul.f32 %v10265_v23, %v8015_v36 }
0x1dea   : > { %v10283_v32 = vpop.eup %10282  ;;  %v8032_v41 = vmul.f32 %v10265_v23, %v8021_v0  ;;  %v7958_v63 = vsub.f32 1.5, %v7957_v3  ;;  %v8041_v55 = vadd.f32 %v10266_v42, %v8030_v62 }
0x1deb   : > { %v7939_v28 = vmul.f32 %v10279_v57, %v7938_v8  ;;  %v7965_v24 = vmul.f32 %v10283_v32, %v13821_v2  ;;  %vm7971_vm5 = vweird.f32 %v10283_v32  ;;  %v8037_v30 = vadd.f32 %v10266_v42, %v8026_v38 }
0x1dec   : > { %v8043_v37 = vadd.f32 %v10266_v42, %v8032_v41  ;;  %v7959_v53 = vmul.f32 %v10281_v14, %v7958_v63  ;;  %v8054_v1 = vpack.c.bf16 %v8041_v55, %v8040_v54  ;;  %vm7972_vm7 = vmor %vm7970_vm6, %vm7971_vm5 }
0x1ded   : > { %v7966_v9 = vmul.f32 %v10283_v32, %v7965_v24  ;;  %v7943_v50 = vsel %vm7942_vm13, %v10279_v57, %v7939_v28 }
0x1dee   : > { %v8055_v56 = vpack.c.bf16 %v8043_v37, %v8042_v27  ;;  %v8014_v10 = vmul.f32 %v7943_v50, %v13732_v12  ;;  %v7963_v15 = vsel %vm7962_vm4, %v10281_v14, %v7959_v53  ;;  %9469 = vmatmul.msk.bf16.vlgmr.msra.gmra.mxu2 %vm1394_vm1, %v8054_v1 }
0x1def   : > { %v7967_v52 = vmul.f32 0.5, %v7966_v9  ;;  %v8016_v48 = vmul.f32 %v7963_v15, %v13748_v25  ;;  %v10267_v25 = vld [vmem:[%s14070_s15] ss:$0 sm:$0xff] }
0x1df0   : > { %9470 = vmatmul.msk.bf16.vlgmr.msra.gmra.mxu3 %vm1394_vm1, %v8055_v56  ;;  %v8025_v44 = vmul.f32 %v10265_v23, %v8014_v10 }
0x1df1   : > { %v7968_v29 = vsub.f32 1.5, %v7967_v52  ;;  %v8027_v5 = vmul.f32 %v10265_v23, %v8016_v48 }
0x1df2   : > { %v8036_v16 = vadd.f32 %v10266_v42, %v8025_v44 }
0x1df3   : > { %v7969_v34 = vmul.f32 %v10283_v32, %v7968_v29  ;;  %v8038_v13 = vadd.f32 %v10266_v42, %v8027_v5 }
0x1df4   : > { %v8052_v12 = vpack.c.bf16 %v8037_v30, %v8036_v16 }
0x1df5   : > { %v7973_v7 = vsel %vm7972_vm7, %v10283_v32, %v7969_v34 }
0x1df6   : > { %9467 = vmatmul.msk.bf16.vlgmr.msra.gmra.mxu0 %vm1394_vm1, %v8052_v12  ;;  %v8017_v35 = vmul.f32 %v7973_v7, %v13751_v6 }
0x1df8   : > { %v8028_v58 = vmul.f32 %v10265_v23, %v8017_v35 }
0x1dfa   : > { %v8039_v18 = vadd.f32 %v10266_v42, %v8028_v58 }
0x1dfc   : > { %v8053_v21 = vpack.c.bf16 %v8039_v18, %v8038_v13 }
0x1dfe   : > { %9468 = vmatmul.msk.bf16.vlgmr.msra.gmra.mxu1 %vm1394_vm1, %v8053_v21 }
0x1e71   : > { %v8115_v51 = vpop.f32.mrf.mxu2 }
0x1e72   : > { %v8116_v33 = vadd.f32 %v10267_v25, %v8115_v51 }
0x1e73   : > { %v8120_v57 = vpop.f32.mrf.mxu3  ;;  %v8105_v45 = vpop.f32.mrf.mxu0 }
0x1e74   : > { %v8121_v2 = vadd.f32 %v10267_v25, %v8120_v57  ;;  %v8106_v20 = vadd.f32 %v10267_v25, %v8105_v45  ;;  %8129 = vst [vmem:[%s10622_s0 + $0x20] sm:$0xff] %v8116_v33 }
0x1e76   : > { %8131 = vst [vmem:[%s10622_s0 + $0x30] sm:$0xff] %v8121_v2 }
0x1e77   : > { %8125 = vst [vmem:[%s10622_s0] sm:$0xff] %v8106_v20 }
0x1e79   : > { %v8117_v6 = vpop.f32.mrf.mxu2 }
0x1e7a   : > { %v8118_v43 = vadd.f32 %v10267_v25, %v8117_v6 }
0x1e7b   : > { %v8122_v39 = vpop.f32.mrf.mxu3  ;;  %v8107_v59 = vpop.f32.mrf.mxu0 }
0x1e7c   : > { %v8123_v14 = vadd.f32 %v10267_v25, %v8122_v39  ;;  %v8110_v26 = vpop.f32.mrf.mxu1  ;;  %v8108_v23 = vadd.f32 %v10267_v25, %v8107_v59  ;;  %8130 = vst [vmem:[%s10622_s0 + $0x28] sm:$0xff] %v8118_v43 }
0x1e7d   : > { %v8111_v47 = vadd.f32 %v10267_v25, %v8110_v26 }
0x1e7e   : > { %8132 = vst [vmem:[%s10622_s0 + $0x38] sm:$0xff] %v8123_v14 }
0x1e7f   : > { %8126 = vst [vmem:[%s10622_s0 + $0x8] sm:$0xff] %v8108_v23 }
0x1e80   : > { %8127 = vst [vmem:[%s10622_s0 + $0x10] sm:$0xff] %v8111_v47 }
0x1e84   : > { %v8112_v46 = vpop.f32.mrf.mxu1 }
0x1e85   : > { %v8113_v31 = vadd.f32 %v10267_v25, %v8112_v46 }
0x1e87   : > { %8128 = vst [vmem:[%s10622_s0 + $0x18] sm:$0xff] %v8113_v31 }
0x1e88 PF: > { %s14071_s28 = sld [smem:[#allocation33_spill]] }
0x1e89   : > { %s14072_s15 = sld [smem:[#allocation31_spill]] }
0x1e8a   : > { %s14073_s16 = sld [smem:[#allocation32_spill]] }
0x1e8b   : > { %s14074_s18 = sld [smem:[#allocation34_spill]] }
0x1e8c   : > { %s14075_s22 = sld [smem:[#allocation35_spill]] }
0x1e8e   : > { %s71_s23 = sadd.s32 1, %s14071_s28  }
0x1e8f   : > { %p68_p9 = scmp.ge.s32.totalorder %s71_s23, 10  }
0x1e91   :  { %70 = sbr.rel (!%p68_p9) target bundleno = 64 (0x40), region = 318 }

</bundles_post_ra>
